<compile_context>
chip_gen: v7x
topology: tpu7x:2x2x1
jax: 0.10.0
libtpu: 0.0.40
codegen_flags: <defaults>
</compile_context>

<pallas_src>
import functools

import jax
import jax.numpy as jnp
import numpy as np
from jax.experimental import pallas as pl
from jax.experimental.pallas import tpu as pltpu


_LPAD = 8  # sublane-aligned left spatial pad used inside the VMEM pad scratches


# ----------------------------------------------------------------------------
# Fused Inception kernel (one grid step = one batch element)
# ----------------------------------------------------------------------------
def _inception_kernel(x_ref, w1o_ref, wred_ref, bred_ref, wc_ref, w4o_ref,
                      bout_ref, o_ref, acc_ref, r35_ref, xpool_ref, *,
                      H, W, c3r, c5r):
    cin = x_ref.shape[-1]
    ctot = o_ref.shape[-1]
    c35 = c3r + c5r
    M = H * W

    xv = x_ref[0]                                   # (H, W, Cin) fp32, in VMEM
    xf = xv.reshape(M, cin)

    # ---- branch1: 1x1 conv; weights pre-scattered into output cols [0:ch1x1]
    acc_ref[...] = jnp.dot(xf, w1o_ref[...], preferred_element_type=jnp.float32)

    # ---- branches 2+3, stage 1: fused 1x1 reduce + bias + ReLU
    red = jnp.dot(xf, wred_ref[...], preferred_element_type=jnp.float32)
    red = jnp.maximum(red + bred_ref[...], 0.0)     # (M, c3r + c5r)

    # zero "same" padding entirely in VMEM (pad 2 serves both the 3x3 and 5x5
    # taps; W-pad starts at sublane-aligned offset _LPAD -> unmasked store).
    r35_ref[...] = jnp.zeros(r35_ref.shape, r35_ref.dtype)
    r35_ref[2:H + 2, _LPAD:_LPAD + W, :] = red.reshape(H, W, c35)

    # ---- branches 2+3, stage 2: merged 3x3 + 5x5 conv, 25 shifted matmuls
    #      (contraction c3r+c5r) accumulating into the output-channel slab.
    for ky in range(5):
        for kx in range(5):
            c0 = _LPAD - 2 + kx
            sl = r35_ref[ky:ky + H, c0:c0 + W, :].reshape(M, c35)
            acc_ref[...] += jnp.dot(sl, wc_ref[ky, kx],
                                    preferred_element_type=jnp.float32)

    # ---- branch4: 3x3 max pool (stride 1, pad 1, -inf padding) + 1x1 proj
    xpool_ref[...] = jnp.full(xpool_ref.shape, -jnp.inf, xpool_ref.dtype)
    xpool_ref[1:H + 1, _LPAD:_LPAD + W, :] = xv
    pooled = None
    for ky in range(3):
        for kx in range(3):
            c0 = _LPAD - 1 + kx
            s = xpool_ref[ky:ky + H, c0:c0 + W, :]
            pooled = s if pooled is None else jnp.maximum(pooled, s)
    acc_ref[...] += jnp.dot(pooled.reshape(M, cin), w4o_ref[...],
                            preferred_element_type=jnp.float32)

    # ---- epilogue: all four branch biases on the fp32 acc, one dense store
    out = acc_ref[...] + bout_ref[...]
    o_ref[...] = out.reshape(1, H, W, ctot).astype(o_ref.dtype)


# ----------------------------------------------------------------------------
# Wrapper: weight re-packing (pure JAX, tiny) + pallas_call plumbing
# ----------------------------------------------------------------------------
def inception_pallas(x_nhwc, params):
    N, H, W, Cin = x_nhwc.shape
    ch1 = params["b1_b"].shape[0]
    c3r = params["b2_b1"].shape[0]
    ch3 = params["b2_b2"].shape[0]
    c5r = params["b3_b1"].shape[0]
    ch5 = params["b3_b2"].shape[0]
    pool = params["b4_b"].shape[0]
    c35 = c3r + c5r
    ctot = ch1 + ch3 + ch5 + pool
    o2, o3, o4 = ch1, ch1 + ch3, ch1 + ch3 + ch5
    f32 = jnp.float32

    # branch1 / branch4 1x1 weights scattered into their final output columns
    w1o = jnp.zeros((Cin, ctot), f32).at[:, 0:ch1].set(
        params["b1_w"].reshape(Cin, ch1))
    w4o = jnp.zeros((Cin, ctot), f32).at[:, o4:o4 + pool].set(
        params["b4_w"].reshape(Cin, pool))

    # fused branch2/branch3 1x1 reduce
    w_red = jnp.concatenate([params["b2_w1"].reshape(Cin, c3r),
                             params["b3_w1"].reshape(Cin, c5r)], axis=1)
    b_red = jnp.concatenate([params["b2_b1"], params["b3_b1"]]).reshape(1, c35)

    # combined per-tap weights for the merged 3x3 (centre taps) + 5x5 conv,
    # scattered into their output columns
    wc = jnp.zeros((5, 5, c35, ctot), f32)
    wc = wc.at[1:4, 1:4, 0:c3r, o2:o2 + ch3].set(params["b2_w2"])
    wc = wc.at[:, :, c3r:c35, o3:o3 + ch5].set(params["b3_w2"])

    # output-stage biases in final concatenation order
    b_out = jnp.concatenate([params["b1_b"], params["b2_b2"],
                             params["b3_b2"], params["b4_b"]]).reshape(1, ctot)

    kern = functools.partial(_inception_kernel, H=H, W=W, c3r=c3r, c5r=c5r)
    full2 = lambda n: (0, 0)
    return pl.pallas_call(
        kern,
        out_shape=jax.ShapeDtypeStruct((N, H, W, ctot), x_nhwc.dtype),
        grid_spec=pltpu.PrefetchScalarGridSpec(
            num_scalar_prefetch=0,
            grid=(N,),
            in_specs=[
                pl.BlockSpec((1, H, W, Cin), lambda n: (n, 0, 0, 0)),
                pl.BlockSpec((Cin, ctot), full2),
                pl.BlockSpec((Cin, c35), full2),
                pl.BlockSpec((1, c35), full2),
                pl.BlockSpec((5, 5, c35, ctot), lambda n: (0, 0, 0, 0)),
                pl.BlockSpec((Cin, ctot), full2),
                pl.BlockSpec((1, ctot), full2),
            ],
            out_specs=pl.BlockSpec((1, H, W, ctot), lambda n: (n, 0, 0, 0)),
            scratch_shapes=[
                pltpu.VMEM((H * W, ctot), jnp.float32),              # acc
                pltpu.VMEM((H + 4, _LPAD + W + 2, c35), jnp.float32),  # pad r35
                pltpu.VMEM((H + 2, _LPAD + W + 1, Cin), jnp.float32),  # pad pool
            ],
        ),
        compiler_params=pltpu.CompilerParams(
            dimension_semantics=("parallel",)),
    )(x_nhwc, w1o, w_red, b_red, wc, w4o, b_out)


@jax.jit
def inception_forward(x_nchw, params):
    x = jnp.transpose(x_nchw, (0, 2, 3, 1))     # NCHW -> NHWC
    y = inception_pallas(x, params)
    return jnp.transpose(y, (0, 3, 1, 2))       # NHWC -> NCHW (torch layout)


# ----------------------------------------------------------------------------
# Parameter init (HWIO weights, like nn.Conv2d but channels-last)
# ----------------------------------------------------------------------------
def init_inception_params(key, in_ch, ch1x1, ch3x3red, ch3x3,
                          ch5x5red, ch5x5, pool_proj):
    def conv_param(k, K, cin, cout):
        kw, kb = jax.random.split(k)
        w = 0.1 * jax.random.normal(kw, (K, K, cin, cout), jnp.float32)
        b = 0.1 * jax.random.normal(kb, (cout,), jnp.float32)
        return w, b

    keys = jax.random.split(key, 6)
    p = {}
    p["b1_w"], p["b1_b"] = conv_param(keys[0], 1, in_ch, ch1x1)
    p["b2_w1"], p["b2_b1"] = conv_param(keys[1], 1, in_ch, ch3x3red)
    p["b2_w2"], p["b2_b2"] = conv_param(keys[2], 3, ch3x3red, ch3x3)
    p["b3_w1"], p["b3_b1"] = conv_param(keys[3], 1, in_ch, ch5x5red)
    p["b3_w2"], p["b3_b2"] = conv_param(keys[4], 5, ch5x5red, ch5x5)
    p["b4_w"], p["b4_b"] = conv_param(keys[5], 1, in_ch, pool_proj)
    return p


# ----------------------------------------------------------------------------
# Pure-JAX reference (for correctness check)
# ----------------------------------------------------------------------------
def _ref_conv(x, w, b, relu=False):
    dn = jax.lax.conv_dimension_numbers(x.shape, w.shape,
                                        ("NHWC", "HWIO", "NHWC"))
    y = jax.lax.conv_general_dilated(x, w, (1, 1), "SAME",
                                     dimension_numbers=dn,
                                     precision=jax.lax.Precision.HIGHEST)
    y = y + b[None, None, None, :]
    return jnp.maximum(y, 0.0) if relu else y


def _ref_forward(x_nchw, p):
    x = jnp.transpose(x_nchw, (0, 2, 3, 1))
    b1 = _ref_conv(x, p["b1_w"], p["b1_b"])
    b2 = _ref_conv(_ref_conv(x, p["b2_w1"], p["b2_b1"], True),
                   p["b2_w2"], p["b2_b2"])
    b3 = _ref_conv(_ref_conv(x, p["b3_w1"], p["b3_b1"], True),
                   p["b3_w2"], p["b3_b2"])
    pooled = jax.lax.reduce_window(
        x, -jnp.inf, jax.lax.max, (1, 3, 3, 1), (1, 1, 1, 1),
        ((0, 0), (1, 1), (1, 1), (0, 0)))
    b4 = _ref_conv(pooled, p["b4_w"], p["b4_b"])
    y = jnp.concatenate([b1, b2, b3, b4], axis=-1)
    return jnp.transpose(y, (0, 3, 1, 2))


# ----------------------------------------------------------------------------
if __name__ == "__main__":
    N, C_IN, H, W = 2, 8, 16, 16
    CH1, CH3R, CH3, CH5R, CH5, POOL = 8, 4, 8, 4, 8, 8

    key = jax.random.PRNGKey(0)
    kx, kp = jax.random.split(key)
    x = jax.random.normal(kx, (N, C_IN, H, W), jnp.float32)  # NCHW like PyTorch
    params = init_inception_params(kp, C_IN, CH1, CH3R, CH3, CH5R, CH5, POOL)

    out = inception_forward(x, params)
    out = jax.block_until_ready(out)

    assert out.shape == (N, CH1 + CH3 + CH5 + POOL, H, W), out.shape

    ref = jax.block_until_ready(_ref_forward(x, params))
    np.testing.assert_allclose(np.asarray(out), np.asarray(ref),
                               rtol=1e-3, atol=1e-3)

    print("KERNEL_OK")
</pallas_src>

<mosaic_0001>
module attributes {stable_mosaic.version = 11 : i64} {
  func.func @_inception_kernel(%arg0: i32, %arg1: memref<1x16x16x8xf32, #tpu.memory_space<vmem>>, %arg2: memref<8x32xf32, #tpu.memory_space<vmem>>, %arg3: memref<8x8xf32, #tpu.memory_space<vmem>>, %arg4: memref<1x8xf32, #tpu.memory_space<vmem>>, %arg5: memref<5x5x8x32xf32, #tpu.memory_space<vmem>>, %arg6: memref<8x32xf32, #tpu.memory_space<vmem>>, %arg7: memref<1x32xf32, #tpu.memory_space<vmem>>, %arg8: memref<1x16x16x32xf32, #tpu.memory_space<vmem>>, %arg9: memref<256x32xf32, #tpu.memory_space<vmem>>, %arg10: memref<20x26x8xf32, #tpu.memory_space<vmem>>, %arg11: memref<18x25x8xf32, #tpu.memory_space<vmem>>) attributes {dimension_semantics = [#tpu.dimension_semantics<parallel>], iteration_bounds = array<i64: 2>, scalar_prefetch = 0 : i64, scratch_operands = 3 : i64, tpu.core_type = #tpu.core_type<tc>, window_params = [{transform_indices = @transform_0, window_bounds = array<i64: 1, 16, 16, 8>}, {pipeline_mode = #tpu.pipeline_mode<synchronous>, transform_indices = @transform_1, window_bounds = array<i64: 8, 32>}, {pipeline_mode = #tpu.pipeline_mode<synchronous>, transform_indices = @transform_2, window_bounds = array<i64: 8, 8>}, {pipeline_mode = #tpu.pipeline_mode<synchronous>, transform_indices = @transform_3, window_bounds = array<i64: 1, 8>}, {pipeline_mode = #tpu.pipeline_mode<synchronous>, transform_indices = @transform_4, window_bounds = array<i64: 5, 5, 8, 32>}, {pipeline_mode = #tpu.pipeline_mode<synchronous>, transform_indices = @transform_5, window_bounds = array<i64: 8, 32>}, {pipeline_mode = #tpu.pipeline_mode<synchronous>, transform_indices = @transform_6, window_bounds = array<i64: 1, 32>}, {transform_indices = @transform_7, window_bounds = array<i64: 1, 16, 16, 32>}]} {
    %c0 = arith.constant 0 : index
    %c0_0 = arith.constant 0 : index
    %c0_1 = arith.constant 0 : index
    %c0_2 = arith.constant 0 : index
    %0 = vector.load %arg1[%c0, %c0_0, %c0_1, %c0_2] : memref<1x16x16x8xf32, #tpu.memory_space<vmem>>, vector<1x16x16x8xf32>
    %1 = vector.shape_cast %0 : vector<1x16x16x8xf32> to vector<16x16x8xf32>
    %2 = vector.shape_cast %1 : vector<16x16x8xf32> to vector<256x8xf32>
    %c0_3 = arith.constant 0 : index
    %c0_4 = arith.constant 0 : index
    %3 = vector.load %arg2[%c0_3, %c0_4] : memref<8x32xf32, #tpu.memory_space<vmem>>, vector<8x32xf32>
    %cst = arith.constant dense<0.000000e+00> : vector<256x32xf32>
    %4 = tpu.matmul %2, %3, %cst {dimension_numbers = #tpu.dot_dimension_numbers<[1], [0], [0], [1], [0, 0, 1, 1], [], []>} : vector<256x8xf32>, vector<8x32xf32>, vector<256x32xf32> -> vector<256x32xf32>
    %c0_5 = arith.constant 0 : index
    %c0_6 = arith.constant 0 : index
    %5 = vector.load %arg9[%c0_5, %c0_6] : memref<256x32xf32, #tpu.memory_space<vmem>>, vector<256x32xf32>
    tpu.vector_store %arg9[%c0_5, %c0_6], %4 {strides = array<i32>} : memref<256x32xf32, #tpu.memory_space<vmem>>, vector<256x32xf32>,
    %c0_7 = arith.constant 0 : index
    %c0_8 = arith.constant 0 : index
    %6 = vector.load %arg3[%c0_7, %c0_8] : memref<8x8xf32, #tpu.memory_space<vmem>>, vector<8x8xf32>
    %cst_9 = arith.constant dense<0.000000e+00> : vector<256x8xf32>
    %7 = tpu.matmul %2, %6, %cst_9 {dimension_numbers = #tpu.dot_dimension_numbers<[1], [0], [0], [1], [0, 0, 1, 1], [], []>} : vector<256x8xf32>, vector<8x8xf32>, vector<256x8xf32> -> vector<256x8xf32>
    %c0_10 = arith.constant 0 : index
    %c0_11 = arith.constant 0 : index
    %8 = vector.load %arg4[%c0_10, %c0_11] : memref<1x8xf32, #tpu.memory_space<vmem>>, vector<1x8xf32>
    %9 = vector.broadcast %8 : vector<1x8xf32> to vector<256x8xf32>
    %10 = arith.addf %7, %9 : vector<256x8xf32>
    %cst_12 = arith.constant 0.000000e+00 : f32
    %11 = vector.broadcast %cst_12 : f32 to vector<256x8xf32>
    %12 = arith.maximumf %10, %11 : vector<256x8xf32>
    %cst_13 = arith.constant 0.000000e+00 : f32
    %13 = vector.broadcast %cst_13 : f32 to vector<20x26x8xf32>
    %c0_14 = arith.constant 0 : index
    %c0_15 = arith.constant 0 : index
    %c0_16 = arith.constant 0 : index
    %14 = vector.load %arg10[%c0_14, %c0_15, %c0_16] : memref<20x26x8xf32, #tpu.memory_space<vmem>>, vector<20x26x8xf32>
    tpu.vector_store %arg10[%c0_14, %c0_15, %c0_16], %13 {strides = array<i32>} : memref<20x26x8xf32, #tpu.memory_space<vmem>>, vector<20x26x8xf32>,
    %15 = vector.shape_cast %12 : vector<256x8xf32> to vector<16x16x8xf32>
    %c2 = arith.constant 2 : index
    %c8 = arith.constant 8 : index
    %c0_17 = arith.constant 0 : index
    %16 = vector.load %arg10[%c2, %c8, %c0_17] : memref<20x26x8xf32, #tpu.memory_space<vmem>>, vector<16x16x8xf32>
    tpu.vector_store %arg10[%c2, %c8, %c0_17], %15 {strides = array<i32>} : memref<20x26x8xf32, #tpu.memory_space<vmem>>, vector<16x16x8xf32>,
    %c0_18 = arith.constant 0 : index
    %c6 = arith.constant 6 : index
    %c0_19 = arith.constant 0 : index
    %17 = vector.load %arg10[%c0_18, %c6, %c0_19] : memref<20x26x8xf32, #tpu.memory_space<vmem>>, vector<16x16x8xf32>
    %18 = vector.shape_cast %17 : vector<16x16x8xf32> to vector<256x8xf32>
    %c0_20 = arith.constant 0 : index
    %c0_21 = arith.constant 0 : index
    %19 = vector.load %arg9[%c0_20, %c0_21] : memref<256x32xf32, #tpu.memory_space<vmem>>, vector<256x32xf32>
    %c0_22 = arith.constant 0 : index
    %c0_23 = arith.constant 0 : index
    %c0_24 = arith.constant 0 : index
    %c0_25 = arith.constant 0 : index
    %20 = vector.load %arg5[%c0_22, %c0_23, %c0_24, %c0_25] : memref<5x5x8x32xf32, #tpu.memory_space<vmem>>, vector<1x1x8x32xf32>
    %21 = vector.shape_cast %20 : vector<1x1x8x32xf32> to vector<8x32xf32>
    %cst_26 = arith.constant dense<0.000000e+00> : vector<256x32xf32>
    %22 = tpu.matmul %18, %21, %cst_26 {dimension_numbers = #tpu.dot_dimension_numbers<[1], [0], [0], [1], [0, 0, 1, 1], [], []>} : vector<256x8xf32>, vector<8x32xf32>, vector<256x32xf32> -> vector<256x32xf32>
    %23 = arith.addf %19, %22 : vector<256x32xf32>
    %c0_27 = arith.constant 0 : index
    %c0_28 = arith.constant 0 : index
    %24 = vector.load %arg9[%c0_27, %c0_28] : memref<256x32xf32, #tpu.memory_space<vmem>>, vector<256x32xf32>
    tpu.vector_store %arg9[%c0_27, %c0_28], %23 {strides = array<i32>} : memref<256x32xf32, #tpu.memory_space<vmem>>, vector<256x32xf32>,
    %c0_29 = arith.constant 0 : index
    %c7 = arith.constant 7 : index
    %c0_30 = arith.constant 0 : index
    %25 = vector.load %arg10[%c0_29, %c7, %c0_30] : memref<20x26x8xf32, #tpu.memory_space<vmem>>, vector<16x16x8xf32>
    %26 = vector.shape_cast %25 : vector<16x16x8xf32> to vector<256x8xf32>
    %c0_31 = arith.constant 0 : index
    %c0_32 = arith.constant 0 : index
    %27 = vector.load %arg9[%c0_31, %c0_32] : memref<256x32xf32, #tpu.memory_space<vmem>>, vector<256x32xf32>
    %c0_33 = arith.constant 0 : index
    %c1 = arith.constant 1 : index
    %c0_34 = arith.constant 0 : index
    %c0_35 = arith.constant 0 : index
    %28 = vector.load %arg5[%c0_33, %c1, %c0_34, %c0_35] : memref<5x5x8x32xf32, #tpu.memory_space<vmem>>, vector<1x1x8x32xf32>
    %29 = vector.shape_cast %28 : vector<1x1x8x32xf32> to vector<8x32xf32>
    %cst_36 = arith.constant dense<0.000000e+00> : vector<256x32xf32>
    %30 = tpu.matmul %26, %29, %cst_36 {dimension_numbers = #tpu.dot_dimension_numbers<[1], [0], [0], [1], [0, 0, 1, 1], [], []>} : vector<256x8xf32>, vector<8x32xf32>, vector<256x32xf32> -> vector<256x32xf32>
    %31 = arith.addf %27, %30 : vector<256x32xf32>
    %c0_37 = arith.constant 0 : index
    %c0_38 = arith.constant 0 : index
    %32 = vector.load %arg9[%c0_37, %c0_38] : memref<256x32xf32, #tpu.memory_space<vmem>>, vector<256x32xf32>
    tpu.vector_store %arg9[%c0_37, %c0_38], %31 {strides = array<i32>} : memref<256x32xf32, #tpu.memory_space<vmem>>, vector<256x32xf32>,
    %c0_39 = arith.constant 0 : index
    %c8_40 = arith.constant 8 : index
    %c0_41 = arith.constant 0 : index
    %33 = vector.load %arg10[%c0_39, %c8_40, %c0_41] : memref<20x26x8xf32, #tpu.memory_space<vmem>>, vector<16x16x8xf32>
    %34 = vector.shape_cast %33 : vector<16x16x8xf32> to vector<256x8xf32>
    %c0_42 = arith.constant 0 : index
    %c0_43 = arith.constant 0 : index
    %35 = vector.load %arg9[%c0_42, %c0_43] : memref<256x32xf32, #tpu.memory_space<vmem>>, vector<256x32xf32>
    %c0_44 = arith.constant 0 : index
    %c2_45 = arith.constant 2 : index
    %c0_46 = arith.constant 0 : index
    %c0_47 = arith.constant 0 : index
    %36 = vector.load %arg5[%c0_44, %c2_45, %c0_46, %c0_47] : memref<5x5x8x32xf32, #tpu.memory_space<vmem>>, vector<1x1x8x32xf32>
    %37 = vector.shape_cast %36 : vector<1x1x8x32xf32> to vector<8x32xf32>
    %cst_48 = arith.constant dense<0.000000e+00> : vector<256x32xf32>
    %38 = tpu.matmul %34, %37, %cst_48 {dimension_numbers = #tpu.dot_dimension_numbers<[1], [0], [0], [1], [0, 0, 1, 1], [], []>} : vector<256x8xf32>, vector<8x32xf32>, vector<256x32xf32> -> vector<256x32xf32>
    %39 = arith.addf %35, %38 : vector<256x32xf32>
    %c0_49 = arith.constant 0 : index
    %c0_50 = arith.constant 0 : index
    %40 = vector.load %arg9[%c0_49, %c0_50] : memref<256x32xf32, #tpu.memory_space<vmem>>, vector<256x32xf32>
    tpu.vector_store %arg9[%c0_49, %c0_50], %39 {strides = array<i32>} : memref<256x32xf32, #tpu.memory_space<vmem>>, vector<256x32xf32>,
    %c0_51 = arith.constant 0 : index
    %c9 = arith.constant 9 : index
    %c0_52 = arith.constant 0 : index
    %41 = vector.load %arg10[%c0_51, %c9, %c0_52] : memref<20x26x8xf32, #tpu.memory_space<vmem>>, vector<16x16x8xf32>
    %42 = vector.shape_cast %41 : vector<16x16x8xf32> to vector<256x8xf32>
    %c0_53 = arith.constant 0 : index
    %c0_54 = arith.constant 0 : index
    %43 = vector.load %arg9[%c0_53, %c0_54] : memref<256x32xf32, #tpu.memory_space<vmem>>, vector<256x32xf32>
    %c0_55 = arith.constant 0 : index
    %c3 = arith.constant 3 : index
    %c0_56 = arith.constant 0 : index
    %c0_57 = arith.constant 0 : index
    %44 = vector.load %arg5[%c0_55, %c3, %c0_56, %c0_57] : memref<5x5x8x32xf32, #tpu.memory_space<vmem>>, vector<1x1x8x32xf32>
    %45 = vector.shape_cast %44 : vector<1x1x8x32xf32> to vector<8x32xf32>
    %cst_58 = arith.constant dense<0.000000e+00> : vector<256x32xf32>
    %46 = tpu.matmul %42, %45, %cst_58 {dimension_numbers = #tpu.dot_dimension_numbers<[1], [0], [0], [1], [0, 0, 1, 1], [], []>} : vector<256x8xf32>, vector<8x32xf32>, vector<256x32xf32> -> vector<256x32xf32>
    %47 = arith.addf %43, %46 : vector<256x32xf32>
    %c0_59 = arith.constant 0 : index
    %c0_60 = arith.constant 0 : index
    %48 = vector.load %arg9[%c0_59, %c0_60] : memref<256x32xf32, #tpu.memory_space<vmem>>, vector<256x32xf32>
    tpu.vector_store %arg9[%c0_59, %c0_60], %47 {strides = array<i32>} : memref<256x32xf32, #tpu.memory_space<vmem>>, vector<256x32xf32>,
    %c0_61 = arith.constant 0 : index
    %c10 = arith.constant 10 : index
    %c0_62 = arith.constant 0 : index
    %49 = vector.load %arg10[%c0_61, %c10, %c0_62] : memref<20x26x8xf32, #tpu.memory_space<vmem>>, vector<16x16x8xf32>
    %50 = vector.shape_cast %49 : vector<16x16x8xf32> to vector<256x8xf32>
    %c0_63 = arith.constant 0 : index
    %c0_64 = arith.constant 0 : index
    %51 = vector.load %arg9[%c0_63, %c0_64] : memref<256x32xf32, #tpu.memory_space<vmem>>, vector<256x32xf32>
    %c0_65 = arith.constant 0 : index
    %c4 = arith.constant 4 : index
    %c0_66 = arith.constant 0 : index
    %c0_67 = arith.constant 0 : index
    %52 = vector.load %arg5[%c0_65, %c4, %c0_66, %c0_67] : memref<5x5x8x32xf32, #tpu.memory_space<vmem>>, vector<1x1x8x32xf32>
    %53 = vector.shape_cast %52 : vector<1x1x8x32xf32> to vector<8x32xf32>
    %cst_68 = arith.constant dense<0.000000e+00> : vector<256x32xf32>
    %54 = tpu.matmul %50, %53, %cst_68 {dimension_numbers = #tpu.dot_dimension_numbers<[1], [0], [0], [1], [0, 0, 1, 1], [], []>} : vector<256x8xf32>, vector<8x32xf32>, vector<256x32xf32> -> vector<256x32xf32>
    %55 = arith.addf %51, %54 : vector<256x32xf32>
    %c0_69 = arith.constant 0 : index
    %c0_70 = arith.constant 0 : index
    %56 = vector.load %arg9[%c0_69, %c0_70] : memref<256x32xf32, #tpu.memory_space<vmem>>, vector<256x32xf32>
    tpu.vector_store %arg9[%c0_69, %c0_70], %55 {strides = array<i32>} : memref<256x32xf32, #tpu.memory_space<vmem>>, vector<256x32xf32>,
    %c1_71 = arith.constant 1 : index
    %c6_72 = arith.constant 6 : index
    %c0_73 = arith.constant 0 : index
    %57 = vector.load %arg10[%c1_71, %c6_72, %c0_73] : memref<20x26x8xf32, #tpu.memory_space<vmem>>, vector<16x16x8xf32>
    %58 = vector.shape_cast %57 : vector<16x16x8xf32> to vector<256x8xf32>
    %c0_74 = arith.constant 0 : index
    %c0_75 = arith.constant 0 : index
    %59 = vector.load %arg9[%c0_74, %c0_75] : memref<256x32xf32, #tpu.memory_space<vmem>>, vector<256x32xf32>
    %c1_76 = arith.constant 1 : index
    %c0_77 = arith.constant 0 : index
    %c0_78 = arith.constant 0 : index
    %c0_79 = arith.constant 0 : index
    %60 = vector.load %arg5[%c1_76, %c0_77, %c0_78, %c0_79] : memref<5x5x8x32xf32, #tpu.memory_space<vmem>>, vector<1x1x8x32xf32>
    %61 = vector.shape_cast %60 : vector<1x1x8x32xf32> to vector<8x32xf32>
    %cst_80 = arith.constant dense<0.000000e+00> : vector<256x32xf32>
    %62 = tpu.matmul %58, %61, %cst_80 {dimension_numbers = #tpu.dot_dimension_numbers<[1], [0], [0], [1], [0, 0, 1, 1], [], []>} : vector<256x8xf32>, vector<8x32xf32>, vector<256x32xf32> -> vector<256x32xf32>
    %63 = arith.addf %59, %62 : vector<256x32xf32>
    %c0_81 = arith.constant 0 : index
    %c0_82 = arith.constant 0 : index
    %64 = vector.load %arg9[%c0_81, %c0_82] : memref<256x32xf32, #tpu.memory_space<vmem>>, vector<256x32xf32>
    tpu.vector_store %arg9[%c0_81, %c0_82], %63 {strides = array<i32>} : memref<256x32xf32, #tpu.memory_space<vmem>>, vector<256x32xf32>,
    %c1_83 = arith.constant 1 : index
    %c7_84 = arith.constant 7 : index
    %c0_85 = arith.constant 0 : index
    %65 = vector.load %arg10[%c1_83, %c7_84, %c0_85] : memref<20x26x8xf32, #tpu.memory_space<vmem>>, vector<16x16x8xf32>
    %66 = vector.shape_cast %65 : vector<16x16x8xf32> to vector<256x8xf32>
    %c0_86 = arith.constant 0 : index
    %c0_87 = arith.constant 0 : index
    %67 = vector.load %arg9[%c0_86, %c0_87] : memref<256x32xf32, #tpu.memory_space<vmem>>, vector<256x32xf32>
    %c1_88 = arith.constant 1 : index
    %c1_89 = arith.constant 1 : index
    %c0_90 = arith.constant 0 : index
    %c0_91 = arith.constant 0 : index
    %68 = vector.load %arg5[%c1_88, %c1_89, %c0_90, %c0_91] : memref<5x5x8x32xf32, #tpu.memory_space<vmem>>, vector<1x1x8x32xf32>
    %69 = vector.shape_cast %68 : vector<1x1x8x32xf32> to vector<8x32xf32>
    %cst_92 = arith.constant dense<0.000000e+00> : vector<256x32xf32>
    %70 = tpu.matmul %66, %69, %cst_92 {dimension_numbers = #tpu.dot_dimension_numbers<[1], [0], [0], [1], [0, 0, 1, 1], [], []>} : vector<256x8xf32>, vector<8x32xf32>, vector<256x32xf32> -> vector<256x32xf32>
    %71 = arith.addf %67, %70 : vector<256x32xf32>
    %c0_93 = arith.constant 0 : index
    %c0_94 = arith.constant 0 : index
    %72 = vector.load %arg9[%c0_93, %c0_94] : memref<256x32xf32, #tpu.memory_space<vmem>>, vector<256x32xf32>
    tpu.vector_store %arg9[%c0_93, %c0_94], %71 {strides = array<i32>} : memref<256x32xf32, #tpu.memory_space<vmem>>, vector<256x32xf32>,
    %c1_95 = arith.constant 1 : index
    %c8_96 = arith.constant 8 : index
    %c0_97 = arith.constant 0 : index
    %73 = vector.load %arg10[%c1_95, %c8_96, %c0_97] : memref<20x26x8xf32, #tpu.memory_space<vmem>>, vector<16x16x8xf32>
    %74 = vector.shape_cast %73 : vector<16x16x8xf32> to vector<256x8xf32>
    %c0_98 = arith.constant 0 : index
    %c0_99 = arith.constant 0 : index
    %75 = vector.load %arg9[%c0_98, %c0_99] : memref<256x32xf32, #tpu.memory_space<vmem>>, vector<256x32xf32>
    %c1_100 = arith.constant 1 : index
    %c2_101 = arith.constant 2 : index
    %c0_102 = arith.constant 0 : index
    %c0_103 = arith.constant 0 : index
    %76 = vector.load %arg5[%c1_100, %c2_101, %c0_102, %c0_103] : memref<5x5x8x32xf32, #tpu.memory_space<vmem>>, vector<1x1x8x32xf32>
    %77 = vector.shape_cast %76 : vector<1x1x8x32xf32> to vector<8x32xf32>
    %cst_104 = arith.constant dense<0.000000e+00> : vector<256x32xf32>
    %78 = tpu.matmul %74, %77, %cst_104 {dimension_numbers = #tpu.dot_dimension_numbers<[1], [0], [0], [1], [0, 0, 1, 1], [], []>} : vector<256x8xf32>, vector<8x32xf32>, vector<256x32xf32> -> vector<256x32xf32>
    %79 = arith.addf %75, %78 : vector<256x32xf32>
    %c0_105 = arith.constant 0 : index
    %c0_106 = arith.constant 0 : index
    %80 = vector.load %arg9[%c0_105, %c0_106] : memref<256x32xf32, #tpu.memory_space<vmem>>, vector<256x32xf32>
    tpu.vector_store %arg9[%c0_105, %c0_106], %79 {strides = array<i32>} : memref<256x32xf32, #tpu.memory_space<vmem>>, vector<256x32xf32>,
    %c1_107 = arith.constant 1 : index
    %c9_108 = arith.constant 9 : index
    %c0_109 = arith.constant 0 : index
    %81 = vector.load %arg10[%c1_107, %c9_108, %c0_109] : memref<20x26x8xf32, #tpu.memory_space<vmem>>, vector<16x16x8xf32>
    %82 = vector.shape_cast %81 : vector<16x16x8xf32> to vector<256x8xf32>
    %c0_110 = arith.constant 0 : index
    %c0_111 = arith.constant 0 : index
    %83 = vector.load %arg9[%c0_110, %c0_111] : memref<256x32xf32, #tpu.memory_space<vmem>>, vector<256x32xf32>
    %c1_112 = arith.constant 1 : index
    %c3_113 = arith.constant 3 : index
    %c0_114 = arith.constant 0 : index
    %c0_115 = arith.constant 0 : index
    %84 = vector.load %arg5[%c1_112, %c3_113, %c0_114, %c0_115] : memref<5x5x8x32xf32, #tpu.memory_space<vmem>>, vector<1x1x8x32xf32>
    %85 = vector.shape_cast %84 : vector<1x1x8x32xf32> to vector<8x32xf32>
    %cst_116 = arith.constant dense<0.000000e+00> : vector<256x32xf32>
    %86 = tpu.matmul %82, %85, %cst_116 {dimension_numbers = #tpu.dot_dimension_numbers<[1], [0], [0], [1], [0, 0, 1, 1], [], []>} : vector<256x8xf32>, vector<8x32xf32>, vector<256x32xf32> -> vector<256x32xf32>
    %87 = arith.addf %83, %86 : vector<256x32xf32>
    %c0_117 = arith.constant 0 : index
    %c0_118 = arith.constant 0 : index
    %88 = vector.load %arg9[%c0_117, %c0_118] : memref<256x32xf32, #tpu.memory_space<vmem>>, vector<256x32xf32>
    tpu.vector_store %arg9[%c0_117, %c0_118], %87 {strides = array<i32>} : memref<256x32xf32, #tpu.memory_space<vmem>>, vector<256x32xf32>,
    %c1_119 = arith.constant 1 : index
    %c10_120 = arith.constant 10 : index
    %c0_121 = arith.constant 0 : index
    %89 = vector.load %arg10[%c1_119, %c10_120, %c0_121] : memref<20x26x8xf32, #tpu.memory_space<vmem>>, vector<16x16x8xf32>
    %90 = vector.shape_cast %89 : vector<16x16x8xf32> to vector<256x8xf32>
    %c0_122 = arith.constant 0 : index
    %c0_123 = arith.constant 0 : index
    %91 = vector.load %arg9[%c0_122, %c0_123] : memref<256x32xf32, #tpu.memory_space<vmem>>, vector<256x32xf32>
    %c1_124 = arith.constant 1 : index
    %c4_125 = arith.constant 4 : index
    %c0_126 = arith.constant 0 : index
    %c0_127 = arith.constant 0 : index
    %92 = vector.load %arg5[%c1_124, %c4_125, %c0_126, %c0_127] : memref<5x5x8x32xf32, #tpu.memory_space<vmem>>, vector<1x1x8x32xf32>
    %93 = vector.shape_cast %92 : vector<1x1x8x32xf32> to vector<8x32xf32>
    %cst_128 = arith.constant dense<0.000000e+00> : vector<256x32xf32>
    %94 = tpu.matmul %90, %93, %cst_128 {dimension_numbers = #tpu.dot_dimension_numbers<[1], [0], [0], [1], [0, 0, 1, 1], [], []>} : vector<256x8xf32>, vector<8x32xf32>, vector<256x32xf32> -> vector<256x32xf32>
    %95 = arith.addf %91, %94 : vector<256x32xf32>
    %c0_129 = arith.constant 0 : index
    %c0_130 = arith.constant 0 : index
    %96 = vector.load %arg9[%c0_129, %c0_130] : memref<256x32xf32, #tpu.memory_space<vmem>>, vector<256x32xf32>
    tpu.vector_store %arg9[%c0_129, %c0_130], %95 {strides = array<i32>} : memref<256x32xf32, #tpu.memory_space<vmem>>, vector<256x32xf32>,
    %c2_131 = arith.constant 2 : index
    %c6_132 = arith.constant 6 : index
    %c0_133 = arith.constant 0 : index
    %97 = vector.load %arg10[%c2_131, %c6_132, %c0_133] : memref<20x26x8xf32, #tpu.memory_space<vmem>>, vector<16x16x8xf32>
    %98 = vector.shape_cast %97 : vector<16x16x8xf32> to vector<256x8xf32>
    %c0_134 = arith.constant 0 : index
    %c0_135 = arith.constant 0 : index
    %99 = vector.load %arg9[%c0_134, %c0_135] : memref<256x32xf32, #tpu.memory_space<vmem>>, vector<256x32xf32>
    %c2_136 = arith.constant 2 : index
    %c0_137 = arith.constant 0 : index
    %c0_138 = arith.constant 0 : index
    %c0_139 = arith.constant 0 : index
    %100 = vector.load %arg5[%c2_136, %c0_137, %c0_138, %c0_139] : memref<5x5x8x32xf32, #tpu.memory_space<vmem>>, vector<1x1x8x32xf32>
    %101 = vector.shape_cast %100 : vector<1x1x8x32xf32> to vector<8x32xf32>
    %cst_140 = arith.constant dense<0.000000e+00> : vector<256x32xf32>
    %102 = tpu.matmul %98, %101, %cst_140 {dimension_numbers = #tpu.dot_dimension_numbers<[1], [0], [0], [1], [0, 0, 1, 1], [], []>} : vector<256x8xf32>, vector<8x32xf32>, vector<256x32xf32> -> vector<256x32xf32>
    %103 = arith.addf %99, %102 : vector<256x32xf32>
    %c0_141 = arith.constant 0 : index
    %c0_142 = arith.constant 0 : index
    %104 = vector.load %arg9[%c0_141, %c0_142] : memref<256x32xf32, #tpu.memory_space<vmem>>, vector<256x32xf32>
    tpu.vector_store %arg9[%c0_141, %c0_142], %103 {strides = array<i32>} : memref<256x32xf32, #tpu.memory_space<vmem>>, vector<256x32xf32>,
    %c2_143 = arith.constant 2 : index
    %c7_144 = arith.constant 7 : index
    %c0_145 = arith.constant 0 : index
    %105 = vector.load %arg10[%c2_143, %c7_144, %c0_145] : memref<20x26x8xf32, #tpu.memory_space<vmem>>, vector<16x16x8xf32>
    %106 = vector.shape_cast %105 : vector<16x16x8xf32> to vector<256x8xf32>
    %c0_146 = arith.constant 0 : index
    %c0_147 = arith.constant 0 : index
    %107 = vector.load %arg9[%c0_146, %c0_147] : memref<256x32xf32, #tpu.memory_space<vmem>>, vector<256x32xf32>
    %c2_148 = arith.constant 2 : index
    %c1_149 = arith.constant 1 : index
    %c0_150 = arith.constant 0 : index
    %c0_151 = arith.constant 0 : index
    %108 = vector.load %arg5[%c2_148, %c1_149, %c0_150, %c0_151] : memref<5x5x8x32xf32, #tpu.memory_space<vmem>>, vector<1x1x8x32xf32>
    %109 = vector.shape_cast %108 : vector<1x1x8x32xf32> to vector<8x32xf32>
    %cst_152 = arith.constant dense<0.000000e+00> : vector<256x32xf32>
    %110 = tpu.matmul %106, %109, %cst_152 {dimension_numbers = #tpu.dot_dimension_numbers<[1], [0], [0], [1], [0, 0, 1, 1], [], []>} : vector<256x8xf32>, vector<8x32xf32>, vector<256x32xf32> -> vector<256x32xf32>
    %111 = arith.addf %107, %110 : vector<256x32xf32>
    %c0_153 = arith.constant 0 : index
    %c0_154 = arith.constant 0 : index
    %112 = vector.load %arg9[%c0_153, %c0_154] : memref<256x32xf32, #tpu.memory_space<vmem>>, vector<256x32xf32>
    tpu.vector_store %arg9[%c0_153, %c0_154], %111 {strides = array<i32>} : memref<256x32xf32, #tpu.memory_space<vmem>>, vector<256x32xf32>,
    %c2_155 = arith.constant 2 : index
    %c8_156 = arith.constant 8 : index
    %c0_157 = arith.constant 0 : index
    %113 = vector.load %arg10[%c2_155, %c8_156, %c0_157] : memref<20x26x8xf32, #tpu.memory_space<vmem>>, vector<16x16x8xf32>
    %114 = vector.shape_cast %113 : vector<16x16x8xf32> to vector<256x8xf32>
    %c0_158 = arith.constant 0 : index
    %c0_159 = arith.constant 0 : index
    %115 = vector.load %arg9[%c0_158, %c0_159] : memref<256x32xf32, #tpu.memory_space<vmem>>, vector<256x32xf32>
    %c2_160 = arith.constant 2 : index
    %c2_161 = arith.constant 2 : index
    %c0_162 = arith.constant 0 : index
    %c0_163 = arith.constant 0 : index
    %116 = vector.load %arg5[%c2_160, %c2_161, %c0_162, %c0_163] : memref<5x5x8x32xf32, #tpu.memory_space<vmem>>, vector<1x1x8x32xf32>
    %117 = vector.shape_cast %116 : vector<1x1x8x32xf32> to vector<8x32xf32>
    %cst_164 = arith.constant dense<0.000000e+00> : vector<256x32xf32>
    %118 = tpu.matmul %114, %117, %cst_164 {dimension_numbers = #tpu.dot_dimension_numbers<[1], [0], [0], [1], [0, 0, 1, 1], [], []>} : vector<256x8xf32>, vector<8x32xf32>, vector<256x32xf32> -> vector<256x32xf32>
    %119 = arith.addf %115, %118 : vector<256x32xf32>
    %c0_165 = arith.constant 0 : index
    %c0_166 = arith.constant 0 : index
    %120 = vector.load %arg9[%c0_165, %c0_166] : memref<256x32xf32, #tpu.memory_space<vmem>>, vector<256x32xf32>
    tpu.vector_store %arg9[%c0_165, %c0_166], %119 {strides = array<i32>} : memref<256x32xf32, #tpu.memory_space<vmem>>, vector<256x32xf32>,
    %c2_167 = arith.constant 2 : index
    %c9_168 = arith.constant 9 : index
    %c0_169 = arith.constant 0 : index
    %121 = vector.load %arg10[%c2_167, %c9_168, %c0_169] : memref<20x26x8xf32, #tpu.memory_space<vmem>>, vector<16x16x8xf32>
    %122 = vector.shape_cast %121 : vector<16x16x8xf32> to vector<256x8xf32>
    %c0_170 = arith.constant 0 : index
    %c0_171 = arith.constant 0 : index
    %123 = vector.load %arg9[%c0_170, %c0_171] : memref<256x32xf32, #tpu.memory_space<vmem>>, vector<256x32xf32>
    %c2_172 = arith.constant 2 : index
    %c3_173 = arith.constant 3 : index
    %c0_174 = arith.constant 0 : index
    %c0_175 = arith.constant 0 : index
    %124 = vector.load %arg5[%c2_172, %c3_173, %c0_174, %c0_175] : memref<5x5x8x32xf32, #tpu.memory_space<vmem>>, vector<1x1x8x32xf32>
    %125 = vector.shape_cast %124 : vector<1x1x8x32xf32> to vector<8x32xf32>
    %cst_176 = arith.constant dense<0.000000e+00> : vector<256x32xf32>
    %126 = tpu.matmul %122, %125, %cst_176 {dimension_numbers = #tpu.dot_dimension_numbers<[1], [0], [0], [1], [0, 0, 1, 1], [], []>} : vector<256x8xf32>, vector<8x32xf32>, vector<256x32xf32> -> vector<256x32xf32>
    %127 = arith.addf %123, %126 : vector<256x32xf32>
    %c0_177 = arith.constant 0 : index
    %c0_178 = arith.constant 0 : index
    %128 = vector.load %arg9[%c0_177, %c0_178] : memref<256x32xf32, #tpu.memory_space<vmem>>, vector<256x32xf32>
    tpu.vector_store %arg9[%c0_177, %c0_178], %127 {strides = array<i32>} : memref<256x32xf32, #tpu.memory_space<vmem>>, vector<256x32xf32>,
    %c2_179 = arith.constant 2 : index
    %c10_180 = arith.constant 10 : index
    %c0_181 = arith.constant 0 : index
    %129 = vector.load %arg10[%c2_179, %c10_180, %c0_181] : memref<20x26x8xf32, #tpu.memory_space<vmem>>, vector<16x16x8xf32>
    %130 = vector.shape_cast %129 : vector<16x16x8xf32> to vector<256x8xf32>
    %c0_182 = arith.constant 0 : index
    %c0_183 = arith.constant 0 : index
    %131 = vector.load %arg9[%c0_182, %c0_183] : memref<256x32xf32, #tpu.memory_space<vmem>>, vector<256x32xf32>
    %c2_184 = arith.constant 2 : index
    %c4_185 = arith.constant 4 : index
    %c0_186 = arith.constant 0 : index
    %c0_187 = arith.constant 0 : index
    %132 = vector.load %arg5[%c2_184, %c4_185, %c0_186, %c0_187] : memref<5x5x8x32xf32, #tpu.memory_space<vmem>>, vector<1x1x8x32xf32>
    %133 = vector.shape_cast %132 : vector<1x1x8x32xf32> to vector<8x32xf32>
    %cst_188 = arith.constant dense<0.000000e+00> : vector<256x32xf32>
    %134 = tpu.matmul %130, %133, %cst_188 {dimension_numbers = #tpu.dot_dimension_numbers<[1], [0], [0], [1], [0, 0, 1, 1], [], []>} : vector<256x8xf32>, vector<8x32xf32>, vector<256x32xf32> -> vector<256x32xf32>
    %135 = arith.addf %131, %134 : vector<256x32xf32>
    %c0_189 = arith.constant 0 : index
    %c0_190 = arith.constant 0 : index
    %136 = vector.load %arg9[%c0_189, %c0_190] : memref<256x32xf32, #tpu.memory_space<vmem>>, vector<256x32xf32>
    tpu.vector_store %arg9[%c0_189, %c0_190], %135 {strides = array<i32>} : memref<256x32xf32, #tpu.memory_space<vmem>>, vector<256x32xf32>,
    %c3_191 = arith.constant 3 : index
    %c6_192 = arith.constant 6 : index
    %c0_193 = arith.constant 0 : index
    %137 = vector.load %arg10[%c3_191, %c6_192, %c0_193] : memref<20x26x8xf32, #tpu.memory_space<vmem>>, vector<16x16x8xf32>
    %138 = vector.shape_cast %137 : vector<16x16x8xf32> to vector<256x8xf32>
    %c0_194 = arith.constant 0 : index
    %c0_195 = arith.constant 0 : index
    %139 = vector.load %arg9[%c0_194, %c0_195] : memref<256x32xf32, #tpu.memory_space<vmem>>, vector<256x32xf32>
    %c3_196 = arith.constant 3 : index
    %c0_197 = arith.constant 0 : index
    %c0_198 = arith.constant 0 : index
    %c0_199 = arith.constant 0 : index
    %140 = vector.load %arg5[%c3_196, %c0_197, %c0_198, %c0_199] : memref<5x5x8x32xf32, #tpu.memory_space<vmem>>, vector<1x1x8x32xf32>
    %141 = vector.shape_cast %140 : vector<1x1x8x32xf32> to vector<8x32xf32>
    %cst_200 = arith.constant dense<0.000000e+00> : vector<256x32xf32>
    %142 = tpu.matmul %138, %141, %cst_200 {dimension_numbers = #tpu.dot_dimension_numbers<[1], [0], [0], [1], [0, 0, 1, 1], [], []>} : vector<256x8xf32>, vector<8x32xf32>, vector<256x32xf32> -> vector<256x32xf32>
    %143 = arith.addf %139, %142 : vector<256x32xf32>
    %c0_201 = arith.constant 0 : index
    %c0_202 = arith.constant 0 : index
    %144 = vector.load %arg9[%c0_201, %c0_202] : memref<256x32xf32, #tpu.memory_space<vmem>>, vector<256x32xf32>
    tpu.vector_store %arg9[%c0_201, %c0_202], %143 {strides = array<i32>} : memref<256x32xf32, #tpu.memory_space<vmem>>, vector<256x32xf32>,
    %c3_203 = arith.constant 3 : index
    %c7_204 = arith.constant 7 : index
    %c0_205 = arith.constant 0 : index
    %145 = vector.load %arg10[%c3_203, %c7_204, %c0_205] : memref<20x26x8xf32, #tpu.memory_space<vmem>>, vector<16x16x8xf32>
    %146 = vector.shape_cast %145 : vector<16x16x8xf32> to vector<256x8xf32>
    %c0_206 = arith.constant 0 : index
    %c0_207 = arith.constant 0 : index
    %147 = vector.load %arg9[%c0_206, %c0_207] : memref<256x32xf32, #tpu.memory_space<vmem>>, vector<256x32xf32>
    %c3_208 = arith.constant 3 : index
    %c1_209 = arith.constant 1 : index
    %c0_210 = arith.constant 0 : index
    %c0_211 = arith.constant 0 : index
    %148 = vector.load %arg5[%c3_208, %c1_209, %c0_210, %c0_211] : memref<5x5x8x32xf32, #tpu.memory_space<vmem>>, vector<1x1x8x32xf32>
    %149 = vector.shape_cast %148 : vector<1x1x8x32xf32> to vector<8x32xf32>
    %cst_212 = arith.constant dense<0.000000e+00> : vector<256x32xf32>
    %150 = tpu.matmul %146, %149, %cst_212 {dimension_numbers = #tpu.dot_dimension_numbers<[1], [0], [0], [1], [0, 0, 1, 1], [], []>} : vector<256x8xf32>, vector<8x32xf32>, vector<256x32xf32> -> vector<256x32xf32>
    %151 = arith.addf %147, %150 : vector<256x32xf32>
    %c0_213 = arith.constant 0 : index
    %c0_214 = arith.constant 0 : index
    %152 = vector.load %arg9[%c0_213, %c0_214] : memref<256x32xf32, #tpu.memory_space<vmem>>, vector<256x32xf32>
    tpu.vector_store %arg9[%c0_213, %c0_214], %151 {strides = array<i32>} : memref<256x32xf32, #tpu.memory_space<vmem>>, vector<256x32xf32>,
    %c3_215 = arith.constant 3 : index
    %c8_216 = arith.constant 8 : index
    %c0_217 = arith.constant 0 : index
    %153 = vector.load %arg10[%c3_215, %c8_216, %c0_217] : memref<20x26x8xf32, #tpu.memory_space<vmem>>, vector<16x16x8xf32>
    %154 = vector.shape_cast %153 : vector<16x16x8xf32> to vector<256x8xf32>
    %c0_218 = arith.constant 0 : index
    %c0_219 = arith.constant 0 : index
    %155 = vector.load %arg9[%c0_218, %c0_219] : memref<256x32xf32, #tpu.memory_space<vmem>>, vector<256x32xf32>
    %c3_220 = arith.constant 3 : index
    %c2_221 = arith.constant 2 : index
    %c0_222 = arith.constant 0 : index
    %c0_223 = arith.constant 0 : index
    %156 = vector.load %arg5[%c3_220, %c2_221, %c0_222, %c0_223] : memref<5x5x8x32xf32, #tpu.memory_space<vmem>>, vector<1x1x8x32xf32>
    %157 = vector.shape_cast %156 : vector<1x1x8x32xf32> to vector<8x32xf32>
    %cst_224 = arith.constant dense<0.000000e+00> : vector<256x32xf32>
    %158 = tpu.matmul %154, %157, %cst_224 {dimension_numbers = #tpu.dot_dimension_numbers<[1], [0], [0], [1], [0, 0, 1, 1], [], []>} : vector<256x8xf32>, vector<8x32xf32>, vector<256x32xf32> -> vector<256x32xf32>
    %159 = arith.addf %155, %158 : vector<256x32xf32>
    %c0_225 = arith.constant 0 : index
    %c0_226 = arith.constant 0 : index
    %160 = vector.load %arg9[%c0_225, %c0_226] : memref<256x32xf32, #tpu.memory_space<vmem>>, vector<256x32xf32>
    tpu.vector_store %arg9[%c0_225, %c0_226], %159 {strides = array<i32>} : memref<256x32xf32, #tpu.memory_space<vmem>>, vector<256x32xf32>,
    %c3_227 = arith.constant 3 : index
    %c9_228 = arith.constant 9 : index
    %c0_229 = arith.constant 0 : index
    %161 = vector.load %arg10[%c3_227, %c9_228, %c0_229] : memref<20x26x8xf32, #tpu.memory_space<vmem>>, vector<16x16x8xf32>
    %162 = vector.shape_cast %161 : vector<16x16x8xf32> to vector<256x8xf32>
    %c0_230 = arith.constant 0 : index
    %c0_231 = arith.constant 0 : index
    %163 = vector.load %arg9[%c0_230, %c0_231] : memref<256x32xf32, #tpu.memory_space<vmem>>, vector<256x32xf32>
    %c3_232 = arith.constant 3 : index
    %c3_233 = arith.constant 3 : index
    %c0_234 = arith.constant 0 : index
    %c0_235 = arith.constant 0 : index
    %164 = vector.load %arg5[%c3_232, %c3_233, %c0_234, %c0_235] : memref<5x5x8x32xf32, #tpu.memory_space<vmem>>, vector<1x1x8x32xf32>
    %165 = vector.shape_cast %164 : vector<1x1x8x32xf32> to vector<8x32xf32>
    %cst_236 = arith.constant dense<0.000000e+00> : vector<256x32xf32>
    %166 = tpu.matmul %162, %165, %cst_236 {dimension_numbers = #tpu.dot_dimension_numbers<[1], [0], [0], [1], [0, 0, 1, 1], [], []>} : vector<256x8xf32>, vector<8x32xf32>, vector<256x32xf32> -> vector<256x32xf32>
    %167 = arith.addf %163, %166 : vector<256x32xf32>
    %c0_237 = arith.constant 0 : index
    %c0_238 = arith.constant 0 : index
    %168 = vector.load %arg9[%c0_237, %c0_238] : memref<256x32xf32, #tpu.memory_space<vmem>>, vector<256x32xf32>
    tpu.vector_store %arg9[%c0_237, %c0_238], %167 {strides = array<i32>} : memref<256x32xf32, #tpu.memory_space<vmem>>, vector<256x32xf32>,
    %c3_239 = arith.constant 3 : index
    %c10_240 = arith.constant 10 : index
    %c0_241 = arith.constant 0 : index
    %169 = vector.load %arg10[%c3_239, %c10_240, %c0_241] : memref<20x26x8xf32, #tpu.memory_space<vmem>>, vector<16x16x8xf32>
    %170 = vector.shape_cast %169 : vector<16x16x8xf32> to vector<256x8xf32>
    %c0_242 = arith.constant 0 : index
    %c0_243 = arith.constant 0 : index
    %171 = vector.load %arg9[%c0_242, %c0_243] : memref<256x32xf32, #tpu.memory_space<vmem>>, vector<256x32xf32>
    %c3_244 = arith.constant 3 : index
    %c4_245 = arith.constant 4 : index
    %c0_246 = arith.constant 0 : index
    %c0_247 = arith.constant 0 : index
    %172 = vector.load %arg5[%c3_244, %c4_245, %c0_246, %c0_247] : memref<5x5x8x32xf32, #tpu.memory_space<vmem>>, vector<1x1x8x32xf32>
    %173 = vector.shape_cast %172 : vector<1x1x8x32xf32> to vector<8x32xf32>
    %cst_248 = arith.constant dense<0.000000e+00> : vector<256x32xf32>
    %174 = tpu.matmul %170, %173, %cst_248 {dimension_numbers = #tpu.dot_dimension_numbers<[1], [0], [0], [1], [0, 0, 1, 1], [], []>} : vector<256x8xf32>, vector<8x32xf32>, vector<256x32xf32> -> vector<256x32xf32>
    %175 = arith.addf %171, %174 : vector<256x32xf32>
    %c0_249 = arith.constant 0 : index
    %c0_250 = arith.constant 0 : index
    %176 = vector.load %arg9[%c0_249, %c0_250] : memref<256x32xf32, #tpu.memory_space<vmem>>, vector<256x32xf32>
    tpu.vector_store %arg9[%c0_249, %c0_250], %175 {strides = array<i32>} : memref<256x32xf32, #tpu.memory_space<vmem>>, vector<256x32xf32>,
    %c4_251 = arith.constant 4 : index
    %c6_252 = arith.constant 6 : index
    %c0_253 = arith.constant 0 : index
    %177 = vector.load %arg10[%c4_251, %c6_252, %c0_253] : memref<20x26x8xf32, #tpu.memory_space<vmem>>, vector<16x16x8xf32>
    %178 = vector.shape_cast %177 : vector<16x16x8xf32> to vector<256x8xf32>
    %c0_254 = arith.constant 0 : index
    %c0_255 = arith.constant 0 : index
    %179 = vector.load %arg9[%c0_254, %c0_255] : memref<256x32xf32, #tpu.memory_space<vmem>>, vector<256x32xf32>
    %c4_256 = arith.constant 4 : index
    %c0_257 = arith.constant 0 : index
    %c0_258 = arith.constant 0 : index
    %c0_259 = arith.constant 0 : index
    %180 = vector.load %arg5[%c4_256, %c0_257, %c0_258, %c0_259] : memref<5x5x8x32xf32, #tpu.memory_space<vmem>>, vector<1x1x8x32xf32>
    %181 = vector.shape_cast %180 : vector<1x1x8x32xf32> to vector<8x32xf32>
    %cst_260 = arith.constant dense<0.000000e+00> : vector<256x32xf32>
    %182 = tpu.matmul %178, %181, %cst_260 {dimension_numbers = #tpu.dot_dimension_numbers<[1], [0], [0], [1], [0, 0, 1, 1], [], []>} : vector<256x8xf32>, vector<8x32xf32>, vector<256x32xf32> -> vector<256x32xf32>
    %183 = arith.addf %179, %182 : vector<256x32xf32>
    %c0_261 = arith.constant 0 : index
    %c0_262 = arith.constant 0 : index
    %184 = vector.load %arg9[%c0_261, %c0_262] : memref<256x32xf32, #tpu.memory_space<vmem>>, vector<256x32xf32>
    tpu.vector_store %arg9[%c0_261, %c0_262], %183 {strides = array<i32>} : memref<256x32xf32, #tpu.memory_space<vmem>>, vector<256x32xf32>,
    %c4_263 = arith.constant 4 : index
    %c7_264 = arith.constant 7 : index
    %c0_265 = arith.constant 0 : index
    %185 = vector.load %arg10[%c4_263, %c7_264, %c0_265] : memref<20x26x8xf32, #tpu.memory_space<vmem>>, vector<16x16x8xf32>
    %186 = vector.shape_cast %185 : vector<16x16x8xf32> to vector<256x8xf32>
    %c0_266 = arith.constant 0 : index
    %c0_267 = arith.constant 0 : index
    %187 = vector.load %arg9[%c0_266, %c0_267] : memref<256x32xf32, #tpu.memory_space<vmem>>, vector<256x32xf32>
    %c4_268 = arith.constant 4 : index
    %c1_269 = arith.constant 1 : index
    %c0_270 = arith.constant 0 : index
    %c0_271 = arith.constant 0 : index
    %188 = vector.load %arg5[%c4_268, %c1_269, %c0_270, %c0_271] : memref<5x5x8x32xf32, #tpu.memory_space<vmem>>, vector<1x1x8x32xf32>
    %189 = vector.shape_cast %188 : vector<1x1x8x32xf32> to vector<8x32xf32>
    %cst_272 = arith.constant dense<0.000000e+00> : vector<256x32xf32>
    %190 = tpu.matmul %186, %189, %cst_272 {dimension_numbers = #tpu.dot_dimension_numbers<[1], [0], [0], [1], [0, 0, 1, 1], [], []>} : vector<256x8xf32>, vector<8x32xf32>, vector<256x32xf32> -> vector<256x32xf32>
    %191 = arith.addf %187, %190 : vector<256x32xf32>
    %c0_273 = arith.constant 0 : index
    %c0_274 = arith.constant 0 : index
    %192 = vector.load %arg9[%c0_273, %c0_274] : memref<256x32xf32, #tpu.memory_space<vmem>>, vector<256x32xf32>
    tpu.vector_store %arg9[%c0_273, %c0_274], %191 {strides = array<i32>} : memref<256x32xf32, #tpu.memory_space<vmem>>, vector<256x32xf32>,
    %c4_275 = arith.constant 4 : index
    %c8_276 = arith.constant 8 : index
    %c0_277 = arith.constant 0 : index
    %193 = vector.load %arg10[%c4_275, %c8_276, %c0_277] : memref<20x26x8xf32, #tpu.memory_space<vmem>>, vector<16x16x8xf32>
    %194 = vector.shape_cast %193 : vector<16x16x8xf32> to vector<256x8xf32>
    %c0_278 = arith.constant 0 : index
    %c0_279 = arith.constant 0 : index
    %195 = vector.load %arg9[%c0_278, %c0_279] : memref<256x32xf32, #tpu.memory_space<vmem>>, vector<256x32xf32>
    %c4_280 = arith.constant 4 : index
    %c2_281 = arith.constant 2 : index
    %c0_282 = arith.constant 0 : index
    %c0_283 = arith.constant 0 : index
    %196 = vector.load %arg5[%c4_280, %c2_281, %c0_282, %c0_283] : memref<5x5x8x32xf32, #tpu.memory_space<vmem>>, vector<1x1x8x32xf32>
    %197 = vector.shape_cast %196 : vector<1x1x8x32xf32> to vector<8x32xf32>
    %cst_284 = arith.constant dense<0.000000e+00> : vector<256x32xf32>
    %198 = tpu.matmul %194, %197, %cst_284 {dimension_numbers = #tpu.dot_dimension_numbers<[1], [0], [0], [1], [0, 0, 1, 1], [], []>} : vector<256x8xf32>, vector<8x32xf32>, vector<256x32xf32> -> vector<256x32xf32>
    %199 = arith.addf %195, %198 : vector<256x32xf32>
    %c0_285 = arith.constant 0 : index
    %c0_286 = arith.constant 0 : index
    %200 = vector.load %arg9[%c0_285, %c0_286] : memref<256x32xf32, #tpu.memory_space<vmem>>, vector<256x32xf32>
    tpu.vector_store %arg9[%c0_285, %c0_286], %199 {strides = array<i32>} : memref<256x32xf32, #tpu.memory_space<vmem>>, vector<256x32xf32>,
    %c4_287 = arith.constant 4 : index
    %c9_288 = arith.constant 9 : index
    %c0_289 = arith.constant 0 : index
    %201 = vector.load %arg10[%c4_287, %c9_288, %c0_289] : memref<20x26x8xf32, #tpu.memory_space<vmem>>, vector<16x16x8xf32>
    %202 = vector.shape_cast %201 : vector<16x16x8xf32> to vector<256x8xf32>
    %c0_290 = arith.constant 0 : index
    %c0_291 = arith.constant 0 : index
    %203 = vector.load %arg9[%c0_290, %c0_291] : memref<256x32xf32, #tpu.memory_space<vmem>>, vector<256x32xf32>
    %c4_292 = arith.constant 4 : index
    %c3_293 = arith.constant 3 : index
    %c0_294 = arith.constant 0 : index
    %c0_295 = arith.constant 0 : index
    %204 = vector.load %arg5[%c4_292, %c3_293, %c0_294, %c0_295] : memref<5x5x8x32xf32, #tpu.memory_space<vmem>>, vector<1x1x8x32xf32>
    %205 = vector.shape_cast %204 : vector<1x1x8x32xf32> to vector<8x32xf32>
    %cst_296 = arith.constant dense<0.000000e+00> : vector<256x32xf32>
    %206 = tpu.matmul %202, %205, %cst_296 {dimension_numbers = #tpu.dot_dimension_numbers<[1], [0], [0], [1], [0, 0, 1, 1], [], []>} : vector<256x8xf32>, vector<8x32xf32>, vector<256x32xf32> -> vector<256x32xf32>
    %207 = arith.addf %203, %206 : vector<256x32xf32>
    %c0_297 = arith.constant 0 : index
    %c0_298 = arith.constant 0 : index
    %208 = vector.load %arg9[%c0_297, %c0_298] : memref<256x32xf32, #tpu.memory_space<vmem>>, vector<256x32xf32>
    tpu.vector_store %arg9[%c0_297, %c0_298], %207 {strides = array<i32>} : memref<256x32xf32, #tpu.memory_space<vmem>>, vector<256x32xf32>,
    %c4_299 = arith.constant 4 : index
    %c10_300 = arith.constant 10 : index
    %c0_301 = arith.constant 0 : index
    %209 = vector.load %arg10[%c4_299, %c10_300, %c0_301] : memref<20x26x8xf32, #tpu.memory_space<vmem>>, vector<16x16x8xf32>
    %210 = vector.shape_cast %209 : vector<16x16x8xf32> to vector<256x8xf32>
    %c0_302 = arith.constant 0 : index
    %c0_303 = arith.constant 0 : index
    %211 = vector.load %arg9[%c0_302, %c0_303] : memref<256x32xf32, #tpu.memory_space<vmem>>, vector<256x32xf32>
    %c4_304 = arith.constant 4 : index
    %c4_305 = arith.constant 4 : index
    %c0_306 = arith.constant 0 : index
    %c0_307 = arith.constant 0 : index
    %212 = vector.load %arg5[%c4_304, %c4_305, %c0_306, %c0_307] : memref<5x5x8x32xf32, #tpu.memory_space<vmem>>, vector<1x1x8x32xf32>
    %213 = vector.shape_cast %212 : vector<1x1x8x32xf32> to vector<8x32xf32>
    %cst_308 = arith.constant dense<0.000000e+00> : vector<256x32xf32>
    %214 = tpu.matmul %210, %213, %cst_308 {dimension_numbers = #tpu.dot_dimension_numbers<[1], [0], [0], [1], [0, 0, 1, 1], [], []>} : vector<256x8xf32>, vector<8x32xf32>, vector<256x32xf32> -> vector<256x32xf32>
    %215 = arith.addf %211, %214 : vector<256x32xf32>
    %c0_309 = arith.constant 0 : index
    %c0_310 = arith.constant 0 : index
    %216 = vector.load %arg9[%c0_309, %c0_310] : memref<256x32xf32, #tpu.memory_space<vmem>>, vector<256x32xf32>
    tpu.vector_store %arg9[%c0_309, %c0_310], %215 {strides = array<i32>} : memref<256x32xf32, #tpu.memory_space<vmem>>, vector<256x32xf32>,
    %cst_311 = arith.constant 0xFF800000 : f32
    %217 = vector.broadcast %cst_311 : f32 to vector<18x25x8xf32>
    %c0_312 = arith.constant 0 : index
    %c0_313 = arith.constant 0 : index
    %c0_314 = arith.constant 0 : index
    %218 = vector.load %arg11[%c0_312, %c0_313, %c0_314] : memref<18x25x8xf32, #tpu.memory_space<vmem>>, vector<18x25x8xf32>
    tpu.vector_store %arg11[%c0_312, %c0_313, %c0_314], %217 {strides = array<i32>} : memref<18x25x8xf32, #tpu.memory_space<vmem>>, vector<18x25x8xf32>,
    %c1_315 = arith.constant 1 : index
    %c8_316 = arith.constant 8 : index
    %c0_317 = arith.constant 0 : index
    %219 = vector.load %arg11[%c1_315, %c8_316, %c0_317] : memref<18x25x8xf32, #tpu.memory_space<vmem>>, vector<16x16x8xf32>
    tpu.vector_store %arg11[%c1_315, %c8_316, %c0_317], %1 {strides = array<i32>} : memref<18x25x8xf32, #tpu.memory_space<vmem>>, vector<16x16x8xf32>,
    %c0_318 = arith.constant 0 : index
    %c7_319 = arith.constant 7 : index
    %c0_320 = arith.constant 0 : index
    %220 = vector.load %arg11[%c0_318, %c7_319, %c0_320] : memref<18x25x8xf32, #tpu.memory_space<vmem>>, vector<16x16x8xf32>
    %c0_321 = arith.constant 0 : index
    %c8_322 = arith.constant 8 : index
    %c0_323 = arith.constant 0 : index
    %221 = vector.load %arg11[%c0_321, %c8_322, %c0_323] : memref<18x25x8xf32, #tpu.memory_space<vmem>>, vector<16x16x8xf32>
    %222 = arith.maximumf %220, %221 : vector<16x16x8xf32>
    %c0_324 = arith.constant 0 : index
    %c9_325 = arith.constant 9 : index
    %c0_326 = arith.constant 0 : index
    %223 = vector.load %arg11[%c0_324, %c9_325, %c0_326] : memref<18x25x8xf32, #tpu.memory_space<vmem>>, vector<16x16x8xf32>
    %224 = arith.maximumf %222, %223 : vector<16x16x8xf32>
    %c1_327 = arith.constant 1 : index
    %c7_328 = arith.constant 7 : index
    %c0_329 = arith.constant 0 : index
    %225 = vector.load %arg11[%c1_327, %c7_328, %c0_329] : memref<18x25x8xf32, #tpu.memory_space<vmem>>, vector<16x16x8xf32>
    %226 = arith.maximumf %224, %225 : vector<16x16x8xf32>
    %c1_330 = arith.constant 1 : index
    %c8_331 = arith.constant 8 : index
    %c0_332 = arith.constant 0 : index
    %227 = vector.load %arg11[%c1_330, %c8_331, %c0_332] : memref<18x25x8xf32, #tpu.memory_space<vmem>>, vector<16x16x8xf32>
    %228 = arith.maximumf %226, %227 : vector<16x16x8xf32>
    %c1_333 = arith.constant 1 : index
    %c9_334 = arith.constant 9 : index
    %c0_335 = arith.constant 0 : index
    %229 = vector.load %arg11[%c1_333, %c9_334, %c0_335] : memref<18x25x8xf32, #tpu.memory_space<vmem>>, vector<16x16x8xf32>
    %230 = arith.maximumf %228, %229 : vector<16x16x8xf32>
    %c2_336 = arith.constant 2 : index
    %c7_337 = arith.constant 7 : index
    %c0_338 = arith.constant 0 : index
    %231 = vector.load %arg11[%c2_336, %c7_337, %c0_338] : memref<18x25x8xf32, #tpu.memory_space<vmem>>, vector<16x16x8xf32>
    %232 = arith.maximumf %230, %231 : vector<16x16x8xf32>
    %c2_339 = arith.constant 2 : index
    %c8_340 = arith.constant 8 : index
    %c0_341 = arith.constant 0 : index
    %233 = vector.load %arg11[%c2_339, %c8_340, %c0_341] : memref<18x25x8xf32, #tpu.memory_space<vmem>>, vector<16x16x8xf32>
    %234 = arith.maximumf %232, %233 : vector<16x16x8xf32>
    %c2_342 = arith.constant 2 : index
    %c9_343 = arith.constant 9 : index
    %c0_344 = arith.constant 0 : index
    %235 = vector.load %arg11[%c2_342, %c9_343, %c0_344] : memref<18x25x8xf32, #tpu.memory_space<vmem>>, vector<16x16x8xf32>
    %236 = arith.maximumf %234, %235 : vector<16x16x8xf32>
    %c0_345 = arith.constant 0 : index
    %c0_346 = arith.constant 0 : index
    %237 = vector.load %arg9[%c0_345, %c0_346] : memref<256x32xf32, #tpu.memory_space<vmem>>, vector<256x32xf32>
    %238 = vector.shape_cast %236 : vector<16x16x8xf32> to vector<256x8xf32>
    %c0_347 = arith.constant 0 : index
    %c0_348 = arith.constant 0 : index
    %239 = vector.load %arg6[%c0_347, %c0_348] : memref<8x32xf32, #tpu.memory_space<vmem>>, vector<8x32xf32>
    %cst_349 = arith.constant dense<0.000000e+00> : vector<256x32xf32>
    %240 = tpu.matmul %238, %239, %cst_349 {dimension_numbers = #tpu.dot_dimension_numbers<[1], [0], [0], [1], [0, 0, 1, 1], [], []>} : vector<256x8xf32>, vector<8x32xf32>, vector<256x32xf32> -> vector<256x32xf32>
    %241 = arith.addf %237, %240 : vector<256x32xf32>
    %c0_350 = arith.constant 0 : index
    %c0_351 = arith.constant 0 : index
    %242 = vector.load %arg9[%c0_350, %c0_351] : memref<256x32xf32, #tpu.memory_space<vmem>>, vector<256x32xf32>
    tpu.vector_store %arg9[%c0_350, %c0_351], %241 {strides = array<i32>} : memref<256x32xf32, #tpu.memory_space<vmem>>, vector<256x32xf32>,
    %c0_352 = arith.constant 0 : index
    %c0_353 = arith.constant 0 : index
    %243 = vector.load %arg9[%c0_352, %c0_353] : memref<256x32xf32, #tpu.memory_space<vmem>>, vector<256x32xf32>
    %c0_354 = arith.constant 0 : index
    %c0_355 = arith.constant 0 : index
    %244 = vector.load %arg7[%c0_354, %c0_355] : memref<1x32xf32, #tpu.memory_space<vmem>>, vector<1x32xf32>
    %245 = vector.broadcast %244 : vector<1x32xf32> to vector<256x32xf32>
    %246 = arith.addf %243, %245 : vector<256x32xf32>
    %247 = vector.shape_cast %246 : vector<256x32xf32> to vector<1x16x16x32xf32>
    %c0_356 = arith.constant 0 : index
    %c0_357 = arith.constant 0 : index
    %c0_358 = arith.constant 0 : index
    %c0_359 = arith.constant 0 : index
    %248 = vector.load %arg8[%c0_356, %c0_357, %c0_358, %c0_359] : memref<1x16x16x32xf32, #tpu.memory_space<vmem>>, vector<1x16x16x32xf32>
    tpu.vector_store %arg8[%c0_356, %c0_357, %c0_358, %c0_359], %247 {strides = array<i32>} : memref<1x16x16x32xf32, #tpu.memory_space<vmem>>, vector<1x16x16x32xf32>,
    return
  }
  func.func @transform_0(%arg0: i32) -> (i32, i32, i32, i32) {
    %c0_i32 = arith.constant 0 : i32
    %c0_i32_0 = arith.constant 0 : i32
    %c0_i32_1 = arith.constant 0 : i32
    %c0_i32_2 = arith.constant 0 : i32
    return %arg0, %c0_i32, %c0_i32_0, %c0_i32_1 : i32, i32, i32, i32
  }
  func.func @transform_1(%arg0: i32) -> (i32, i32) {
    %c0_i32 = arith.constant 0 : i32
    %c0_i32_0 = arith.constant 0 : i32
    %c0_i32_1 = arith.constant 0 : i32
    return %c0_i32, %c0_i32_0 : i32, i32
  }
  func.func @transform_2(%arg0: i32) -> (i32, i32) {
    %c0_i32 = arith.constant 0 : i32
    %c0_i32_0 = arith.constant 0 : i32
    %c0_i32_1 = arith.constant 0 : i32
    return %c0_i32, %c0_i32_0 : i32, i32
  }
  func.func @transform_3(%arg0: i32) -> (i32, i32) {
    %c0_i32 = arith.constant 0 : i32
    %c0_i32_0 = arith.constant 0 : i32
    %c0_i32_1 = arith.constant 0 : i32
    return %c0_i32, %c0_i32_0 : i32, i32
  }
  func.func @transform_4(%arg0: i32) -> (i32, i32, i32, i32) {
    %c0_i32 = arith.constant 0 : i32
    %c0_i32_0 = arith.constant 0 : i32
    %c0_i32_1 = arith.constant 0 : i32
    %c0_i32_2 = arith.constant 0 : i32
    %c0_i32_3 = arith.constant 0 : i32
    return %c0_i32, %c0_i32_0, %c0_i32_1, %c0_i32_2 : i32, i32, i32, i32
  }
  func.func @transform_5(%arg0: i32) -> (i32, i32) {
    %c0_i32 = arith.constant 0 : i32
    %c0_i32_0 = arith.constant 0 : i32
    %c0_i32_1 = arith.constant 0 : i32
    return %c0_i32, %c0_i32_0 : i32, i32
  }
  func.func @transform_6(%arg0: i32) -> (i32, i32) {
    %c0_i32 = arith.constant 0 : i32
    %c0_i32_0 = arith.constant 0 : i32
    %c0_i32_1 = arith.constant 0 : i32
    return %c0_i32, %c0_i32_0 : i32, i32
  }
  func.func @transform_7(%arg0: i32) -> (i32, i32, i32, i32) {
    %c0_i32 = arith.constant 0 : i32
    %c0_i32_0 = arith.constant 0 : i32
    %c0_i32_1 = arith.constant 0 : i32
    %c0_i32_2 = arith.constant 0 : i32
    return %arg0, %c0_i32, %c0_i32_0, %c0_i32_1 : i32, i32, i32, i32
  }
}

</mosaic_0001>

<bundles_post_ra>
// kernel: inception_forward.1
= control target key start
LH: loop header
LB: loop body
LE: loop exit
PB: predicated region body
PF: predicated region fallthrough
CT: control target
= control target key end

     0   :  { %12 = vsyncpa [#allocation6], 0  ;;  %s21246_s0 = inlined_call_operand.vmem [shape: f32[2,16,16,8], index: 0, kind: input, shape index: {}]   ;;  %s21247_s1 = inlined_call_operand.vmem [shape: f32[8,32], index: 1, kind: input, shape index: {}]   ;;  %s21248_s2 = inlined_call_operand.vmem [shape: f32[8,8], index: 2, kind: input, shape index: {}]   ;;  %s21249_s3 = inlined_call_operand.vmem [shape: f32[1,8], index: 3, kind: input, shape index: {}]   ;;  %s21250_s4 = inlined_call_operand.vmem [shape: f32[5,5,8,32], index: 4, kind: input, shape index: {}]   ;;  %s21251_s5 = inlined_call_operand.vmem [shape: f32[8,32], index: 5, kind: input, shape index: {}]   ;;  %s21252_s6 = inlined_call_operand.vmem [shape: f32[1,32], index: 6, kind: input, shape index: {}]   ;;  %s21253_s7 = inlined_call_operand.hbm [shape: f32[2,16,16,32], index: 7, kind: output, shape index: {}]  }
   0x1   :  { %14 = vsyncpa [#allocation6 + $0x1], 0  ;;  %s16983_s24 = smov 0   ;;  %s16985_s25 = smov 0  }
   0x2   :  { %s16987_s26 = smov 0   ;;  %s16989_s27 = smov 0  }
   0x3 LB: > { %s17004_s28 = sadd.s32 4294967295, %s16936_s27   ;;  %s13569_s29 = sadd.s32 4294967294, %s16936_s27   ;;  %s16936_s27 = sphi %s16989_s27, %s21268_s27   ;;  %s16932_s26 = sphi %s16987_s26, %s21267_s26   ;;  %s16928_s25 = sphi %s16985_s25, %s21266_s25   ;;  %s16924_s24 = sphi %s16983_s24, %s21265_s24  }
   0x4   : > { %s17008_s30 = sadd.s32 1, %s16936_s27   ;;  %s179_s8 = sadd.s32 1, %s16932_s26 }
   0x5   : > { %s176_s9 = ssub.s32 %s16936_s27, %s17008_s30  ;;  %p189_p0 = scmp.ne.s32.totalorder %s16932_s26, %s16928_s25 }
   0x6   : > { %p177_p1 = scmp.eq.s32.totalorder %s176_s9, 0  ;;  %p190_p2 = scmp.eq.s32.totalorder %s17004_s28, 1 }
   0x7   : > { %p195_p3 = scmp.ne.s32.totalorder %s16928_s25, %s16924_s24  ;;  %p196_p4 = scmp.eq.s32.totalorder %s13569_s29, 1 }
   0x8   : > { %s17019_s10 = scalar_select %p177_p1, %s16932_s26, %s179_s8  }
   0x9   : > { %p17021_p5 = por %p190_p2, %p189_p0  ;;  %p17025_p6 = por %p196_p4, %p195_p3 }
   0xa   : > { %p13572_p7 = scmp.ge.s32.totalorder %s16936_s27, 1  ;;  %p240_p8 = scmp.lt.s32.totalorder %s16936_s27, 3 }
   0xc   : > { %p241_p9 = pnand %p13572_p7, %p240_p8 }
   0xe   : > { %244 = sbr.rel (%p241_p9) target bundleno = 1341 (0x53d), region = 48 }
  0x15   : > { %v17034_v0 = vld [vmem:[%s21248_s2] sm:$0xff]  ;;  %p272_p10 = scmp.lt.s32.totalorder %s17004_s28, 1  ;;  %vm310_vm0 = vcmask 64512   ;;  %vm12324_vm1 = vcmask 57344   ;;  %v16938_v2 = vmov -inf   ;;  %v17196_v4 = vld [vmem:[%s21250_s4 + $0x8] sm:$0xff] }
  0x16   : > { %v17040_v1 = vld [vmem:[%s21247_s1] sm:$0xff]  ;;  %15479 = vmatprep.subr.mxu1 %v17034_v0  ;;  %12327 = vst.msk [vmem:[#allocation4 + $0x28] sm:$0xff] %vm310_vm0, %v16938_v2  ;;  %12321 = vst.msk [vmem:[#allocation4] sm:$0xff] %vm310_vm0, %v16938_v2  ;;  %v16939_v5 = vmov 0.0   ;;  %vm933_vm2 = vcmask 58368   ;;  %v13706_v46 = vld [vmem:[%s21250_s4 + $0x10] sm:$0xff] }
  0x17   : > { %12322 = vst.msk [vmem:[#allocation4 + $0x8] sm:$0xff] %vm310_vm0, %v16938_v2  ;;  %12323 = vst.msk [vmem:[#allocation4 + $0x10] sm:$0xff] %vm310_vm0, %v16938_v2  ;;  %15429 = vmatprep.subr.mxu0 %v17040_v1  ;;  %v17191_v3 = vld [vmem:[%s21250_s4] sm:$0xff]  ;;  %15480 = vmatpush3.msra.mxu1 %v17034_v0  ;;  %s17202_s21 = scalar_select %p272_p10, %s17004_s28, 1  ;;  %v13739_v47 = vld [vmem:[%s21250_s4 + $0x18] sm:$0xff]  ;;  %vm632_vm3 = vcmask 261120  }
  0x18   : > { %12326 = vst.msk [vmem:[#allocation4 + $0x20] sm:$0xff] %vm310_vm0, %v16938_v2  ;;  %12328 = vst.msk [vmem:[#allocation4 + $0x30] sm:$0xff] %vm310_vm0, %v16938_v2  ;;  %15430 = vmatpush3.msra.mxu0 %v17040_v1  ;;  %15579 = vmatprep.subr.mxu1 %v17196_v4  ;;  %v17535_v48 = vld [vmem:[%s21250_s4 + $0x20] sm:$0xff]  ;;  %v17541_v49 = vld [vmem:[%s21250_s4 + $0x28] sm:$0xff]  ;;  %s269_s20 = sand.u32 1, %s16928_s25   ;;  %s16940_s17 = smov [#allocation5]  }
  0x19   : > { %12330 = vst.msk [vmem:[#allocation4 + $0x40] sm:$0xff] %vm310_vm0, %v16938_v2  ;;  %12331 = vst.msk [vmem:[#allocation4 + $0x48] sm:$0xff] %vm310_vm0, %v16938_v2  ;;  %15529 = vmatprep.subr.mxu0 %v17191_v3  ;;  %s14503_s22 = sshll.u32 %s17202_s21, 8  ;;  %v17547_v50 = vld [vmem:[%s21249_s3] ss:$0 sm:$0xff]  ;;  %s13573_s21 = sshll.u32 %s269_s20, 8 }
  0x1a   : > { %12332 = vst.msk [vmem:[#allocation4 + $0x50] sm:$0xff] %vm310_vm0, %v16938_v2  ;;  %12334 = vst.msk [vmem:[#allocation4 + $0x60] sm:$0xff] %vm310_vm0, %v16938_v2  ;;  %s17331_s8 = scalar_lea.vmem %s21246_s0, %s14503_s22  ;;  %s21050_s29 = scalar_lea.vmem [#allocation5], %s13573_s21 }
  0x1b   : > { %12335 = vst.msk [vmem:[#allocation4 + $0x68] sm:$0xff] %vm310_vm0, %v16938_v2  ;;  %12336 = vst.msk [vmem:[#allocation4 + $0x70] sm:$0xff] %vm310_vm0, %v16938_v2  ;;  %v277_v6 = vld [vmem:[%s17331_s8] sm:$0xff]  ;;  %v278_v7 = vld [vmem:[%s17331_s8 + $0x8] sm:$0xff]  ;;  %s13507_s9 = sshll.u32 %s21050_s29, 4  ;;  %s16878_s18 = sshll.u32 %s16940_s17, 4  ;;  %s21196_s9 = int_to_ptr.vmem [resolvable:$true] %s13507_s9  ;;  %s16879_s18 = int_to_ptr.vmem [resolvable:$false] %s16878_s18 }
  0x1c   : > { %12338 = vst.msk [vmem:[#allocation4 + $0x80] sm:$0xff] %vm310_vm0, %v16938_v2  ;;  %12339 = vst.msk [vmem:[#allocation4 + $0x88] sm:$0xff] %vm310_vm0, %v16938_v2  ;;  %v279_v8 = vld [vmem:[%s17331_s8 + $0x10] sm:$0xff]  ;;  %15481 = vmatprep.mubr.msk.f32.mxu1 %vm310_vm0, %v277_v6  ;;  %v280_v9 = vld [vmem:[%s17331_s8 + $0x18] sm:$0xff]  ;;  %15431 = vmatprep.mubr.msk.f32.mxu0 %vm310_vm0, %v277_v6  ;;  %s16874_s16 = scalar_lea.vmem %s21196_s9, 4096  ;;  %s16880_s19 = scalar_lea.vmem %s16879_s18, 8192 }
  0x1d   : > { %12340 = vst.msk [vmem:[#allocation4 + $0x90] sm:$0xff] %vm310_vm0, %v16938_v2  ;;  %12342 = vst.msk [vmem:[#allocation4 + $0xa0] sm:$0xff] %vm310_vm0, %v16938_v2  ;;  %v281_v10 = vld [vmem:[%s17331_s8 + $0x20] sm:$0xff]  ;;  %v282_v11 = vld [vmem:[%s17331_s8 + $0x28] sm:$0xff]  ;;  %15482 = vmatmul.mubr.msk.f32.vlgmr.msra.gmra.mrb[0].mxu1 %vm310_vm0, %v278_v7  ;;  %15432 = vmatmul.mubr.msk.f32.vlgmr.msra.gmra.mrb[0].mxu0 %vm310_vm0, %v278_v7  ;;  %p16875_p11 = scmp.ne.s32.totalorder %s21196_s9, %s16874_s16  ;;  %p16881_p0 = scmp.lt.s32.totalorder %s21196_s9, %s16879_s18 }
  0x1e   : > { %12343 = vst.msk [vmem:[#allocation4 + $0xa8] sm:$0xff] %vm310_vm0, %v16938_v2  ;;  %12344 = vst.msk [vmem:[#allocation4 + $0xb0] sm:$0xff] %vm310_vm0, %v16938_v2  ;;  %15484 = vmatprep.mubr.msk.f32.mxu1 %vm310_vm0, %v279_v8  ;;  %v283_v12 = vld [vmem:[%s17331_s8 + $0x30] sm:$0xff]  ;;  %v17352_v13 = vld [vmem:[%s17331_s8 + $0x38] sm:$0xff]  ;;  %15434 = vmatprep.mubr.msk.f32.mxu0 %vm310_vm0, %v279_v8  ;;  %p16882_p1 = scmp.lt.s32.totalorder %s16880_s19, %s16874_s16 }
  0x1f   : > { %12346 = vst.msk [vmem:[#allocation4 + $0xc0] sm:$0xff] %vm310_vm0, %v16938_v2  ;;  %12347 = vst.msk [vmem:[#allocation4 + $0xc8] sm:$0xff] %vm310_vm0, %v16938_v2  ;;  %v17355_v14 = vld [vmem:[%s17331_s8 + $0x40] sm:$0xff]  ;;  %v286_v15 = vld [vmem:[%s17331_s8 + $0x48] sm:$0xff]  ;;  %15530 = vmatpush3.msra.mxu0 %v17191_v3  ;;  %15580 = vmatpush3.msra.mxu1 %v17196_v4  ;;  %p16876_p12 = pnand %p16875_p11, %p17021_p5 }
  0x20   : > { %12348 = vst.msk [vmem:[#allocation4 + $0xd0] sm:$0xff] %vm310_vm0, %v16938_v2  ;;  %12350 = vst.msk [vmem:[#allocation4 + $0xe0] sm:$0xff] %vm310_vm0, %v16938_v2  ;;  %v287_v16 = vld [vmem:[%s17331_s8 + $0x50] sm:$0xff]  ;;  %v17366_v17 = vld [vmem:[%s17331_s8 + $0x58] sm:$0xff]  ;;  %15629 = vmatprep.subr.mxu0 %v13706_v46  ;;  %15679 = vmatprep.subr.mxu1 %v13739_v47  ;;  %p16883_p2 = por %p16882_p1, %p16881_p0 }
  0x21   : > { %12351 = vst.msk [vmem:[#allocation4 + $0xe8] sm:$0xff] %vm310_vm0, %v16938_v2  ;;  %12352 = vst.msk [vmem:[#allocation4 + $0xf0] sm:$0xff] %vm310_vm0, %v16938_v2  ;;  %v289_v18 = vld [vmem:[%s17331_s8 + $0x60] sm:$0xff]  ;;  %v290_v19 = vld [vmem:[%s17331_s8 + $0x68] sm:$0xff]  ;;  %15485 = vmatmul.mubr.msk.f32.gmra.mrb[2].mxu1 %vm310_vm0, %v280_v9  ;;  %15435 = vmatmul.mubr.msk.f32.gmra.mrb[2].mxu0 %vm310_vm0, %v280_v9  ;;  %p16877_p13 = pneg %p16876_p12 }
  0x22   : > { %12354 = vst.msk [vmem:[#allocation4 + $0x100] sm:$0xff] %vm310_vm0, %v16938_v2  ;;  %12355 = vst.msk [vmem:[#allocation4 + $0x108] sm:$0xff] %vm310_vm0, %v16938_v2  ;;  %v291_v20 = vld [vmem:[%s17331_s8 + $0x70] sm:$0xff]  ;;  %v292_v21 = vld [vmem:[%s17331_s8 + $0x78] sm:$0xff]  ;;  %15487 = vmatprep.mubr.msk.f32.mxu1 %vm310_vm0, %v281_v10  ;;  %15437 = vmatprep.mubr.msk.f32.mxu0 %vm310_vm0, %v281_v10 }
  0x23   : > { %12356 = vst.msk [vmem:[#allocation4 + $0x110] sm:$0xff] %vm310_vm0, %v16938_v2  ;;  %12358 = vst.msk [vmem:[#allocation4 + $0x120] sm:$0xff] %vm310_vm0, %v16938_v2  ;;  %v293_v22 = vld [vmem:[%s17331_s8 + $0x80] sm:$0xff]  ;;  %v294_v23 = vld [vmem:[%s17331_s8 + $0x88] sm:$0xff]  ;;  %p16884_p3 = pnand %p16883_p2, %p16877_p13 }
  0x24   : > { %12359 = vst.msk [vmem:[#allocation4 + $0x128] sm:$0xff] %vm310_vm0, %v16938_v2  ;;  %12360 = vst.msk [vmem:[#allocation4 + $0x130] sm:$0xff] %vm310_vm0, %v16938_v2  ;;  %v295_v24 = vld [vmem:[%s17331_s8 + $0x90] sm:$0xff]  ;;  %v296_v25 = vld [vmem:[%s17331_s8 + $0x98] sm:$0xff] }
  0x25   : > { %12362 = vst.msk [vmem:[#allocation4 + $0x140] sm:$0xff] %vm310_vm0, %v16938_v2  ;;  %12363 = vst.msk [vmem:[#allocation4 + $0x148] sm:$0xff] %vm310_vm0, %v16938_v2  ;;  %v297_v26 = vld [vmem:[%s17331_s8 + $0xa0] sm:$0xff]  ;;  %v298_v27 = vld [vmem:[%s17331_s8 + $0xa8] sm:$0xff]  ;;  %15488 = vmatmul.mubr.msk.f32.gmra.mrb[4].mxu1 %vm310_vm0, %v282_v11  ;;  %15438 = vmatmul.mubr.msk.f32.gmra.mrb[4].mxu0 %vm310_vm0, %v282_v11 }
  0x26   : > { %12364 = vst.msk [vmem:[#allocation4 + $0x150] sm:$0xff] %vm310_vm0, %v16938_v2  ;;  %12366 = vst.msk [vmem:[#allocation4 + $0x160] sm:$0xff] %vm310_vm0, %v16938_v2  ;;  %v299_v28 = vld [vmem:[%s17331_s8 + $0xb0] sm:$0xff]  ;;  %v300_v29 = vld [vmem:[%s17331_s8 + $0xb8] sm:$0xff]  ;;  %15490 = vmatprep.mubr.msk.f32.mxu1 %vm310_vm0, %v283_v12  ;;  %15440 = vmatprep.mubr.msk.f32.mxu0 %vm310_vm0, %v283_v12 }
  0x27   : > { %12367 = vst.msk [vmem:[#allocation4 + $0x168] sm:$0xff] %vm310_vm0, %v16938_v2  ;;  %12368 = vst.msk [vmem:[#allocation4 + $0x170] sm:$0xff] %vm310_vm0, %v16938_v2  ;;  %v301_v30 = vld [vmem:[%s17331_s8 + $0xc0] sm:$0xff]  ;;  %v302_v31 = vld [vmem:[%s17331_s8 + $0xc8] sm:$0xff] }
  0x28   : > { %12370 = vst.msk [vmem:[#allocation4 + $0x180] sm:$0xff] %vm310_vm0, %v16938_v2  ;;  %12371 = vst.msk [vmem:[#allocation4 + $0x188] sm:$0xff] %vm310_vm0, %v16938_v2  ;;  %v303_v32 = vld [vmem:[%s17331_s8 + $0xd0] sm:$0xff]  ;;  %v304_v33 = vld [vmem:[%s17331_s8 + $0xd8] sm:$0xff] }
  0x29   : > { %12372 = vst.msk [vmem:[#allocation4 + $0x190] sm:$0xff] %vm310_vm0, %v16938_v2  ;;  %12374 = vst.msk [vmem:[#allocation4 + $0x1a0] sm:$0xff] %vm310_vm0, %v16938_v2  ;;  %v305_v34 = vld [vmem:[%s17331_s8 + $0xe0] sm:$0xff]  ;;  %v306_v35 = vld [vmem:[%s17331_s8 + $0xe8] sm:$0xff]  ;;  %15491 = vmatmul.mubr.msk.f32.gmra.mrb[6].mxu1 %vm310_vm0, %v17352_v13  ;;  %15441 = vmatmul.mubr.msk.f32.gmra.mrb[6].mxu0 %vm310_vm0, %v17352_v13 }
  0x2a   : > { %12375 = vst.msk [vmem:[#allocation4 + $0x1a8] sm:$0xff] %vm310_vm0, %v16938_v2  ;;  %12376 = vst.msk [vmem:[#allocation4 + $0x1b0] sm:$0xff] %vm310_vm0, %v16938_v2  ;;  %v307_v36 = vld [vmem:[%s17331_s8 + $0xf0] sm:$0xff]  ;;  %v308_v37 = vld [vmem:[%s17331_s8 + $0xf8] sm:$0xff]  ;;  %15493 = vmatprep.mubr.msk.f32.mxu1 %vm310_vm0, %v17355_v14  ;;  %15443 = vmatprep.mubr.msk.f32.mxu0 %vm310_vm0, %v17355_v14  ;;  %s14504_s8 = sshll.u32 %s17004_s28, 12  ;;  %s21205_s28 = scalar_lea.sflag [#allocation6], %s269_s20 }
  0x2b   : > { %12378 = vst.msk [vmem:[#allocation4 + $0x1c0] sm:$0xff] %vm310_vm0, %v16938_v2  ;;  %12379 = vst.msk [vmem:[#allocation4 + $0x1c8] sm:$0xff] %vm310_vm0, %v16938_v2  ;;  %s21194_s15 = scalar_lea.hbm %s21253_s7, %s14504_s8 }
  0x2c   : > { %12380 = vst.msk [vmem:[#allocation4 + $0x1d0] sm:$0xff] %vm310_vm0, %v16938_v2  ;;  %12382 = vst.msk [vmem:[#allocation4 + $0x1e0] sm:$0xff] %vm310_vm0, %v16938_v2 }
  0x2d   : > { %12383 = vst.msk [vmem:[#allocation4 + $0x1e8] sm:$0xff] %vm310_vm0, %v16938_v2  ;;  %12384 = vst.msk [vmem:[#allocation4 + $0x1f0] sm:$0xff] %vm310_vm0, %v16938_v2  ;;  %15494 = vmatmul.mubr.msk.f32.gmra.mrb[8].mxu1 %vm310_vm0, %v286_v15  ;;  %15444 = vmatmul.mubr.msk.f32.gmra.mrb[8].mxu0 %vm310_vm0, %v286_v15 }
  0x2e   : > { %12386 = vst.msk [vmem:[#allocation4 + $0x200] sm:$0xff] %vm310_vm0, %v16938_v2  ;;  %12387 = vst.msk [vmem:[#allocation4 + $0x208] sm:$0xff] %vm310_vm0, %v16938_v2  ;;  %15496 = vmatprep.mubr.msk.f32.mxu1 %vm310_vm0, %v287_v16  ;;  %15446 = vmatprep.mubr.msk.f32.mxu0 %vm310_vm0, %v287_v16 }
  0x2f   : > { %12388 = vst.msk [vmem:[#allocation4 + $0x210] sm:$0xff] %vm310_vm0, %v16938_v2  ;;  %12390 = vst.msk [vmem:[#allocation4 + $0x220] sm:$0xff] %vm310_vm0, %v16938_v2 }
  0x30   : > { %12391 = vst.msk [vmem:[#allocation4 + $0x228] sm:$0xff] %vm310_vm0, %v16938_v2  ;;  %12392 = vst.msk [vmem:[#allocation4 + $0x230] sm:$0xff] %vm310_vm0, %v16938_v2 }
  0x31   : > { %12325 = vst.msk [vmem:[#allocation4 + $0x18] sm:$0x1] %vm12324_vm1, %v16938_v2  ;;  %12329 = vst.msk [vmem:[#allocation4 + $0x38] sm:$0x1] %vm12324_vm1, %v16938_v2  ;;  %15497 = vmatmul.mubr.msk.f32.gmra.mrb[10].mxu1 %vm310_vm0, %v17366_v17  ;;  %15447 = vmatmul.mubr.msk.f32.gmra.mrb[10].mxu0 %vm310_vm0, %v17366_v17 }
  0x32   : > { %12333 = vst.msk [vmem:[#allocation4 + $0x58] sm:$0x1] %vm12324_vm1, %v16938_v2  ;;  %12337 = vst.msk [vmem:[#allocation4 + $0x78] sm:$0x1] %vm12324_vm1, %v16938_v2  ;;  %15499 = vmatprep.mubr.msk.f32.mxu1 %vm310_vm0, %v289_v18  ;;  %15449 = vmatprep.mubr.msk.f32.mxu0 %vm310_vm0, %v289_v18 }
  0x33   : > { %12341 = vst.msk [vmem:[#allocation4 + $0x98] sm:$0x1] %vm12324_vm1, %v16938_v2  ;;  %12345 = vst.msk [vmem:[#allocation4 + $0xb8] sm:$0x1] %vm12324_vm1, %v16938_v2 }
  0x34   : > { %12349 = vst.msk [vmem:[#allocation4 + $0xd8] sm:$0x1] %vm12324_vm1, %v16938_v2  ;;  %12353 = vst.msk [vmem:[#allocation4 + $0xf8] sm:$0x1] %vm12324_vm1, %v16938_v2 }
  0x35   : > { %12357 = vst.msk [vmem:[#allocation4 + $0x118] sm:$0x1] %vm12324_vm1, %v16938_v2  ;;  %12361 = vst.msk [vmem:[#allocation4 + $0x138] sm:$0x1] %vm12324_vm1, %v16938_v2  ;;  %15500 = vmatmul.mubr.msk.f32.gmra.mrb[12].mxu1 %vm310_vm0, %v290_v19  ;;  %15450 = vmatmul.mubr.msk.f32.gmra.mrb[12].mxu0 %vm310_vm0, %v290_v19 }
  0x36   : > { %12365 = vst.msk [vmem:[#allocation4 + $0x158] sm:$0x1] %vm12324_vm1, %v16938_v2  ;;  %12369 = vst.msk [vmem:[#allocation4 + $0x178] sm:$0x1] %vm12324_vm1, %v16938_v2  ;;  %15502 = vmatprep.mubr.msk.f32.mxu1 %vm310_vm0, %v291_v20  ;;  %15452 = vmatprep.mubr.msk.f32.mxu0 %vm310_vm0, %v291_v20 }
  0x37   : > { %12373 = vst.msk [vmem:[#allocation4 + $0x198] sm:$0x1] %vm12324_vm1, %v16938_v2  ;;  %12377 = vst.msk [vmem:[#allocation4 + $0x1b8] sm:$0x1] %vm12324_vm1, %v16938_v2 }
  0x38   : > { %12381 = vst.msk [vmem:[#allocation4 + $0x1d8] sm:$0x1] %vm12324_vm1, %v16938_v2  ;;  %12385 = vst.msk [vmem:[#allocation4 + $0x1f8] sm:$0x1] %vm12324_vm1, %v16938_v2 }
  0x39   : > { %12389 = vst.msk [vmem:[#allocation4 + $0x218] sm:$0x1] %vm12324_vm1, %v16938_v2  ;;  %12393 = vst.msk [vmem:[#allocation4 + $0x238] sm:$0x1] %vm12324_vm1, %v16938_v2  ;;  %15503 = vmatmul.mubr.msk.f32.gmra.mrb[14].mxu1 %vm310_vm0, %v292_v21  ;;  %15453 = vmatmul.mubr.msk.f32.gmra.mrb[14].mxu0 %vm310_vm0, %v292_v21 }
  0x3a   : > { %930 = vst.msk [vmem:[#allocation3] sm:$0xff] %vm310_vm0, %v16939_v5  ;;  %931 = vst.msk [vmem:[#allocation3 + $0x8] sm:$0xff] %vm310_vm0, %v16939_v5  ;;  %15505 = vmatprep.mubr.msk.f32.mxu1 %vm310_vm0, %v293_v22  ;;  %15455 = vmatprep.mubr.msk.f32.mxu0 %vm310_vm0, %v293_v22 }
  0x3b   : > { %932 = vst.msk [vmem:[#allocation3 + $0x10] sm:$0xff] %vm310_vm0, %v16939_v5  ;;  %935 = vst.msk [vmem:[#allocation3 + $0x20] sm:$0xff] %vm310_vm0, %v16939_v5 }
  0x3c   : > { %936 = vst.msk [vmem:[#allocation3 + $0x28] sm:$0xff] %vm310_vm0, %v16939_v5  ;;  %937 = vst.msk [vmem:[#allocation3 + $0x30] sm:$0xff] %vm310_vm0, %v16939_v5 }
  0x3d   : > { %939 = vst.msk [vmem:[#allocation3 + $0x40] sm:$0xff] %vm310_vm0, %v16939_v5  ;;  %940 = vst.msk [vmem:[#allocation3 + $0x48] sm:$0xff] %vm310_vm0, %v16939_v5  ;;  %15506 = vmatmul.mubr.msk.f32.gmra.mrb[16].mxu1 %vm310_vm0, %v294_v23  ;;  %15456 = vmatmul.mubr.msk.f32.gmra.mrb[16].mxu0 %vm310_vm0, %v294_v23 }
  0x3e   : > { %941 = vst.msk [vmem:[#allocation3 + $0x50] sm:$0xff] %vm310_vm0, %v16939_v5  ;;  %943 = vst.msk [vmem:[#allocation3 + $0x60] sm:$0xff] %vm310_vm0, %v16939_v5  ;;  %15508 = vmatprep.mubr.msk.f32.mxu1 %vm310_vm0, %v295_v24  ;;  %15458 = vmatprep.mubr.msk.f32.mxu0 %vm310_vm0, %v295_v24 }
  0x3f   : > { %944 = vst.msk [vmem:[#allocation3 + $0x68] sm:$0xff] %vm310_vm0, %v16939_v5  ;;  %945 = vst.msk [vmem:[#allocation3 + $0x70] sm:$0xff] %vm310_vm0, %v16939_v5 }
  0x40   : > { %947 = vst.msk [vmem:[#allocation3 + $0x80] sm:$0xff] %vm310_vm0, %v16939_v5  ;;  %948 = vst.msk [vmem:[#allocation3 + $0x88] sm:$0xff] %vm310_vm0, %v16939_v5 }
  0x41   : > { %949 = vst.msk [vmem:[#allocation3 + $0x90] sm:$0xff] %vm310_vm0, %v16939_v5  ;;  %951 = vst.msk [vmem:[#allocation3 + $0xa0] sm:$0xff] %vm310_vm0, %v16939_v5  ;;  %15509 = vmatmul.mubr.msk.f32.gmra.mrb[18].mxu1 %vm310_vm0, %v296_v25  ;;  %15459 = vmatmul.mubr.msk.f32.gmra.mrb[18].mxu0 %vm310_vm0, %v296_v25  ;;  %v1044_v38 = vld [vmem:[#allocation3 + $0x6] sm:$0xff] }
  0x42   : > { %952 = vst.msk [vmem:[#allocation3 + $0xa8] sm:$0xff] %vm310_vm0, %v16939_v5  ;;  %953 = vst.msk [vmem:[#allocation3 + $0xb0] sm:$0xff] %vm310_vm0, %v16939_v5  ;;  %15511 = vmatprep.mubr.msk.f32.mxu1 %vm310_vm0, %v297_v26  ;;  %15461 = vmatprep.mubr.msk.f32.mxu0 %vm310_vm0, %v297_v26  ;;  %v1494_v39 = vld [vmem:[#allocation3 + $0x7] sm:$0xff]  ;;  %v1495_v41 = vld [vmem:[#allocation3 + $0xf] sm:$0xff] }
  0x43   : > { %955 = vst.msk [vmem:[#allocation3 + $0xc0] sm:$0xff] %vm310_vm0, %v16939_v5  ;;  %956 = vst.msk [vmem:[#allocation3 + $0xc8] sm:$0xff] %vm310_vm0, %v16939_v5  ;;  %v1045_v40 = vld [vmem:[#allocation3 + $0xe] sm:$0xff]  ;;  %v1046_v42 = vld [vmem:[#allocation3 + $0x26] sm:$0xff] }
  0x44   : > { %957 = vst.msk [vmem:[#allocation3 + $0xd0] sm:$0xff] %vm310_vm0, %v16939_v5  ;;  %959 = vst.msk [vmem:[#allocation3 + $0xe0] sm:$0xff] %vm310_vm0, %v16939_v5  ;;  %v1496_v43 = vld [vmem:[#allocation3 + $0x27] sm:$0xff]  ;;  %v1497_v45 = vld [vmem:[#allocation3 + $0x2f] sm:$0xff] }
  0x45   : > { %960 = vst.msk [vmem:[#allocation3 + $0xe8] sm:$0xff] %vm310_vm0, %v16939_v5  ;;  %961 = vst.msk [vmem:[#allocation3 + $0xf0] sm:$0xff] %vm310_vm0, %v16939_v5  ;;  %15512 = vmatmul.mubr.msk.f32.gmra.mrb[20].mxu1 %vm310_vm0, %v298_v27  ;;  %15462 = vmatmul.mubr.msk.f32.gmra.mrb[20].mxu0 %vm310_vm0, %v298_v27  ;;  %v1047_v44 = vld [vmem:[#allocation3 + $0x2e] sm:$0xff] }
  0x46   : > { %963 = vst.msk [vmem:[#allocation3 + $0x100] sm:$0xff] %vm310_vm0, %v16939_v5  ;;  %964 = vst.msk [vmem:[#allocation3 + $0x108] sm:$0xff] %vm310_vm0, %v16939_v5  ;;  %15514 = vmatprep.mubr.msk.f32.mxu1 %vm310_vm0, %v299_v28  ;;  %15464 = vmatprep.mubr.msk.f32.mxu0 %vm310_vm0, %v299_v28 }
  0x47   : > { %965 = vst.msk [vmem:[#allocation3 + $0x110] sm:$0xff] %vm310_vm0, %v16939_v5  ;;  %967 = vst.msk [vmem:[#allocation3 + $0x120] sm:$0xff] %vm310_vm0, %v16939_v5 }
  0x48   : > { %968 = vst.msk [vmem:[#allocation3 + $0x128] sm:$0xff] %vm310_vm0, %v16939_v5  ;;  %969 = vst.msk [vmem:[#allocation3 + $0x130] sm:$0xff] %vm310_vm0, %v16939_v5 }
  0x49   : > { %971 = vst.msk [vmem:[#allocation3 + $0x140] sm:$0xff] %vm310_vm0, %v16939_v5  ;;  %972 = vst.msk [vmem:[#allocation3 + $0x148] sm:$0xff] %vm310_vm0, %v16939_v5  ;;  %15515 = vmatmul.mubr.msk.f32.gmra.mrb[22].mxu1 %vm310_vm0, %v300_v29  ;;  %15465 = vmatmul.mubr.msk.f32.gmra.mrb[22].mxu0 %vm310_vm0, %v300_v29 }
  0x4a   : > { %973 = vst.msk [vmem:[#allocation3 + $0x150] sm:$0xff] %vm310_vm0, %v16939_v5  ;;  %975 = vst.msk [vmem:[#allocation3 + $0x160] sm:$0xff] %vm310_vm0, %v16939_v5  ;;  %15517 = vmatprep.mubr.msk.f32.mxu1 %vm310_vm0, %v301_v30  ;;  %15467 = vmatprep.mubr.msk.f32.mxu0 %vm310_vm0, %v301_v30 }
  0x4b   : > { %976 = vst.msk [vmem:[#allocation3 + $0x168] sm:$0xff] %vm310_vm0, %v16939_v5  ;;  %977 = vst.msk [vmem:[#allocation3 + $0x170] sm:$0xff] %vm310_vm0, %v16939_v5 }
  0x4c   : > { %979 = vst.msk [vmem:[#allocation3 + $0x180] sm:$0xff] %vm310_vm0, %v16939_v5  ;;  %980 = vst.msk [vmem:[#allocation3 + $0x188] sm:$0xff] %vm310_vm0, %v16939_v5 }
  0x4d   : > { %981 = vst.msk [vmem:[#allocation3 + $0x190] sm:$0xff] %vm310_vm0, %v16939_v5  ;;  %983 = vst.msk [vmem:[#allocation3 + $0x1a0] sm:$0xff] %vm310_vm0, %v16939_v5  ;;  %15518 = vmatmul.mubr.msk.f32.gmra.mrb[24].mxu1 %vm310_vm0, %v302_v31  ;;  %15468 = vmatmul.mubr.msk.f32.gmra.mrb[24].mxu0 %vm310_vm0, %v302_v31 }
  0x4e   : > { %984 = vst.msk [vmem:[#allocation3 + $0x1a8] sm:$0xff] %vm310_vm0, %v16939_v5  ;;  %985 = vst.msk [vmem:[#allocation3 + $0x1b0] sm:$0xff] %vm310_vm0, %v16939_v5  ;;  %15520 = vmatprep.mubr.msk.f32.mxu1 %vm310_vm0, %v303_v32  ;;  %15470 = vmatprep.mubr.msk.f32.mxu0 %vm310_vm0, %v303_v32 }
  0x4f   : > { %987 = vst.msk [vmem:[#allocation3 + $0x1c0] sm:$0xff] %vm310_vm0, %v16939_v5  ;;  %988 = vst.msk [vmem:[#allocation3 + $0x1c8] sm:$0xff] %vm310_vm0, %v16939_v5 }
  0x50   : > { %989 = vst.msk [vmem:[#allocation3 + $0x1d0] sm:$0xff] %vm310_vm0, %v16939_v5  ;;  %991 = vst.msk [vmem:[#allocation3 + $0x1e0] sm:$0xff] %vm310_vm0, %v16939_v5 }
  0x51   : > { %992 = vst.msk [vmem:[#allocation3 + $0x1e8] sm:$0xff] %vm310_vm0, %v16939_v5  ;;  %993 = vst.msk [vmem:[#allocation3 + $0x1f0] sm:$0xff] %vm310_vm0, %v16939_v5  ;;  %15521 = vmatmul.mubr.msk.f32.gmra.mrb[26].mxu1 %vm310_vm0, %v304_v33  ;;  %15471 = vmatmul.mubr.msk.f32.gmra.mrb[26].mxu0 %vm310_vm0, %v304_v33 }
  0x52   : > { %995 = vst.msk [vmem:[#allocation3 + $0x200] sm:$0xff] %vm310_vm0, %v16939_v5  ;;  %996 = vst.msk [vmem:[#allocation3 + $0x208] sm:$0xff] %vm310_vm0, %v16939_v5  ;;  %15473 = vmatprep.mubr.msk.f32.mxu0 %vm310_vm0, %v305_v34  ;;  %15523 = vmatprep.mubr.msk.f32.mxu1 %vm310_vm0, %v305_v34 }
  0x53   : > { %997 = vst.msk [vmem:[#allocation3 + $0x210] sm:$0xff] %vm310_vm0, %v16939_v5  ;;  %999 = vst.msk [vmem:[#allocation3 + $0x220] sm:$0xff] %vm310_vm0, %v16939_v5 }
  0x54   : > { %1000 = vst.msk [vmem:[#allocation3 + $0x228] sm:$0xff] %vm310_vm0, %v16939_v5  ;;  %1001 = vst.msk [vmem:[#allocation3 + $0x230] sm:$0xff] %vm310_vm0, %v16939_v5 }
  0x55   : > { %1003 = vst.msk [vmem:[#allocation3 + $0x240] sm:$0xff] %vm310_vm0, %v16939_v5  ;;  %1004 = vst.msk [vmem:[#allocation3 + $0x248] sm:$0xff] %vm310_vm0, %v16939_v5  ;;  %15474 = vmatmul.mubr.msk.f32.gmra.mrb[28].mxu0 %vm310_vm0, %v306_v35  ;;  %15524 = vmatmul.mubr.msk.f32.gmra.mrb[28].mxu1 %vm310_vm0, %v306_v35 }
  0x56   : > { %1005 = vst.msk [vmem:[#allocation3 + $0x250] sm:$0xff] %vm310_vm0, %v16939_v5  ;;  %1007 = vst.msk [vmem:[#allocation3 + $0x260] sm:$0xff] %vm310_vm0, %v16939_v5  ;;  %15476 = vmatprep.mubr.msk.f32.mxu0 %vm310_vm0, %v307_v36  ;;  %15526 = vmatprep.mubr.msk.f32.mxu1 %vm310_vm0, %v307_v36 }
  0x57   : > { %1008 = vst.msk [vmem:[#allocation3 + $0x268] sm:$0xff] %vm310_vm0, %v16939_v5  ;;  %1009 = vst.msk [vmem:[#allocation3 + $0x270] sm:$0xff] %vm310_vm0, %v16939_v5 }
  0x58   : > { %12395 = vst.msk [vmem:[#allocation4 + $0x28] sm:$0xff] %vm310_vm0, %v277_v6  ;;  %12396 = vst.msk [vmem:[#allocation4 + $0x30] sm:$0xff] %vm310_vm0, %v278_v7 }
  0x59   : > { %12397 = vst.msk [vmem:[#allocation4 + $0x48] sm:$0xff] %vm310_vm0, %v279_v8  ;;  %12398 = vst.msk [vmem:[#allocation4 + $0x50] sm:$0xff] %vm310_vm0, %v280_v9  ;;  %15477 = vmatmul.mubr.msk.f32.gmra.mrb[30].mxu0 %vm310_vm0, %v308_v37  ;;  %15527 = vmatmul.mubr.msk.f32.gmra.mrb[30].mxu1 %vm310_vm0, %v308_v37 }
  0x5a   : > { %12399 = vst.msk [vmem:[#allocation4 + $0x68] sm:$0xff] %vm310_vm0, %v281_v10  ;;  %12400 = vst.msk [vmem:[#allocation4 + $0x70] sm:$0xff] %vm310_vm0, %v282_v11  ;;  %15531 = vmatprep.mubr.msk.f32.mxu0 %vm310_vm0, %v1044_v38  ;;  %15581 = vmatprep.mubr.msk.f32.mxu1 %vm310_vm0, %v1494_v39 }
  0x5b   : > { %12401 = vst.msk [vmem:[#allocation4 + $0x88] sm:$0xff] %vm310_vm0, %v283_v12  ;;  %12402 = vst.msk [vmem:[#allocation4 + $0x90] sm:$0xff] %vm310_vm0, %v17352_v13 }
  0x5c   : > { %12403 = vst.msk [vmem:[#allocation4 + $0xa8] sm:$0xff] %vm310_vm0, %v17355_v14  ;;  %12404 = vst.msk [vmem:[#allocation4 + $0xb0] sm:$0xff] %vm310_vm0, %v286_v15 }
  0x5d   : > { %12405 = vst.msk [vmem:[#allocation4 + $0xc8] sm:$0xff] %vm310_vm0, %v287_v16  ;;  %12406 = vst.msk [vmem:[#allocation4 + $0xd0] sm:$0xff] %vm310_vm0, %v17366_v17  ;;  %15532 = vmatmul.mubr.msk.f32.vlgmr.msra.gmra.mrb[32].mxu0 %vm310_vm0, %v1045_v40  ;;  %15582 = vmatmul.mubr.msk.f32.vlgmr.msra.gmra.mrb[32].mxu1 %vm310_vm0, %v1495_v41 }
  0x5e   : > { %12407 = vst.msk [vmem:[#allocation4 + $0xe8] sm:$0xff] %vm310_vm0, %v289_v18  ;;  %12408 = vst.msk [vmem:[#allocation4 + $0xf0] sm:$0xff] %vm310_vm0, %v290_v19  ;;  %15534 = vmatprep.mubr.msk.f32.mxu0 %vm310_vm0, %v1046_v42  ;;  %15584 = vmatprep.mubr.msk.f32.mxu1 %vm310_vm0, %v1496_v43 }
  0x5f   : > { %12409 = vst.msk [vmem:[#allocation4 + $0x108] sm:$0xff] %vm310_vm0, %v291_v20  ;;  %12410 = vst.msk [vmem:[#allocation4 + $0x110] sm:$0xff] %vm310_vm0, %v292_v21  ;;  %15630 = vmatpush3.msra.mxu0 %v13706_v46  ;;  %15680 = vmatpush3.msra.mxu1 %v13739_v47 }
  0x60   : > { %12411 = vst.msk [vmem:[#allocation4 + $0x128] sm:$0xff] %vm310_vm0, %v293_v22  ;;  %12412 = vst.msk [vmem:[#allocation4 + $0x130] sm:$0xff] %vm310_vm0, %v294_v23  ;;  %15729 = vmatprep.subr.mxu0 %v17535_v48  ;;  %15779 = vmatprep.subr.mxu1 %v17541_v49 }
  0x61   : > { %12413 = vst.msk [vmem:[#allocation4 + $0x148] sm:$0xff] %vm310_vm0, %v295_v24  ;;  %12414 = vst.msk [vmem:[#allocation4 + $0x150] sm:$0xff] %vm310_vm0, %v296_v25  ;;  %15535 = vmatmul.mubr.msk.f32.gmra.mrb[34].mxu0 %vm310_vm0, %v1047_v44  ;;  %15585 = vmatmul.mubr.msk.f32.gmra.mrb[34].mxu1 %vm310_vm0, %v1497_v45 }
  0x62   : > { %12415 = vst.msk [vmem:[#allocation4 + $0x168] sm:$0xff] %vm310_vm0, %v297_v26  ;;  %12416 = vst.msk [vmem:[#allocation4 + $0x170] sm:$0xff] %vm310_vm0, %v298_v27 }
  0x63   : > { %12417 = vst.msk [vmem:[#allocation4 + $0x188] sm:$0xff] %vm310_vm0, %v299_v28  ;;  %12418 = vst.msk [vmem:[#allocation4 + $0x190] sm:$0xff] %vm310_vm0, %v300_v29 }
  0x64   : > { %12419 = vst.msk [vmem:[#allocation4 + $0x1a8] sm:$0xff] %vm310_vm0, %v301_v30  ;;  %12420 = vst.msk [vmem:[#allocation4 + $0x1b0] sm:$0xff] %vm310_vm0, %v302_v31 }
  0x65   : > { %12421 = vst.msk [vmem:[#allocation4 + $0x1c8] sm:$0xff] %vm310_vm0, %v303_v32  ;;  %12422 = vst.msk [vmem:[#allocation4 + $0x1d0] sm:$0xff] %vm310_vm0, %v304_v33 }
  0x66   : > { %12423 = vst.msk [vmem:[#allocation4 + $0x1e8] sm:$0xff] %vm310_vm0, %v305_v34  ;;  %12424 = vst.msk [vmem:[#allocation4 + $0x1f0] sm:$0xff] %vm310_vm0, %v306_v35 }
  0x67   : > { %12425 = vst.msk [vmem:[#allocation4 + $0x208] sm:$0xff] %vm310_vm0, %v307_v36  ;;  %12426 = vst.msk [vmem:[#allocation4 + $0x210] sm:$0xff] %vm310_vm0, %v308_v37 }
  0x68   : > { %934 = vst.msk [vmem:[#allocation3 + $0x18] sm:$0x3] %vm933_vm2, %v16939_v5  ;;  %938 = vst.msk [vmem:[#allocation3 + $0x38] sm:$0x3] %vm933_vm2, %v16939_v5 }
  0x69   : > { %942 = vst.msk [vmem:[#allocation3 + $0x58] sm:$0x3] %vm933_vm2, %v16939_v5  ;;  %946 = vst.msk [vmem:[#allocation3 + $0x78] sm:$0x3] %vm933_vm2, %v16939_v5 }
  0x6a   : > { %950 = vst.msk [vmem:[#allocation3 + $0x98] sm:$0x3] %vm933_vm2, %v16939_v5  ;;  %954 = vst.msk [vmem:[#allocation3 + $0xb8] sm:$0x3] %vm933_vm2, %v16939_v5 }
  0x6b   : > { %958 = vst.msk [vmem:[#allocation3 + $0xd8] sm:$0x3] %vm933_vm2, %v16939_v5  ;;  %962 = vst.msk [vmem:[#allocation3 + $0xf8] sm:$0x3] %vm933_vm2, %v16939_v5 }
  0x6c   : > { %966 = vst.msk [vmem:[#allocation3 + $0x118] sm:$0x3] %vm933_vm2, %v16939_v5  ;;  %970 = vst.msk [vmem:[#allocation3 + $0x138] sm:$0x3] %vm933_vm2, %v16939_v5 }
  0x6d   : > { %974 = vst.msk [vmem:[#allocation3 + $0x158] sm:$0x3] %vm933_vm2, %v16939_v5  ;;  %978 = vst.msk [vmem:[#allocation3 + $0x178] sm:$0x3] %vm933_vm2, %v16939_v5 }
  0x6e   : > { %982 = vst.msk [vmem:[#allocation3 + $0x198] sm:$0x3] %vm933_vm2, %v16939_v5  ;;  %986 = vst.msk [vmem:[#allocation3 + $0x1b8] sm:$0x3] %vm933_vm2, %v16939_v5 }
  0x6f   : > { %990 = vst.msk [vmem:[#allocation3 + $0x1d8] sm:$0x3] %vm933_vm2, %v16939_v5  ;;  %994 = vst.msk [vmem:[#allocation3 + $0x1f8] sm:$0x3] %vm933_vm2, %v16939_v5 }
  0x70   : > { %998 = vst.msk [vmem:[#allocation3 + $0x218] sm:$0x3] %vm933_vm2, %v16939_v5  ;;  %1002 = vst.msk [vmem:[#allocation3 + $0x238] sm:$0x3] %vm933_vm2, %v16939_v5 }
  0x71   : > { %1006 = vst.msk [vmem:[#allocation3 + $0x258] sm:$0x3] %vm933_vm2, %v16939_v5  ;;  %1010 = vst.msk [vmem:[#allocation3 + $0x278] sm:$0x3] %vm933_vm2, %v16939_v5 }
  0xf0   : > { %v15483_v51 = vpop.f32.mrb[0].mxu1  ;;  %v15433_v52 = vpop.f32.mrb[0].mxu0 }
  0xf1   : > { %v745_v53 = vadd.f32 %v15483_v51, %v17547_v50  ;;  %v739_v54 = vpop.f32.mrb[1].mxu1  ;;  %634 = vst.msk [vmem:[#allocation2 + $0x8] sm:$0xff] %vm632_vm3, %v15433_v52  ;;  %v473_v55 = vpop.f32.mrb[1].mxu0 }
  0xf2   : > { %v740_v56 = vadd.f32 %v17547_v50, %v739_v54  ;;  %633 = vst.msk [vmem:[#allocation2] sm:$0xff] %vm632_vm3, %v473_v55 }
  0xf3   : > { %v899_v57 = vmax.f32 %v745_v53, 0.0 }
  0xf4   : > { %v898_v58 = vmax.f32 %v740_v56, 0.0  ;;  %v15486_v59 = vpop.f32.mrb[2].mxu1  ;;  %v15436_v60 = vpop.f32.mrb[2].mxu0 }
  0xf5   : > { %1013 = vst.msk [vmem:[#allocation3 + $0x50] sm:$0xff] %vm310_vm0, %v899_v57  ;;  %v755_v61 = vadd.f32 %v15486_v59, %v17547_v50  ;;  %v749_v62 = vpop.f32.mrb[3].mxu1  ;;  %v483_v63 = vpop.f32.mrb[3].mxu0 }
  0xf6   : > { %636 = vst.msk [vmem:[#allocation2 + $0x18] sm:$0xff] %vm632_vm3, %v15436_v60  ;;  %v750_v0 = vadd.f32 %v17547_v50, %v749_v62  ;;  %635 = vst.msk [vmem:[#allocation2 + $0x10] sm:$0xff] %vm632_vm3, %v483_v63 }
  0xf7   : > { %1012 = vst.msk [vmem:[#allocation3 + $0x48] sm:$0xff] %vm310_vm0, %v898_v58  ;;  %v901_v1 = vmax.f32 %v755_v61, 0.0 }
  0xf8   : > { %v900_v2 = vmax.f32 %v750_v0, 0.0  ;;  %v15489_v3 = vpop.f32.mrb[4].mxu1  ;;  %v15439_v4 = vpop.f32.mrb[4].mxu0 }
  0xf9   : > { %1015 = vst.msk [vmem:[#allocation3 + $0x70] sm:$0xff] %vm310_vm0, %v901_v1  ;;  %v765_v5 = vadd.f32 %v15489_v3, %v17547_v50  ;;  %v759_v6 = vpop.f32.mrb[5].mxu1  ;;  %v493_v7 = vpop.f32.mrb[5].mxu0 }
  0xfa   : > { %638 = vst.msk [vmem:[#allocation2 + $0x28] sm:$0xff] %vm632_vm3, %v15439_v4  ;;  %v760_v8 = vadd.f32 %v17547_v50, %v759_v6  ;;  %637 = vst.msk [vmem:[#allocation2 + $0x20] sm:$0xff] %vm632_vm3, %v493_v7 }
  0xfb   : > { %1014 = vst.msk [vmem:[#allocation3 + $0x68] sm:$0xff] %vm310_vm0, %v900_v2  ;;  %v903_v9 = vmax.f32 %v765_v5, 0.0 }
  0xfc   : > { %v902_v10 = vmax.f32 %v760_v8, 0.0  ;;  %v15492_v11 = vpop.f32.mrb[6].mxu1  ;;  %v15442_v12 = vpop.f32.mrb[6].mxu0 }
  0xfd   : > { %1017 = vst.msk [vmem:[#allocation3 + $0x90] sm:$0xff] %vm310_vm0, %v903_v9  ;;  %v775_v13 = vadd.f32 %v15492_v11, %v17547_v50  ;;  %v769_v14 = vpop.f32.mrb[7].mxu1  ;;  %v503_v18 = vpop.f32.mrb[7].mxu0 }
  0xfe   : > { %v17567_v15 = vld [vmem:[#allocation3 + $0x46] sm:$0xff]  ;;  %v17569_v17 = vld [vmem:[#allocation3 + $0x4e] sm:$0xff]  ;;  %640 = vst.msk [vmem:[#allocation2 + $0x38] sm:$0xff] %vm632_vm3, %v15442_v12  ;;  %v770_v19 = vadd.f32 %v17547_v50, %v769_v14  ;;  %639 = vst.msk [vmem:[#allocation2 + $0x30] sm:$0xff] %vm632_vm3, %v503_v18 }
  0xff   : > { %v1498_v16 = vld [vmem:[#allocation3 + $0x47] sm:$0xff]  ;;  %1016 = vst.msk [vmem:[#allocation3 + $0x88] sm:$0xff] %vm310_vm0, %v902_v10  ;;  %15537 = vmatprep.mubr.msk.f32.mxu0 %vm310_vm0, %v17567_v15  ;;  %v1499_v20 = vld [vmem:[#allocation3 + $0x4f] sm:$0xff]  ;;  %v905_v21 = vmax.f32 %v775_v13, 0.0 }
 0x100   : > { %15587 = vmatprep.mubr.msk.f32.mxu1 %vm310_vm0, %v1498_v16  ;;  %15538 = vmatmul.mubr.msk.f32.gmra.mrb[36].mxu0 %vm310_vm0, %v17569_v17  ;;  %v904_v22 = vmax.f32 %v770_v19, 0.0  ;;  %v15495_v23 = vpop.f32.mrb[8].mxu1  ;;  %v15445_v24 = vpop.f32.mrb[8].mxu0 }
 0x101   : > { %15588 = vmatmul.mubr.msk.f32.gmra.mrb[36].mxu1 %vm310_vm0, %v1499_v20  ;;  %1019 = vst.msk [vmem:[#allocation3 + $0xb0] sm:$0xff] %vm310_vm0, %v905_v21  ;;  %v785_v25 = vadd.f32 %v15495_v23, %v17547_v50  ;;  %v779_v26 = vpop.f32.mrb[9].mxu1  ;;  %v513_v30 = vpop.f32.mrb[9].mxu0 }
 0x102   : > { %v17583_v27 = vld [vmem:[#allocation3 + $0x66] sm:$0xff]  ;;  %v17585_v29 = vld [vmem:[#allocation3 + $0x6e] sm:$0xff]  ;;  %642 = vst.msk [vmem:[#allocation2 + $0x48] sm:$0xff] %vm632_vm3, %v15445_v24  ;;  %v780_v31 = vadd.f32 %v17547_v50, %v779_v26  ;;  %641 = vst.msk [vmem:[#allocation2 + $0x40] sm:$0xff] %vm632_vm3, %v513_v30 }
 0x103   : > { %v1500_v28 = vld [vmem:[#allocation3 + $0x67] sm:$0xff]  ;;  %1018 = vst.msk [vmem:[#allocation3 + $0xa8] sm:$0xff] %vm310_vm0, %v904_v22  ;;  %15540 = vmatprep.mubr.msk.f32.mxu0 %vm310_vm0, %v17583_v27  ;;  %v1501_v32 = vld [vmem:[#allocation3 + $0x6f] sm:$0xff]  ;;  %v907_v33 = vmax.f32 %v785_v25, 0.0 }
 0x104   : > { %15590 = vmatprep.mubr.msk.f32.mxu1 %vm310_vm0, %v1500_v28  ;;  %15541 = vmatmul.mubr.msk.f32.gmra.mrb[38].mxu0 %vm310_vm0, %v17585_v29  ;;  %v906_v34 = vmax.f32 %v780_v31, 0.0  ;;  %v15498_v35 = vpop.f32.mrb[10].mxu1  ;;  %v15448_v36 = vpop.f32.mrb[10].mxu0 }
 0x105   : > { %15591 = vmatmul.mubr.msk.f32.gmra.mrb[38].mxu1 %vm310_vm0, %v1501_v32  ;;  %1021 = vst.msk [vmem:[#allocation3 + $0xd0] sm:$0xff] %vm310_vm0, %v907_v33  ;;  %v795_v37 = vadd.f32 %v15498_v35, %v17547_v50  ;;  %v789_v38 = vpop.f32.mrb[11].mxu1  ;;  %v523_v42 = vpop.f32.mrb[11].mxu0 }
 0x106   : > { %v17599_v39 = vld [vmem:[#allocation3 + $0x86] sm:$0xff]  ;;  %v17601_v41 = vld [vmem:[#allocation3 + $0x8e] sm:$0xff]  ;;  %644 = vst.msk [vmem:[#allocation2 + $0x58] sm:$0xff] %vm632_vm3, %v15448_v36  ;;  %v790_v43 = vadd.f32 %v17547_v50, %v789_v38  ;;  %643 = vst.msk [vmem:[#allocation2 + $0x50] sm:$0xff] %vm632_vm3, %v523_v42 }
 0x107   : > { %v1502_v40 = vld [vmem:[#allocation3 + $0x87] sm:$0xff]  ;;  %1020 = vst.msk [vmem:[#allocation3 + $0xc8] sm:$0xff] %vm310_vm0, %v906_v34  ;;  %15543 = vmatprep.mubr.msk.f32.mxu0 %vm310_vm0, %v17599_v39  ;;  %v1503_v44 = vld [vmem:[#allocation3 + $0x8f] sm:$0xff]  ;;  %v909_v45 = vmax.f32 %v795_v37, 0.0 }
 0x108   : > { %15593 = vmatprep.mubr.msk.f32.mxu1 %vm310_vm0, %v1502_v40  ;;  %15544 = vmatmul.mubr.msk.f32.gmra.mrb[40].mxu0 %vm310_vm0, %v17601_v41  ;;  %v908_v46 = vmax.f32 %v790_v43, 0.0  ;;  %v15501_v47 = vpop.f32.mrb[12].mxu1  ;;  %v15451_v51 = vpop.f32.mrb[12].mxu0 }
 0x109   : > { %15594 = vmatmul.mubr.msk.f32.gmra.mrb[40].mxu1 %vm310_vm0, %v1503_v44  ;;  %1023 = vst.msk [vmem:[#allocation3 + $0xf0] sm:$0xff] %vm310_vm0, %v909_v45  ;;  %v805_v52 = vadd.f32 %v15501_v47, %v17547_v50  ;;  %v799_v53 = vpop.f32.mrb[13].mxu1  ;;  %v533_v57 = vpop.f32.mrb[13].mxu0 }
 0x10a   : > { %v17615_v54 = vld [vmem:[#allocation3 + $0xa6] sm:$0xff]  ;;  %v17617_v56 = vld [vmem:[#allocation3 + $0xae] sm:$0xff]  ;;  %646 = vst.msk [vmem:[#allocation2 + $0x68] sm:$0xff] %vm632_vm3, %v15451_v51  ;;  %v800_v58 = vadd.f32 %v17547_v50, %v799_v53  ;;  %645 = vst.msk [vmem:[#allocation2 + $0x60] sm:$0xff] %vm632_vm3, %v533_v57 }
 0x10b   : > { %v1504_v55 = vld [vmem:[#allocation3 + $0xa7] sm:$0xff]  ;;  %1022 = vst.msk [vmem:[#allocation3 + $0xe8] sm:$0xff] %vm310_vm0, %v908_v46  ;;  %15546 = vmatprep.mubr.msk.f32.mxu0 %vm310_vm0, %v17615_v54  ;;  %v1505_v59 = vld [vmem:[#allocation3 + $0xaf] sm:$0xff]  ;;  %v911_v60 = vmax.f32 %v805_v52, 0.0 }
 0x10c   : > { %15596 = vmatprep.mubr.msk.f32.mxu1 %vm310_vm0, %v1504_v55  ;;  %15547 = vmatmul.mubr.msk.f32.gmra.mrb[42].mxu0 %vm310_vm0, %v17617_v56  ;;  %v910_v61 = vmax.f32 %v800_v58, 0.0  ;;  %v15504_v62 = vpop.f32.mrb[14].mxu1  ;;  %v15454_v63 = vpop.f32.mrb[14].mxu0 }
 0x10d   : > { %15597 = vmatmul.mubr.msk.f32.gmra.mrb[42].mxu1 %vm310_vm0, %v1505_v59  ;;  %1025 = vst.msk [vmem:[#allocation3 + $0x110] sm:$0xff] %vm310_vm0, %v911_v60  ;;  %v815_v0 = vadd.f32 %v15504_v62, %v17547_v50  ;;  %v809_v1 = vpop.f32.mrb[15].mxu1  ;;  %v543_v5 = vpop.f32.mrb[15].mxu0 }
 0x10e   : > { %v17631_v2 = vld [vmem:[#allocation3 + $0xc6] sm:$0xff]  ;;  %v17633_v4 = vld [vmem:[#allocation3 + $0xce] sm:$0xff]  ;;  %648 = vst.msk [vmem:[#allocation2 + $0x78] sm:$0xff] %vm632_vm3, %v15454_v63  ;;  %v810_v6 = vadd.f32 %v17547_v50, %v809_v1  ;;  %647 = vst.msk [vmem:[#allocation2 + $0x70] sm:$0xff] %vm632_vm3, %v543_v5 }
 0x10f   : > { %v1506_v3 = vld [vmem:[#allocation3 + $0xc7] sm:$0xff]  ;;  %1024 = vst.msk [vmem:[#allocation3 + $0x108] sm:$0xff] %vm310_vm0, %v910_v61  ;;  %15549 = vmatprep.mubr.msk.f32.mxu0 %vm310_vm0, %v17631_v2  ;;  %v1507_v7 = vld [vmem:[#allocation3 + $0xcf] sm:$0xff]  ;;  %v913_v8 = vmax.f32 %v815_v0, 0.0 }
 0x110   : > { %15599 = vmatprep.mubr.msk.f32.mxu1 %vm310_vm0, %v1506_v3  ;;  %15550 = vmatmul.mubr.msk.f32.gmra.mrb[44].mxu0 %vm310_vm0, %v17633_v4  ;;  %v912_v9 = vmax.f32 %v810_v6, 0.0  ;;  %v15507_v10 = vpop.f32.mrb[16].mxu1  ;;  %v15457_v11 = vpop.f32.mrb[16].mxu0 }
 0x111   : > { %15600 = vmatmul.mubr.msk.f32.gmra.mrb[44].mxu1 %vm310_vm0, %v1507_v7  ;;  %1027 = vst.msk [vmem:[#allocation3 + $0x130] sm:$0xff] %vm310_vm0, %v913_v8  ;;  %v825_v12 = vadd.f32 %v15507_v10, %v17547_v50  ;;  %v819_v13 = vpop.f32.mrb[17].mxu1  ;;  %v553_v19 = vpop.f32.mrb[17].mxu0 }
 0x112   : > { %v17647_v14 = vld [vmem:[#allocation3 + $0xe6] sm:$0xff]  ;;  %v17649_v18 = vld [vmem:[#allocation3 + $0xee] sm:$0xff]  ;;  %650 = vst.msk [vmem:[#allocation2 + $0x88] sm:$0xff] %vm632_vm3, %v15457_v11  ;;  %v820_v20 = vadd.f32 %v17547_v50, %v819_v13  ;;  %649 = vst.msk [vmem:[#allocation2 + $0x80] sm:$0xff] %vm632_vm3, %v553_v19 }
 0x113   : > { %v1508_v16 = vld [vmem:[#allocation3 + $0xe7] sm:$0xff]  ;;  %1026 = vst.msk [vmem:[#allocation3 + $0x128] sm:$0xff] %vm310_vm0, %v912_v9  ;;  %15552 = vmatprep.mubr.msk.f32.mxu0 %vm310_vm0, %v17647_v14  ;;  %v1509_v21 = vld [vmem:[#allocation3 + $0xef] sm:$0xff]  ;;  %v915_v22 = vmax.f32 %v825_v12, 0.0 }
 0x114   : > { %15602 = vmatprep.mubr.msk.f32.mxu1 %vm310_vm0, %v1508_v16  ;;  %15553 = vmatmul.mubr.msk.f32.gmra.mrb[46].mxu0 %vm310_vm0, %v17649_v18  ;;  %v914_v23 = vmax.f32 %v820_v20, 0.0  ;;  %v15510_v24 = vpop.f32.mrb[18].mxu1  ;;  %v15460_v25 = vpop.f32.mrb[18].mxu0 }
 0x115   : > { %15603 = vmatmul.mubr.msk.f32.gmra.mrb[46].mxu1 %vm310_vm0, %v1509_v21  ;;  %1029 = vst.msk [vmem:[#allocation3 + $0x150] sm:$0xff] %vm310_vm0, %v915_v22  ;;  %v835_v26 = vadd.f32 %v15510_v24, %v17547_v50  ;;  %v829_v28 = vpop.f32.mrb[19].mxu1  ;;  %v563_v33 = vpop.f32.mrb[19].mxu0 }
 0x116   : > { %v17663_v30 = vld [vmem:[#allocation3 + $0x106] sm:$0xff]  ;;  %v17665_v32 = vld [vmem:[#allocation3 + $0x10e] sm:$0xff]  ;;  %652 = vst.msk [vmem:[#allocation2 + $0x98] sm:$0xff] %vm632_vm3, %v15460_v25  ;;  %v830_v34 = vadd.f32 %v17547_v50, %v829_v28  ;;  %651 = vst.msk [vmem:[#allocation2 + $0x90] sm:$0xff] %vm632_vm3, %v563_v33 }
 0x117   : > { %v1510_v31 = vld [vmem:[#allocation3 + $0x107] sm:$0xff]  ;;  %1028 = vst.msk [vmem:[#allocation3 + $0x148] sm:$0xff] %vm310_vm0, %v914_v23  ;;  %15555 = vmatprep.mubr.msk.f32.mxu0 %vm310_vm0, %v17663_v30  ;;  %v1511_v35 = vld [vmem:[#allocation3 + $0x10f] sm:$0xff]  ;;  %v917_v36 = vmax.f32 %v835_v26, 0.0 }
 0x118   : > { %15605 = vmatprep.mubr.msk.f32.mxu1 %vm310_vm0, %v1510_v31  ;;  %15556 = vmatmul.mubr.msk.f32.gmra.mrb[48].mxu0 %vm310_vm0, %v17665_v32  ;;  %v916_v37 = vmax.f32 %v830_v34, 0.0  ;;  %v15513_v38 = vpop.f32.mrb[20].mxu1  ;;  %v15463_v40 = vpop.f32.mrb[20].mxu0 }
 0x119   : > { %15606 = vmatmul.mubr.msk.f32.gmra.mrb[48].mxu1 %vm310_vm0, %v1511_v35  ;;  %1031 = vst.msk [vmem:[#allocation3 + $0x170] sm:$0xff] %vm310_vm0, %v917_v36  ;;  %v845_v42 = vadd.f32 %v15513_v38, %v17547_v50  ;;  %v839_v43 = vpop.f32.mrb[21].mxu1  ;;  %v573_v47 = vpop.f32.mrb[21].mxu0 }
 0x11a   : > { %v17679_v44 = vld [vmem:[#allocation3 + $0x126] sm:$0xff]  ;;  %v17681_v46 = vld [vmem:[#allocation3 + $0x12e] sm:$0xff]  ;;  %654 = vst.msk [vmem:[#allocation2 + $0xa8] sm:$0xff] %vm632_vm3, %v15463_v40  ;;  %v840_v51 = vadd.f32 %v17547_v50, %v839_v43  ;;  %653 = vst.msk [vmem:[#allocation2 + $0xa0] sm:$0xff] %vm632_vm3, %v573_v47 }
 0x11b   : > { %v1512_v45 = vld [vmem:[#allocation3 + $0x127] sm:$0xff]  ;;  %1030 = vst.msk [vmem:[#allocation3 + $0x168] sm:$0xff] %vm310_vm0, %v916_v37  ;;  %15558 = vmatprep.mubr.msk.f32.mxu0 %vm310_vm0, %v17679_v44  ;;  %v1513_v52 = vld [vmem:[#allocation3 + $0x12f] sm:$0xff]  ;;  %v919_v53 = vmax.f32 %v845_v42, 0.0 }
 0x11c   : > { %15608 = vmatprep.mubr.msk.f32.mxu1 %vm310_vm0, %v1512_v45  ;;  %15559 = vmatmul.mubr.msk.f32.gmra.mrb[50].mxu0 %vm310_vm0, %v17681_v46  ;;  %v918_v55 = vmax.f32 %v840_v51, 0.0  ;;  %v15516_v57 = vpop.f32.mrb[22].mxu1  ;;  %v15466_v58 = vpop.f32.mrb[22].mxu0 }
 0x11d   : > { %15609 = vmatmul.mubr.msk.f32.gmra.mrb[50].mxu1 %vm310_vm0, %v1513_v52  ;;  %1033 = vst.msk [vmem:[#allocation3 + $0x190] sm:$0xff] %vm310_vm0, %v919_v53  ;;  %v855_v59 = vadd.f32 %v15516_v57, %v17547_v50  ;;  %v849_v60 = vpop.f32.mrb[23].mxu1  ;;  %v583_v0 = vpop.f32.mrb[23].mxu0 }
 0x11e   : > { %v17695_v61 = vld [vmem:[#allocation3 + $0x146] sm:$0xff]  ;;  %v17697_v63 = vld [vmem:[#allocation3 + $0x14e] sm:$0xff]  ;;  %656 = vst.msk [vmem:[#allocation2 + $0xb8] sm:$0xff] %vm632_vm3, %v15466_v58  ;;  %v850_v1 = vadd.f32 %v17547_v50, %v849_v60  ;;  %655 = vst.msk [vmem:[#allocation2 + $0xb0] sm:$0xff] %vm632_vm3, %v583_v0 }
 0x11f   : > { %v1514_v62 = vld [vmem:[#allocation3 + $0x147] sm:$0xff]  ;;  %1032 = vst.msk [vmem:[#allocation3 + $0x188] sm:$0xff] %vm310_vm0, %v918_v55  ;;  %15561 = vmatprep.mubr.msk.f32.mxu0 %vm310_vm0, %v17695_v61  ;;  %v1515_v3 = vld [vmem:[#allocation3 + $0x14f] sm:$0xff]  ;;  %v921_v5 = vmax.f32 %v855_v59, 0.0 }
 0x120   : > { %15611 = vmatprep.mubr.msk.f32.mxu1 %vm310_vm0, %v1514_v62  ;;  %15562 = vmatmul.mubr.msk.f32.gmra.mrb[52].mxu0 %vm310_vm0, %v17697_v63  ;;  %v920_v6 = vmax.f32 %v850_v1, 0.0  ;;  %v15519_v7 = vpop.f32.mrb[24].mxu1  ;;  %v15469_v8 = vpop.f32.mrb[24].mxu0 }
 0x121   : > { %15612 = vmatmul.mubr.msk.f32.gmra.mrb[52].mxu1 %vm310_vm0, %v1515_v3  ;;  %1035 = vst.msk [vmem:[#allocation3 + $0x1b0] sm:$0xff] %vm310_vm0, %v921_v5  ;;  %v865_v9 = vadd.f32 %v15519_v7, %v17547_v50  ;;  %v859_v10 = vpop.f32.mrb[25].mxu1  ;;  %v593_v16 = vpop.f32.mrb[25].mxu0 }
 0x122   : > { %v17711_v11 = vld [vmem:[#allocation3 + $0x166] sm:$0xff]  ;;  %v17713_v13 = vld [vmem:[#allocation3 + $0x16e] sm:$0xff]  ;;  %658 = vst.msk [vmem:[#allocation2 + $0xc8] sm:$0xff] %vm632_vm3, %v15469_v8  ;;  %v860_v19 = vadd.f32 %v17547_v50, %v859_v10  ;;  %657 = vst.msk [vmem:[#allocation2 + $0xc0] sm:$0xff] %vm632_vm3, %v593_v16 }
 0x123   : > { %v1516_v12 = vld [vmem:[#allocation3 + $0x167] sm:$0xff]  ;;  %1034 = vst.msk [vmem:[#allocation3 + $0x1a8] sm:$0xff] %vm310_vm0, %v920_v6  ;;  %15564 = vmatprep.mubr.msk.f32.mxu0 %vm310_vm0, %v17711_v11  ;;  %v1517_v20 = vld [vmem:[#allocation3 + $0x16f] sm:$0xff]  ;;  %v923_v21 = vmax.f32 %v865_v9, 0.0 }
 0x124   : > { %15614 = vmatprep.mubr.msk.f32.mxu1 %vm310_vm0, %v1516_v12  ;;  %15565 = vmatmul.mubr.msk.f32.gmra.mrb[54].mxu0 %vm310_vm0, %v17713_v13  ;;  %v922_v22 = vmax.f32 %v860_v19, 0.0  ;;  %v15522_v23 = vpop.f32.mrb[26].mxu1  ;;  %v15472_v24 = vpop.f32.mrb[26].mxu0  ;;  %v1077_v9 = vld [vmem:[#allocation2 + $0x8] sm:$0xff]  ;;  %v1076_v12 = vld [vmem:[#allocation2] sm:$0xff] }
 0x125   : > { %15615 = vmatmul.mubr.msk.f32.gmra.mrb[54].mxu1 %vm310_vm0, %v1517_v20  ;;  %1037 = vst.msk [vmem:[#allocation3 + $0x1d0] sm:$0xff] %vm310_vm0, %v923_v21  ;;  %v875_v25 = vadd.f32 %v15522_v23, %v17547_v50  ;;  %v869_v26 = vpop.f32.mrb[27].mxu1  ;;  %v603_v34 = vpop.f32.mrb[27].mxu0  ;;  %v1945_v19 = vld [vmem:[#allocation3 + $0x8] sm:$0xff] }
 0x126   : > { %v17727_v28 = vld [vmem:[#allocation3 + $0x186] sm:$0xff]  ;;  %v17729_v33 = vld [vmem:[#allocation3 + $0x18e] sm:$0xff]  ;;  %660 = vst.msk [vmem:[#allocation2 + $0xd8] sm:$0xff] %vm632_vm3, %v15472_v24  ;;  %v870_v35 = vadd.f32 %v17547_v50, %v869_v26  ;;  %659 = vst.msk [vmem:[#allocation2 + $0xd0] sm:$0xff] %vm632_vm3, %v603_v34 }
 0x127   : > { %v1518_v31 = vld [vmem:[#allocation3 + $0x187] sm:$0xff]  ;;  %1036 = vst.msk [vmem:[#allocation3 + $0x1c8] sm:$0xff] %vm310_vm0, %v922_v22  ;;  %15567 = vmatprep.mubr.msk.f32.mxu0 %vm310_vm0, %v17727_v28  ;;  %v1519_v36 = vld [vmem:[#allocation3 + $0x18f] sm:$0xff]  ;;  %v925_v37 = vmax.f32 %v875_v25, 0.0 }
 0x128   : > { %15617 = vmatprep.mubr.msk.f32.mxu1 %vm310_vm0, %v1518_v31  ;;  %15568 = vmatmul.mubr.msk.f32.gmra.mrb[56].mxu0 %vm310_vm0, %v17729_v33  ;;  %v924_v38 = vmax.f32 %v870_v35, 0.0  ;;  %v15475_v40 = vpop.f32.mrb[28].mxu0  ;;  %v15525_v42 = vpop.f32.mrb[28].mxu1  ;;  %v2396_v20 = vld [vmem:[#allocation3 + $0x9] sm:$0xff] }
 0x129   : > { %15618 = vmatmul.mubr.msk.f32.gmra.mrb[56].mxu1 %vm310_vm0, %v1519_v36  ;;  %1039 = vst.msk [vmem:[#allocation3 + $0x1f0] sm:$0xff] %vm310_vm0, %v925_v37  ;;  %v613_v51 = vpop.f32.mrb[29].mxu0  ;;  %v885_v52 = vadd.f32 %v15525_v42, %v17547_v50  ;;  %v879_v53 = vpop.f32.mrb[29].mxu1  ;;  %v1079_v37 = vld [vmem:[#allocation2 + $0x18] sm:$0xff] }
 0x12a   : > { %v17742_v43 = vld [vmem:[#allocation3 + $0x1a6] sm:$0xff]  ;;  %v17744_v47 = vld [vmem:[#allocation3 + $0x1ae] sm:$0xff]  ;;  %662 = vst.msk [vmem:[#allocation2 + $0xe8] sm:$0xff] %vm632_vm3, %v15475_v40  ;;  %661 = vst.msk [vmem:[#allocation2 + $0xe0] sm:$0xff] %vm632_vm3, %v613_v51  ;;  %v880_v57 = vadd.f32 %v17547_v50, %v879_v53 }
 0x12b   : > { %v1520_v45 = vld [vmem:[#allocation3 + $0x1a7] sm:$0xff]  ;;  %1038 = vst.msk [vmem:[#allocation3 + $0x1e8] sm:$0xff] %vm310_vm0, %v924_v38  ;;  %15570 = vmatprep.mubr.msk.f32.mxu0 %vm310_vm0, %v17742_v43  ;;  %v1521_v55 = vld [vmem:[#allocation3 + $0x1af] sm:$0xff]  ;;  %v927_v58 = vmax.f32 %v885_v52, 0.0 }
 0x12c   : > { %15620 = vmatprep.mubr.msk.f32.mxu1 %vm310_vm0, %v1520_v45  ;;  %15571 = vmatmul.mubr.msk.f32.gmra.mrb[58].mxu0 %vm310_vm0, %v17744_v47  ;;  %v15478_v59 = vpop.f32.mrb[30].mxu0  ;;  %v926_v60 = vmax.f32 %v880_v57, 0.0  ;;  %v15528_v62 = vpop.f32.mrb[30].mxu1  ;;  %v1078_v38 = vld [vmem:[#allocation2 + $0x10] sm:$0xff]  ;;  %v17789_v52 = vld [vmem:[#allocation3 + $0x28] sm:$0xff] }
 0x12d   : > { %15621 = vmatmul.mubr.msk.f32.gmra.mrb[58].mxu1 %vm310_vm0, %v1521_v55  ;;  %664 = vst.msk [vmem:[#allocation2 + $0xf8] sm:$0xff] %vm632_vm3, %v15478_v59  ;;  %v623_v5 = vpop.f32.mrb[31].mxu0  ;;  %v895_v6 = vadd.f32 %v15528_v62, %v17547_v50  ;;  %v889_v7 = vpop.f32.mrb[31].mxu1  ;;  %v1946_v40 = vld [vmem:[#allocation3 + $0x10] sm:$0xff]  ;;  %v17801_v62 = vld [vmem:[%s21250_s4 + $0x38] sm:$0xff] }
 0x12e   : > { %v17757_v0 = vld [vmem:[#allocation3 + $0x1c6] sm:$0xff]  ;;  %v17759_v3 = vld [vmem:[#allocation3 + $0x1ce] sm:$0xff]  ;;  %1041 = vst.msk [vmem:[#allocation3 + $0x210] sm:$0xff] %vm310_vm0, %v927_v58  ;;  %1040 = vst.msk [vmem:[#allocation3 + $0x208] sm:$0xff] %vm310_vm0, %v926_v60  ;;  %v890_v10 = vadd.f32 %v17547_v50, %v889_v7 }
 0x12f   : > { %v1522_v1 = vld [vmem:[#allocation3 + $0x1c7] sm:$0xff]  ;;  %15573 = vmatprep.mubr.msk.f32.mxu0 %vm310_vm0, %v17757_v0  ;;  %v1523_v8 = vld [vmem:[#allocation3 + $0x1cf] sm:$0xff]  ;;  %663 = vst.msk [vmem:[#allocation2 + $0xf0] sm:$0xff] %vm632_vm3, %v623_v5  ;;  %v929_v16 = vmax.f32 %v895_v6, 0.0 }
 0x130   : > { %15623 = vmatprep.mubr.msk.f32.mxu1 %vm310_vm0, %v1522_v1  ;;  %15574 = vmatmul.mubr.msk.f32.gmra.mrb[60].mxu0 %vm310_vm0, %v17759_v3  ;;  %v15533_v21 = vpop.f32.mrb[32].mxu0  ;;  %v928_v22 = vmax.f32 %v890_v10, 0.0  ;;  %v15583_v23 = vpop.f32.mrb[32].mxu1  ;;  %v2397_v42 = vld [vmem:[#allocation3 + $0x11] sm:$0xff]  ;;  %v2398_v58 = vld [vmem:[#allocation3 + $0x29] sm:$0xff] }
 0x131   : > { %15624 = vmatmul.mubr.msk.f32.gmra.mrb[60].mxu1 %vm310_vm0, %v1523_v8  ;;  %v1431_v31 = vadd.f32 %v15533_v21, %v1077_v9  ;;  %v1271_v34 = vpop.f32.mrb[33].mxu0  ;;  %1043 = vst.msk [vmem:[#allocation3 + $0x230] sm:$0xff] %vm310_vm0, %v929_v16  ;;  %v1722_v50 = vpop.f32.mrb[33].mxu1  ;;  %v17796_v60 = vld [vmem:[%s21250_s4 + $0x30] sm:$0xff] }
 0x132   : > { %v17773_v24 = vld [vmem:[#allocation3 + $0x1e6] sm:$0xff]  ;;  %v17775_v26 = vld [vmem:[#allocation3 + $0x1ee] sm:$0xff]  ;;  %v1430_v36 = vadd.f32 %v1271_v34, %v1076_v12  ;;  %1042 = vst.msk [vmem:[#allocation3 + $0x228] sm:$0xff] %vm310_vm0, %v928_v22 }
 0x133   : > { %v1524_v25 = vld [vmem:[#allocation3 + $0x1e7] sm:$0xff]  ;;  %15576 = vmatprep.mubr.msk.f32.mxu0 %vm310_vm0, %v17773_v24  ;;  %v1525_v35 = vld [vmem:[#allocation3 + $0x1ef] sm:$0xff]  ;;  %1463 = vst.msk [vmem:[#allocation2 + $0x8] sm:$0xff] %vm632_vm3, %v1431_v31 }
 0x134   : > { %15626 = vmatprep.mubr.msk.f32.mxu1 %vm310_vm0, %v1524_v25  ;;  %15577 = vmatmul.mubr.msk.f32.gmra.mrb[62].mxu0 %vm310_vm0, %v17775_v26  ;;  %1462 = vst.msk [vmem:[#allocation2] sm:$0xff] %vm632_vm3, %v1430_v36  ;;  %v15536_v45 = vpop.f32.mrb[34].mxu0  ;;  %v15586_v51 = vpop.f32.mrb[34].mxu1  ;;  %v17807_v1 = vld [vmem:[#allocation3 + $0x30] sm:$0xff]  ;;  %v17841_v34 = vld [vmem:[#allocation3 + $0x88] sm:$0xff] }
 0x135   : > { %15627 = vmatmul.mubr.msk.f32.gmra.mrb[62].mxu1 %vm310_vm0, %v1525_v35  ;;  %15631 = vmatprep.mubr.msk.f32.mxu0 %vm310_vm0, %v1945_v19  ;;  %v1433_v53 = vadd.f32 %v15536_v45, %v1079_v37  ;;  %v1281_v55 = vpop.f32.mrb[35].mxu0  ;;  %v1732_v57 = vpop.f32.mrb[35].mxu1  ;;  %v2399_v5 = vld [vmem:[#allocation3 + $0x31] sm:$0xff]  ;;  %v2400_v7 = vld [vmem:[#allocation3 + $0x49] sm:$0xff] }
 0x136   : > { %15681 = vmatprep.mubr.msk.f32.mxu1 %vm310_vm0, %v2396_v20  ;;  %v1432_v59 = vadd.f32 %v1281_v55, %v1078_v38  ;;  %v17823_v10 = vld [vmem:[#allocation3 + $0x50] sm:$0xff]  ;;  %v17829_v19 = vld [vmem:[#allocation3 + $0x68] sm:$0xff] }
 0x137   : > { %1465 = vst.msk [vmem:[#allocation2 + $0x18] sm:$0xff] %vm632_vm3, %v1433_v53  ;;  %v2401_v12 = vld [vmem:[#allocation3 + $0x51] sm:$0xff]  ;;  %v2402_v20 = vld [vmem:[#allocation3 + $0x69] sm:$0xff] }
 0x138   : > { %15632 = vmatmul.mubr.msk.f32.vlgmr.msra.gmra.mrb[64].mxu0 %vm310_vm0, %v1946_v40  ;;  %1464 = vst.msk [vmem:[#allocation2 + $0x10] sm:$0xff] %vm632_vm3, %v1432_v59  ;;  %v17835_v25 = vld [vmem:[#allocation3 + $0x70] sm:$0xff]  ;;  %v17851_v37 = vld [vmem:[#allocation3 + $0xa8] sm:$0xff] }
 0x139   : > { %15682 = vmatmul.mubr.msk.f32.vlgmr.msra.gmra.mrb[64].mxu1 %vm310_vm0, %v2397_v42  ;;  %15730 = vmatpush3.msra.mxu0 %v17535_v48  ;;  %v17817_v48 = vld [vmem:[#allocation3 + $0x48] sm:$0xff]  ;;  %v2403_v31 = vld [vmem:[#allocation3 + $0x71] sm:$0xff] }
 0x13a   : > { %15634 = vmatprep.mubr.msk.f32.mxu0 %vm310_vm0, %v17789_v52  ;;  %15684 = vmatprep.mubr.msk.f32.mxu1 %vm310_vm0, %v2398_v58  ;;  %v1527_v6 = vld [vmem:[#allocation2 + $0x8] sm:$0xff]  ;;  %v17846_v35 = vld [vmem:[#allocation3 + $0x90] sm:$0xff] }
 0x13b   : > { %15780 = vmatpush3.msra.mxu1 %v17541_v49  ;;  %15829 = vmatprep.subr.mxu0 %v17796_v60  ;;  %v1882_v8 = vadd.f32 %v15583_v23, %v1527_v6  ;;  %v1526_v9 = vld [vmem:[#allocation2] sm:$0xff]  ;;  %v2405_v36 = vld [vmem:[#allocation3 + $0x91] sm:$0xff]  ;;  %v2406_v38 = vld [vmem:[#allocation3 + $0xa9] sm:$0xff] }
 0x13c   : > { %15879 = vmatprep.subr.mxu1 %v17801_v62  ;;  %15635 = vmatmul.mubr.msk.f32.gmra.mrb[66].mxu0 %vm310_vm0, %v17807_v1  ;;  %v1881_v49 = vadd.f32 %v1722_v50, %v1526_v9  ;;  %v2404_v50 = vld [vmem:[#allocation3 + $0x89] sm:$0xff]  ;;  %v2407_v42 = vld [vmem:[#allocation3 + $0xb1] sm:$0xff] }
 0x13d   : > { %15685 = vmatmul.mubr.msk.f32.gmra.mrb[66].mxu1 %vm310_vm0, %v2399_v5  ;;  %15637 = vmatprep.mubr.msk.f32.mxu0 %vm310_vm0, %v17817_v48  ;;  %1914 = vst.msk [vmem:[#allocation2 + $0x8] sm:$0xff] %vm632_vm3, %v1882_v8  ;;  %v17856_v40 = vld [vmem:[#allocation3 + $0xb0] sm:$0xff]  ;;  %v17861_v45 = vld [vmem:[#allocation3 + $0xc8] sm:$0xff] }
 0x13e   : > { %15687 = vmatprep.mubr.msk.f32.mxu1 %vm310_vm0, %v2400_v7  ;;  %1913 = vst.msk [vmem:[#allocation2] sm:$0xff] %vm632_vm3, %v1881_v49  ;;  %v1529_v16 = vld [vmem:[#allocation2 + $0x18] sm:$0xff]  ;;  %v17866_v53 = vld [vmem:[#allocation3 + $0xd0] sm:$0xff]  ;;  %v17881_v6 = vld [vmem:[#allocation3 + $0x108] sm:$0xff] }
 0x13f   : > { %v1884_v21 = vadd.f32 %v15586_v51, %v1529_v16  ;;  %v1528_v22 = vld [vmem:[#allocation2 + $0x10] sm:$0xff]  ;;  %v17891_v49 = vld [vmem:[#allocation3 + $0x128] sm:$0xff] }
 0x140   : > { %15638 = vmatmul.mubr.msk.f32.gmra.mrb[68].mxu0 %vm310_vm0, %v17823_v10  ;;  %v1883_v23 = vadd.f32 %v1732_v57, %v1528_v22  ;;  %v2408_v51 = vld [vmem:[#allocation3 + $0xc9] sm:$0xff]  ;;  %v2409_v55 = vld [vmem:[#allocation3 + $0xd1] sm:$0xff] }
 0x141   : > { %15688 = vmatmul.mubr.msk.f32.gmra.mrb[68].mxu1 %vm310_vm0, %v2401_v12  ;;  %15640 = vmatprep.mubr.msk.f32.mxu0 %vm310_vm0, %v17829_v19  ;;  %1916 = vst.msk [vmem:[#allocation2 + $0x18] sm:$0xff] %vm632_vm3, %v1884_v21  ;;  %v17871_v57 = vld [vmem:[#allocation3 + $0xe8] sm:$0xff]  ;;  %v17876_v59 = vld [vmem:[#allocation3 + $0xf0] sm:$0xff] }
 0x142   : > { %15690 = vmatprep.mubr.msk.f32.mxu1 %vm310_vm0, %v2402_v20  ;;  %1915 = vst.msk [vmem:[#allocation2 + $0x10] sm:$0xff] %vm632_vm3, %v1883_v23  ;;  %v2410_v58 = vld [vmem:[#allocation3 + $0xe9] sm:$0xff]  ;;  %v2411_v5 = vld [vmem:[#allocation3 + $0xf1] sm:$0xff] }
 0x143   : > { %v2412_v7 = vld [vmem:[#allocation3 + $0x109] sm:$0xff]  ;;  %v2413_v9 = vld [vmem:[#allocation3 + $0x111] sm:$0xff] }
 0x144   : > { %15641 = vmatmul.mubr.msk.f32.gmra.mrb[70].mxu0 %vm310_vm0, %v17835_v25  ;;  %v17886_v8 = vld [vmem:[#allocation3 + $0x110] sm:$0xff]  ;;  %v17901_v21 = vld [vmem:[#allocation3 + $0x148] sm:$0xff] }
 0x145   : > { %15691 = vmatmul.mubr.msk.f32.gmra.mrb[70].mxu1 %vm310_vm0, %v2403_v31  ;;  %15643 = vmatprep.mubr.msk.f32.mxu0 %vm310_vm0, %v17841_v34  ;;  %v2414_v12 = vld [vmem:[#allocation3 + $0x129] sm:$0xff]  ;;  %v2415_v20 = vld [vmem:[#allocation3 + $0x131] sm:$0xff] }
 0x146   : > { %15693 = vmatprep.mubr.msk.f32.mxu1 %vm310_vm0, %v2404_v50  ;;  %v17896_v16 = vld [vmem:[#allocation3 + $0x130] sm:$0xff]  ;;  %v17911_v50 = vld [vmem:[#allocation3 + $0x168] sm:$0xff] }
 0x147   : > { %v2416_v22 = vld [vmem:[#allocation3 + $0x149] sm:$0xff]  ;;  %v2417_v31 = vld [vmem:[#allocation3 + $0x151] sm:$0xff] }
 0x148   : > { %15644 = vmatmul.mubr.msk.f32.gmra.mrb[72].mxu0 %vm310_vm0, %v17846_v35  ;;  %v17906_v23 = vld [vmem:[#allocation3 + $0x150] sm:$0xff] }
 0x149   : > { %15694 = vmatmul.mubr.msk.f32.gmra.mrb[72].mxu1 %vm310_vm0, %v2405_v36  ;;  %15646 = vmatprep.mubr.msk.f32.mxu0 %vm310_vm0, %v17851_v37  ;;  %v2418_v36 = vld [vmem:[#allocation3 + $0x169] sm:$0xff] }
 0x14a   : > { %15696 = vmatprep.mubr.msk.f32.mxu1 %vm310_vm0, %v2406_v38  ;;  %v17916_v38 = vld [vmem:[#allocation3 + $0x170] sm:$0xff] }
 0x14c   : > { %15647 = vmatmul.mubr.msk.f32.gmra.mrb[74].mxu0 %vm310_vm0, %v17856_v40 }
 0x14d   : > { %15697 = vmatmul.mubr.msk.f32.gmra.mrb[74].mxu1 %vm310_vm0, %v2407_v42  ;;  %15649 = vmatprep.mubr.msk.f32.mxu0 %vm310_vm0, %v17861_v45  ;;  %v2419_v42 = vld [vmem:[#allocation3 + $0x171] sm:$0xff] }
 0x14e   : > { %15699 = vmatprep.mubr.msk.f32.mxu1 %vm310_vm0, %v2408_v51  ;;  %v17921_v51 = vld [vmem:[#allocation3 + $0x188] sm:$0xff] }
 0x150   : > { %15650 = vmatmul.mubr.msk.f32.gmra.mrb[76].mxu0 %vm310_vm0, %v17866_v53 }
 0x151   : > { %15700 = vmatmul.mubr.msk.f32.gmra.mrb[76].mxu1 %vm310_vm0, %v2409_v55  ;;  %15652 = vmatprep.mubr.msk.f32.mxu0 %vm310_vm0, %v17871_v57  ;;  %v2420_v55 = vld [vmem:[#allocation3 + $0x189] sm:$0xff] }
 0x152   : > { %15702 = vmatprep.mubr.msk.f32.mxu1 %vm310_vm0, %v2410_v58  ;;  %v17926_v58 = vld [vmem:[#allocation3 + $0x190] sm:$0xff] }
 0x154   : > { %15653 = vmatmul.mubr.msk.f32.gmra.mrb[78].mxu0 %vm310_vm0, %v17876_v59 }
 0x155   : > { %15703 = vmatmul.mubr.msk.f32.gmra.mrb[78].mxu1 %vm310_vm0, %v2411_v5  ;;  %15655 = vmatprep.mubr.msk.f32.mxu0 %vm310_vm0, %v17881_v6  ;;  %v2421_v5 = vld [vmem:[#allocation3 + $0x191] sm:$0xff] }
 0x156   : > { %15705 = vmatprep.mubr.msk.f32.mxu1 %vm310_vm0, %v2412_v7  ;;  %v17931_v7 = vld [vmem:[#allocation3 + $0x1a8] sm:$0xff] }
 0x158   : > { %15656 = vmatmul.mubr.msk.f32.gmra.mrb[80].mxu0 %vm310_vm0, %v17886_v8 }
 0x159   : > { %15706 = vmatmul.mubr.msk.f32.gmra.mrb[80].mxu1 %vm310_vm0, %v2413_v9  ;;  %15658 = vmatprep.mubr.msk.f32.mxu0 %vm310_vm0, %v17891_v49  ;;  %v2422_v9 = vld [vmem:[#allocation3 + $0x1a9] sm:$0xff] }
 0x15a   : > { %15708 = vmatprep.mubr.msk.f32.mxu1 %vm310_vm0, %v2414_v12  ;;  %v17936_v12 = vld [vmem:[#allocation3 + $0x1b0] sm:$0xff] }
 0x15c   : > { %15659 = vmatmul.mubr.msk.f32.gmra.mrb[82].mxu0 %vm310_vm0, %v17896_v16 }
 0x15d   : > { %15709 = vmatmul.mubr.msk.f32.gmra.mrb[82].mxu1 %vm310_vm0, %v2415_v20  ;;  %15661 = vmatprep.mubr.msk.f32.mxu0 %vm310_vm0, %v17901_v21  ;;  %v2423_v20 = vld [vmem:[#allocation3 + $0x1b1] sm:$0xff] }
 0x15e   : > { %15711 = vmatprep.mubr.msk.f32.mxu1 %vm310_vm0, %v2416_v22  ;;  %v17941_v22 = vld [vmem:[#allocation3 + $0x1c8] sm:$0xff] }
 0x15f   : > { %21259 = vst [vmem:[#allocation8_spill] sm:$0xff] %v17941_v22 }
 0x160   : > { %15662 = vmatmul.mubr.msk.f32.gmra.mrb[84].mxu0 %vm310_vm0, %v17906_v23 }
 0x161   : > { %15712 = vmatmul.mubr.msk.f32.gmra.mrb[84].mxu1 %vm310_vm0, %v2417_v31  ;;  %15664 = vmatprep.mubr.msk.f32.mxu0 %vm310_vm0, %v17911_v50  ;;  %v2424_v31 = vld [vmem:[#allocation3 + $0x1c9] sm:$0xff] }
 0x162   : > { %15714 = vmatprep.mubr.msk.f32.mxu1 %vm310_vm0, %v2418_v36  ;;  %v17946_v36 = vld [vmem:[#allocation3 + $0x1d0] sm:$0xff] }
 0x163   : > { %21260 = vst [vmem:[#allocation9_spill] sm:$0xff] %v17946_v36 }
 0x164   : > { %15665 = vmatmul.mubr.msk.f32.gmra.mrb[86].mxu0 %vm310_vm0, %v17916_v38 }
 0x165   : > { %15715 = vmatmul.mubr.msk.f32.gmra.mrb[86].mxu1 %vm310_vm0, %v2419_v42  ;;  %15667 = vmatprep.mubr.msk.f32.mxu0 %vm310_vm0, %v17921_v51  ;;  %v2425_v42 = vld [vmem:[#allocation3 + $0x1d1] sm:$0xff] }
 0x166   : > { %15717 = vmatprep.mubr.msk.f32.mxu1 %vm310_vm0, %v2420_v55  ;;  %v17951_v55 = vld [vmem:[#allocation3 + $0x1e8] sm:$0xff] }
 0x167   : > { %21261 = vst [vmem:[#allocation10_spill] sm:$0xff] %v17951_v55 }
 0x168   : > { %15668 = vmatmul.mubr.msk.f32.gmra.mrb[88].mxu0 %vm310_vm0, %v17926_v58 }
 0x169   : > { %15718 = vmatmul.mubr.msk.f32.gmra.mrb[88].mxu1 %vm310_vm0, %v2421_v5  ;;  %15670 = vmatprep.mubr.msk.f32.mxu0 %vm310_vm0, %v17931_v7  ;;  %v2426_v5 = vld [vmem:[#allocation3 + $0x1e9] sm:$0xff] }
 0x16a   : > { %15720 = vmatprep.mubr.msk.f32.mxu1 %vm310_vm0, %v2422_v9  ;;  %v2847_v9 = vld [vmem:[#allocation3 + $0xa] sm:$0xff] }
 0x16c   : > { %15671 = vmatmul.mubr.msk.f32.gmra.mrb[90].mxu0 %vm310_vm0, %v17936_v12 }
 0x16d   : > { %15721 = vmatmul.mubr.msk.f32.gmra.mrb[90].mxu1 %vm310_vm0, %v2423_v20  ;;  %15673 = vmatprep.mubr.msk.f32.mxu0 %vm310_vm0, %v17941_v22  ;;  %v17956_v20 = vld [vmem:[#allocation3 + $0x1f0] sm:$0xff] }
 0x16e   : > { %15723 = vmatprep.mubr.msk.f32.mxu1 %vm310_vm0, %v2424_v31  ;;  %v2427_v31 = vld [vmem:[#allocation3 + $0x1f1] sm:$0xff] }
 0x16f   : > { %v17963_v22 = vld [vmem:[#allocation3 + $0x2a] sm:$0xff] }
 0x170   : > { %15674 = vmatmul.mubr.msk.f32.gmra.mrb[92].mxu0 %vm310_vm0, %v17946_v36  ;;  %v2848_v36 = vld [vmem:[#allocation3 + $0x12] sm:$0xff] }
 0x171   : > { %15724 = vmatmul.mubr.msk.f32.gmra.mrb[92].mxu1 %vm310_vm0, %v2425_v42  ;;  %15676 = vmatprep.mubr.msk.f32.mxu0 %vm310_vm0, %v17951_v55  ;;  %v16872_v42 = vld [vmem:[#allocation3 + $0x26] sm:$0xff] }
 0x172   : > { %15726 = vmatprep.mubr.msk.f32.mxu1 %vm310_vm0, %v2426_v5  ;;  %v16873_v5 = vld [vmem:[#allocation3 + $0x2e] sm:$0xff]  ;;  %v17970_v55 = vld [vmem:[%s21250_s4 + $0x40] sm:$0xff] }
 0x174   : > { %15677 = vmatmul.mubr.msk.f32.gmra.mrb[94].mxu0 %vm310_vm0, %v17956_v20 }
 0x175   : > { %15727 = vmatmul.mubr.msk.f32.gmra.mrb[94].mxu1 %vm310_vm0, %v2427_v31  ;;  %15731 = vmatprep.mubr.msk.f32.mxu0 %vm310_vm0, %v2847_v9  ;;  %v17975_v9 = vld [vmem:[%s21250_s4 + $0x48] sm:$0xff]  ;;  %v17980_v31 = vld [vmem:[#allocation3 + $0x32] sm:$0xff] }
 0x176   : > { %15781 = vmatprep.mubr.msk.f32.mxu1 %vm310_vm0, %v16872_v42  ;;  %v3330_v42 = vld [vmem:[#allocation3 + $0x20e] sm:$0xff] }
 0x178   : > { %15732 = vmatmul.mubr.msk.f32.vlgmr.msra.gmra.mrb[96].mxu0 %vm310_vm0, %v2848_v36  ;;  %v2855_v36 = vld [vmem:[#allocation3 + $0x8a] sm:$0xff] }
 0x179   : > { %15782 = vmatmul.mubr.msk.f32.vlgmr.msra.gmra.mrb[96].mxu1 %vm310_vm0, %v16873_v5  ;;  %15830 = vmatpush3.msra.mxu0 %v17796_v60  ;;  %v17991_v60 = vld [vmem:[#allocation3 + $0x4a] sm:$0xff]  ;;  %v2878_v5 = vld [vmem:[#allocation3 + $0x1f2] sm:$0xff] }
 0x17a   : > { %15784 = vmatprep.mubr.msk.f32.mxu1 %vm310_vm0, %v17567_v15  ;;  %15734 = vmatprep.mubr.msk.f32.mxu0 %vm310_vm0, %v17963_v22  ;;  %v2852_v15 = vld [vmem:[#allocation3 + $0x52] sm:$0xff] }
 0x17b   : > { %15880 = vmatpush3.msra.mxu1 %v17801_v62  ;;  %15929 = vmatprep.subr.mxu0 %v17970_v55  ;;  %v2853_v62 = vld [vmem:[#allocation3 + $0x6a] sm:$0xff] }
 0x17c   : > { %15979 = vmatprep.subr.mxu1 %v17975_v9  ;;  %15735 = vmatmul.mubr.msk.f32.gmra.mrb[98].mxu0 %vm310_vm0, %v17980_v31 }
 0x17d   : > { %15785 = vmatmul.mubr.msk.f32.gmra.mrb[98].mxu1 %vm310_vm0, %v17569_v17  ;;  %15737 = vmatprep.mubr.msk.f32.mxu0 %vm310_vm0, %v17991_v60  ;;  %v2854_v17 = vld [vmem:[#allocation3 + $0x72] sm:$0xff] }
 0x17e   : > { %15787 = vmatprep.mubr.msk.f32.mxu1 %vm310_vm0, %v17583_v27  ;;  %v2856_v27 = vld [vmem:[#allocation3 + $0x92] sm:$0xff] }
 0x180   : > { %15738 = vmatmul.mubr.msk.f32.gmra.mrb[100].mxu0 %vm310_vm0, %v2852_v15  ;;  %v18085_v15 = vld [vmem:[%s21250_s4 + $0x50] sm:$0xff] }
 0x181   : > { %15788 = vmatmul.mubr.msk.f32.gmra.mrb[100].mxu1 %vm310_vm0, %v17585_v29  ;;  %15740 = vmatprep.mubr.msk.f32.mxu0 %vm310_vm0, %v2853_v62  ;;  %v2857_v29 = vld [vmem:[#allocation3 + $0xaa] sm:$0xff]  ;;  %v18090_v62 = vld [vmem:[%s21250_s4 + $0x58] sm:$0xff] }
 0x182   : > { %15790 = vmatprep.mubr.msk.f32.mxu1 %vm310_vm0, %v17599_v39  ;;  %v2858_v39 = vld [vmem:[#allocation3 + $0xb2] sm:$0xff] }
 0x184   : > { %15741 = vmatmul.mubr.msk.f32.gmra.mrb[102].mxu0 %vm310_vm0, %v2854_v17 }
 0x185   : > { %15791 = vmatmul.mubr.msk.f32.gmra.mrb[102].mxu1 %vm310_vm0, %v17601_v41  ;;  %15743 = vmatprep.mubr.msk.f32.mxu0 %vm310_vm0, %v2855_v36  ;;  %v2859_v41 = vld [vmem:[#allocation3 + $0xca] sm:$0xff] }
 0x186   : > { %15793 = vmatprep.mubr.msk.f32.mxu1 %vm310_vm0, %v17615_v54  ;;  %v2860_v54 = vld [vmem:[#allocation3 + $0xd2] sm:$0xff] }
 0x187   : > { %v3765_v36 = vld [vmem:[#allocation3 + $0x10f] sm:$0xff] }
 0x188   : > { %15744 = vmatmul.mubr.msk.f32.gmra.mrb[104].mxu0 %vm310_vm0, %v2856_v27 }
 0x189   : > { %15794 = vmatmul.mubr.msk.f32.gmra.mrb[104].mxu1 %vm310_vm0, %v17617_v56  ;;  %15746 = vmatprep.mubr.msk.f32.mxu0 %vm310_vm0, %v2857_v29  ;;  %v2861_v56 = vld [vmem:[#allocation3 + $0xea] sm:$0xff]  ;;  %v1080_v29 = vld [vmem:[#allocation2 + $0x20] sm:$0xff] }
 0x18a   : > { %15796 = vmatprep.mubr.msk.f32.mxu1 %vm310_vm0, %v17631_v2  ;;  %v2862_v2 = vld [vmem:[#allocation3 + $0xf2] sm:$0xff] }
 0x18c   : > { %15747 = vmatmul.mubr.msk.f32.gmra.mrb[106].mxu0 %vm310_vm0, %v2858_v39 }
 0x18d   : > { %15797 = vmatmul.mubr.msk.f32.gmra.mrb[106].mxu1 %vm310_vm0, %v17633_v4  ;;  %15749 = vmatprep.mubr.msk.f32.mxu0 %vm310_vm0, %v2859_v41  ;;  %v2863_v4 = vld [vmem:[#allocation3 + $0x10a] sm:$0xff] }
 0x18e   : > { %15799 = vmatprep.mubr.msk.f32.mxu1 %vm310_vm0, %v17647_v14  ;;  %v2864_v14 = vld [vmem:[#allocation3 + $0x112] sm:$0xff] }
 0x190   : > { %15750 = vmatmul.mubr.msk.f32.gmra.mrb[108].mxu0 %vm310_vm0, %v2860_v54 }
 0x191   : > { %15800 = vmatmul.mubr.msk.f32.gmra.mrb[108].mxu1 %vm310_vm0, %v17649_v18  ;;  %15752 = vmatprep.mubr.msk.f32.mxu0 %vm310_vm0, %v2861_v56  ;;  %v2865_v18 = vld [vmem:[#allocation3 + $0x12a] sm:$0xff] }
 0x192   : > { %15802 = vmatprep.mubr.msk.f32.mxu1 %vm310_vm0, %v17663_v30  ;;  %v2866_v30 = vld [vmem:[#allocation3 + $0x132] sm:$0xff] }
 0x194   : > { %15753 = vmatmul.mubr.msk.f32.gmra.mrb[110].mxu0 %vm310_vm0, %v2862_v2  ;;  %v3767_v2 = vld [vmem:[#allocation3 + $0x12f] sm:$0xff] }
 0x195   : > { %15803 = vmatmul.mubr.msk.f32.gmra.mrb[110].mxu1 %vm310_vm0, %v17665_v32  ;;  %15755 = vmatprep.mubr.msk.f32.mxu0 %vm310_vm0, %v2863_v4  ;;  %v2867_v32 = vld [vmem:[#allocation3 + $0x14a] sm:$0xff] }
 0x196   : > { %15805 = vmatprep.mubr.msk.f32.mxu1 %vm310_vm0, %v17679_v44  ;;  %v2868_v44 = vld [vmem:[#allocation3 + $0x152] sm:$0xff] }
 0x198   : > { %15756 = vmatmul.mubr.msk.f32.gmra.mrb[112].mxu0 %vm310_vm0, %v2864_v14  ;;  %v1082_v14 = vld [vmem:[#allocation2 + $0x30] sm:$0xff] }
 0x199   : > { %15806 = vmatmul.mubr.msk.f32.gmra.mrb[112].mxu1 %vm310_vm0, %v17681_v46  ;;  %15758 = vmatprep.mubr.msk.f32.mxu0 %vm310_vm0, %v2865_v18  ;;  %v2869_v46 = vld [vmem:[#allocation3 + $0x16a] sm:$0xff] }
 0x19a   : > { %15808 = vmatprep.mubr.msk.f32.mxu1 %vm310_vm0, %v17695_v61  ;;  %v2870_v61 = vld [vmem:[#allocation3 + $0x172] sm:$0xff] }
 0x19c   : > { %15759 = vmatmul.mubr.msk.f32.gmra.mrb[114].mxu0 %vm310_vm0, %v2866_v30 }
 0x19d   : > { %15809 = vmatmul.mubr.msk.f32.gmra.mrb[114].mxu1 %vm310_vm0, %v17697_v63  ;;  %15761 = vmatprep.mubr.msk.f32.mxu0 %vm310_vm0, %v2867_v32  ;;  %v2871_v63 = vld [vmem:[#allocation3 + $0x18a] sm:$0xff] }
 0x19e   : > { %15811 = vmatprep.mubr.msk.f32.mxu1 %vm310_vm0, %v17711_v11  ;;  %v2872_v11 = vld [vmem:[#allocation3 + $0x192] sm:$0xff] }
 0x1a0   : > { %15762 = vmatmul.mubr.msk.f32.gmra.mrb[116].mxu0 %vm310_vm0, %v2868_v44 }
 0x1a1   : > { %15812 = vmatmul.mubr.msk.f32.gmra.mrb[116].mxu1 %vm310_vm0, %v17713_v13  ;;  %15764 = vmatprep.mubr.msk.f32.mxu0 %vm310_vm0, %v2869_v46  ;;  %v2873_v13 = vld [vmem:[#allocation3 + $0x1aa] sm:$0xff] }
 0x1a2   : > { %15814 = vmatprep.mubr.msk.f32.mxu1 %vm310_vm0, %v17727_v28  ;;  %v2874_v28 = vld [vmem:[#allocation3 + $0x1b2] sm:$0xff] }
 0x1a4   : > { %15765 = vmatmul.mubr.msk.f32.gmra.mrb[118].mxu0 %vm310_vm0, %v2870_v61  ;;  %v3769_v61 = vld [vmem:[#allocation3 + $0x14f] sm:$0xff] }
 0x1a5   : > { %15815 = vmatmul.mubr.msk.f32.gmra.mrb[118].mxu1 %vm310_vm0, %v17729_v33  ;;  %15767 = vmatprep.mubr.msk.f32.mxu0 %vm310_vm0, %v2871_v63  ;;  %v2875_v33 = vld [vmem:[#allocation3 + $0x1ca] sm:$0xff] }
 0x1a6   : > { %15817 = vmatprep.mubr.msk.f32.mxu1 %vm310_vm0, %v17742_v43  ;;  %v3329_v43 = vld [vmem:[#allocation3 + $0x206] sm:$0xff] }
 0x1a8   : > { %15768 = vmatmul.mubr.msk.f32.gmra.mrb[120].mxu0 %vm310_vm0, %v2872_v11  ;;  %v1084_v11 = vld [vmem:[#allocation2 + $0x40] sm:$0xff] }
 0x1a9   : > { %15818 = vmatmul.mubr.msk.f32.gmra.mrb[120].mxu1 %vm310_vm0, %v17744_v47  ;;  %15770 = vmatprep.mubr.msk.f32.mxu0 %vm310_vm0, %v2873_v13  ;;  %v2876_v47 = vld [vmem:[#allocation3 + $0x1d2] sm:$0xff] }
 0x1aa   : > { %15820 = vmatprep.mubr.msk.f32.mxu1 %vm310_vm0, %v17757_v0  ;;  %v2877_v0 = vld [vmem:[#allocation3 + $0x1ea] sm:$0xff] }
 0x1ac   : > { %15771 = vmatmul.mubr.msk.f32.gmra.mrb[122].mxu0 %vm310_vm0, %v2874_v28 }
 0x1ad   : > { %15821 = vmatmul.mubr.msk.f32.gmra.mrb[122].mxu1 %vm310_vm0, %v17759_v3  ;;  %15773 = vmatprep.mubr.msk.f32.mxu0 %vm310_vm0, %v2875_v33  ;;  %v3750_v3 = vld [vmem:[#allocation3 + $0x27] sm:$0xff] }
 0x1ae   : > { %15823 = vmatprep.mubr.msk.f32.mxu1 %vm310_vm0, %v17773_v24  ;;  %v3751_v24 = vld [vmem:[#allocation3 + $0x2f] sm:$0xff] }
 0x1b0   : > { %15774 = vmatmul.mubr.msk.f32.gmra.mrb[124].mxu0 %vm310_vm0, %v2876_v47 }
 0x1b1   : > { %15824 = vmatmul.mubr.msk.f32.gmra.mrb[124].mxu1 %vm310_vm0, %v17775_v26  ;;  %15776 = vmatprep.mubr.msk.f32.mxu0 %vm310_vm0, %v2877_v0  ;;  %v3752_v26 = vld [vmem:[#allocation3 + $0x47] sm:$0xff] }
 0x1b2   : > { %15826 = vmatprep.mubr.msk.f32.mxu1 %vm310_vm0, %v3329_v43 }
 0x1b4   : > { %15777 = vmatmul.mubr.msk.f32.gmra.mrb[126].mxu0 %vm310_vm0, %v2878_v5 }
 0x1b5   : > { %15827 = vmatmul.mubr.msk.f32.gmra.mrb[126].mxu1 %vm310_vm0, %v3330_v42  ;;  %15831 = vmatprep.mubr.msk.f32.mxu0 %vm310_vm0, %v3750_v3  ;;  %v1087_v42 = vld [vmem:[#allocation2 + $0x58] sm:$0xff] }
 0x1b6   : > { %15881 = vmatprep.mubr.msk.f32.mxu1 %vm310_vm0, %v17789_v52  ;;  %v3753_v52 = vld [vmem:[#allocation3 + $0x4f] sm:$0xff] }
 0x1b8   : > { %15832 = vmatmul.mubr.msk.f32.vlgmr.msra.gmra.mrb[128].mxu0 %vm310_vm0, %v3751_v24  ;;  %v3771_v24 = vld [vmem:[#allocation3 + $0x16f] sm:$0xff] }
 0x1b9   : > { %15882 = vmatmul.mubr.msk.f32.vlgmr.msra.gmra.mrb[128].mxu1 %vm310_vm0, %v17807_v1  ;;  %15930 = vmatpush3.msra.mxu0 %v17970_v55  ;;  %v3754_v1 = vld [vmem:[#allocation3 + $0x67] sm:$0xff]  ;;  %v3755_v55 = vld [vmem:[#allocation3 + $0x6f] sm:$0xff] }
 0x1ba   : > { %15834 = vmatprep.mubr.msk.f32.mxu0 %vm310_vm0, %v3752_v26  ;;  %15884 = vmatprep.mubr.msk.f32.mxu1 %vm310_vm0, %v17817_v48  ;;  %v3756_v48 = vld [vmem:[#allocation3 + $0x87] sm:$0xff]  ;;  %v1086_v26 = vld [vmem:[#allocation2 + $0x50] sm:$0xff] }
 0x1bb   : > { %15980 = vmatpush3.msra.mxu1 %v17975_v9  ;;  %16029 = vmatprep.subr.mxu0 %v18085_v15  ;;  %v3757_v9 = vld [vmem:[#allocation3 + $0x8f] sm:$0xff] }
 0x1bc   : > { %16079 = vmatprep.subr.mxu1 %v18090_v62  ;;  %15835 = vmatmul.mubr.msk.f32.gmra.mrb[130].mxu0 %vm310_vm0, %v3753_v52 }
 0x1bd   : > { %15885 = vmatmul.mubr.msk.f32.gmra.mrb[130].mxu1 %vm310_vm0, %v17823_v10  ;;  %15837 = vmatprep.mubr.msk.f32.mxu0 %vm310_vm0, %v3754_v1  ;;  %v3758_v10 = vld [vmem:[#allocation3 + $0xa7] sm:$0xff] }
 0x1be   : > { %15887 = vmatprep.mubr.msk.f32.mxu1 %vm310_vm0, %v17829_v19  ;;  %v3759_v19 = vld [vmem:[#allocation3 + $0xaf] sm:$0xff] }
 0x1c0   : > { %15838 = vmatmul.mubr.msk.f32.gmra.mrb[132].mxu0 %vm310_vm0, %v3755_v55 }
 0x1c1   : > { %15888 = vmatmul.mubr.msk.f32.gmra.mrb[132].mxu1 %vm310_vm0, %v17835_v25  ;;  %15840 = vmatprep.mubr.msk.f32.mxu0 %vm310_vm0, %v3756_v48  ;;  %v3760_v25 = vld [vmem:[#allocation3 + $0xc7] sm:$0xff] }
 0x1c2   : > { %15890 = vmatprep.mubr.msk.f32.mxu1 %vm310_vm0, %v17841_v34  ;;  %v3761_v34 = vld [vmem:[#allocation3 + $0xcf] sm:$0xff] }
 0x1c4   : > { %15841 = vmatmul.mubr.msk.f32.gmra.mrb[134].mxu0 %vm310_vm0, %v3757_v9 }
 0x1c5   : > { %15891 = vmatmul.mubr.msk.f32.gmra.mrb[134].mxu1 %vm310_vm0, %v17846_v35  ;;  %15843 = vmatprep.mubr.msk.f32.mxu0 %vm310_vm0, %v3758_v10  ;;  %v3762_v35 = vld [vmem:[#allocation3 + $0xe7] sm:$0xff] }
 0x1c6   : > { %15893 = vmatprep.mubr.msk.f32.mxu1 %vm310_vm0, %v17851_v37  ;;  %v3763_v37 = vld [vmem:[#allocation3 + $0xef] sm:$0xff] }
 0x1c8   : > { %15844 = vmatmul.mubr.msk.f32.gmra.mrb[136].mxu0 %vm310_vm0, %v3759_v19 }
 0x1c9   : > { %15894 = vmatmul.mubr.msk.f32.gmra.mrb[136].mxu1 %vm310_vm0, %v17856_v40  ;;  %15846 = vmatprep.mubr.msk.f32.mxu0 %vm310_vm0, %v3760_v25  ;;  %v3764_v40 = vld [vmem:[#allocation3 + $0x107] sm:$0xff] }
 0x1ca   : > { %15896 = vmatprep.mubr.msk.f32.mxu1 %vm310_vm0, %v17861_v45  ;;  %v1081_v45 = vld [vmem:[#allocation2 + $0x28] sm:$0xff] }
 0x1cb   : > { %v1089_v25 = vld [vmem:[#allocation2 + $0x68] sm:$0xff] }
 0x1cc   : > { %15847 = vmatmul.mubr.msk.f32.gmra.mrb[138].mxu0 %vm310_vm0, %v3761_v34 }
 0x1cd   : > { %15897 = vmatmul.mubr.msk.f32.gmra.mrb[138].mxu1 %vm310_vm0, %v17866_v53  ;;  %15849 = vmatprep.mubr.msk.f32.mxu0 %vm310_vm0, %v3762_v35  ;;  %v3773_v35 = vld [vmem:[#allocation3 + $0x18f] sm:$0xff] }
 0x1ce   : > { %15899 = vmatprep.mubr.msk.f32.mxu1 %vm310_vm0, %v17871_v57 }
 0x1d0   : > { %15850 = vmatmul.mubr.msk.f32.gmra.mrb[140].mxu0 %vm310_vm0, %v3763_v37 }
 0x1d1   : > { %15900 = vmatmul.mubr.msk.f32.gmra.mrb[140].mxu1 %vm310_vm0, %v17876_v59  ;;  %15852 = vmatprep.mubr.msk.f32.mxu0 %vm310_vm0, %v3764_v40  ;;  %v3766_v59 = vld [vmem:[#allocation3 + $0x127] sm:$0xff] }
 0x1d2   : > { %15902 = vmatprep.mubr.msk.f32.mxu1 %vm310_vm0, %v17881_v6  ;;  %v1083_v6 = vld [vmem:[#allocation2 + $0x38] sm:$0xff]  ;;  %v1088_v40 = vld [vmem:[#allocation2 + $0x60] sm:$0xff] }
 0x1d3   : > { %v15539_v53 = vpop.f32.mrb[36].mxu0 }
 0x1d4   : > { %v15589_v17 = vpop.f32.mrb[36].mxu1  ;;  %v1435_v27 = vadd.f32 %v15539_v53, %v1081_v45  ;;  %v1291_v39 = vpop.f32.mrb[37].mxu0  ;;  %15853 = vmatmul.mubr.msk.f32.gmra.mrb[142].mxu0 %vm310_vm0, %v3765_v36 }
 0x1d5   : > { %v1742_v57 = vpop.f32.mrb[37].mxu1  ;;  %15903 = vmatmul.mubr.msk.f32.gmra.mrb[142].mxu1 %vm310_vm0, %v17886_v8  ;;  %v1434_v41 = vadd.f32 %v1291_v39, %v1080_v29  ;;  %15855 = vmatprep.mubr.msk.f32.mxu0 %vm310_vm0, %v3766_v59  ;;  %v3768_v8 = vld [vmem:[#allocation3 + $0x147] sm:$0xff] }
 0x1d6   : > { %15905 = vmatprep.mubr.msk.f32.mxu1 %vm310_vm0, %v17891_v49  ;;  %1467 = vst.msk [vmem:[#allocation2 + $0x28] sm:$0xff] %vm632_vm3, %v1435_v27  ;;  %v1085_v49 = vld [vmem:[#allocation2 + $0x48] sm:$0xff] }
 0x1d7   : > { %1466 = vst.msk [vmem:[#allocation2 + $0x20] sm:$0xff] %vm632_vm3, %v1434_v41  ;;  %v15542_v54 = vpop.f32.mrb[38].mxu0  ;;  %v3775_v41 = vld [vmem:[#allocation3 + $0x1af] sm:$0xff] }
 0x1d8   : > { %v15592_v56 = vpop.f32.mrb[38].mxu1  ;;  %v1437_v4 = vadd.f32 %v15542_v54, %v1083_v6  ;;  %v1301_v18 = vpop.f32.mrb[39].mxu0  ;;  %15856 = vmatmul.mubr.msk.f32.gmra.mrb[144].mxu0 %vm310_vm0, %v3767_v2  ;;  %v1090_v54 = vld [vmem:[#allocation2 + $0x70] sm:$0xff] }
 0x1d9   : > { %v1752_v30 = vpop.f32.mrb[39].mxu1  ;;  %15906 = vmatmul.mubr.msk.f32.gmra.mrb[144].mxu1 %vm310_vm0, %v17896_v16  ;;  %v1436_v32 = vadd.f32 %v1301_v18, %v1082_v14  ;;  %15858 = vmatprep.mubr.msk.f32.mxu0 %vm310_vm0, %v3768_v8  ;;  %v3770_v16 = vld [vmem:[#allocation3 + $0x167] sm:$0xff] }
 0x1da   : > { %15908 = vmatprep.mubr.msk.f32.mxu1 %vm310_vm0, %v17901_v21  ;;  %1469 = vst.msk [vmem:[#allocation2 + $0x38] sm:$0xff] %vm632_vm3, %v1437_v4  ;;  %v21262_v18 = vld [vmem:[#allocation8_spill] sm:$0xff] }
 0x1db   : > { %1468 = vst.msk [vmem:[#allocation2 + $0x30] sm:$0xff] %vm632_vm3, %v1436_v32  ;;  %v15545_v44 = vpop.f32.mrb[40].mxu0 }
 0x1dc   : > { %v15595_v46 = vpop.f32.mrb[40].mxu1  ;;  %v1439_v63 = vadd.f32 %v15545_v44, %v1085_v49  ;;  %v1311_v13 = vpop.f32.mrb[41].mxu0  ;;  %15859 = vmatmul.mubr.msk.f32.gmra.mrb[146].mxu0 %vm310_vm0, %v3769_v61  ;;  %v1093_v49 = vld [vmem:[#allocation2 + $0x88] sm:$0xff] }
 0x1dd   : > { %v1762_v28 = vpop.f32.mrb[41].mxu1  ;;  %15909 = vmatmul.mubr.msk.f32.gmra.mrb[146].mxu1 %vm310_vm0, %v17906_v23  ;;  %v1531_v33 = vld [vmem:[#allocation2 + $0x28] sm:$0xff]  ;;  %v1438_v21 = vadd.f32 %v1311_v13, %v1084_v11  ;;  %15861 = vmatprep.mubr.msk.f32.mxu0 %vm310_vm0, %v3770_v16 }
 0x1de   : > { %15911 = vmatprep.mubr.msk.f32.mxu1 %vm310_vm0, %v17911_v50  ;;  %v1886_v43 = vadd.f32 %v15589_v17, %v1531_v33  ;;  %v1530_v47 = vld [vmem:[#allocation2 + $0x20] sm:$0xff]  ;;  %1471 = vst.msk [vmem:[#allocation2 + $0x48] sm:$0xff] %vm632_vm3, %v1439_v63 }
 0x1df   : > { %v1885_v0 = vadd.f32 %v1742_v57, %v1530_v47  ;;  %1470 = vst.msk [vmem:[#allocation2 + $0x40] sm:$0xff] %vm632_vm3, %v1438_v21  ;;  %v15548_v3 = vpop.f32.mrb[42].mxu0  ;;  %v3772_v50 = vld [vmem:[#allocation3 + $0x187] sm:$0xff]  ;;  %v1091_v57 = vld [vmem:[#allocation2 + $0x78] sm:$0xff] }
 0x1e0   : > { %v15598_v5 = vpop.f32.mrb[42].mxu1  ;;  %1918 = vst.msk [vmem:[#allocation2 + $0x28] sm:$0xff] %vm632_vm3, %v1886_v43  ;;  %v1441_v23 = vadd.f32 %v15548_v3, %v1087_v42  ;;  %v1321_v52 = vpop.f32.mrb[43].mxu0  ;;  %15862 = vmatmul.mubr.msk.f32.gmra.mrb[148].mxu0 %vm310_vm0, %v3771_v24  ;;  %v1092_v63 = vld [vmem:[#allocation2 + $0x80] sm:$0xff]  ;;  %v21264_v43 = vld [vmem:[#allocation10_spill] sm:$0xff]  ;;  %v1095_v3 = vld [vmem:[#allocation2 + $0x98] sm:$0xff] }
 0x1e1   : > { %v1772_v1 = vpop.f32.mrb[43].mxu1  ;;  %15912 = vmatmul.mubr.msk.f32.gmra.mrb[148].mxu1 %vm310_vm0, %v17916_v38  ;;  %1917 = vst.msk [vmem:[#allocation2 + $0x20] sm:$0xff] %vm632_vm3, %v1885_v0  ;;  %v1533_v55 = vld [vmem:[#allocation2 + $0x38] sm:$0xff]  ;;  %v1440_v48 = vadd.f32 %v1321_v52, %v1086_v26  ;;  %15864 = vmatprep.mubr.msk.f32.mxu0 %vm310_vm0, %v3772_v50  ;;  %v3778_v16 = vld [vmem:[#allocation3 + $0x1e7] sm:$0xff]  ;;  %v1094_v52 = vld [vmem:[#allocation2 + $0x90] sm:$0xff] }
 0x1e2   : > { %15914 = vmatprep.mubr.msk.f32.mxu1 %vm310_vm0, %v17921_v51  ;;  %v1888_v9 = vadd.f32 %v15592_v56, %v1533_v55  ;;  %v1532_v10 = vld [vmem:[#allocation2 + $0x30] sm:$0xff]  ;;  %1473 = vst.msk [vmem:[#allocation2 + $0x58] sm:$0xff] %vm632_vm3, %v1441_v23  ;;  %v3774_v51 = vld [vmem:[#allocation3 + $0x1a7] sm:$0xff] }
 0x1e3   : > { %v1887_v19 = vadd.f32 %v1752_v30, %v1532_v10  ;;  %1472 = vst.msk [vmem:[#allocation2 + $0x50] sm:$0xff] %vm632_vm3, %v1440_v48  ;;  %v15551_v34 = vpop.f32.mrb[44].mxu0  ;;  %v3779_v23 = vld [vmem:[#allocation3 + $0x1ef] sm:$0xff]  ;;  %v3780_v55 = vld [vmem:[#allocation3 + $0x207] sm:$0xff] }
 0x1e4   : > { %v15601_v38 = vpop.f32.mrb[44].mxu1  ;;  %1920 = vst.msk [vmem:[#allocation2 + $0x38] sm:$0xff] %vm632_vm3, %v1888_v9  ;;  %v1443_v37 = vadd.f32 %v15551_v34, %v1089_v25  ;;  %v1331_v45 = vpop.f32.mrb[45].mxu0  ;;  %15865 = vmatmul.mubr.msk.f32.gmra.mrb[150].mxu0 %vm310_vm0, %v3773_v35  ;;  %v4231_v48 = vld [vmem:[#allocation3 + $0x208] sm:$0xff] }
 0x1e5   : > { %v1782_v53 = vpop.f32.mrb[45].mxu1  ;;  %15915 = vmatmul.mubr.msk.f32.gmra.mrb[150].mxu1 %vm310_vm0, %v17926_v58  ;;  %1919 = vst.msk [vmem:[#allocation2 + $0x30] sm:$0xff] %vm632_vm3, %v1887_v19  ;;  %v1535_v17 = vld [vmem:[#allocation2 + $0x48] sm:$0xff]  ;;  %v1442_v36 = vadd.f32 %v1331_v45, %v1088_v40  ;;  %15867 = vmatprep.mubr.msk.f32.mxu0 %vm310_vm0, %v3774_v51  ;;  %v4232_v45 = vld [vmem:[#allocation3 + $0x210] sm:$0xff]  ;;  %v1096_v51 = vld [vmem:[#allocation2 + $0xa0] sm:$0xff] }
 0x1e6   : > { %15917 = vmatprep.mubr.msk.f32.mxu1 %vm310_vm0, %v17931_v7  ;;  %v1890_v27 = vadd.f32 %v15595_v46, %v1535_v17  ;;  %v1534_v29 = vld [vmem:[#allocation2 + $0x40] sm:$0xff]  ;;  %1475 = vst.msk [vmem:[#allocation2 + $0x68] sm:$0xff] %vm632_vm3, %v1443_v37  ;;  %v3777_v46 = vld [vmem:[#allocation3 + $0x1cf] sm:$0xff] }
 0x1e7   : > { %v1889_v39 = vadd.f32 %v1762_v28, %v1534_v29  ;;  %1474 = vst.msk [vmem:[#allocation2 + $0x60] sm:$0xff] %vm632_vm3, %v1442_v36  ;;  %v15554_v59 = vpop.f32.mrb[46].mxu0  ;;  %v3776_v7 = vld [vmem:[#allocation3 + $0x1c7] sm:$0xff]  ;;  %v3781_v40 = vld [vmem:[#allocation3 + $0x20f] sm:$0xff] }
 0x1e8   : > { %v15604_v58 = vpop.f32.mrb[46].mxu1  ;;  %1922 = vst.msk [vmem:[#allocation2 + $0x48] sm:$0xff] %vm632_vm3, %v1890_v27  ;;  %v1445_v6 = vadd.f32 %v15554_v59, %v1091_v57  ;;  %v1341_v56 = vpop.f32.mrb[47].mxu0  ;;  %15868 = vmatmul.mubr.msk.f32.gmra.mrb[152].mxu0 %vm310_vm0, %v3775_v41  ;;  %v21263_v28 = vld [vmem:[#allocation9_spill] sm:$0xff]  ;;  %v1099_v41 = vld [vmem:[#allocation2 + $0xb8] sm:$0xff] }
 0x1e9   : > { %v1792_v2 = vpop.f32.mrb[47].mxu1  ;;  %15918 = vmatmul.mubr.msk.f32.gmra.mrb[152].mxu1 %vm310_vm0, %v17936_v12  ;;  %1921 = vst.msk [vmem:[#allocation2 + $0x40] sm:$0xff] %vm632_vm3, %v1889_v39  ;;  %v1537_v4 = vld [vmem:[#allocation2 + $0x58] sm:$0xff]  ;;  %v1444_v14 = vadd.f32 %v1341_v56, %v1090_v54  ;;  %15870 = vmatprep.mubr.msk.f32.mxu0 %vm310_vm0, %v3776_v7  ;;  %v4652_v34 = vld [vmem:[#allocation3 + $0x29] sm:$0xff] }
 0x1ea   : > { %15920 = vmatprep.mubr.msk.f32.mxu1 %vm310_vm0, %v21262_v18  ;;  %v1892_v30 = vadd.f32 %v15598_v5, %v1537_v4  ;;  %v1536_v8 = vld [vmem:[#allocation2 + $0x50] sm:$0xff]  ;;  %1477 = vst.msk [vmem:[#allocation2 + $0x78] sm:$0xff] %vm632_vm3, %v1445_v6  ;;  %v1097_v35 = vld [vmem:[#allocation2 + $0xa8] sm:$0xff] }
 0x1eb   : > { %v1891_v32 = vadd.f32 %v1772_v1, %v1536_v8  ;;  %1476 = vst.msk [vmem:[#allocation2 + $0x70] sm:$0xff] %vm632_vm3, %v1444_v14  ;;  %v15557_v44 = vpop.f32.mrb[48].mxu0  ;;  %v4653_v39 = vld [vmem:[#allocation3 + $0x31] sm:$0xff]  ;;  %v4654_v56 = vld [vmem:[#allocation3 + $0x49] sm:$0xff] }
 0x1ec   : > { %v15607_v12 = vpop.f32.mrb[48].mxu1  ;;  %1924 = vst.msk [vmem:[#allocation2 + $0x58] sm:$0xff] %vm632_vm3, %v1892_v30  ;;  %v1447_v61 = vadd.f32 %v15557_v44, %v1093_v49  ;;  %v1351_v11 = vpop.f32.mrb[49].mxu0  ;;  %15871 = vmatmul.mubr.msk.f32.gmra.mrb[154].mxu0 %vm310_vm0, %v3777_v46  ;;  %v1098_v7 = vld [vmem:[#allocation2 + $0xb0] sm:$0xff]  ;;  %v18239_v18 = vld [vmem:[%s21250_s4 + $0x68] sm:$0xff] }
 0x1ed   : > { %v1802_v13 = vpop.f32.mrb[49].mxu1  ;;  %15921 = vmatmul.mubr.msk.f32.gmra.mrb[154].mxu1 %vm310_vm0, %v21263_v28  ;;  %1923 = vst.msk [vmem:[#allocation2 + $0x50] sm:$0xff] %vm632_vm3, %v1891_v32  ;;  %v1539_v33 = vld [vmem:[#allocation2 + $0x68] sm:$0xff]  ;;  %v1446_v21 = vadd.f32 %v1351_v11, %v1092_v63  ;;  %15873 = vmatprep.mubr.msk.f32.mxu0 %vm310_vm0, %v3778_v16  ;;  %v1100_v11 = vld [vmem:[#allocation2 + $0xc0] sm:$0xff] }
 0x1ee   : > { %15923 = vmatprep.mubr.msk.f32.mxu1 %vm310_vm0, %v21264_v43  ;;  %v1894_v47 = vadd.f32 %v15601_v38, %v1539_v33  ;;  %v1538_v0 = vld [vmem:[#allocation2 + $0x60] sm:$0xff]  ;;  %1479 = vst.msk [vmem:[#allocation2 + $0x88] sm:$0xff] %vm632_vm3, %v1447_v61  ;;  %v1101_v44 = vld [vmem:[#allocation2 + $0xc8] sm:$0xff]  ;;  %v5106_v61 = vld [vmem:[#allocation3 + $0x52] sm:$0xff] }
 0x1ef   : > { %v1893_v42 = vadd.f32 %v1782_v53, %v1538_v0  ;;  %1478 = vst.msk [vmem:[#allocation2 + $0x80] sm:$0xff] %vm632_vm3, %v1446_v21  ;;  %v15560_v5 = vpop.f32.mrb[50].mxu0  ;;  %v5107_v28 = vld [vmem:[#allocation3 + $0x6a] sm:$0xff]  ;;  %v1103_v0 = vld [vmem:[#allocation2 + $0xd8] sm:$0xff] }
 0x1f0   : > { %v18199_v24 = vpop.f32.mrb[50].mxu1  ;;  %1926 = vst.msk [vmem:[#allocation2 + $0x68] sm:$0xff] %vm632_vm3, %v1894_v47  ;;  %v1449_v26 = vadd.f32 %v15560_v5, %v1095_v3  ;;  %v1361_v1 = vpop.f32.mrb[51].mxu0  ;;  %15874 = vmatmul.mubr.msk.f32.gmra.mrb[156].mxu0 %vm310_vm0, %v3779_v23  ;;  %v4657_v5 = vld [vmem:[#allocation3 + $0x71] sm:$0xff] }
 0x1f1   : > { %v1812_v50 = vpop.f32.mrb[51].mxu1  ;;  %15924 = vmatmul.mubr.msk.f32.gmra.mrb[156].mxu1 %vm310_vm0, %v17956_v20  ;;  %1925 = vst.msk [vmem:[#allocation2 + $0x60] sm:$0xff] %vm632_vm3, %v1893_v42  ;;  %v1541_v9 = vld [vmem:[#allocation2 + $0x78] sm:$0xff]  ;;  %v1448_v10 = vadd.f32 %v1361_v1, %v1094_v52  ;;  %15876 = vmatprep.mubr.msk.f32.mxu0 %vm310_vm0, %v3780_v55  ;;  %v5109_v55 = vld [vmem:[#allocation3 + $0x8a] sm:$0xff] }
 0x1f2   : > { %15926 = vmatprep.mubr.msk.f32.mxu1 %vm310_vm0, %v4231_v48  ;;  %v1896_v19 = vadd.f32 %v15604_v58, %v1541_v9  ;;  %v1540_v25 = vld [vmem:[#allocation2 + $0x70] sm:$0xff]  ;;  %1481 = vst.msk [vmem:[#allocation2 + $0x98] sm:$0xff] %vm632_vm3, %v1449_v26 }
 0x1f3   : > { %v1895_v38 = vadd.f32 %v1792_v2, %v1540_v25  ;;  %1480 = vst.msk [vmem:[#allocation2 + $0x90] sm:$0xff] %vm632_vm3, %v1448_v10  ;;  %v15563_v20 = vpop.f32.mrb[52].mxu0  ;;  %v1102_v26 = vld [vmem:[#allocation2 + $0xd0] sm:$0xff] }
 0x1f4   : > { %v18210_v37 = vpop.f32.mrb[52].mxu1  ;;  %1928 = vst.msk [vmem:[#allocation2 + $0x78] sm:$0xff] %vm632_vm3, %v1896_v19  ;;  %v1451_v53 = vadd.f32 %v15563_v20, %v1097_v35  ;;  %v1371_v17 = vpop.f32.mrb[53].mxu0  ;;  %15877 = vmatmul.mubr.msk.f32.gmra.mrb[158].mxu0 %vm310_vm0, %v3781_v40  ;;  %v4659_v20 = vld [vmem:[#allocation3 + $0x91] sm:$0xff] }
 0x1f5   : > { %v18213_v36 = vpop.f32.mrb[53].mxu1  ;;  %15927 = vmatmul.mubr.msk.f32.gmra.mrb[158].mxu1 %vm310_vm0, %v4232_v45  ;;  %1927 = vst.msk [vmem:[#allocation2 + $0x70] sm:$0xff] %vm632_vm3, %v1895_v38  ;;  %v1543_v27 = vld [vmem:[#allocation2 + $0x88] sm:$0xff]  ;;  %v1450_v29 = vadd.f32 %v1371_v17, %v1096_v51  ;;  %15931 = vmatprep.mubr.msk.f32.mxu0 %vm310_vm0, %v4652_v34  ;;  %v1104_v45 = vld [vmem:[#allocation2 + $0xe0] sm:$0xff] }
 0x1f6   : > { %15981 = vmatprep.mubr.msk.f32.mxu1 %vm310_vm0, %v17963_v22  ;;  %v1898_v57 = vadd.f32 %v15607_v12, %v1543_v27  ;;  %v1542_v59 = vld [vmem:[#allocation2 + $0x80] sm:$0xff]  ;;  %1483 = vst.msk [vmem:[#allocation2 + $0xa8] sm:$0xff] %vm632_vm3, %v1451_v53  ;;  %v1105_v34 = vld [vmem:[#allocation2 + $0xe8] sm:$0xff] }
 0x1f7   : > { %v1897_v58 = vadd.f32 %v1802_v13, %v1542_v59  ;;  %1482 = vst.msk [vmem:[#allocation2 + $0xa0] sm:$0xff] %vm632_vm3, %v1450_v29  ;;  %v15566_v6 = vpop.f32.mrb[54].mxu0  ;;  %v18234_v22 = vld [vmem:[%s21250_s4 + $0x60] sm:$0xff]  ;;  %v4660_v17 = vld [vmem:[#allocation3 + $0xa9] sm:$0xff] }
 0x1f8   : > { %v18223_v54 = vpop.f32.mrb[54].mxu1  ;;  %1930 = vst.msk [vmem:[#allocation2 + $0x88] sm:$0xff] %vm632_vm3, %v1898_v57  ;;  %v1453_v2 = vadd.f32 %v15566_v6, %v1099_v41  ;;  %v1381_v4 = vpop.f32.mrb[55].mxu0  ;;  %15932 = vmatmul.mubr.msk.f32.vlgmr.msra.gmra.mrb[160].mxu0 %vm310_vm0, %v4653_v39 }
 0x1f9   : > { %v18226_v14 = vpop.f32.mrb[55].mxu1  ;;  %15982 = vmatmul.mubr.msk.f32.vlgmr.msra.gmra.mrb[160].mxu1 %vm310_vm0, %v17980_v31  ;;  %1929 = vst.msk [vmem:[#allocation2 + $0x80] sm:$0xff] %vm632_vm3, %v1897_v58  ;;  %v1545_v30 = vld [vmem:[#allocation2 + $0x98] sm:$0xff]  ;;  %v1452_v8 = vadd.f32 %v1381_v4, %v1098_v7  ;;  %16030 = vmatpush3.msra.mxu0 %v18085_v15  ;;  %v1106_v7 = vld [vmem:[#allocation2 + $0xf0] sm:$0xff] }
 0x1fa   : > { %15934 = vmatprep.mubr.msk.f32.mxu0 %vm310_vm0, %v4654_v56  ;;  %v1900_v31 = vadd.f32 %v18199_v24, %v1545_v30  ;;  %v1544_v32 = vld [vmem:[#allocation2 + $0x90] sm:$0xff]  ;;  %1485 = vst.msk [vmem:[#allocation2 + $0xb8] sm:$0xff] %vm632_vm3, %v1453_v2  ;;  %15984 = vmatprep.mubr.msk.f32.mxu1 %vm310_vm0, %v17991_v60  ;;  %v1107_v58 = vld [vmem:[#allocation2 + $0xf8] sm:$0xff] }
 0x1fb   : > { %16080 = vmatpush3.msra.mxu1 %v18090_v62  ;;  %v1899_v49 = vadd.f32 %v1812_v50, %v1544_v32  ;;  %1484 = vst.msk [vmem:[#allocation2 + $0xb0] sm:$0xff] %vm632_vm3, %v1452_v8  ;;  %v15569_v12 = vpop.f32.mrb[56].mxu0  ;;  %v4655_v15 = vld [vmem:[#allocation3 + $0x51] sm:$0xff]  ;;  %16129 = vmatprep.subr.mxu0 %v18234_v22  ;;  %v4656_v62 = vld [vmem:[#allocation3 + $0x69] sm:$0xff] }
 0x1fc   : > { %v18250_v46 = vpop.f32.mrb[56].mxu1  ;;  %16179 = vmatprep.subr.mxu1 %v18239_v18  ;;  %1932 = vst.msk [vmem:[#allocation2 + $0x98] sm:$0xff] %vm632_vm3, %v1900_v31  ;;  %v1455_v63 = vadd.f32 %v15569_v12, %v1101_v44  ;;  %v1391_v60 = vpop.f32.mrb[57].mxu0  ;;  %15935 = vmatmul.mubr.msk.f32.gmra.mrb[162].mxu0 %vm310_vm0, %v4655_v15  ;;  %v5108_v24 = vld [vmem:[#allocation3 + $0x72] sm:$0xff]  ;;  %v4658_v50 = vld [vmem:[#allocation3 + $0x89] sm:$0xff] }
 0x1fd   : > { %v1842_v13 = vpop.f32.mrb[57].mxu1  ;;  %15985 = vmatmul.mubr.msk.f32.gmra.mrb[162].mxu1 %vm310_vm0, %v5106_v61  ;;  %1931 = vst.msk [vmem:[#allocation2 + $0x90] sm:$0xff] %vm632_vm3, %v1899_v49  ;;  %v1547_v16 = vld [vmem:[#allocation2 + $0xa8] sm:$0xff]  ;;  %v1454_v33 = vadd.f32 %v1391_v60, %v1100_v11  ;;  %15937 = vmatprep.mubr.msk.f32.mxu0 %vm310_vm0, %v4656_v62  ;;  %v5112_v56 = vld [vmem:[#allocation3 + $0xb2] sm:$0xff] }
 0x1fe   : > { %15987 = vmatprep.mubr.msk.f32.mxu1 %vm310_vm0, %v5107_v28  ;;  %v1902_v21 = vadd.f32 %v18210_v37, %v1547_v16  ;;  %v1546_v43 = vld [vmem:[#allocation2 + $0xa0] sm:$0xff]  ;;  %1487 = vst.msk [vmem:[#allocation2 + $0xc8] sm:$0xff] %vm632_vm3, %v1455_v63  ;;  %v5110_v37 = vld [vmem:[#allocation3 + $0x92] sm:$0xff]  ;;  %v4662_v30 = vld [vmem:[#allocation3 + $0xc9] sm:$0xff] }
 0x1ff   : > { %v1901_v47 = vadd.f32 %v18213_v36, %v1546_v43  ;;  %1486 = vst.msk [vmem:[#allocation2 + $0xc0] sm:$0xff] %vm632_vm3, %v1454_v33  ;;  %v15572_v42 = vpop.f32.mrb[58].mxu0  ;;  %v5111_v36 = vld [vmem:[#allocation3 + $0xaa] sm:$0xff]  ;;  %v5114_v63 = vld [vmem:[#allocation3 + $0xd2] sm:$0xff] }
 0x200   : > { %v18264_v3 = vpop.f32.mrb[58].mxu1  ;;  %1934 = vst.msk [vmem:[#allocation2 + $0xa8] sm:$0xff] %vm632_vm3, %v1902_v21  ;;  %v1457_v23 = vadd.f32 %v15572_v42, %v1103_v0  ;;  %v1401_v52 = vpop.f32.mrb[59].mxu0  ;;  %15938 = vmatmul.mubr.msk.f32.gmra.mrb[164].mxu0 %vm310_vm0, %v4657_v5  ;;  %v5113_v8 = vld [vmem:[#allocation3 + $0xca] sm:$0xff] }
 0x201   : > { %v1852_v1 = vpop.f32.mrb[59].mxu1  ;;  %15988 = vmatmul.mubr.msk.f32.gmra.mrb[164].mxu1 %vm310_vm0, %v5108_v24  ;;  %1933 = vst.msk [vmem:[#allocation2 + $0xa0] sm:$0xff] %vm632_vm3, %v1901_v47  ;;  %v1549_v48 = vld [vmem:[#allocation2 + $0xb8] sm:$0xff]  ;;  %v1456_v9 = vadd.f32 %v1401_v52, %v1102_v26  ;;  %15940 = vmatprep.mubr.msk.f32.mxu0 %vm310_vm0, %v4658_v50  ;;  %v4664_v28 = vld [vmem:[#allocation3 + $0xe9] sm:$0xff] }
 0x202   : > { %15990 = vmatprep.mubr.msk.f32.mxu1 %vm310_vm0, %v5109_v55  ;;  %v1904_v10 = vadd.f32 %v18223_v54, %v1549_v48  ;;  %v1548_v19 = vld [vmem:[#allocation2 + $0xb0] sm:$0xff]  ;;  %1489 = vst.msk [vmem:[#allocation2 + $0xd8] sm:$0xff] %vm632_vm3, %v1457_v23 }
 0x203   : > { %v1903_v25 = vadd.f32 %v18226_v14, %v1548_v19  ;;  %1488 = vst.msk [vmem:[#allocation2 + $0xd0] sm:$0xff] %vm632_vm3, %v1456_v9  ;;  %v15575_v38 = vpop.f32.mrb[60].mxu0  ;;  %v4661_v54 = vld [vmem:[#allocation3 + $0xb1] sm:$0xff]  ;;  %v4666_v55 = vld [vmem:[#allocation3 + $0x109] sm:$0xff] }
 0x204   : > { %v18276_v35 = vpop.f32.mrb[60].mxu1  ;;  %1936 = vst.msk [vmem:[#allocation2 + $0xb8] sm:$0xff] %vm632_vm3, %v1904_v10  ;;  %v1459_v40 = vadd.f32 %v15575_v38, %v1105_v34  ;;  %v1411_v53 = vpop.f32.mrb[61].mxu0  ;;  %15941 = vmatmul.mubr.msk.f32.gmra.mrb[166].mxu0 %vm310_vm0, %v4659_v20  ;;  %v4663_v61 = vld [vmem:[#allocation3 + $0xd1] sm:$0xff] }
 0x205   : > { %v1862_v51 = vpop.f32.mrb[61].mxu1  ;;  %15991 = vmatmul.mubr.msk.f32.gmra.mrb[166].mxu1 %vm310_vm0, %v5110_v37  ;;  %1935 = vst.msk [vmem:[#allocation2 + $0xb0] sm:$0xff] %vm632_vm3, %v1903_v25  ;;  %v1551_v27 = vld [vmem:[#allocation2 + $0xc8] sm:$0xff]  ;;  %v1458_v29 = vadd.f32 %v1411_v53, %v1104_v45  ;;  %15943 = vmatprep.mubr.msk.f32.mxu0 %vm310_vm0, %v4660_v17  ;;  %v4665_v24 = vld [vmem:[#allocation3 + $0xf1] sm:$0xff] }
 0x206   : > { %15993 = vmatprep.mubr.msk.f32.mxu1 %vm310_vm0, %v5111_v36  ;;  %v1906_v39 = vadd.f32 %v18250_v46, %v1551_v27  ;;  %v1550_v57 = vld [vmem:[#allocation2 + $0xc0] sm:$0xff]  ;;  %1491 = vst.msk [vmem:[#allocation2 + $0xe8] sm:$0xff] %vm632_vm3, %v1459_v40  ;;  %v1978_v46 = vld [vmem:[#allocation2 + $0x8] sm:$0xff]  ;;  %v5116_v23 = vld [vmem:[#allocation3 + $0xf2] sm:$0xff] }
 0x207   : > { %v1905_v59 = vadd.f32 %v1842_v13, %v1550_v57  ;;  %1490 = vst.msk [vmem:[#allocation2 + $0xe0] sm:$0xff] %vm632_vm3, %v1458_v29  ;;  %v15578_v41 = vpop.f32.mrb[62].mxu0  ;;  %v1977_v13 = vld [vmem:[#allocation2] sm:$0xff]  ;;  %v5115_v16 = vld [vmem:[#allocation3 + $0xea] sm:$0xff]  ;;  %v5118_v45 = vld [vmem:[#allocation3 + $0x112] sm:$0xff] }
 0x208   : > { %v18287_v6 = vpop.f32.mrb[62].mxu1  ;;  %1938 = vst.msk [vmem:[#allocation2 + $0xc8] sm:$0xff] %vm632_vm3, %v1906_v39  ;;  %v1461_v2 = vadd.f32 %v15578_v41, %v1107_v58  ;;  %v1421_v4 = vpop.f32.mrb[63].mxu0  ;;  %15944 = vmatmul.mubr.msk.f32.gmra.mrb[168].mxu0 %vm310_vm0, %v4661_v54  ;;  %v5117_v48 = vld [vmem:[#allocation3 + $0x10a] sm:$0xff] }
 0x209   : > { %v1872_v14 = vpop.f32.mrb[63].mxu1  ;;  %15994 = vmatmul.mubr.msk.f32.gmra.mrb[168].mxu1 %vm310_vm0, %v5112_v56  ;;  %1937 = vst.msk [vmem:[#allocation2 + $0xc0] sm:$0xff] %vm632_vm3, %v1905_v59  ;;  %v1553_v31 = vld [vmem:[#allocation2 + $0xd8] sm:$0xff]  ;;  %v1460_v32 = vadd.f32 %v1421_v4, %v1106_v7  ;;  %15946 = vmatprep.mubr.msk.f32.mxu0 %vm310_vm0, %v4662_v30  ;;  %v4668_v27 = vld [vmem:[#allocation3 + $0x129] sm:$0xff] }
 0x20a   : > { %15996 = vmatprep.mubr.msk.f32.mxu1 %vm310_vm0, %v5113_v8  ;;  %v1908_v49 = vadd.f32 %v18264_v3, %v1553_v31  ;;  %v1552_v44 = vld [vmem:[#allocation2 + $0xd0] sm:$0xff]  ;;  %1493 = vst.msk [vmem:[#allocation2 + $0xf8] sm:$0xff] %vm632_vm3, %v1461_v2  ;;  %v1980_v3 = vld [vmem:[#allocation2 + $0x18] sm:$0xff] }
 0x20b   : > { %v1907_v12 = vadd.f32 %v1852_v1, %v1552_v44  ;;  %1492 = vst.msk [vmem:[#allocation2 + $0xf0] sm:$0xff] %vm632_vm3, %v1460_v32  ;;  %v15633_v15 = vpop.f32.mrb[64].mxu0  ;;  %v1979_v1 = vld [vmem:[#allocation2 + $0x10] sm:$0xff] }
 0x20c   : > { %v18298_v11 = vpop.f32.mrb[64].mxu1  ;;  %1940 = vst.msk [vmem:[#allocation2 + $0xd8] sm:$0xff] %vm632_vm3, %v1908_v49  ;;  %v2333_v60 = vadd.f32 %v15633_v15, %v1978_v46  ;;  %v2173_v62 = vpop.f32.mrb[65].mxu0  ;;  %15947 = vmatmul.mubr.msk.f32.gmra.mrb[170].mxu0 %vm310_vm0, %v4663_v61  ;;  %v4667_v40 = vld [vmem:[#allocation3 + $0x111] sm:$0xff]  ;;  %v4670_v31 = vld [vmem:[#allocation3 + $0x149] sm:$0xff] }
 0x20d   : > { %15997 = vmatmul.mubr.msk.f32.gmra.mrb[170].mxu1 %vm310_vm0, %v5114_v63  ;;  %v2624_v33 = vpop.f32.mrb[65].mxu1  ;;  %1939 = vst.msk [vmem:[#allocation2 + $0xd0] sm:$0xff] %vm632_vm3, %v1907_v12  ;;  %v1555_v21 = vld [vmem:[#allocation2 + $0xe8] sm:$0xff]  ;;  %v2332_v43 = vadd.f32 %v2173_v62, %v1977_v13  ;;  %15949 = vmatprep.mubr.msk.f32.mxu0 %vm310_vm0, %v4664_v28  ;;  %v4669_v2 = vld [vmem:[#allocation3 + $0x131] sm:$0xff]  ;;  %v1985_v28 = vld [vmem:[#allocation2 + $0x40] sm:$0xff] }
 0x20e   : > { %15999 = vmatprep.mubr.msk.f32.mxu1 %vm310_vm0, %v5115_v16  ;;  %v1910_v47 = vadd.f32 %v18276_v35, %v1555_v21  ;;  %v1554_v0 = vld [vmem:[#allocation2 + $0xe0] sm:$0xff]  ;;  %2365 = vst.msk [vmem:[#allocation2 + $0x8] sm:$0xff] %vm632_vm3, %v2333_v60  ;;  %v1982_v35 = vld [vmem:[#allocation2 + $0x28] sm:$0xff]  ;;  %v5120_v7 = vld [vmem:[#allocation3 + $0x132] sm:$0xff] }
 0x20f   : > { %v1909_v42 = vadd.f32 %v1862_v51, %v1554_v0  ;;  %2364 = vst.msk [vmem:[#allocation2] sm:$0xff] %vm632_vm3, %v2332_v43  ;;  %v15636_v5 = vpop.f32.mrb[66].mxu0  ;;  %v1981_v51 = vld [vmem:[#allocation2 + $0x20] sm:$0xff]  ;;  %v5119_v29 = vld [vmem:[#allocation3 + $0x12a] sm:$0xff]  ;;  %v5122_v13 = vld [vmem:[#allocation3 + $0x152] sm:$0xff] }
 0x210   : > { %v18309_v26 = vpop.f32.mrb[66].mxu1  ;;  %1942 = vst.msk [vmem:[#allocation2 + $0xe8] sm:$0xff] %vm632_vm3, %v1910_v47  ;;  %v2335_v52 = vadd.f32 %v15636_v5, %v1980_v3  ;;  %v2183_v50 = vpop.f32.mrb[67].mxu0  ;;  %15950 = vmatmul.mubr.msk.f32.gmra.mrb[172].mxu0 %vm310_vm0, %v4665_v24  ;;  %v5121_v32 = vld [vmem:[#allocation3 + $0x14a] sm:$0xff]  ;;  %v1988_v24 = vld [vmem:[#allocation2 + $0x58] sm:$0xff] }
 0x211   : > { %16000 = vmatmul.mubr.msk.f32.gmra.mrb[172].mxu1 %vm310_vm0, %v5116_v23  ;;  %v2634_v9 = vpop.f32.mrb[67].mxu1  ;;  %1941 = vst.msk [vmem:[#allocation2 + $0xe0] sm:$0xff] %vm632_vm3, %v1909_v42  ;;  %v1557_v10 = vld [vmem:[#allocation2 + $0xf8] sm:$0xff]  ;;  %v2334_v19 = vadd.f32 %v2183_v50, %v1979_v1  ;;  %15952 = vmatprep.mubr.msk.f32.mxu0 %vm310_vm0, %v4666_v55  ;;  %v1986_v61 = vld [vmem:[#allocation2 + $0x48] sm:$0xff]  ;;  %v1987_v55 = vld [vmem:[#allocation2 + $0x50] sm:$0xff] }
 0x212   : > { %16002 = vmatprep.mubr.msk.f32.mxu1 %vm310_vm0, %v5117_v48  ;;  %v1912_v25 = vadd.f32 %v18287_v6, %v1557_v10  ;;  %v1556_v34 = vld [vmem:[#allocation2 + $0xf0] sm:$0xff]  ;;  %2367 = vst.msk [vmem:[#allocation2 + $0x18] sm:$0xff] %vm632_vm3, %v2335_v52  ;;  %v1984_v6 = vld [vmem:[#allocation2 + $0x38] sm:$0xff] }
 0x213   : > { %v1911_v38 = vadd.f32 %v1872_v14, %v1556_v34  ;;  %2366 = vst.msk [vmem:[#allocation2 + $0x10] sm:$0xff] %vm632_vm3, %v2334_v19  ;;  %v15639_v20 = vpop.f32.mrb[68].mxu0  ;;  %v1983_v14 = vld [vmem:[#allocation2 + $0x30] sm:$0xff] }
 0x214   : > { %v18320_v37 = vpop.f32.mrb[68].mxu1  ;;  %1944 = vst.msk [vmem:[#allocation2 + $0xf8] sm:$0xff] %vm632_vm3, %v1912_v25  ;;  %v2337_v53 = vadd.f32 %v15639_v20, %v1982_v35  ;;  %v2193_v17 = vpop.f32.mrb[69].mxu0  ;;  %15953 = vmatmul.mubr.msk.f32.gmra.mrb[174].mxu0 %vm310_vm0, %v4667_v40  ;;  %v4671_v60 = vld [vmem:[#allocation3 + $0x151] sm:$0xff]  ;;  %v4672_v21 = vld [vmem:[#allocation3 + $0x169] sm:$0xff] }
 0x215   : > { %v2644_v36 = vpop.f32.mrb[69].mxu1  ;;  %16003 = vmatmul.mubr.msk.f32.gmra.mrb[174].mxu1 %vm310_vm0, %v5118_v45  ;;  %1943 = vst.msk [vmem:[#allocation2 + $0xf0] sm:$0xff] %vm632_vm3, %v1911_v38  ;;  %v2429_v39 = vld [vmem:[#allocation2 + $0x8] sm:$0xff]  ;;  %v2336_v57 = vadd.f32 %v2193_v17, %v1981_v51  ;;  %15955 = vmatprep.mubr.msk.f32.mxu0 %vm310_vm0, %v4668_v27  ;;  %v4673_v52 = vld [vmem:[#allocation3 + $0x171] sm:$0xff] }
 0x216   : > { %16005 = vmatprep.mubr.msk.f32.mxu1 %vm310_vm0, %v5119_v29  ;;  %v2784_v59 = vadd.f32 %v18298_v11, %v2429_v39  ;;  %v2428_v58 = vld [vmem:[#allocation2] sm:$0xff]  ;;  %2369 = vst.msk [vmem:[#allocation2 + $0x28] sm:$0xff] %vm632_vm3, %v2337_v53  ;;  %v5123_v43 = vld [vmem:[#allocation3 + $0x16a] sm:$0xff]  ;;  %v5124_v1 = vld [vmem:[#allocation3 + $0x172] sm:$0xff] }
 0x217   : > { %v2783_v41 = vadd.f32 %v2624_v33, %v2428_v58  ;;  %2368 = vst.msk [vmem:[#allocation2 + $0x20] sm:$0xff] %vm632_vm3, %v2336_v57  ;;  %v15642_v54 = vpop.f32.mrb[70].mxu0  ;;  %v4674_v10 = vld [vmem:[#allocation3 + $0x189] sm:$0xff]  ;;  %v4675_v53 = vld [vmem:[#allocation3 + $0x191] sm:$0xff] }
 0x218   : > { %v18331_v56 = vpop.f32.mrb[70].mxu1  ;;  %2816 = vst.msk [vmem:[#allocation2 + $0x8] sm:$0xff] %vm632_vm3, %v2784_v59  ;;  %v2339_v4 = vadd.f32 %v15642_v54, %v1984_v6  ;;  %v2203_v30 = vpop.f32.mrb[71].mxu0  ;;  %15956 = vmatmul.mubr.msk.f32.gmra.mrb[176].mxu0 %vm310_vm0, %v4669_v2  ;;  %v5125_v19 = vld [vmem:[#allocation3 + $0x18a] sm:$0xff]  ;;  %v5126_v51 = vld [vmem:[#allocation3 + $0x192] sm:$0xff] }
 0x219   : > { %v2654_v8 = vpop.f32.mrb[71].mxu1  ;;  %16006 = vmatmul.mubr.msk.f32.gmra.mrb[176].mxu1 %vm310_vm0, %v5120_v7  ;;  %2815 = vst.msk [vmem:[#allocation2] sm:$0xff] %vm632_vm3, %v2783_v41  ;;  %v2431_v49 = vld [vmem:[#allocation2 + $0x18] sm:$0xff]  ;;  %v2338_v44 = vadd.f32 %v2203_v30, %v1983_v14  ;;  %15958 = vmatprep.mubr.msk.f32.mxu0 %vm310_vm0, %v4670_v31  ;;  %v4676_v39 = vld [vmem:[#allocation3 + $0x1a9] sm:$0xff] }
 0x21a   : > { %16008 = vmatprep.mubr.msk.f32.mxu1 %vm310_vm0, %v5121_v32  ;;  %v2786_v12 = vadd.f32 %v18309_v26, %v2431_v49  ;;  %v2430_v46 = vld [vmem:[#allocation2 + $0x10] sm:$0xff]  ;;  %2371 = vst.msk [vmem:[#allocation2 + $0x38] sm:$0xff] %vm632_vm3, %v2339_v4 }
 0x21b   : > { %v2785_v15 = vadd.f32 %v2634_v9, %v2430_v46  ;;  %2370 = vst.msk [vmem:[#allocation2 + $0x30] sm:$0xff] %vm632_vm3, %v2338_v44  ;;  %v15645_v63 = vpop.f32.mrb[72].mxu0  ;;  %v5127_v57 = vld [vmem:[#allocation3 + $0x1aa] sm:$0xff]  ;;  %v5128_v14 = vld [vmem:[#allocation3 + $0x1b2] sm:$0xff] }
 0x21c   : > { %v18342_v11 = vpop.f32.mrb[72].mxu1  ;;  %2818 = vst.msk [vmem:[#allocation2 + $0x18] sm:$0xff] %vm632_vm3, %v2786_v12  ;;  %v2341_v62 = vadd.f32 %v15645_v63, %v1986_v61  ;;  %v2213_v16 = vpop.f32.mrb[73].mxu0  ;;  %15959 = vmatmul.mubr.msk.f32.gmra.mrb[178].mxu0 %vm310_vm0, %v4671_v60  ;;  %v4677_v4 = vld [vmem:[#allocation3 + $0x1b1] sm:$0xff]  ;;  %v4678_v49 = vld [vmem:[#allocation3 + $0x1c9] sm:$0xff] }
 0x21d   : > { %v2664_v33 = vpop.f32.mrb[73].mxu1  ;;  %16009 = vmatmul.mubr.msk.f32.gmra.mrb[178].mxu1 %vm310_vm0, %v5122_v13  ;;  %2817 = vst.msk [vmem:[#allocation2 + $0x10] sm:$0xff] %vm632_vm3, %v2785_v15  ;;  %v2433_v47 = vld [vmem:[#allocation2 + $0x28] sm:$0xff]  ;;  %v2340_v0 = vadd.f32 %v2213_v16, %v1985_v28  ;;  %15961 = vmatprep.mubr.msk.f32.mxu0 %vm310_vm0, %v4672_v21  ;;  %v5130_v28 = vld [vmem:[#allocation3 + $0x1d2] sm:$0xff] }
 0x21e   : > { %16011 = vmatprep.mubr.msk.f32.mxu1 %vm310_vm0, %v5123_v43  ;;  %v2788_v42 = vadd.f32 %v18320_v37, %v2433_v47  ;;  %v2432_v3 = vld [vmem:[#allocation2 + $0x20] sm:$0xff]  ;;  %2373 = vst.msk [vmem:[#allocation2 + $0x48] sm:$0xff] %vm632_vm3, %v2341_v62  ;;  %v1990_v37 = vld [vmem:[#allocation2 + $0x68] sm:$0xff]  ;;  %v4679_v62 = vld [vmem:[#allocation3 + $0x1d1] sm:$0xff] }
 0x21f   : > { %v2787_v5 = vadd.f32 %v2644_v36, %v2432_v3  ;;  %2372 = vst.msk [vmem:[#allocation2 + $0x40] sm:$0xff] %vm632_vm3, %v2340_v0  ;;  %v15648_v23 = vpop.f32.mrb[74].mxu0  ;;  %v1989_v36 = vld [vmem:[#allocation2 + $0x60] sm:$0xff]  ;;  %v5129_v44 = vld [vmem:[#allocation3 + $0x1ca] sm:$0xff] }
 0x220   : > { %v18353_v26 = vpop.f32.mrb[74].mxu1  ;;  %2820 = vst.msk [vmem:[#allocation2 + $0x28] sm:$0xff] %vm632_vm3, %v2788_v42  ;;  %v2343_v50 = vadd.f32 %v15648_v23, %v1988_v24  ;;  %v2223_v48 = vpop.f32.mrb[75].mxu0  ;;  %15962 = vmatmul.mubr.msk.f32.gmra.mrb[180].mxu0 %vm310_vm0, %v4673_v52  ;;  %v4680_v47 = vld [vmem:[#allocation3 + $0x1e9] sm:$0xff] }
 0x221   : > { %v2674_v9 = vpop.f32.mrb[75].mxu1  ;;  %16012 = vmatmul.mubr.msk.f32.gmra.mrb[180].mxu1 %vm310_vm0, %v5124_v1  ;;  %2819 = vst.msk [vmem:[#allocation2 + $0x20] sm:$0xff] %vm632_vm3, %v2787_v5  ;;  %v2435_v25 = vld [vmem:[#allocation2 + $0x38] sm:$0xff]  ;;  %v2342_v34 = vadd.f32 %v2223_v48, %v1987_v55  ;;  %15964 = vmatprep.mubr.msk.f32.mxu0 %vm310_vm0, %v4674_v10  ;;  %v5131_v0 = vld [vmem:[#allocation3 + $0x1ea] sm:$0xff] }
 0x222   : > { %16014 = vmatprep.mubr.msk.f32.mxu1 %vm310_vm0, %v5125_v19  ;;  %v2790_v38 = vadd.f32 %v18331_v56, %v2435_v25  ;;  %v2434_v35 = vld [vmem:[#allocation2 + $0x30] sm:$0xff]  ;;  %2375 = vst.msk [vmem:[#allocation2 + $0x58] sm:$0xff] %vm632_vm3, %v2343_v50  ;;  %v1992_v56 = vld [vmem:[#allocation2 + $0x78] sm:$0xff] }
 0x223   : > { %v2789_v20 = vadd.f32 %v2654_v8, %v2434_v35  ;;  %2374 = vst.msk [vmem:[#allocation2 + $0x50] sm:$0xff] %vm632_vm3, %v2342_v34  ;;  %v15651_v40 = vpop.f32.mrb[76].mxu0  ;;  %v1991_v8 = vld [vmem:[#allocation2 + $0x70] sm:$0xff] }
 0x224   : > { %v18364_v45 = vpop.f32.mrb[76].mxu1  ;;  %2822 = vst.msk [vmem:[#allocation2 + $0x38] sm:$0xff] %vm632_vm3, %v2790_v38  ;;  %v2345_v17 = vadd.f32 %v15651_v40, %v1990_v37  ;;  %v2233_v27 = vpop.f32.mrb[77].mxu0  ;;  %15965 = vmatmul.mubr.msk.f32.gmra.mrb[182].mxu0 %vm310_vm0, %v4675_v53  ;;  %v4681_v50 = vld [vmem:[#allocation3 + $0x1f1] sm:$0xff]  ;;  %v4682_v25 = vld [vmem:[#allocation3 + $0x209] sm:$0xff] }
 0x225   : > { %v2684_v29 = vpop.f32.mrb[77].mxu1  ;;  %16015 = vmatmul.mubr.msk.f32.gmra.mrb[182].mxu1 %vm310_vm0, %v5126_v51  ;;  %2821 = vst.msk [vmem:[#allocation2 + $0x30] sm:$0xff] %vm632_vm3, %v2789_v20  ;;  %v2437_v59 = vld [vmem:[#allocation2 + $0x48] sm:$0xff]  ;;  %v2344_v58 = vadd.f32 %v2233_v27, %v1989_v36  ;;  %15967 = vmatprep.mubr.msk.f32.mxu0 %vm310_vm0, %v4676_v39  ;;  %v5132_v55 = vld [vmem:[#allocation3 + $0x1f2] sm:$0xff] }
 0x226   : > { %16017 = vmatprep.mubr.msk.f32.mxu1 %vm310_vm0, %v5127_v57  ;;  %v2792_v41 = vadd.f32 %v18342_v11, %v2437_v59  ;;  %v2436_v6 = vld [vmem:[#allocation2 + $0x40] sm:$0xff]  ;;  %2377 = vst.msk [vmem:[#allocation2 + $0x68] sm:$0xff] %vm632_vm3, %v2345_v17  ;;  %v1994_v11 = vld [vmem:[#allocation2 + $0x88] sm:$0xff]  ;;  %v4683_v17 = vld [vmem:[#allocation3 + $0x211] sm:$0xff] }
 0x227   : > { %v2791_v54 = vadd.f32 %v2664_v33, %v2436_v6  ;;  %2376 = vst.msk [vmem:[#allocation2 + $0x60] sm:$0xff] %vm632_vm3, %v2344_v58  ;;  %v15654_v2 = vpop.f32.mrb[78].mxu0  ;;  %v1993_v33 = vld [vmem:[#allocation2 + $0x80] sm:$0xff]  ;;  %v5133_v34 = vld [vmem:[#allocation3 + $0x20a] sm:$0xff]  ;;  %v5134_v36 = vld [vmem:[#allocation3 + $0x212] sm:$0xff] }
 0x228   : > { %v18375_v7 = vpop.f32.mrb[78].mxu1  ;;  %2824 = vst.msk [vmem:[#allocation2 + $0x48] sm:$0xff] %vm632_vm3, %v2792_v41  ;;  %v2347_v30 = vadd.f32 %v15654_v2, %v1992_v56  ;;  %v2243_v31 = vpop.f32.mrb[79].mxu0  ;;  %15968 = vmatmul.mubr.msk.f32.gmra.mrb[184].mxu0 %vm310_vm0, %v4677_v4  ;;  %v5554_v59 = vld [vmem:[#allocation3 + $0x46] sm:$0xff]  ;;  %v5555_v2 = vld [vmem:[#allocation3 + $0x4e] sm:$0xff]  ;;  %v2000_v4 = vld [vmem:[#allocation2 + $0xb8] sm:$0xff] }
 0x229   : > { %v2694_v32 = vpop.f32.mrb[79].mxu1  ;;  %16018 = vmatmul.mubr.msk.f32.gmra.mrb[184].mxu1 %vm310_vm0, %v5128_v14  ;;  %2823 = vst.msk [vmem:[#allocation2 + $0x40] sm:$0xff] %vm632_vm3, %v2791_v54  ;;  %v2439_v12 = vld [vmem:[#allocation2 + $0x58] sm:$0xff]  ;;  %v2346_v46 = vadd.f32 %v2243_v31, %v1991_v8  ;;  %15970 = vmatprep.mubr.msk.f32.mxu0 %vm310_vm0, %v4678_v49  ;;  %v6005_v58 = vld [vmem:[#allocation3 + $0x47] sm:$0xff]  ;;  %v6006_v8 = vld [vmem:[#allocation3 + $0x4f] sm:$0xff] }
 0x22a   : > { %16020 = vmatprep.mubr.msk.f32.mxu1 %vm310_vm0, %v5129_v44  ;;  %v2794_v15 = vadd.f32 %v18353_v26, %v2439_v12  ;;  %v2438_v61 = vld [vmem:[#allocation2 + $0x50] sm:$0xff]  ;;  %2379 = vst.msk [vmem:[#allocation2 + $0x78] sm:$0xff] %vm632_vm3, %v2347_v30  ;;  %v1996_v26 = vld [vmem:[#allocation2 + $0x98] sm:$0xff]  ;;  %v5556_v31 = vld [vmem:[#allocation3 + $0x66] sm:$0xff] }
 0x22b   : > { %v2793_v63 = vadd.f32 %v2674_v9, %v2438_v61  ;;  %2378 = vst.msk [vmem:[#allocation2 + $0x70] sm:$0xff] %vm632_vm3, %v2346_v46  ;;  %v15657_v60 = vpop.f32.mrb[80].mxu0  ;;  %v1995_v9 = vld [vmem:[#allocation2 + $0x90] sm:$0xff] }
 0x22c   : > { %v18386_v13 = vpop.f32.mrb[80].mxu1  ;;  %2826 = vst.msk [vmem:[#allocation2 + $0x58] sm:$0xff] %vm632_vm3, %v2794_v15  ;;  %v2349_v16 = vadd.f32 %v15657_v60, %v1994_v11  ;;  %v2253_v21 = vpop.f32.mrb[81].mxu0  ;;  %15971 = vmatmul.mubr.msk.f32.gmra.mrb[186].mxu0 %vm310_vm0, %v4679_v62  ;;  %v1999_v49 = vld [vmem:[#allocation2 + $0xb0] sm:$0xff]  ;;  %v18438_v15 = vld [vmem:[%s21250_s4 + $0x78] sm:$0xff]  ;;  %v6007_v11 = vld [vmem:[#allocation3 + $0x67] sm:$0xff] }
 0x22d   : > { %v2704_v43 = vpop.f32.mrb[81].mxu1  ;;  %16021 = vmatmul.mubr.msk.f32.gmra.mrb[186].mxu1 %vm310_vm0, %v5130_v28  ;;  %2825 = vst.msk [vmem:[#allocation2 + $0x50] sm:$0xff] %vm632_vm3, %v2793_v63  ;;  %v2441_v42 = vld [vmem:[#allocation2 + $0x68] sm:$0xff]  ;;  %v2348_v3 = vadd.f32 %v2253_v21, %v1993_v33  ;;  %15973 = vmatprep.mubr.msk.f32.mxu0 %vm310_vm0, %v4680_v47  ;;  %v18433_v46 = vld [vmem:[%s21250_s4 + $0x70] sm:$0xff]  ;;  %v2001_v47 = vld [vmem:[#allocation2 + $0xc0] sm:$0xff] }
 0x22e   : > { %16023 = vmatprep.mubr.msk.f32.mxu1 %vm310_vm0, %v5131_v0  ;;  %v2796_v5 = vadd.f32 %v18364_v45, %v2441_v42  ;;  %v2440_v24 = vld [vmem:[#allocation2 + $0x60] sm:$0xff]  ;;  %2381 = vst.msk [vmem:[#allocation2 + $0x88] sm:$0xff] %vm632_vm3, %v2349_v16  ;;  %v1998_v45 = vld [vmem:[#allocation2 + $0xa8] sm:$0xff] }
 0x22f   : > { %v2795_v23 = vadd.f32 %v2684_v29, %v2440_v24  ;;  %2380 = vst.msk [vmem:[#allocation2 + $0x80] sm:$0xff] %vm632_vm3, %v2348_v3  ;;  %v15660_v52 = vpop.f32.mrb[82].mxu0  ;;  %v1997_v29 = vld [vmem:[#allocation2 + $0xa0] sm:$0xff]  ;;  %v2002_v28 = vld [vmem:[#allocation2 + $0xc8] sm:$0xff] }
 0x230   : > { %v18397_v1 = vpop.f32.mrb[82].mxu1  ;;  %2828 = vst.msk [vmem:[#allocation2 + $0x68] sm:$0xff] %vm632_vm3, %v2796_v5  ;;  %v2351_v48 = vadd.f32 %v15660_v52, %v1996_v26  ;;  %v2263_v10 = vpop.f32.mrb[83].mxu0  ;;  %15974 = vmatmul.mubr.msk.f32.gmra.mrb[188].mxu0 %vm310_vm0, %v4681_v50  ;;  %v6008_v21 = vld [vmem:[#allocation3 + $0x6f] sm:$0xff]  ;;  %v5558_v42 = vld [vmem:[#allocation3 + $0x86] sm:$0xff] }
 0x231   : > { %v18400_v19 = vpop.f32.mrb[83].mxu1  ;;  %16024 = vmatmul.mubr.msk.f32.gmra.mrb[188].mxu1 %vm310_vm0, %v5132_v55  ;;  %2827 = vst.msk [vmem:[#allocation2 + $0x60] sm:$0xff] %vm632_vm3, %v2795_v23  ;;  %v2443_v38 = vld [vmem:[#allocation2 + $0x78] sm:$0xff]  ;;  %v2350_v35 = vadd.f32 %v2263_v10, %v1995_v9  ;;  %15976 = vmatprep.mubr.msk.f32.mxu0 %vm310_vm0, %v4682_v25  ;;  %v6009_v3 = vld [vmem:[#allocation3 + $0x87] sm:$0xff]  ;;  %v6010_v9 = vld [vmem:[#allocation3 + $0x8f] sm:$0xff] }
 0x232   : > { %16026 = vmatprep.mubr.msk.f32.mxu1 %vm310_vm0, %v5133_v34  ;;  %v2798_v20 = vadd.f32 %v18375_v7, %v2443_v38  ;;  %v2442_v37 = vld [vmem:[#allocation2 + $0x70] sm:$0xff]  ;;  %2383 = vst.msk [vmem:[#allocation2 + $0x98] sm:$0xff] %vm632_vm3, %v2351_v48  ;;  %v5560_v38 = vld [vmem:[#allocation3 + $0xa6] sm:$0xff] }
 0x233   : > { %v2797_v40 = vadd.f32 %v2694_v32, %v2442_v37  ;;  %2382 = vst.msk [vmem:[#allocation2 + $0x90] sm:$0xff] %vm632_vm3, %v2350_v35  ;;  %v15663_v53 = vpop.f32.mrb[84].mxu0  ;;  %v5559_v48 = vld [vmem:[#allocation3 + $0x8e] sm:$0xff] }
 0x234   : > { %v18410_v51 = vpop.f32.mrb[84].mxu1  ;;  %2830 = vst.msk [vmem:[#allocation2 + $0x78] sm:$0xff] %vm632_vm3, %v2798_v20  ;;  %v2353_v27 = vadd.f32 %v15663_v53, %v1998_v45  ;;  %v2273_v39 = vpop.f32.mrb[85].mxu0  ;;  %15977 = vmatmul.mubr.msk.f32.gmra.mrb[190].mxu0 %vm310_vm0, %v4683_v17  ;;  %v6011_v35 = vld [vmem:[#allocation3 + $0xa7] sm:$0xff] }
 0x235   : > { %v18413_v57 = vpop.f32.mrb[85].mxu1  ;;  %16027 = vmatmul.mubr.msk.f32.gmra.mrb[190].mxu1 %vm310_vm0, %v5134_v36  ;;  %2829 = vst.msk [vmem:[#allocation2 + $0x70] sm:$0xff] %vm632_vm3, %v2797_v40  ;;  %v2445_v41 = vld [vmem:[#allocation2 + $0x88] sm:$0xff]  ;;  %v2352_v6 = vadd.f32 %v2273_v39, %v1997_v29  ;;  %16031 = vmatprep.mubr.msk.f32.mxu0 %vm310_vm0, %v5554_v59 }
 0x236   : > { %16081 = vmatprep.mubr.msk.f32.mxu1 %vm310_vm0, %v6005_v58  ;;  %v2800_v54 = vadd.f32 %v18386_v13, %v2445_v41  ;;  %v2444_v56 = vld [vmem:[#allocation2 + $0x80] sm:$0xff]  ;;  %2385 = vst.msk [vmem:[#allocation2 + $0xa8] sm:$0xff] %vm632_vm3, %v2353_v27  ;;  %v5561_v27 = vld [vmem:[#allocation3 + $0xae] sm:$0xff] }
 0x237   : > { %v2799_v7 = vadd.f32 %v2704_v43, %v2444_v56  ;;  %2384 = vst.msk [vmem:[#allocation2 + $0xa0] sm:$0xff] %vm632_vm3, %v2352_v6  ;;  %v15666_v14 = vpop.f32.mrb[86].mxu0  ;;  %v6012_v29 = vld [vmem:[#allocation3 + $0xaf] sm:$0xff]  ;;  %v5562_v41 = vld [vmem:[#allocation3 + $0xc6] sm:$0xff] }
 0x238   : > { %v18423_v30 = vpop.f32.mrb[86].mxu1  ;;  %2832 = vst.msk [vmem:[#allocation2 + $0x88] sm:$0xff] %vm632_vm3, %v2800_v54  ;;  %v2355_v32 = vadd.f32 %v15666_v14, %v2000_v4  ;;  %v2283_v44 = vpop.f32.mrb[87].mxu0  ;;  %16032 = vmatmul.mubr.msk.f32.vlgmr.msra.gmra.mrb[192].mxu0 %vm310_vm0, %v5555_v2  ;;  %v6013_v6 = vld [vmem:[#allocation3 + $0xc7] sm:$0xff]  ;;  %v2008_v14 = vld [vmem:[#allocation2 + $0xf8] sm:$0xff] }
 0x239   : > { %v18426_v12 = vpop.f32.mrb[87].mxu1  ;;  %16082 = vmatmul.mubr.msk.f32.vlgmr.msra.gmra.mrb[192].mxu1 %vm310_vm0, %v6006_v8  ;;  %2831 = vst.msk [vmem:[#allocation2 + $0x80] sm:$0xff] %vm632_vm3, %v2799_v7  ;;  %v2447_v61 = vld [vmem:[#allocation2 + $0x98] sm:$0xff]  ;;  %v2354_v63 = vadd.f32 %v2283_v44, %v1999_v49  ;;  %16130 = vmatpush3.msra.mxu0 %v18234_v22  ;;  %v5557_v22 = vld [vmem:[#allocation3 + $0x6e] sm:$0xff] }
 0x23a   : > { %16034 = vmatprep.mubr.msk.f32.mxu0 %vm310_vm0, %v5556_v31  ;;  %v2802_v60 = vadd.f32 %v18397_v1, %v2447_v61  ;;  %v2446_v13 = vld [vmem:[#allocation2 + $0x90] sm:$0xff]  ;;  %2387 = vst.msk [vmem:[#allocation2 + $0xb8] sm:$0xff] %vm632_vm3, %v2355_v32  ;;  %16084 = vmatprep.mubr.msk.f32.mxu1 %vm310_vm0, %v6007_v11  ;;  %v2004_v1 = vld [vmem:[#allocation2 + $0xd8] sm:$0xff]  ;;  %v6015_v11 = vld [vmem:[#allocation3 + $0xe7] sm:$0xff] }
 0x23b   : > { %16180 = vmatpush3.msra.mxu1 %v18239_v18  ;;  %v2801_v62 = vadd.f32 %v18400_v19, %v2446_v13  ;;  %2386 = vst.msk [vmem:[#allocation2 + $0xb0] sm:$0xff] %vm632_vm3, %v2354_v63  ;;  %v15669_v16 = vpop.f32.mrb[88].mxu0  ;;  %16229 = vmatprep.subr.mxu0 %v18433_v46  ;;  %v2003_v19 = vld [vmem:[#allocation2 + $0xd0] sm:$0xff]  ;;  %v5564_v63 = vld [vmem:[#allocation3 + $0xe6] sm:$0xff] }
 0x23c   : > { %v18449_v33 = vpop.f32.mrb[88].mxu1  ;;  %16279 = vmatprep.subr.mxu1 %v18438_v15  ;;  %2834 = vst.msk [vmem:[#allocation2 + $0x98] sm:$0xff] %vm632_vm3, %v2802_v60  ;;  %v2357_v43 = vadd.f32 %v15669_v16, %v2002_v28  ;;  %v2293_v0 = vpop.f32.mrb[89].mxu0  ;;  %16035 = vmatmul.mubr.msk.f32.gmra.mrb[194].mxu0 %vm310_vm0, %v5557_v22  ;;  %v5563_v31 = vld [vmem:[#allocation3 + $0xce] sm:$0xff] }
 0x23d   : > { %v2744_v18 = vpop.f32.mrb[89].mxu1  ;;  %16085 = vmatmul.mubr.msk.f32.gmra.mrb[194].mxu1 %vm310_vm0, %v6008_v21  ;;  %2833 = vst.msk [vmem:[#allocation2 + $0x90] sm:$0xff] %vm632_vm3, %v2801_v62  ;;  %v2449_v5 = vld [vmem:[#allocation2 + $0xa8] sm:$0xff]  ;;  %v2356_v24 = vadd.f32 %v2293_v0, %v2001_v47  ;;  %16037 = vmatprep.mubr.msk.f32.mxu0 %vm310_vm0, %v5558_v42  ;;  %v2007_v44 = vld [vmem:[#allocation2 + $0xf0] sm:$0xff] }
 0x23e   : > { %16087 = vmatprep.mubr.msk.f32.mxu1 %vm310_vm0, %v6009_v3  ;;  %v2804_v23 = vadd.f32 %v18410_v51, %v2449_v5  ;;  %v2448_v26 = vld [vmem:[#allocation2 + $0xa0] sm:$0xff]  ;;  %2389 = vst.msk [vmem:[#allocation2 + $0xc8] sm:$0xff] %vm632_vm3, %v2357_v43  ;;  %v2006_v51 = vld [vmem:[#allocation2 + $0xe8] sm:$0xff] }
 0x23f   : > { %v2803_v52 = vadd.f32 %v18413_v57, %v2448_v26  ;;  %2388 = vst.msk [vmem:[#allocation2 + $0xc0] sm:$0xff] %vm632_vm3, %v2356_v24  ;;  %v15672_v50 = vpop.f32.mrb[90].mxu0  ;;  %v2005_v57 = vld [vmem:[#allocation2 + $0xe0] sm:$0xff]  ;;  %v6014_v32 = vld [vmem:[#allocation3 + $0xcf] sm:$0xff] }
 0x240   : > { %v18463_v55 = vpop.f32.mrb[90].mxu1  ;;  %2836 = vst.msk [vmem:[#allocation2 + $0xa8] sm:$0xff] %vm632_vm3, %v2804_v23  ;;  %v2359_v10 = vadd.f32 %v15672_v50, %v2004_v1  ;;  %v2303_v25 = vpop.f32.mrb[91].mxu0  ;;  %16038 = vmatmul.mubr.msk.f32.gmra.mrb[196].mxu0 %vm310_vm0, %v5559_v48  ;;  %v5565_v21 = vld [vmem:[#allocation3 + $0xee] sm:$0xff]  ;;  %v5566_v3 = vld [vmem:[#allocation3 + $0x106] sm:$0xff] }
 0x241   : > { %v2754_v34 = vpop.f32.mrb[91].mxu1  ;;  %16088 = vmatmul.mubr.msk.f32.gmra.mrb[196].mxu1 %vm310_vm0, %v6010_v9  ;;  %2835 = vst.msk [vmem:[#allocation2 + $0xa0] sm:$0xff] %vm632_vm3, %v2803_v52  ;;  %v2451_v20 = vld [vmem:[#allocation2 + $0xb8] sm:$0xff]  ;;  %v2358_v37 = vadd.f32 %v2303_v25, %v2003_v19  ;;  %16040 = vmatprep.mubr.msk.f32.mxu0 %vm310_vm0, %v5560_v38  ;;  %v6016_v43 = vld [vmem:[#allocation3 + $0xef] sm:$0xff]  ;;  %v6017_v5 = vld [vmem:[#allocation3 + $0x107] sm:$0xff] }
 0x242   : > { %16090 = vmatprep.mubr.msk.f32.mxu1 %vm310_vm0, %v6011_v35  ;;  %v2806_v40 = vadd.f32 %v18423_v30, %v2451_v20  ;;  %v2450_v45 = vld [vmem:[#allocation2 + $0xb0] sm:$0xff]  ;;  %2391 = vst.msk [vmem:[#allocation2 + $0xd8] sm:$0xff] %vm632_vm3, %v2359_v10  ;;  %v5568_v20 = vld [vmem:[#allocation3 + $0x126] sm:$0xff] }
 0x243   : > { %v2805_v53 = vadd.f32 %v18426_v12, %v2450_v45  ;;  %2390 = vst.msk [vmem:[#allocation2 + $0xd0] sm:$0xff] %vm632_vm3, %v2358_v37  ;;  %v15675_v17 = vpop.f32.mrb[92].mxu0  ;;  %v5567_v10 = vld [vmem:[#allocation3 + $0x10e] sm:$0xff] }
 0x244   : > { %v18475_v36 = vpop.f32.mrb[92].mxu1  ;;  %2838 = vst.msk [vmem:[#allocation2 + $0xb8] sm:$0xff] %vm632_vm3, %v2806_v40  ;;  %v2361_v39 = vadd.f32 %v15675_v17, %v2006_v51  ;;  %v2313_v59 = vpop.f32.mrb[93].mxu0  ;;  %16041 = vmatmul.mubr.msk.f32.gmra.mrb[198].mxu0 %vm310_vm0, %v5561_v27  ;;  %v6018_v19 = vld [vmem:[#allocation3 + $0x10f] sm:$0xff]  ;;  %v6019_v37 = vld [vmem:[#allocation3 + $0x127] sm:$0xff] }
 0x245   : > { %v2764_v58 = vpop.f32.mrb[93].mxu1  ;;  %16091 = vmatmul.mubr.msk.f32.gmra.mrb[198].mxu1 %vm310_vm0, %v6012_v29  ;;  %2837 = vst.msk [vmem:[#allocation2 + $0xb0] sm:$0xff] %vm632_vm3, %v2805_v53  ;;  %v2453_v54 = vld [vmem:[#allocation2 + $0xc8] sm:$0xff]  ;;  %v2360_v56 = vadd.f32 %v2313_v59, %v2005_v57  ;;  %16043 = vmatprep.mubr.msk.f32.mxu0 %vm310_vm0, %v5562_v41 }
 0x246   : > { %16093 = vmatprep.mubr.msk.f32.mxu1 %vm310_vm0, %v6013_v6  ;;  %v2808_v2 = vadd.f32 %v18449_v33, %v2453_v54  ;;  %v2452_v7 = vld [vmem:[#allocation2 + $0xc0] sm:$0xff]  ;;  %2393 = vst.msk [vmem:[#allocation2 + $0xe8] sm:$0xff] %vm632_vm3, %v2361_v39  ;;  %v2880_v33 = vld [vmem:[#allocation2 + $0x8] sm:$0xff] }
 0x247   : > { %v2807_v4 = vadd.f32 %v2744_v18, %v2452_v7  ;;  %2392 = vst.msk [vmem:[#allocation2 + $0xe0] sm:$0xff] %vm632_vm3, %v2360_v56  ;;  %v15678_v30 = vpop.f32.mrb[94].mxu0  ;;  %v2879_v18 = vld [vmem:[#allocation2] sm:$0xff]  ;;  %v5569_v39 = vld [vmem:[#allocation3 + $0x12e] sm:$0xff] }
 0x248   : > { %v18486_v8 = vpop.f32.mrb[94].mxu1  ;;  %2840 = vst.msk [vmem:[#allocation2 + $0xc8] sm:$0xff] %vm632_vm3, %v2808_v2  ;;  %v2363_v49 = vadd.f32 %v15678_v30, %v2008_v14  ;;  %v2323_v12 = vpop.f32.mrb[95].mxu0  ;;  %16044 = vmatmul.mubr.msk.f32.gmra.mrb[200].mxu0 %vm310_vm0, %v5563_v31  ;;  %v6020_v57 = vld [vmem:[#allocation3 + $0x12f] sm:$0xff]  ;;  %v5570_v54 = vld [vmem:[#allocation3 + $0x146] sm:$0xff] }
 0x249   : > { %v2774_v61 = vpop.f32.mrb[95].mxu1  ;;  %16094 = vmatmul.mubr.msk.f32.gmra.mrb[200].mxu1 %vm310_vm0, %v6014_v32  ;;  %2839 = vst.msk [vmem:[#allocation2 + $0xc0] sm:$0xff] %vm632_vm3, %v2807_v4  ;;  %v2455_v60 = vld [vmem:[#allocation2 + $0xd8] sm:$0xff]  ;;  %v2362_v13 = vadd.f32 %v2323_v12, %v2007_v44  ;;  %16046 = vmatprep.mubr.msk.f32.mxu0 %vm310_vm0, %v5564_v63  ;;  %v6021_v56 = vld [vmem:[#allocation3 + $0x147] sm:$0xff]  ;;  %v6022_v44 = vld [vmem:[#allocation3 + $0x14f] sm:$0xff] }
 0x24a   : > { %16096 = vmatprep.mubr.msk.f32.mxu1 %vm310_vm0, %v6015_v11  ;;  %v2810_v62 = vadd.f32 %v18463_v55, %v2455_v60  ;;  %v2454_v28 = vld [vmem:[#allocation2 + $0xd0] sm:$0xff]  ;;  %2395 = vst.msk [vmem:[#allocation2 + $0xf8] sm:$0xff] %vm632_vm3, %v2363_v49  ;;  %v2882_v55 = vld [vmem:[#allocation2 + $0x18] sm:$0xff]  ;;  %v5572_v60 = vld [vmem:[#allocation3 + $0x166] sm:$0xff] }
 0x24b   : > { %v2809_v16 = vadd.f32 %v2754_v34, %v2454_v28  ;;  %2394 = vst.msk [vmem:[#allocation2 + $0xf0] sm:$0xff] %vm632_vm3, %v2362_v13  ;;  %v15733_v22 = vpop.f32.mrb[96].mxu0  ;;  %v2881_v34 = vld [vmem:[#allocation2 + $0x10] sm:$0xff]  ;;  %v6023_v13 = vld [vmem:[#allocation3 + $0x167] sm:$0xff] }
 0x24c   : > { %v18497_v47 = vpop.f32.mrb[96].mxu1  ;;  %2842 = vst.msk [vmem:[#allocation2 + $0xd8] sm:$0xff] %vm632_vm3, %v2810_v62  ;;  %v3235_v0 = vadd.f32 %v15733_v22, %v2880_v33  ;;  %v3075_v42 = vpop.f32.mrb[97].mxu0  ;;  %16047 = vmatmul.mubr.msk.f32.gmra.mrb[202].mxu0 %vm310_vm0, %v5565_v21  ;;  %v5571_v49 = vld [vmem:[#allocation3 + $0x14e] sm:$0xff] }
 0x24d   : > { %16097 = vmatmul.mubr.msk.f32.gmra.mrb[202].mxu1 %vm310_vm0, %v6016_v43  ;;  %v3527_v24 = vpop.f32.mrb[97].mxu1  ;;  %2841 = vst.msk [vmem:[#allocation2 + $0xd0] sm:$0xff] %vm632_vm3, %v2809_v16  ;;  %v2457_v23 = vld [vmem:[#allocation2 + $0xe8] sm:$0xff]  ;;  %v3234_v26 = vadd.f32 %v3075_v42, %v2879_v18  ;;  %16049 = vmatprep.mubr.msk.f32.mxu0 %vm310_vm0, %v5566_v3  ;;  %v2887_v3 = vld [vmem:[#allocation2 + $0x40] sm:$0xff] }
 0x24e   : > { %16099 = vmatprep.mubr.msk.f32.mxu1 %vm310_vm0, %v6017_v5  ;;  %v2812_v52 = vadd.f32 %v18475_v36, %v2457_v23  ;;  %v2456_v1 = vld [vmem:[#allocation2 + $0xe0] sm:$0xff]  ;;  %3267 = vst.msk [vmem:[#allocation2 + $0x8] sm:$0xff] %vm632_vm3, %v3235_v0  ;;  %v2884_v36 = vld [vmem:[#allocation2 + $0x28] sm:$0xff] }
 0x24f   : > { %v2811_v50 = vadd.f32 %v2764_v58, %v2456_v1  ;;  %3266 = vst.msk [vmem:[#allocation2] sm:$0xff] %vm632_vm3, %v3234_v26  ;;  %v15736_v48 = vpop.f32.mrb[98].mxu0  ;;  %v2883_v58 = vld [vmem:[#allocation2 + $0x20] sm:$0xff]  ;;  %v2888_v21 = vld [vmem:[#allocation2 + $0x48] sm:$0xff] }
 0x250   : > { %v18508_v9 = vpop.f32.mrb[98].mxu1  ;;  %2844 = vst.msk [vmem:[#allocation2 + $0xe8] sm:$0xff] %vm632_vm3, %v2812_v52  ;;  %v3237_v25 = vadd.f32 %v15736_v48, %v2882_v55  ;;  %v3085_v38 = vpop.f32.mrb[99].mxu0  ;;  %16050 = vmatmul.mubr.msk.f32.gmra.mrb[204].mxu0 %vm310_vm0, %v5567_v10  ;;  %v5573_v0 = vld [vmem:[#allocation3 + $0x16e] sm:$0xff]  ;;  %v5574_v23 = vld [vmem:[#allocation3 + $0x186] sm:$0xff] }
 0x251   : > { %v3537_v35 = vpop.f32.mrb[99].mxu1  ;;  %16100 = vmatmul.mubr.msk.f32.gmra.mrb[204].mxu1 %vm310_vm0, %v6018_v19  ;;  %2843 = vst.msk [vmem:[#allocation2 + $0xe0] sm:$0xff] %vm632_vm3, %v2811_v50  ;;  %v2459_v40 = vld [vmem:[#allocation2 + $0xf8] sm:$0xff]  ;;  %v3236_v45 = vadd.f32 %v3085_v38, %v2881_v34  ;;  %16052 = vmatprep.mubr.msk.f32.mxu0 %vm310_vm0, %v5568_v20  ;;  %v6024_v18 = vld [vmem:[#allocation3 + $0x16f] sm:$0xff]  ;;  %v6025_v26 = vld [vmem:[#allocation3 + $0x187] sm:$0xff] }
 0x252   : > { %16102 = vmatprep.mubr.msk.f32.mxu1 %vm310_vm0, %v6019_v37  ;;  %v2814_v53 = vadd.f32 %v18486_v8, %v2459_v40  ;;  %v2458_v51 = vld [vmem:[#allocation2 + $0xf0] sm:$0xff]  ;;  %3269 = vst.msk [vmem:[#allocation2 + $0x18] sm:$0xff] %vm632_vm3, %v3237_v25  ;;  %v2886_v8 = vld [vmem:[#allocation2 + $0x38] sm:$0xff]  ;;  %v5576_v40 = vld [vmem:[#allocation3 + $0x1a6] sm:$0xff] }
 0x253   : > { %v2813_v17 = vadd.f32 %v2774_v61, %v2458_v51  ;;  %3268 = vst.msk [vmem:[#allocation2 + $0x10] sm:$0xff] %vm632_vm3, %v3236_v45  ;;  %v15739_v27 = vpop.f32.mrb[100].mxu0  ;;  %v2885_v61 = vld [vmem:[#allocation2 + $0x30] sm:$0xff]  ;;  %v6027_v45 = vld [vmem:[#allocation3 + $0x1a7] sm:$0xff] }
 0x254   : > { %v18519_v29 = vpop.f32.mrb[100].mxu1  ;;  %2846 = vst.msk [vmem:[#allocation2 + $0xf8] sm:$0xff] %vm632_vm3, %v2814_v53  ;;  %v3239_v59 = vadd.f32 %v15739_v27, %v2884_v36  ;;  %v3095_v41 = vpop.f32.mrb[101].mxu0  ;;  %16053 = vmatmul.mubr.msk.f32.gmra.mrb[206].mxu0 %vm310_vm0, %v5569_v39  ;;  %v5575_v25 = vld [vmem:[#allocation3 + $0x18e] sm:$0xff] }
 0x255   : > { %v3547_v6 = vpop.f32.mrb[101].mxu1  ;;  %16103 = vmatmul.mubr.msk.f32.gmra.mrb[206].mxu1 %vm310_vm0, %v6020_v57  ;;  %2845 = vst.msk [vmem:[#allocation2 + $0xf0] sm:$0xff] %vm632_vm3, %v2813_v17  ;;  %v3332_v2 = vld [vmem:[#allocation2 + $0x8] sm:$0xff]  ;;  %v3238_v7 = vadd.f32 %v3095_v41, %v2883_v58  ;;  %16055 = vmatprep.mubr.msk.f32.mxu0 %vm310_vm0, %v5570_v54 }
 0x256   : > { %16105 = vmatprep.mubr.msk.f32.mxu1 %vm310_vm0, %v6021_v56  ;;  %v3687_v4 = vadd.f32 %v18497_v47, %v3332_v2  ;;  %v3331_v14 = vld [vmem:[#allocation2] sm:$0xff]  ;;  %3271 = vst.msk [vmem:[#allocation2 + $0x28] sm:$0xff] %vm632_vm3, %v3239_v59  ;;  %v6026_v34 = vld [vmem:[#allocation3 + $0x18f] sm:$0xff] }
 0x257   : > { %v3686_v30 = vadd.f32 %v3527_v24, %v3331_v14  ;;  %3270 = vst.msk [vmem:[#allocation2 + $0x20] sm:$0xff] %vm632_vm3, %v3238_v7  ;;  %v15742_v31 = vpop.f32.mrb[102].mxu0  ;;  %v5577_v59 = vld [vmem:[#allocation3 + $0x1ae] sm:$0xff]  ;;  %v5578_v2 = vld [vmem:[#allocation3 + $0x1c6] sm:$0xff] }
 0x258   : > { %v18530_v32 = vpop.f32.mrb[102].mxu1  ;;  %3719 = vst.msk [vmem:[#allocation2 + $0x8] sm:$0xff] %vm632_vm3, %v3687_v4  ;;  %v3241_v12 = vadd.f32 %v15742_v31, %v2886_v8  ;;  %v3105_v63 = vpop.f32.mrb[103].mxu0  ;;  %16056 = vmatmul.mubr.msk.f32.gmra.mrb[208].mxu0 %vm310_vm0, %v5571_v49  ;;  %v6028_v58 = vld [vmem:[#allocation3 + $0x1af] sm:$0xff]  ;;  %v6029_v7 = vld [vmem:[#allocation3 + $0x1c7] sm:$0xff] }
 0x259   : > { %v3557_v11 = vpop.f32.mrb[103].mxu1  ;;  %16106 = vmatmul.mubr.msk.f32.gmra.mrb[208].mxu1 %vm310_vm0, %v6022_v44  ;;  %3718 = vst.msk [vmem:[#allocation2] sm:$0xff] %vm632_vm3, %v3686_v30  ;;  %v3334_v62 = vld [vmem:[#allocation2 + $0x18] sm:$0xff]  ;;  %v3240_v28 = vadd.f32 %v3105_v63, %v2885_v61  ;;  %16058 = vmatprep.mubr.msk.f32.mxu0 %vm310_vm0, %v5572_v60  ;;  %v6030_v61 = vld [vmem:[#allocation3 + $0x1cf] sm:$0xff] }
 0x25a   : > { %16108 = vmatprep.mubr.msk.f32.mxu1 %vm310_vm0, %v6023_v13  ;;  %v3689_v16 = vadd.f32 %v18508_v9, %v3334_v62  ;;  %v3333_v33 = vld [vmem:[#allocation2 + $0x10] sm:$0xff]  ;;  %3273 = vst.msk [vmem:[#allocation2 + $0x38] sm:$0xff] %vm632_vm3, %v3241_v12  ;;  %v2890_v9 = vld [vmem:[#allocation2 + $0x58] sm:$0xff]  ;;  %v5580_v62 = vld [vmem:[#allocation3 + $0x1e6] sm:$0xff] }
 0x25b   : > { %v3688_v22 = vadd.f32 %v3537_v35, %v3333_v33  ;;  %3272 = vst.msk [vmem:[#allocation2 + $0x30] sm:$0xff] %vm632_vm3, %v3240_v28  ;;  %v15745_v43 = vpop.f32.mrb[104].mxu0  ;;  %v2889_v35 = vld [vmem:[#allocation2 + $0x50] sm:$0xff]  ;;  %v6031_v28 = vld [vmem:[#allocation3 + $0x1e7] sm:$0xff] }
 0x25c   : > { %v18541_v47 = vpop.f32.mrb[104].mxu1  ;;  %3721 = vst.msk [vmem:[#allocation2 + $0x18] sm:$0xff] %vm632_vm3, %v3689_v16  ;;  %v3243_v42 = vadd.f32 %v15745_v43, %v2888_v21  ;;  %v3115_v5 = vpop.f32.mrb[105].mxu0  ;;  %16059 = vmatmul.mubr.msk.f32.gmra.mrb[210].mxu0 %vm310_vm0, %v5573_v0  ;;  %v5579_v12 = vld [vmem:[#allocation3 + $0x1ce] sm:$0xff] }
 0x25d   : > { %v3567_v24 = vpop.f32.mrb[105].mxu1  ;;  %16109 = vmatmul.mubr.msk.f32.gmra.mrb[210].mxu1 %vm310_vm0, %v6024_v18  ;;  %3720 = vst.msk [vmem:[#allocation2 + $0x10] sm:$0xff] %vm632_vm3, %v3688_v22  ;;  %v3336_v52 = vld [vmem:[#allocation2 + $0x28] sm:$0xff]  ;;  %v3242_v1 = vadd.f32 %v3115_v5, %v2887_v3  ;;  %16061 = vmatprep.mubr.msk.f32.mxu0 %vm310_vm0, %v5574_v23 }
 0x25e   : > { %16111 = vmatprep.mubr.msk.f32.mxu1 %vm310_vm0, %v6025_v26  ;;  %v3691_v50 = vadd.f32 %v18519_v29, %v3336_v52  ;;  %v3335_v55 = vld [vmem:[#allocation2 + $0x20] sm:$0xff]  ;;  %3275 = vst.msk [vmem:[#allocation2 + $0x48] sm:$0xff] %vm632_vm3, %v3243_v42  ;;  %v2892_v29 = vld [vmem:[#allocation2 + $0x68] sm:$0xff] }
 0x25f   : > { %v3690_v48 = vadd.f32 %v3547_v6, %v3335_v55  ;;  %3274 = vst.msk [vmem:[#allocation2 + $0x40] sm:$0xff] %vm632_vm3, %v3242_v1  ;;  %v15748_v10 = vpop.f32.mrb[106].mxu0  ;;  %v2891_v6 = vld [vmem:[#allocation2 + $0x60] sm:$0xff]  ;;  %v5581_v42 = vld [vmem:[#allocation3 + $0x1ee] sm:$0xff] }
 0x260   : > { %v18552_v19 = vpop.f32.mrb[106].mxu1  ;;  %3723 = vst.msk [vmem:[#allocation2 + $0x28] sm:$0xff] %vm632_vm3, %v3691_v50  ;;  %v3245_v38 = vadd.f32 %v15748_v10, %v2890_v9  ;;  %v3125_v20 = vpop.f32.mrb[107].mxu0  ;;  %16062 = vmatmul.mubr.msk.f32.gmra.mrb[212].mxu0 %vm310_vm0, %v5575_v25  ;;  %v6032_v3 = vld [vmem:[#allocation3 + $0x1ef] sm:$0xff]  ;;  %v5582_v52 = vld [vmem:[#allocation3 + $0x206] sm:$0xff] }
 0x261   : > { %v3577_v37 = vpop.f32.mrb[107].mxu1  ;;  %16112 = vmatmul.mubr.msk.f32.gmra.mrb[212].mxu1 %vm310_vm0, %v6026_v34  ;;  %3722 = vst.msk [vmem:[#allocation2 + $0x20] sm:$0xff] %vm632_vm3, %v3690_v48  ;;  %v3338_v53 = vld [vmem:[#allocation2 + $0x38] sm:$0xff]  ;;  %v3244_v51 = vadd.f32 %v3125_v20, %v2889_v35  ;;  %16064 = vmatprep.mubr.msk.f32.mxu0 %vm310_vm0, %v5576_v40  ;;  %v6033_v1 = vld [vmem:[#allocation3 + $0x207] sm:$0xff]  ;;  %v6034_v35 = vld [vmem:[#allocation3 + $0x20f] sm:$0xff] }
 0x262   : > { %16114 = vmatprep.mubr.msk.f32.mxu1 %vm310_vm0, %v6027_v45  ;;  %v3693_v17 = vadd.f32 %v18530_v32, %v3338_v53  ;;  %v3337_v36 = vld [vmem:[#allocation2 + $0x30] sm:$0xff]  ;;  %3277 = vst.msk [vmem:[#allocation2 + $0x58] sm:$0xff] %vm632_vm3, %v3245_v38  ;;  %v2894_v32 = vld [vmem:[#allocation2 + $0x78] sm:$0xff]  ;;  %v5584_v53 = vld [vmem:[#allocation3 + $0x226] sm:$0xff] }
 0x263   : > { %v3692_v27 = vadd.f32 %v3557_v11, %v3337_v36  ;;  %3276 = vst.msk [vmem:[#allocation2 + $0x50] sm:$0xff] %vm632_vm3, %v3244_v51  ;;  %v15751_v39 = vpop.f32.mrb[108].mxu0  ;;  %v2893_v11 = vld [vmem:[#allocation2 + $0x70] sm:$0xff]  ;;  %v6035_v51 = vld [vmem:[#allocation3 + $0x227] sm:$0xff] }
 0x264   : > { %v18563_v57 = vpop.f32.mrb[108].mxu1  ;;  %3725 = vst.msk [vmem:[#allocation2 + $0x38] sm:$0xff] %vm632_vm3, %v3693_v17  ;;  %v3247_v41 = vadd.f32 %v15751_v39, %v2892_v29  ;;  %v3135_v54 = vpop.f32.mrb[109].mxu0  ;;  %16065 = vmatmul.mubr.msk.f32.gmra.mrb[214].mxu0 %vm310_vm0, %v5577_v59  ;;  %v5583_v38 = vld [vmem:[#allocation3 + $0x20e] sm:$0xff] }
 0x265   : > { %v3587_v56 = vpop.f32.mrb[109].mxu1  ;;  %16115 = vmatmul.mubr.msk.f32.gmra.mrb[214].mxu1 %vm310_vm0, %v6028_v58  ;;  %3724 = vst.msk [vmem:[#allocation2 + $0x30] sm:$0xff] %vm632_vm3, %v3692_v27  ;;  %v3340_v4 = vld [vmem:[#allocation2 + $0x48] sm:$0xff]  ;;  %v3246_v14 = vadd.f32 %v3135_v54, %v2891_v6  ;;  %16067 = vmatprep.mubr.msk.f32.mxu0 %vm310_vm0, %v5578_v2 }
 0x266   : > { %16117 = vmatprep.mubr.msk.f32.mxu1 %vm310_vm0, %v6029_v7  ;;  %v3695_v30 = vadd.f32 %v18541_v47, %v3340_v4  ;;  %v3339_v8 = vld [vmem:[#allocation2 + $0x40] sm:$0xff]  ;;  %3279 = vst.msk [vmem:[#allocation2 + $0x68] sm:$0xff] %vm632_vm3, %v3247_v41  ;;  %v2896_v47 = vld [vmem:[#allocation2 + $0x88] sm:$0xff] }
 0x267   : > { %v3694_v31 = vadd.f32 %v3567_v24, %v3339_v8  ;;  %3278 = vst.msk [vmem:[#allocation2 + $0x60] sm:$0xff] %vm632_vm3, %v3246_v14  ;;  %v15754_v49 = vpop.f32.mrb[110].mxu0  ;;  %v2895_v24 = vld [vmem:[#allocation2 + $0x80] sm:$0xff]  ;;  %v5585_v41 = vld [vmem:[#allocation3 + $0x22e] sm:$0xff] }
 0x268   : > { %v18574_v44 = vpop.f32.mrb[110].mxu1  ;;  %3727 = vst.msk [vmem:[#allocation2 + $0x48] sm:$0xff] %vm632_vm3, %v3695_v30  ;;  %v3249_v63 = vadd.f32 %v15754_v49, %v2894_v32  ;;  %v3145_v60 = vpop.f32.mrb[111].mxu0  ;;  %16068 = vmatmul.mubr.msk.f32.gmra.mrb[216].mxu0 %vm310_vm0, %v5579_v12  ;;  %v6036_v6 = vld [vmem:[#allocation3 + $0x22f] sm:$0xff]  ;;  %v2902_v12 = vld [vmem:[#allocation2 + $0xb8] sm:$0xff] }
 0x269   : > { %v3597_v13 = vpop.f32.mrb[111].mxu1  ;;  %16118 = vmatmul.mubr.msk.f32.gmra.mrb[216].mxu1 %vm310_vm0, %v6030_v61  ;;  %3726 = vst.msk [vmem:[#allocation2 + $0x40] sm:$0xff] %vm632_vm3, %v3694_v31  ;;  %v3342_v16 = vld [vmem:[#allocation2 + $0x58] sm:$0xff]  ;;  %v3248_v33 = vadd.f32 %v3145_v60, %v2893_v11  ;;  %16070 = vmatprep.mubr.msk.f32.mxu0 %vm310_vm0, %v5580_v62  ;;  %v6456_v4 = vld [vmem:[#allocation3 + $0x48] sm:$0xff]  ;;  %v6457_v49 = vld [vmem:[#allocation3 + $0x50] sm:$0xff] }
 0x26a   : > { %16120 = vmatprep.mubr.msk.f32.mxu1 %vm310_vm0, %v6031_v28  ;;  %v3697_v22 = vadd.f32 %v18552_v19, %v3342_v16  ;;  %v3341_v21 = vld [vmem:[#allocation2 + $0x50] sm:$0xff]  ;;  %3281 = vst.msk [vmem:[#allocation2 + $0x78] sm:$0xff] %vm632_vm3, %v3249_v63  ;;  %v2898_v19 = vld [vmem:[#allocation2 + $0x98] sm:$0xff]  ;;  %v6458_v60 = vld [vmem:[#allocation3 + $0x68] sm:$0xff] }
 0x26b   : > { %v3696_v43 = vadd.f32 %v3577_v37, %v3341_v21  ;;  %3280 = vst.msk [vmem:[#allocation2 + $0x70] sm:$0xff] %vm632_vm3, %v3248_v33  ;;  %v15757_v0 = vpop.f32.mrb[112].mxu0  ;;  %v2897_v37 = vld [vmem:[#allocation2 + $0x90] sm:$0xff]  ;;  %v18632_v33 = vld [vmem:[%s21250_s4 + $0x80] sm:$0xff] }
 0x26c   : > { %v18585_v18 = vpop.f32.mrb[112].mxu1  ;;  %3729 = vst.msk [vmem:[#allocation2 + $0x58] sm:$0xff] %vm632_vm3, %v3697_v22  ;;  %v3251_v5 = vadd.f32 %v15757_v0, %v2896_v47  ;;  %v3155_v23 = vpop.f32.mrb[113].mxu0  ;;  %16071 = vmatmul.mubr.msk.f32.gmra.mrb[218].mxu0 %vm310_vm0, %v5581_v42  ;;  %v6907_v14 = vld [vmem:[#allocation3 + $0x49] sm:$0xff]  ;;  %v6908_v11 = vld [vmem:[#allocation3 + $0x51] sm:$0xff] }
 0x26d   : > { %v3607_v26 = vpop.f32.mrb[113].mxu1  ;;  %16121 = vmatmul.mubr.msk.f32.gmra.mrb[218].mxu1 %vm310_vm0, %v6032_v3  ;;  %3728 = vst.msk [vmem:[#allocation2 + $0x50] sm:$0xff] %vm632_vm3, %v3696_v43  ;;  %v3344_v50 = vld [vmem:[#allocation2 + $0x68] sm:$0xff]  ;;  %v3250_v55 = vadd.f32 %v3155_v23, %v2895_v24  ;;  %16073 = vmatprep.mubr.msk.f32.mxu0 %vm310_vm0, %v5582_v52  ;;  %v2901_v62 = vld [vmem:[#allocation2 + $0xb0] sm:$0xff]  ;;  %v2903_v52 = vld [vmem:[#allocation2 + $0xc0] sm:$0xff] }
 0x26e   : > { %16123 = vmatprep.mubr.msk.f32.mxu1 %vm310_vm0, %v6033_v1  ;;  %v3699_v48 = vadd.f32 %v18563_v57, %v3344_v50  ;;  %v3343_v9 = vld [vmem:[#allocation2 + $0x60] sm:$0xff]  ;;  %3283 = vst.msk [vmem:[#allocation2 + $0x88] sm:$0xff] %vm632_vm3, %v3251_v5  ;;  %v2900_v57 = vld [vmem:[#allocation2 + $0xa8] sm:$0xff]  ;;  %v6910_v23 = vld [vmem:[#allocation3 + $0x71] sm:$0xff] }
 0x26f   : > { %v3698_v10 = vadd.f32 %v3587_v56, %v3343_v9  ;;  %3282 = vst.msk [vmem:[#allocation2 + $0x80] sm:$0xff] %vm632_vm3, %v3250_v55  ;;  %v15760_v25 = vpop.f32.mrb[114].mxu0  ;;  %v2899_v56 = vld [vmem:[#allocation2 + $0xa0] sm:$0xff]  ;;  %v18637_v22 = vld [vmem:[%s21250_s4 + $0x88] sm:$0xff] }
 0x270   : > { %v18596_v34 = vpop.f32.mrb[114].mxu1  ;;  %3731 = vst.msk [vmem:[#allocation2 + $0x68] sm:$0xff] %vm632_vm3, %v3699_v48  ;;  %v3253_v20 = vadd.f32 %v15760_v25, %v2898_v19  ;;  %v3165_v40 = vpop.f32.mrb[115].mxu0  ;;  %16074 = vmatmul.mubr.msk.f32.gmra.mrb[220].mxu0 %vm310_vm0, %v5583_v38  ;;  %v6909_v47 = vld [vmem:[#allocation3 + $0x69] sm:$0xff] }
 0x271   : > { %v18599_v45 = vpop.f32.mrb[115].mxu1  ;;  %16124 = vmatmul.mubr.msk.f32.gmra.mrb[220].mxu1 %vm310_vm0, %v6034_v35  ;;  %3730 = vst.msk [vmem:[#allocation2 + $0x60] sm:$0xff] %vm632_vm3, %v3698_v10  ;;  %v3346_v17 = vld [vmem:[#allocation2 + $0x78] sm:$0xff]  ;;  %v3252_v36 = vadd.f32 %v3165_v40, %v2897_v37  ;;  %16076 = vmatprep.mubr.msk.f32.mxu0 %vm310_vm0, %v5584_v53  ;;  %v2904_v3 = vld [vmem:[#allocation2 + $0xc8] sm:$0xff] }
 0x272   : > { %16126 = vmatprep.mubr.msk.f32.mxu1 %vm310_vm0, %v6035_v51  ;;  %v3701_v27 = vadd.f32 %v18574_v44, %v3346_v17  ;;  %v3345_v29 = vld [vmem:[#allocation2 + $0x70] sm:$0xff]  ;;  %3285 = vst.msk [vmem:[#allocation2 + $0x98] sm:$0xff] %vm632_vm3, %v3253_v20  ;;  %v6460_v50 = vld [vmem:[#allocation3 + $0x88] sm:$0xff] }
 0x273   : > { %v3700_v39 = vadd.f32 %v3597_v13, %v3345_v29  ;;  %3284 = vst.msk [vmem:[#allocation2 + $0x90] sm:$0xff] %vm632_vm3, %v3252_v36  ;;  %v15763_v59 = vpop.f32.mrb[116].mxu0  ;;  %v6911_v55 = vld [vmem:[#allocation3 + $0x89] sm:$0xff]  ;;  %v6912_v37 = vld [vmem:[#allocation3 + $0x91] sm:$0xff] }
 0x274   : > { %v18609_v58 = vpop.f32.mrb[116].mxu1  ;;  %3733 = vst.msk [vmem:[#allocation2 + $0x78] sm:$0xff] %vm632_vm3, %v3701_v27  ;;  %v3255_v54 = vadd.f32 %v15763_v59, %v2900_v57  ;;  %v3175_v2 = vpop.f32.mrb[117].mxu0  ;;  %16077 = vmatmul.mubr.msk.f32.gmra.mrb[222].mxu0 %vm310_vm0, %v5585_v41  ;;  %v6461_v20 = vld [vmem:[#allocation3 + $0x90] sm:$0xff]  ;;  %v6462_v17 = vld [vmem:[#allocation3 + $0xa8] sm:$0xff] }
 0x275   : > { %v18612_v7 = vpop.f32.mrb[117].mxu1  ;;  %16127 = vmatmul.mubr.msk.f32.gmra.mrb[222].mxu1 %vm310_vm0, %v6036_v6  ;;  %3732 = vst.msk [vmem:[#allocation2 + $0x70] sm:$0xff] %vm632_vm3, %v3700_v39  ;;  %v3348_v30 = vld [vmem:[#allocation2 + $0x88] sm:$0xff]  ;;  %v3254_v8 = vadd.f32 %v3175_v2, %v2899_v56  ;;  %16131 = vmatprep.mubr.msk.f32.mxu0 %vm310_vm0, %v6456_v4  ;;  %v6914_v56 = vld [vmem:[#allocation3 + $0xb1] sm:$0xff] }
 0x276   : > { %16181 = vmatprep.mubr.msk.f32.mxu1 %vm310_vm0, %v6907_v14  ;;  %v3703_v31 = vadd.f32 %v18585_v18, %v3348_v30  ;;  %v3347_v32 = vld [vmem:[#allocation2 + $0x80] sm:$0xff]  ;;  %3287 = vst.msk [vmem:[#allocation2 + $0xa8] sm:$0xff] %vm632_vm3, %v3255_v54  ;;  %v6913_v36 = vld [vmem:[#allocation3 + $0xa9] sm:$0xff] }
 0x277   : > { %v3702_v44 = vadd.f32 %v3607_v26, %v3347_v32  ;;  %3286 = vst.msk [vmem:[#allocation2 + $0xa0] sm:$0xff] %vm632_vm3, %v3254_v8  ;;  %v15766_v61 = vpop.f32.mrb[118].mxu0  ;;  %v6463_v54 = vld [vmem:[#allocation3 + $0xb0] sm:$0xff]  ;;  %v6464_v30 = vld [vmem:[#allocation3 + $0xc8] sm:$0xff] }
 0x278   : > { %v18622_v63 = vpop.f32.mrb[118].mxu1  ;;  %3735 = vst.msk [vmem:[#allocation2 + $0x88] sm:$0xff] %vm632_vm3, %v3703_v31  ;;  %v3257_v13 = vadd.f32 %v15766_v61, %v2902_v12  ;;  %v3185_v28 = vpop.f32.mrb[119].mxu0  ;;  %16132 = vmatmul.mubr.msk.f32.vlgmr.msra.gmra.mrb[224].mxu0 %vm310_vm0, %v6457_v49  ;;  %v6915_v8 = vld [vmem:[#allocation3 + $0xc9] sm:$0xff]  ;;  %v2910_v61 = vld [vmem:[#allocation2 + $0xf8] sm:$0xff] }
 0x279   : > { %v18625_v16 = vpop.f32.mrb[119].mxu1  ;;  %16182 = vmatmul.mubr.msk.f32.vlgmr.msra.gmra.mrb[224].mxu1 %vm310_vm0, %v6908_v11  ;;  %3734 = vst.msk [vmem:[#allocation2 + $0x80] sm:$0xff] %vm632_vm3, %v3702_v44  ;;  %v3350_v21 = vld [vmem:[#allocation2 + $0x98] sm:$0xff]  ;;  %v3256_v43 = vadd.f32 %v3185_v28, %v2901_v62  ;;  %16230 = vmatpush3.msra.mxu0 %v18433_v46  ;;  %v6459_v46 = vld [vmem:[#allocation3 + $0x70] sm:$0xff] }
 0x27a   : > { %16134 = vmatprep.mubr.msk.f32.mxu0 %vm310_vm0, %v6458_v60  ;;  %v3705_v0 = vadd.f32 %v18596_v34, %v3350_v21  ;;  %v3349_v18 = vld [vmem:[#allocation2 + $0x90] sm:$0xff]  ;;  %3289 = vst.msk [vmem:[#allocation2 + $0xb8] sm:$0xff] %vm632_vm3, %v3257_v13  ;;  %16184 = vmatprep.mubr.msk.f32.mxu1 %vm310_vm0, %v6909_v47  ;;  %v2906_v34 = vld [vmem:[#allocation2 + $0xd8] sm:$0xff]  ;;  %v6466_v21 = vld [vmem:[#allocation3 + $0xe8] sm:$0xff] }
 0x27b   : > { %16280 = vmatpush3.msra.mxu1 %v18438_v15  ;;  %v3704_v42 = vadd.f32 %v18599_v45, %v3349_v18  ;;  %3288 = vst.msk [vmem:[#allocation2 + $0xb0] sm:$0xff] %vm632_vm3, %v3256_v43  ;;  %v15769_v5 = vpop.f32.mrb[120].mxu0  ;;  %16329 = vmatprep.subr.mxu0 %v18632_v33  ;;  %v2905_v45 = vld [vmem:[#allocation2 + $0xd0] sm:$0xff] }
 0x27c   : > { %v18648_v24 = vpop.f32.mrb[120].mxu1  ;;  %16379 = vmatprep.subr.mxu1 %v18637_v22  ;;  %3737 = vst.msk [vmem:[#allocation2 + $0x98] sm:$0xff] %vm632_vm3, %v3705_v0  ;;  %v3259_v26 = vadd.f32 %v15769_v5, %v2904_v3  ;;  %v3195_v1 = vpop.f32.mrb[121].mxu0  ;;  %16135 = vmatmul.mubr.msk.f32.gmra.mrb[226].mxu0 %vm310_vm0, %v6459_v46  ;;  %v6465_v11 = vld [vmem:[#allocation3 + $0xd0] sm:$0xff] }
 0x27d   : > { %v3647_v15 = vpop.f32.mrb[121].mxu1  ;;  %16185 = vmatmul.mubr.msk.f32.gmra.mrb[226].mxu1 %vm310_vm0, %v6910_v23  ;;  %3736 = vst.msk [vmem:[#allocation2 + $0x90] sm:$0xff] %vm632_vm3, %v3704_v42  ;;  %v3352_v48 = vld [vmem:[#allocation2 + $0xa8] sm:$0xff]  ;;  %v3258_v9 = vadd.f32 %v3195_v1, %v2903_v52  ;;  %16137 = vmatprep.mubr.msk.f32.mxu0 %vm310_vm0, %v6460_v50  ;;  %v6916_v60 = vld [vmem:[#allocation3 + $0xd1] sm:$0xff] }
 0x27e   : > { %16187 = vmatprep.mubr.msk.f32.mxu1 %vm310_vm0, %v6911_v55  ;;  %v3707_v10 = vadd.f32 %v18609_v58, %v3352_v48  ;;  %v3351_v19 = vld [vmem:[#allocation2 + $0xa0] sm:$0xff]  ;;  %3291 = vst.msk [vmem:[#allocation2 + $0xc8] sm:$0xff] %vm632_vm3, %v3259_v26  ;;  %v2908_v58 = vld [vmem:[#allocation2 + $0xe8] sm:$0xff]  ;;  %v2909_v28 = vld [vmem:[#allocation2 + $0xf0] sm:$0xff] }
 0x27f   : > { %v3706_v25 = vadd.f32 %v18612_v7, %v3351_v19  ;;  %3290 = vst.msk [vmem:[#allocation2 + $0xc0] sm:$0xff] %vm632_vm3, %v3258_v9  ;;  %v15772_v38 = vpop.f32.mrb[122].mxu0  ;;  %v2907_v7 = vld [vmem:[#allocation2 + $0xe0] sm:$0xff]  ;;  %v6917_v43 = vld [vmem:[#allocation3 + $0xe9] sm:$0xff]  ;;  %v6918_v26 = vld [vmem:[#allocation3 + $0xf1] sm:$0xff] }
 0x280   : > { %v18662_v35 = vpop.f32.mrb[122].mxu1  ;;  %3739 = vst.msk [vmem:[#allocation2 + $0xa8] sm:$0xff] %vm632_vm3, %v3707_v10  ;;  %v3261_v40 = vadd.f32 %v15772_v38, %v2906_v34  ;;  %v3205_v53 = vpop.f32.mrb[123].mxu0  ;;  %16138 = vmatmul.mubr.msk.f32.gmra.mrb[228].mxu0 %vm310_vm0, %v6461_v20  ;;  %v6467_v23 = vld [vmem:[#allocation3 + $0xf0] sm:$0xff]  ;;  %v6468_v55 = vld [vmem:[#allocation3 + $0x108] sm:$0xff] }
 0x281   : > { %v3657_v51 = vpop.f32.mrb[123].mxu1  ;;  %16188 = vmatmul.mubr.msk.f32.gmra.mrb[228].mxu1 %vm310_vm0, %v6912_v37  ;;  %3738 = vst.msk [vmem:[#allocation2 + $0xa0] sm:$0xff] %vm632_vm3, %v3706_v25  ;;  %v3354_v27 = vld [vmem:[#allocation2 + $0xb8] sm:$0xff]  ;;  %v3260_v29 = vadd.f32 %v3205_v53, %v2905_v45  ;;  %16140 = vmatprep.mubr.msk.f32.mxu0 %vm310_vm0, %v6462_v17  ;;  %v6919_v48 = vld [vmem:[#allocation3 + $0x109] sm:$0xff] }
 0x282   : > { %16190 = vmatprep.mubr.msk.f32.mxu1 %vm310_vm0, %v6913_v36  ;;  %v3709_v39 = vadd.f32 %v18622_v63, %v3354_v27  ;;  %v3353_v57 = vld [vmem:[#allocation2 + $0xb0] sm:$0xff]  ;;  %3293 = vst.msk [vmem:[#allocation2 + $0xd8] sm:$0xff] %vm632_vm3, %v3261_v40  ;;  %v6470_v27 = vld [vmem:[#allocation3 + $0x128] sm:$0xff] }
 0x283   : > { %v3708_v59 = vadd.f32 %v18625_v16, %v3353_v57  ;;  %3292 = vst.msk [vmem:[#allocation2 + $0xd0] sm:$0xff] %vm632_vm3, %v3260_v29  ;;  %v15775_v41 = vpop.f32.mrb[124].mxu0  ;;  %v6469_v40 = vld [vmem:[#allocation3 + $0x110] sm:$0xff] }
 0x284   : > { %v18674_v6 = vpop.f32.mrb[124].mxu1  ;;  %3741 = vst.msk [vmem:[#allocation2 + $0xb8] sm:$0xff] %vm632_vm3, %v3709_v39  ;;  %v3263_v2 = vadd.f32 %v15775_v41, %v2908_v58  ;;  %v3215_v4 = vpop.f32.mrb[125].mxu0  ;;  %16141 = vmatmul.mubr.msk.f32.gmra.mrb[230].mxu0 %vm310_vm0, %v6463_v54  ;;  %v6920_v45 = vld [vmem:[#allocation3 + $0x111] sm:$0xff]  ;;  %v6921_v29 = vld [vmem:[#allocation3 + $0x129] sm:$0xff] }
 0x285   : > { %v3667_v14 = vpop.f32.mrb[125].mxu1  ;;  %16191 = vmatmul.mubr.msk.f32.gmra.mrb[230].mxu1 %vm310_vm0, %v6914_v56  ;;  %3740 = vst.msk [vmem:[#allocation2 + $0xb0] sm:$0xff] %vm632_vm3, %v3708_v59  ;;  %v3356_v31 = vld [vmem:[#allocation2 + $0xc8] sm:$0xff]  ;;  %v3262_v32 = vadd.f32 %v3215_v4, %v2907_v7  ;;  %16143 = vmatprep.mubr.msk.f32.mxu0 %vm310_vm0, %v6464_v30  ;;  %v6922_v7 = vld [vmem:[#allocation3 + $0x131] sm:$0xff] }
 0x286   : > { %16193 = vmatprep.mubr.msk.f32.mxu1 %vm310_vm0, %v6915_v8  ;;  %v3711_v49 = vadd.f32 %v18648_v24, %v3356_v31  ;;  %v3355_v44 = vld [vmem:[#allocation2 + $0xc0] sm:$0xff]  ;;  %3295 = vst.msk [vmem:[#allocation2 + $0xe8] sm:$0xff] %vm632_vm3, %v3263_v2  ;;  %v3783_v24 = vld [vmem:[#allocation2 + $0x8] sm:$0xff]  ;;  %v6471_v2 = vld [vmem:[#allocation3 + $0x130] sm:$0xff] }
 0x287   : > { %v3710_v12 = vadd.f32 %v3647_v15, %v3355_v44  ;;  %3294 = vst.msk [vmem:[#allocation2 + $0xe0] sm:$0xff] %vm632_vm3, %v3262_v32  ;;  %v15778_v63 = vpop.f32.mrb[126].mxu0  ;;  %v3782_v15 = vld [vmem:[#allocation2] sm:$0xff]  ;;  %v6472_v31 = vld [vmem:[#allocation3 + $0x148] sm:$0xff] }
 0x288   : > { %v18685_v13 = vpop.f32.mrb[126].mxu1  ;;  %3743 = vst.msk [vmem:[#allocation2 + $0xc8] sm:$0xff] %vm632_vm3, %v3711_v49  ;;  %v3265_v62 = vadd.f32 %v15778_v63, %v2910_v61  ;;  %v3225_v16 = vpop.f32.mrb[127].mxu0  ;;  %16144 = vmatmul.mubr.msk.f32.gmra.mrb[232].mxu0 %vm310_vm0, %v6465_v11  ;;  %v6923_v32 = vld [vmem:[#allocation3 + $0x149] sm:$0xff]  ;;  %v3789_v11 = vld [vmem:[#allocation2 + $0x38] sm:$0xff] }
 0x289   : > { %16194 = vmatmul.mubr.msk.f32.gmra.mrb[232].mxu1 %vm310_vm0, %v6916_v60  ;;  %v3677_v47 = vpop.f32.mrb[127].mxu1  ;;  %3742 = vst.msk [vmem:[#allocation2 + $0xc0] sm:$0xff] %vm632_vm3, %v3710_v12  ;;  %v3358_v0 = vld [vmem:[#allocation2 + $0xd8] sm:$0xff]  ;;  %v3264_v18 = vadd.f32 %v3225_v16, %v2909_v28  ;;  %16146 = vmatprep.mubr.msk.f32.mxu0 %vm310_vm0, %v6466_v21  ;;  %v3788_v21 = vld [vmem:[#allocation2 + $0x30] sm:$0xff] }
 0x28a   : > { %16196 = vmatprep.mubr.msk.f32.mxu1 %vm310_vm0, %v6917_v43  ;;  %v3713_v42 = vadd.f32 %v18662_v35, %v3358_v0  ;;  %v3357_v3 = vld [vmem:[#allocation2 + $0xd0] sm:$0xff]  ;;  %3297 = vst.msk [vmem:[#allocation2 + $0xf8] sm:$0xff] %vm632_vm3, %v3265_v62  ;;  %v3785_v35 = vld [vmem:[#allocation2 + $0x18] sm:$0xff]  ;;  %v6474_v0 = vld [vmem:[#allocation3 + $0x168] sm:$0xff] }
 0x28b   : > { %v3712_v5 = vadd.f32 %v3657_v51, %v3357_v3  ;;  %3296 = vst.msk [vmem:[#allocation2 + $0xf0] sm:$0xff] %vm632_vm3, %v3264_v18  ;;  %v15833_v46 = vpop.f32.mrb[128].mxu0  ;;  %v3784_v51 = vld [vmem:[#allocation2 + $0x10] sm:$0xff] }
 0x28c   : > { %v18696_v52 = vpop.f32.mrb[128].mxu1  ;;  %3745 = vst.msk [vmem:[#allocation2 + $0xd8] sm:$0xff] %vm632_vm3, %v3713_v42  ;;  %v4138_v1 = vadd.f32 %v15833_v46, %v3783_v24  ;;  %v3978_v50 = vpop.f32.mrb[129].mxu0  ;;  %16147 = vmatmul.mubr.msk.f32.gmra.mrb[234].mxu0 %vm310_vm0, %v6467_v23  ;;  %v6473_v62 = vld [vmem:[#allocation3 + $0x150] sm:$0xff]  ;;  %v3791_v23 = vld [vmem:[#allocation2 + $0x48] sm:$0xff] }
 0x28d   : > { %16197 = vmatmul.mubr.msk.f32.gmra.mrb[234].mxu1 %vm310_vm0, %v6918_v26  ;;  %v4429_v9 = vpop.f32.mrb[129].mxu1  ;;  %3744 = vst.msk [vmem:[#allocation2 + $0xd0] sm:$0xff] %vm632_vm3, %v3712_v5  ;;  %v3360_v10 = vld [vmem:[#allocation2 + $0xe8] sm:$0xff]  ;;  %v4137_v19 = vadd.f32 %v3978_v50, %v3782_v15  ;;  %16149 = vmatprep.mubr.msk.f32.mxu0 %vm310_vm0, %v6468_v55  ;;  %v6924_v28 = vld [vmem:[#allocation3 + $0x151] sm:$0xff]  ;;  %v3790_v55 = vld [vmem:[#allocation2 + $0x40] sm:$0xff] }
 0x28e   : > { %16199 = vmatprep.mubr.msk.f32.mxu1 %vm310_vm0, %v6919_v48  ;;  %v3715_v25 = vadd.f32 %v18674_v6, %v3360_v10  ;;  %v3359_v34 = vld [vmem:[#allocation2 + $0xe0] sm:$0xff]  ;;  %4170 = vst.msk [vmem:[#allocation2 + $0x8] sm:$0xff] %vm632_vm3, %v4138_v1  ;;  %v3787_v6 = vld [vmem:[#allocation2 + $0x28] sm:$0xff]  ;;  %v6475_v1 = vld [vmem:[#allocation3 + $0x170] sm:$0xff] }
 0x28f   : > { %v3714_v38 = vadd.f32 %v3667_v14, %v3359_v34  ;;  %4169 = vst.msk [vmem:[#allocation2] sm:$0xff] %vm632_vm3, %v4137_v19  ;;  %v15836_v20 = vpop.f32.mrb[130].mxu0  ;;  %v3786_v14 = vld [vmem:[#allocation2 + $0x20] sm:$0xff]  ;;  %v6925_v18 = vld [vmem:[#allocation3 + $0x169] sm:$0xff]  ;;  %v6926_v15 = vld [vmem:[#allocation3 + $0x171] sm:$0xff] }
 0x290   : > { %v18707_v37 = vpop.f32.mrb[130].mxu1  ;;  %3747 = vst.msk [vmem:[#allocation2 + $0xe8] sm:$0xff] %vm632_vm3, %v3715_v25  ;;  %v4140_v53 = vadd.f32 %v15836_v20, %v3785_v35  ;;  %v3988_v17 = vpop.f32.mrb[131].mxu0  ;;  %16150 = vmatmul.mubr.msk.f32.gmra.mrb[236].mxu0 %vm310_vm0, %v6469_v40  ;;  %v6476_v10 = vld [vmem:[#allocation3 + $0x188] sm:$0xff] }
 0x291   : > { %v4439_v36 = vpop.f32.mrb[131].mxu1  ;;  %16200 = vmatmul.mubr.msk.f32.gmra.mrb[236].mxu1 %vm310_vm0, %v6920_v45  ;;  %3746 = vst.msk [vmem:[#allocation2 + $0xe0] sm:$0xff] %vm632_vm3, %v3714_v38  ;;  %v3362_v39 = vld [vmem:[#allocation2 + $0xf8] sm:$0xff]  ;;  %v4139_v57 = vadd.f32 %v3988_v17, %v3784_v51  ;;  %16152 = vmatprep.mubr.msk.f32.mxu0 %vm310_vm0, %v6470_v27  ;;  %v6927_v19 = vld [vmem:[#allocation3 + $0x189] sm:$0xff] }
 0x292   : > { %16202 = vmatprep.mubr.msk.f32.mxu1 %vm310_vm0, %v6921_v29  ;;  %v3717_v59 = vadd.f32 %v18685_v13, %v3362_v39  ;;  %v3361_v58 = vld [vmem:[#allocation2 + $0xf0] sm:$0xff]  ;;  %4172 = vst.msk [vmem:[#allocation2 + $0x18] sm:$0xff] %vm632_vm3, %v4140_v53  ;;  %v6478_v39 = vld [vmem:[#allocation3 + $0x1a8] sm:$0xff] }
 0x293   : > { %v3716_v41 = vadd.f32 %v3677_v47, %v3361_v58  ;;  %4171 = vst.msk [vmem:[#allocation2 + $0x10] sm:$0xff] %vm632_vm3, %v4139_v57  ;;  %v15839_v54 = vpop.f32.mrb[132].mxu0  ;;  %v6477_v53 = vld [vmem:[#allocation3 + $0x190] sm:$0xff] }
 0x294   : > { %v18718_v56 = vpop.f32.mrb[132].mxu1  ;;  %3749 = vst.msk [vmem:[#allocation2 + $0xf8] sm:$0xff] %vm632_vm3, %v3717_v59  ;;  %v4142_v4 = vadd.f32 %v15839_v54, %v3787_v6  ;;  %v3998_v30 = vpop.f32.mrb[133].mxu0  ;;  %16153 = vmatmul.mubr.msk.f32.gmra.mrb[238].mxu0 %vm310_vm0, %v6471_v2  ;;  %v6928_v51 = vld [vmem:[#allocation3 + $0x191] sm:$0xff]  ;;  %v6929_v57 = vld [vmem:[#allocation3 + $0x1a9] sm:$0xff] }
 0x295   : > { %v4449_v8 = vpop.f32.mrb[133].mxu1  ;;  %16203 = vmatmul.mubr.msk.f32.gmra.mrb[238].mxu1 %vm310_vm0, %v6922_v7  ;;  %3748 = vst.msk [vmem:[#allocation2 + $0xf0] sm:$0xff] %vm632_vm3, %v3716_v41  ;;  %v4234_v49 = vld [vmem:[#allocation2 + $0x8] sm:$0xff]  ;;  %v4141_v44 = vadd.f32 %v3998_v30, %v3786_v14  ;;  %16155 = vmatprep.mubr.msk.f32.mxu0 %vm310_vm0, %v6472_v31  ;;  %v6930_v14 = vld [vmem:[#allocation3 + $0x1b1] sm:$0xff] }
 0x296   : > { %16205 = vmatprep.mubr.msk.f32.mxu1 %vm310_vm0, %v6923_v32  ;;  %v4589_v12 = vadd.f32 %v18696_v52, %v4234_v49  ;;  %v4233_v61 = vld [vmem:[#allocation2] sm:$0xff]  ;;  %4174 = vst.msk [vmem:[#allocation2 + $0x28] sm:$0xff] %vm632_vm3, %v4142_v4  ;;  %v6479_v4 = vld [vmem:[#allocation3 + $0x1b0] sm:$0xff]  ;;  %v6480_v49 = vld [vmem:[#allocation3 + $0x1c8] sm:$0xff] }
 0x297   : > { %v4588_v63 = vadd.f32 %v4429_v9, %v4233_v61  ;;  %4173 = vst.msk [vmem:[#allocation2 + $0x20] sm:$0xff] %vm632_vm3, %v4141_v44  ;;  %v15842_v60 = vpop.f32.mrb[134].mxu0  ;;  %v6931_v44 = vld [vmem:[#allocation3 + $0x1c9] sm:$0xff] }
 0x298   : > { %v18729_v13 = vpop.f32.mrb[134].mxu1  ;;  %4621 = vst.msk [vmem:[#allocation2 + $0x8] sm:$0xff] %vm632_vm3, %v4589_v12  ;;  %v4144_v16 = vadd.f32 %v15842_v60, %v3789_v11  ;;  %v4008_v43 = vpop.f32.mrb[135].mxu0  ;;  %16156 = vmatmul.mubr.msk.f32.gmra.mrb[240].mxu0 %vm310_vm0, %v6473_v62 }
 0x299   : > { %v4459_v47 = vpop.f32.mrb[135].mxu1  ;;  %16206 = vmatmul.mubr.msk.f32.gmra.mrb[240].mxu1 %vm310_vm0, %v6924_v28  ;;  %4620 = vst.msk [vmem:[#allocation2] sm:$0xff] %vm632_vm3, %v4588_v63  ;;  %v4236_v42 = vld [vmem:[#allocation2 + $0x18] sm:$0xff]  ;;  %v4143_v3 = vadd.f32 %v4008_v43, %v3788_v21  ;;  %16158 = vmatprep.mubr.msk.f32.mxu0 %vm310_vm0, %v6474_v0 }
 0x29a   : > { %16208 = vmatprep.mubr.msk.f32.mxu1 %vm310_vm0, %v6925_v18  ;;  %v4591_v5 = vadd.f32 %v18707_v37, %v4236_v42  ;;  %v4235_v24 = vld [vmem:[#allocation2 + $0x10] sm:$0xff]  ;;  %4176 = vst.msk [vmem:[#allocation2 + $0x38] sm:$0xff] %vm632_vm3, %v4144_v16  ;;  %v3793_v37 = vld [vmem:[#allocation2 + $0x58] sm:$0xff]  ;;  %v6482_v42 = vld [vmem:[#allocation3 + $0x1e8] sm:$0xff] }
 0x29b   : > { %v4590_v46 = vadd.f32 %v4439_v36, %v4235_v24  ;;  %4175 = vst.msk [vmem:[#allocation2 + $0x30] sm:$0xff] %vm632_vm3, %v4143_v3  ;;  %v15845_v26 = vpop.f32.mrb[136].mxu0  ;;  %v3792_v36 = vld [vmem:[#allocation2 + $0x50] sm:$0xff] }
 0x29c   : > { %v18740_v52 = vpop.f32.mrb[136].mxu1  ;;  %4623 = vst.msk [vmem:[#allocation2 + $0x18] sm:$0xff] %vm632_vm3, %v4591_v5  ;;  %v4146_v50 = vadd.f32 %v15845_v26, %v3791_v23  ;;  %v4018_v48 = vpop.f32.mrb[137].mxu0  ;;  %16159 = vmatmul.mubr.msk.f32.gmra.mrb[242].mxu0 %vm310_vm0, %v6475_v1  ;;  %v6481_v16 = vld [vmem:[#allocation3 + $0x1d0] sm:$0xff] }
 0x29d   : > { %v4469_v9 = vpop.f32.mrb[137].mxu1  ;;  %16209 = vmatmul.mubr.msk.f32.gmra.mrb[242].mxu1 %vm310_vm0, %v6926_v15  ;;  %4622 = vst.msk [vmem:[#allocation2 + $0x10] sm:$0xff] %vm632_vm3, %v4590_v46  ;;  %v4238_v25 = vld [vmem:[#allocation2 + $0x28] sm:$0xff]  ;;  %v4145_v34 = vadd.f32 %v4018_v48, %v3790_v55  ;;  %16161 = vmatprep.mubr.msk.f32.mxu0 %vm310_vm0, %v6476_v10  ;;  %v6932_v21 = vld [vmem:[#allocation3 + $0x1d1] sm:$0xff] }
 0x29e   : > { %16211 = vmatprep.mubr.msk.f32.mxu1 %vm310_vm0, %v6927_v19  ;;  %v4593_v38 = vadd.f32 %v18718_v56, %v4238_v25  ;;  %v4237_v35 = vld [vmem:[#allocation2 + $0x20] sm:$0xff]  ;;  %4178 = vst.msk [vmem:[#allocation2 + $0x48] sm:$0xff] %vm632_vm3, %v4146_v50  ;;  %v3795_v56 = vld [vmem:[#allocation2 + $0x68] sm:$0xff]  ;;  %v6483_v50 = vld [vmem:[#allocation3 + $0x1f0] sm:$0xff] }
 0x29f   : > { %v4592_v20 = vadd.f32 %v4449_v8, %v4237_v35  ;;  %4177 = vst.msk [vmem:[#allocation2 + $0x40] sm:$0xff] %vm632_vm3, %v4145_v34  ;;  %v15848_v40 = vpop.f32.mrb[138].mxu0  ;;  %v3794_v8 = vld [vmem:[#allocation2 + $0x60] sm:$0xff]  ;;  %v6933_v3 = vld [vmem:[#allocation3 + $0x1e9] sm:$0xff]  ;;  %v6934_v55 = vld [vmem:[#allocation3 + $0x1f1] sm:$0xff] }
 0x2a0   : > { %v18751_v45 = vpop.f32.mrb[138].mxu1  ;;  %4625 = vst.msk [vmem:[#allocation2 + $0x28] sm:$0xff] %vm632_vm3, %v4593_v38  ;;  %v4148_v17 = vadd.f32 %v15848_v40, %v3793_v37  ;;  %v4028_v27 = vpop.f32.mrb[139].mxu0  ;;  %16162 = vmatmul.mubr.msk.f32.gmra.mrb[244].mxu0 %vm310_vm0, %v6477_v53  ;;  %v6484_v25 = vld [vmem:[#allocation3 + $0x208] sm:$0xff] }
 0x2a1   : > { %v4479_v29 = vpop.f32.mrb[139].mxu1  ;;  %16212 = vmatmul.mubr.msk.f32.gmra.mrb[244].mxu1 %vm310_vm0, %v6928_v51  ;;  %4624 = vst.msk [vmem:[#allocation2 + $0x20] sm:$0xff] %vm632_vm3, %v4592_v20  ;;  %v4240_v59 = vld [vmem:[#allocation2 + $0x38] sm:$0xff]  ;;  %v4147_v58 = vadd.f32 %v4028_v27, %v3792_v36  ;;  %16164 = vmatprep.mubr.msk.f32.mxu0 %vm310_vm0, %v6478_v39  ;;  %v6935_v34 = vld [vmem:[#allocation3 + $0x209] sm:$0xff] }
 0x2a2   : > { %16214 = vmatprep.mubr.msk.f32.mxu1 %vm310_vm0, %v6929_v57  ;;  %v4595_v41 = vadd.f32 %v18729_v13, %v4240_v59  ;;  %v4239_v6 = vld [vmem:[#allocation2 + $0x30] sm:$0xff]  ;;  %4180 = vst.msk [vmem:[#allocation2 + $0x58] sm:$0xff] %vm632_vm3, %v4148_v17  ;;  %v3797_v13 = vld [vmem:[#allocation2 + $0x78] sm:$0xff]  ;;  %v6486_v59 = vld [vmem:[#allocation3 + $0x228] sm:$0xff] }
 0x2a3   : > { %v4594_v54 = vadd.f32 %v4459_v47, %v4239_v6  ;;  %4179 = vst.msk [vmem:[#allocation2 + $0x50] sm:$0xff] %vm632_vm3, %v4147_v58  ;;  %v15851_v2 = vpop.f32.mrb[140].mxu0  ;;  %v3796_v47 = vld [vmem:[#allocation2 + $0x70] sm:$0xff] }
 0x2a4   : > { %v18762_v7 = vpop.f32.mrb[140].mxu1  ;;  %4627 = vst.msk [vmem:[#allocation2 + $0x38] sm:$0xff] %vm632_vm3, %v4595_v41  ;;  %v4150_v30 = vadd.f32 %v15851_v2, %v3795_v56  ;;  %v4038_v31 = vpop.f32.mrb[141].mxu0  ;;  %16165 = vmatmul.mubr.msk.f32.gmra.mrb[246].mxu0 %vm310_vm0, %v6479_v4  ;;  %v6485_v17 = vld [vmem:[#allocation3 + $0x210] sm:$0xff] }
 0x2a5   : > { %v4489_v32 = vpop.f32.mrb[141].mxu1  ;;  %16215 = vmatmul.mubr.msk.f32.gmra.mrb[246].mxu1 %vm310_vm0, %v6930_v14  ;;  %4626 = vst.msk [vmem:[#allocation2 + $0x30] sm:$0xff] %vm632_vm3, %v4594_v54  ;;  %v4242_v12 = vld [vmem:[#allocation2 + $0x48] sm:$0xff]  ;;  %v4149_v61 = vadd.f32 %v4038_v31, %v3794_v8  ;;  %16167 = vmatprep.mubr.msk.f32.mxu0 %vm310_vm0, %v6480_v49  ;;  %v6936_v36 = vld [vmem:[#allocation3 + $0x211] sm:$0xff] }
 0x2a6   : > { %16217 = vmatprep.mubr.msk.f32.mxu1 %vm310_vm0, %v6931_v44  ;;  %v4597_v63 = vadd.f32 %v18740_v52, %v4242_v12  ;;  %v4241_v11 = vld [vmem:[#allocation2 + $0x40] sm:$0xff]  ;;  %4182 = vst.msk [vmem:[#allocation2 + $0x68] sm:$0xff] %vm632_vm3, %v4150_v30  ;;  %v3799_v52 = vld [vmem:[#allocation2 + $0x88] sm:$0xff]  ;;  %v6487_v30 = vld [vmem:[#allocation3 + $0x230] sm:$0xff] }
 0x2a7   : > { %v4596_v60 = vadd.f32 %v4469_v9, %v4241_v11  ;;  %4181 = vst.msk [vmem:[#allocation2 + $0x60] sm:$0xff] %vm632_vm3, %v4149_v61  ;;  %v15854_v62 = vpop.f32.mrb[142].mxu0  ;;  %v3798_v9 = vld [vmem:[#allocation2 + $0x80] sm:$0xff]  ;;  %v6937_v58 = vld [vmem:[#allocation3 + $0x229] sm:$0xff]  ;;  %v6938_v8 = vld [vmem:[#allocation3 + $0x231] sm:$0xff] }
 0x2a8   : > { %v18773_v28 = vpop.f32.mrb[142].mxu1  ;;  %4629 = vst.msk [vmem:[#allocation2 + $0x48] sm:$0xff] %vm632_vm3, %v4597_v63  ;;  %v4152_v43 = vadd.f32 %v15854_v62, %v3797_v13  ;;  %v4048_v0 = vpop.f32.mrb[143].mxu0  ;;  %16168 = vmatmul.mubr.msk.f32.gmra.mrb[248].mxu0 %vm310_vm0, %v6481_v16  ;;  %v7358_v12 = vld [vmem:[#allocation3 + $0x4a] sm:$0xff]  ;;  %v7359_v62 = vld [vmem:[#allocation3 + $0x52] sm:$0xff] }
 0x2a9   : > { %v4499_v18 = vpop.f32.mrb[143].mxu1  ;;  %16218 = vmatmul.mubr.msk.f32.gmra.mrb[248].mxu1 %vm310_vm0, %v6932_v21  ;;  %4628 = vst.msk [vmem:[#allocation2 + $0x40] sm:$0xff] %vm632_vm3, %v4596_v60  ;;  %v4244_v5 = vld [vmem:[#allocation2 + $0x58] sm:$0xff]  ;;  %v4151_v24 = vadd.f32 %v4048_v0, %v3796_v47  ;;  %16170 = vmatprep.mubr.msk.f32.mxu0 %vm310_vm0, %v6482_v42  ;;  %v7810_v61 = vld [vmem:[#allocation3 + $0x66] sm:$0xff]  ;;  %v7811_v47 = vld [vmem:[#allocation3 + $0x6e] sm:$0xff] }
 0x2aa   : > { %16220 = vmatprep.mubr.msk.f32.mxu1 %vm310_vm0, %v6933_v3  ;;  %v4599_v46 = vadd.f32 %v18751_v45, %v4244_v5  ;;  %v4243_v23 = vld [vmem:[#allocation2 + $0x50] sm:$0xff]  ;;  %4184 = vst.msk [vmem:[#allocation2 + $0x78] sm:$0xff] %vm632_vm3, %v4152_v43  ;;  %v3801_v45 = vld [vmem:[#allocation2 + $0x98] sm:$0xff] }
 0x2ab   : > { %v4598_v26 = vadd.f32 %v4479_v29, %v4243_v23  ;;  %4183 = vst.msk [vmem:[#allocation2 + $0x70] sm:$0xff] %vm632_vm3, %v4151_v24  ;;  %v15857_v1 = vpop.f32.mrb[144].mxu0  ;;  %v3800_v29 = vld [vmem:[#allocation2 + $0x90] sm:$0xff]  ;;  %v3805_v16 = vld [vmem:[#allocation2 + $0xb8] sm:$0xff] }
 0x2ac   : > { %v18784_v15 = vpop.f32.mrb[144].mxu1  ;;  %4631 = vst.msk [vmem:[#allocation2 + $0x58] sm:$0xff] %vm632_vm3, %v4599_v46  ;;  %v4154_v48 = vadd.f32 %v15857_v1, %v3799_v52  ;;  %v4058_v10 = vpop.f32.mrb[145].mxu0  ;;  %16171 = vmatmul.mubr.msk.f32.gmra.mrb[250].mxu0 %vm310_vm0, %v6483_v50  ;;  %v7360_v0 = vld [vmem:[#allocation3 + $0x6a] sm:$0xff]  ;;  %v18836_v46 = vld [vmem:[%s21250_s4 + $0x98] sm:$0xff] }
 0x2ad   : > { %v4509_v19 = vpop.f32.mrb[145].mxu1  ;;  %16221 = vmatmul.mubr.msk.f32.gmra.mrb[250].mxu1 %vm310_vm0, %v6934_v55  ;;  %4630 = vst.msk [vmem:[#allocation2 + $0x50] sm:$0xff] %vm632_vm3, %v4598_v26  ;;  %v4246_v38 = vld [vmem:[#allocation2 + $0x68] sm:$0xff]  ;;  %v4153_v35 = vadd.f32 %v4058_v10, %v3798_v9  ;;  %16173 = vmatprep.mubr.msk.f32.mxu0 %vm310_vm0, %v6484_v25  ;;  %v3804_v42 = vld [vmem:[#allocation2 + $0xb0] sm:$0xff]  ;;  %v3806_v25 = vld [vmem:[#allocation2 + $0xc0] sm:$0xff] }
 0x2ae   : > { %16223 = vmatprep.mubr.msk.f32.mxu1 %vm310_vm0, %v6935_v34  ;;  %v4601_v20 = vadd.f32 %v18762_v7, %v4246_v38  ;;  %v4245_v37 = vld [vmem:[#allocation2 + $0x60] sm:$0xff]  ;;  %4186 = vst.msk [vmem:[#allocation2 + $0x88] sm:$0xff] %vm632_vm3, %v4154_v48  ;;  %v3803_v7 = vld [vmem:[#allocation2 + $0xa8] sm:$0xff]  ;;  %v18831_v24 = vld [vmem:[%s21250_s4 + $0x90] sm:$0xff] }
 0x2af   : > { %v4600_v40 = vadd.f32 %v4489_v32, %v4245_v37  ;;  %4185 = vst.msk [vmem:[#allocation2 + $0x80] sm:$0xff] %vm632_vm3, %v4153_v35  ;;  %v15860_v53 = vpop.f32.mrb[146].mxu0  ;;  %v3802_v32 = vld [vmem:[#allocation2 + $0xa0] sm:$0xff]  ;;  %v3807_v55 = vld [vmem:[#allocation2 + $0xc8] sm:$0xff] }
 0x2b0   : > { %v18795_v51 = vpop.f32.mrb[146].mxu1  ;;  %4633 = vst.msk [vmem:[#allocation2 + $0x68] sm:$0xff] %vm632_vm3, %v4601_v20  ;;  %v4156_v27 = vadd.f32 %v15860_v53, %v3801_v45  ;;  %v4068_v39 = vpop.f32.mrb[147].mxu0  ;;  %16174 = vmatmul.mubr.msk.f32.gmra.mrb[252].mxu0 %vm310_vm0, %v6485_v17  ;;  %v7812_v52 = vld [vmem:[#allocation3 + $0x86] sm:$0xff]  ;;  %v7813_v10 = vld [vmem:[#allocation3 + $0x8e] sm:$0xff] }
 0x2b1   : > { %v18798_v57 = vpop.f32.mrb[147].mxu1  ;;  %16224 = vmatmul.mubr.msk.f32.gmra.mrb[252].mxu1 %vm310_vm0, %v6936_v36  ;;  %4632 = vst.msk [vmem:[#allocation2 + $0x60] sm:$0xff] %vm632_vm3, %v4600_v40  ;;  %v4248_v41 = vld [vmem:[#allocation2 + $0x78] sm:$0xff]  ;;  %v4155_v6 = vadd.f32 %v4068_v39, %v3800_v29  ;;  %16176 = vmatprep.mubr.msk.f32.mxu0 %vm310_vm0, %v6486_v59  ;;  %v7362_v38 = vld [vmem:[#allocation3 + $0x8a] sm:$0xff] }
 0x2b2   : > { %16226 = vmatprep.mubr.msk.f32.mxu1 %vm310_vm0, %v6937_v58  ;;  %v4603_v54 = vadd.f32 %v18773_v28, %v4248_v41  ;;  %v4247_v56 = vld [vmem:[#allocation2 + $0x70] sm:$0xff]  ;;  %4188 = vst.msk [vmem:[#allocation2 + $0x98] sm:$0xff] %vm632_vm3, %v4156_v27  ;;  %v7814_v35 = vld [vmem:[#allocation3 + $0xa6] sm:$0xff] }
 0x2b3   : > { %v4602_v2 = vadd.f32 %v4499_v18, %v4247_v56  ;;  %4187 = vst.msk [vmem:[#allocation2 + $0x90] sm:$0xff] %vm632_vm3, %v4155_v6  ;;  %v15863_v4 = vpop.f32.mrb[148].mxu0  ;;  %v7363_v27 = vld [vmem:[#allocation3 + $0x92] sm:$0xff]  ;;  %v7364_v41 = vld [vmem:[#allocation3 + $0xaa] sm:$0xff] }
 0x2b4   : > { %v18808_v14 = vpop.f32.mrb[148].mxu1  ;;  %4635 = vst.msk [vmem:[#allocation2 + $0x78] sm:$0xff] %vm632_vm3, %v4603_v54  ;;  %v4158_v31 = vadd.f32 %v15863_v4, %v3803_v7  ;;  %v4078_v49 = vpop.f32.mrb[149].mxu0  ;;  %16177 = vmatmul.mubr.msk.f32.gmra.mrb[254].mxu0 %vm310_vm0, %v6487_v30  ;;  %v7815_v29 = vld [vmem:[#allocation3 + $0xae] sm:$0xff]  ;;  %v7816_v6 = vld [vmem:[#allocation3 + $0xc6] sm:$0xff] }
 0x2b5   : > { %v18811_v44 = vpop.f32.mrb[149].mxu1  ;;  %16227 = vmatmul.mubr.msk.f32.gmra.mrb[254].mxu1 %vm310_vm0, %v6938_v8  ;;  %4634 = vst.msk [vmem:[#allocation2 + $0x70] sm:$0xff] %vm632_vm3, %v4602_v2  ;;  %v4250_v63 = vld [vmem:[#allocation2 + $0x88] sm:$0xff]  ;;  %v4157_v11 = vadd.f32 %v4078_v49, %v3802_v32  ;;  %16231 = vmatprep.mubr.msk.f32.mxu0 %vm310_vm0, %v7358_v12 }
 0x2b6   : > { %16281 = vmatprep.mubr.msk.f32.mxu1 %vm310_vm0, %v7810_v61  ;;  %v4605_v60 = vadd.f32 %v18784_v15, %v4250_v63  ;;  %v4249_v13 = vld [vmem:[#allocation2 + $0x80] sm:$0xff]  ;;  %4190 = vst.msk [vmem:[#allocation2 + $0xa8] sm:$0xff] %vm632_vm3, %v4158_v31  ;;  %v7365_v31 = vld [vmem:[#allocation3 + $0xb2] sm:$0xff]  ;;  %v7366_v63 = vld [vmem:[#allocation3 + $0xca] sm:$0xff] }
 0x2b7   : > { %v4604_v28 = vadd.f32 %v4509_v19, %v4249_v13  ;;  %4189 = vst.msk [vmem:[#allocation2 + $0xa0] sm:$0xff] %vm632_vm3, %v4157_v11  ;;  %v15866_v21 = vpop.f32.mrb[150].mxu0  ;;  %v7817_v32 = vld [vmem:[#allocation3 + $0xce] sm:$0xff]  ;;  %v7818_v11 = vld [vmem:[#allocation3 + $0xe6] sm:$0xff] }
 0x2b8   : > { %v18821_v43 = vpop.f32.mrb[150].mxu1  ;;  %4637 = vst.msk [vmem:[#allocation2 + $0x88] sm:$0xff] %vm632_vm3, %v4605_v60  ;;  %v4160_v18 = vadd.f32 %v15866_v21, %v3805_v16  ;;  %v4088_v3 = vpop.f32.mrb[151].mxu0  ;;  %16232 = vmatmul.mubr.msk.f32.vlgmr.msra.gmra.mrb[0].mxu0 %vm310_vm0, %v7359_v62  ;;  %v3813_v21 = vld [vmem:[#allocation2 + $0xf8] sm:$0xff] }
 0x2b9   : > { %v18824_v5 = vpop.f32.mrb[151].mxu1  ;;  %16282 = vmatmul.mubr.msk.f32.vlgmr.msra.gmra.mrb[0].mxu1 %vm310_vm0, %v7811_v47  ;;  %4636 = vst.msk [vmem:[#allocation2 + $0x80] sm:$0xff] %vm632_vm3, %v4604_v28  ;;  %v4252_v23 = vld [vmem:[#allocation2 + $0x98] sm:$0xff]  ;;  %v4159_v26 = vadd.f32 %v4088_v3, %v3804_v42  ;;  %16330 = vmatpush3.msra.mxu0 %v18632_v33  ;;  %v3812_v3 = vld [vmem:[#allocation2 + $0xf0] sm:$0xff] }
 0x2ba   : > { %16234 = vmatprep.mubr.msk.f32.mxu0 %vm310_vm0, %v7360_v0  ;;  %v4607_v1 = vadd.f32 %v18795_v51, %v4252_v23  ;;  %v4251_v15 = vld [vmem:[#allocation2 + $0x90] sm:$0xff]  ;;  %4192 = vst.msk [vmem:[#allocation2 + $0xb8] sm:$0xff] %vm632_vm3, %v4160_v18  ;;  %16284 = vmatprep.mubr.msk.f32.mxu1 %vm310_vm0, %v7812_v52  ;;  %v3809_v51 = vld [vmem:[#allocation2 + $0xd8] sm:$0xff]  ;;  %v7820_v52 = vld [vmem:[#allocation3 + $0x106] sm:$0xff] }
 0x2bb   : > { %16380 = vmatpush3.msra.mxu1 %v18637_v22  ;;  %v4606_v50 = vadd.f32 %v18798_v57, %v4251_v15  ;;  %4191 = vst.msk [vmem:[#allocation2 + $0xb0] sm:$0xff] %vm632_vm3, %v4159_v26  ;;  %v15869_v48 = vpop.f32.mrb[152].mxu0  ;;  %v7361_v33 = vld [vmem:[#allocation3 + $0x72] sm:$0xff]  ;;  %16429 = vmatprep.subr.mxu0 %v18831_v24  ;;  %v7368_v26 = vld [vmem:[#allocation3 + $0xea] sm:$0xff] }
 0x2bc   : > { %v18847_v9 = vpop.f32.mrb[152].mxu1  ;;  %16479 = vmatprep.subr.mxu1 %v18836_v46  ;;  %4639 = vst.msk [vmem:[#allocation2 + $0x98] sm:$0xff] %vm632_vm3, %v4607_v1  ;;  %v4162_v19 = vadd.f32 %v15869_v48, %v3807_v55  ;;  %v4098_v34 = vpop.f32.mrb[153].mxu0  ;;  %16235 = vmatmul.mubr.msk.f32.gmra.mrb[2].mxu0 %vm310_vm0, %v7361_v33  ;;  %v3808_v57 = vld [vmem:[#allocation2 + $0xd0] sm:$0xff] }
 0x2bd   : > { %v4549_v22 = vpop.f32.mrb[153].mxu1  ;;  %16285 = vmatmul.mubr.msk.f32.gmra.mrb[2].mxu1 %vm310_vm0, %v7813_v10  ;;  %4638 = vst.msk [vmem:[#allocation2 + $0x90] sm:$0xff] %vm632_vm3, %v4606_v50  ;;  %v4254_v20 = vld [vmem:[#allocation2 + $0xa8] sm:$0xff]  ;;  %v4161_v37 = vadd.f32 %v4098_v34, %v3806_v25  ;;  %16237 = vmatprep.mubr.msk.f32.mxu0 %vm310_vm0, %v7362_v38  ;;  %v7367_v0 = vld [vmem:[#allocation3 + $0xd2] sm:$0xff] }
 0x2be   : > { %16287 = vmatprep.mubr.msk.f32.mxu1 %vm310_vm0, %v7814_v35  ;;  %v4609_v40 = vadd.f32 %v18808_v14, %v4254_v20  ;;  %v4253_v45 = vld [vmem:[#allocation2 + $0xa0] sm:$0xff]  ;;  %4194 = vst.msk [vmem:[#allocation2 + $0xc8] sm:$0xff] %vm632_vm3, %v4162_v19  ;;  %v3811_v14 = vld [vmem:[#allocation2 + $0xe8] sm:$0xff]  ;;  %v7369_v10 = vld [vmem:[#allocation3 + $0xf2] sm:$0xff] }
 0x2bf   : > { %v4608_v53 = vadd.f32 %v18811_v44, %v4253_v45  ;;  %4193 = vst.msk [vmem:[#allocation2 + $0xc0] sm:$0xff] %vm632_vm3, %v4161_v37  ;;  %v15872_v17 = vpop.f32.mrb[154].mxu0  ;;  %v3810_v44 = vld [vmem:[#allocation2 + $0xe0] sm:$0xff]  ;;  %v7819_v18 = vld [vmem:[#allocation3 + $0xee] sm:$0xff] }
 0x2c0   : > { %v18861_v36 = vpop.f32.mrb[154].mxu1  ;;  %4641 = vst.msk [vmem:[#allocation2 + $0xa8] sm:$0xff] %vm632_vm3, %v4609_v40  ;;  %v4164_v39 = vadd.f32 %v15872_v17, %v3809_v51  ;;  %v4108_v59 = vpop.f32.mrb[155].mxu0  ;;  %16238 = vmatmul.mubr.msk.f32.gmra.mrb[4].mxu0 %vm310_vm0, %v7363_v27  ;;  %v7821_v19 = vld [vmem:[#allocation3 + $0x10e] sm:$0xff]  ;;  %v7822_v20 = vld [vmem:[#allocation3 + $0x126] sm:$0xff] }
 0x2c1   : > { %v4559_v58 = vpop.f32.mrb[155].mxu1  ;;  %16288 = vmatmul.mubr.msk.f32.gmra.mrb[4].mxu1 %vm310_vm0, %v7815_v29  ;;  %4640 = vst.msk [vmem:[#allocation2 + $0xa0] sm:$0xff] %vm632_vm3, %v4608_v53  ;;  %v4256_v54 = vld [vmem:[#allocation2 + $0xb8] sm:$0xff]  ;;  %v4163_v56 = vadd.f32 %v4108_v59, %v3808_v57  ;;  %16240 = vmatprep.mubr.msk.f32.mxu0 %vm310_vm0, %v7364_v41  ;;  %v7370_v35 = vld [vmem:[#allocation3 + $0x10a] sm:$0xff] }
 0x2c2   : > { %16290 = vmatprep.mubr.msk.f32.mxu1 %vm310_vm0, %v7816_v6  ;;  %v4611_v2 = vadd.f32 %v18821_v43, %v4256_v54  ;;  %v4255_v7 = vld [vmem:[#allocation2 + $0xb0] sm:$0xff]  ;;  %4196 = vst.msk [vmem:[#allocation2 + $0xd8] sm:$0xff] %vm632_vm3, %v4164_v39 }
 0x2c3   : > { %v4610_v4 = vadd.f32 %v18824_v5, %v4255_v7  ;;  %4195 = vst.msk [vmem:[#allocation2 + $0xd0] sm:$0xff] %vm632_vm3, %v4163_v56  ;;  %v15875_v30 = vpop.f32.mrb[156].mxu0  ;;  %v7371_v39 = vld [vmem:[#allocation3 + $0x112] sm:$0xff]  ;;  %v7372_v54 = vld [vmem:[#allocation3 + $0x12a] sm:$0xff] }
 0x2c4   : > { %v18873_v8 = vpop.f32.mrb[156].mxu1  ;;  %4643 = vst.msk [vmem:[#allocation2 + $0xb8] sm:$0xff] %vm632_vm3, %v4611_v2  ;;  %v4166_v49 = vadd.f32 %v15875_v30, %v3811_v14  ;;  %v4118_v12 = vpop.f32.mrb[157].mxu0  ;;  %16241 = vmatmul.mubr.msk.f32.gmra.mrb[6].mxu0 %vm310_vm0, %v7365_v31  ;;  %v7823_v57 = vld [vmem:[#allocation3 + $0x12e] sm:$0xff]  ;;  %v7824_v56 = vld [vmem:[#allocation3 + $0x146] sm:$0xff] }
 0x2c5   : > { %v4569_v61 = vpop.f32.mrb[157].mxu1  ;;  %16291 = vmatmul.mubr.msk.f32.gmra.mrb[6].mxu1 %vm310_vm0, %v7817_v32  ;;  %4642 = vst.msk [vmem:[#allocation2 + $0xb0] sm:$0xff] %vm632_vm3, %v4610_v4  ;;  %v4258_v60 = vld [vmem:[#allocation2 + $0xc8] sm:$0xff]  ;;  %v4165_v13 = vadd.f32 %v4118_v12, %v3810_v44  ;;  %16243 = vmatprep.mubr.msk.f32.mxu0 %vm310_vm0, %v7366_v63 }
 0x2c6   : > { %16293 = vmatprep.mubr.msk.f32.mxu1 %vm310_vm0, %v7818_v11  ;;  %v4613_v62 = vadd.f32 %v18847_v9, %v4258_v60  ;;  %v4257_v28 = vld [vmem:[#allocation2 + $0xc0] sm:$0xff]  ;;  %4198 = vst.msk [vmem:[#allocation2 + $0xe8] sm:$0xff] %vm632_vm3, %v4166_v49  ;;  %v4685_v9 = vld [vmem:[#allocation2 + $0x8] sm:$0xff]  ;;  %v7373_v49 = vld [vmem:[#allocation3 + $0x132] sm:$0xff] }
 0x2c7   : > { %v4612_v16 = vadd.f32 %v4549_v22, %v4257_v28  ;;  %4197 = vst.msk [vmem:[#allocation2 + $0xe0] sm:$0xff] %vm632_vm3, %v4165_v13  ;;  %v15878_v43 = vpop.f32.mrb[158].mxu0  ;;  %v4684_v22 = vld [vmem:[#allocation2] sm:$0xff]  ;;  %v7825_v44 = vld [vmem:[#allocation3 + $0x14e] sm:$0xff] }
 0x2c8   : > { %v18884_v47 = vpop.f32.mrb[158].mxu1  ;;  %4645 = vst.msk [vmem:[#allocation2 + $0xc8] sm:$0xff] %vm632_vm3, %v4613_v62  ;;  %v4168_v42 = vadd.f32 %v15878_v43, %v3813_v21  ;;  %v4128_v5 = vpop.f32.mrb[159].mxu0  ;;  %16244 = vmatmul.mubr.msk.f32.gmra.mrb[8].mxu0 %vm310_vm0, %v7367_v0  ;;  %v7374_v60 = vld [vmem:[#allocation3 + $0x14a] sm:$0xff] }
 0x2c9   : > { %v4579_v23 = vpop.f32.mrb[159].mxu1  ;;  %16294 = vmatmul.mubr.msk.f32.gmra.mrb[8].mxu1 %vm310_vm0, %v7819_v18  ;;  %4644 = vst.msk [vmem:[#allocation2 + $0xc0] sm:$0xff] %vm632_vm3, %v4612_v16  ;;  %v4260_v1 = vld [vmem:[#allocation2 + $0xd8] sm:$0xff]  ;;  %v4167_v15 = vadd.f32 %v4128_v5, %v3812_v3  ;;  %16246 = vmatprep.mubr.msk.f32.mxu0 %vm310_vm0, %v7368_v26  ;;  %v7826_v13 = vld [vmem:[#allocation3 + $0x166] sm:$0xff]  ;;  %v7827_v3 = vld [vmem:[#allocation3 + $0x16e] sm:$0xff] }
 0x2ca   : > { %16296 = vmatprep.mubr.msk.f32.mxu1 %vm310_vm0, %v7820_v52  ;;  %v4615_v50 = vadd.f32 %v18861_v36, %v4260_v1  ;;  %v4259_v55 = vld [vmem:[#allocation2 + $0xd0] sm:$0xff]  ;;  %4200 = vst.msk [vmem:[#allocation2 + $0xf8] sm:$0xff] %vm632_vm3, %v4168_v42  ;;  %v4687_v36 = vld [vmem:[#allocation2 + $0x18] sm:$0xff] }
 0x2cb   : > { %v4614_v48 = vadd.f32 %v4559_v58, %v4259_v55  ;;  %4199 = vst.msk [vmem:[#allocation2 + $0xf0] sm:$0xff] %vm632_vm3, %v4167_v15  ;;  %v15933_v33 = vpop.f32.mrb[160].mxu0  ;;  %v4686_v58 = vld [vmem:[#allocation2 + $0x10] sm:$0xff]  ;;  %v7828_v15 = vld [vmem:[#allocation3 + $0x186] sm:$0xff] }
 0x2cc   : > { %v18895_v25 = vpop.f32.mrb[160].mxu1  ;;  %4647 = vst.msk [vmem:[#allocation2 + $0xd8] sm:$0xff] %vm632_vm3, %v4615_v50  ;;  %v5040_v34 = vadd.f32 %v15933_v33, %v4685_v9  ;;  %v4880_v38 = vpop.f32.mrb[161].mxu0  ;;  %16247 = vmatmul.mubr.msk.f32.gmra.mrb[10].mxu0 %vm310_vm0, %v7369_v10  ;;  %v7375_v42 = vld [vmem:[#allocation3 + $0x152] sm:$0xff]  ;;  %v7376_v1 = vld [vmem:[#allocation3 + $0x16a] sm:$0xff] }
 0x2cd   : > { %16297 = vmatmul.mubr.msk.f32.gmra.mrb[10].mxu1 %vm310_vm0, %v7821_v19  ;;  %v5331_v37 = vpop.f32.mrb[161].mxu1  ;;  %4646 = vst.msk [vmem:[#allocation2 + $0xd0] sm:$0xff] %vm632_vm3, %v4614_v48  ;;  %v4262_v40 = vld [vmem:[#allocation2 + $0xe8] sm:$0xff]  ;;  %v5039_v45 = vadd.f32 %v4880_v38, %v4684_v22  ;;  %16249 = vmatprep.mubr.msk.f32.mxu0 %vm310_vm0, %v7370_v35  ;;  %v4692_v35 = vld [vmem:[#allocation2 + $0x40] sm:$0xff] }
 0x2ce   : > { %16299 = vmatprep.mubr.msk.f32.mxu1 %vm310_vm0, %v7822_v20  ;;  %v4617_v53 = vadd.f32 %v18873_v8, %v4262_v40  ;;  %v4261_v51 = vld [vmem:[#allocation2 + $0xe0] sm:$0xff]  ;;  %5072 = vst.msk [vmem:[#allocation2 + $0x8] sm:$0xff] %vm632_vm3, %v5040_v34  ;;  %v4689_v8 = vld [vmem:[#allocation2 + $0x28] sm:$0xff]  ;;  %v7377_v34 = vld [vmem:[#allocation3 + $0x172] sm:$0xff] }
 0x2cf   : > { %v4616_v17 = vadd.f32 %v4569_v61, %v4261_v51  ;;  %5071 = vst.msk [vmem:[#allocation2] sm:$0xff] %vm632_vm3, %v5039_v45  ;;  %v15936_v27 = vpop.f32.mrb[162].mxu0  ;;  %v4688_v61 = vld [vmem:[#allocation2 + $0x20] sm:$0xff]  ;;  %v4693_v10 = vld [vmem:[#allocation2 + $0x48] sm:$0xff] }
 0x2d0   : > { %v18906_v29 = vpop.f32.mrb[162].mxu1  ;;  %4649 = vst.msk [vmem:[#allocation2 + $0xe8] sm:$0xff] %vm632_vm3, %v4617_v53  ;;  %v5042_v59 = vadd.f32 %v15936_v27, %v4687_v36  ;;  %v4890_v41 = vpop.f32.mrb[163].mxu0  ;;  %16250 = vmatmul.mubr.msk.f32.gmra.mrb[12].mxu0 %vm310_vm0, %v7371_v39  ;;  %v7829_v22 = vld [vmem:[#allocation3 + $0x18e] sm:$0xff]  ;;  %v7830_v45 = vld [vmem:[#allocation3 + $0x1a6] sm:$0xff] }
 0x2d1   : > { %v5341_v6 = vpop.f32.mrb[163].mxu1  ;;  %16300 = vmatmul.mubr.msk.f32.gmra.mrb[12].mxu1 %vm310_vm0, %v7823_v57  ;;  %4648 = vst.msk [vmem:[#allocation2 + $0xe0] sm:$0xff] %vm632_vm3, %v4616_v17  ;;  %v4264_v2 = vld [vmem:[#allocation2 + $0xf8] sm:$0xff]  ;;  %v5041_v7 = vadd.f32 %v4890_v41, %v4686_v58  ;;  %16252 = vmatprep.mubr.msk.f32.mxu0 %vm310_vm0, %v7372_v54  ;;  %v7378_v40 = vld [vmem:[#allocation3 + $0x18a] sm:$0xff] }
 0x2d2   : > { %16302 = vmatprep.mubr.msk.f32.mxu1 %vm310_vm0, %v7824_v56  ;;  %v4619_v4 = vadd.f32 %v18884_v47, %v4264_v2  ;;  %v4263_v14 = vld [vmem:[#allocation2 + $0xf0] sm:$0xff]  ;;  %5074 = vst.msk [vmem:[#allocation2 + $0x18] sm:$0xff] %vm632_vm3, %v5042_v59  ;;  %v4691_v47 = vld [vmem:[#allocation2 + $0x38] sm:$0xff] }
 0x2d3   : > { %v4618_v30 = vadd.f32 %v4579_v23, %v4263_v14  ;;  %5073 = vst.msk [vmem:[#allocation2 + $0x10] sm:$0xff] %vm632_vm3, %v5041_v7  ;;  %v15939_v31 = vpop.f32.mrb[164].mxu0  ;;  %v4690_v23 = vld [vmem:[#allocation2 + $0x30] sm:$0xff]  ;;  %v7832_v7 = vld [vmem:[#allocation3 + $0x1c6] sm:$0xff] }
 0x2d4   : > { %v18917_v32 = vpop.f32.mrb[164].mxu1  ;;  %4651 = vst.msk [vmem:[#allocation2 + $0xf8] sm:$0xff] %vm632_vm3, %v4619_v4  ;;  %v5044_v12 = vadd.f32 %v15939_v31, %v4689_v8  ;;  %v4900_v63 = vpop.f32.mrb[165].mxu0  ;;  %16253 = vmatmul.mubr.msk.f32.gmra.mrb[14].mxu0 %vm310_vm0, %v7373_v49  ;;  %v7379_v59 = vld [vmem:[#allocation3 + $0x192] sm:$0xff]  ;;  %v7380_v2 = vld [vmem:[#allocation3 + $0x1aa] sm:$0xff] }
 0x2d5   : > { %v5351_v11 = vpop.f32.mrb[165].mxu1  ;;  %16303 = vmatmul.mubr.msk.f32.gmra.mrb[14].mxu1 %vm310_vm0, %v7825_v44  ;;  %4650 = vst.msk [vmem:[#allocation2 + $0xf0] sm:$0xff] %vm632_vm3, %v4618_v30  ;;  %v5136_v62 = vld [vmem:[#allocation2 + $0x8] sm:$0xff]  ;;  %v5043_v28 = vadd.f32 %v4900_v63, %v4688_v61  ;;  %16255 = vmatprep.mubr.msk.f32.mxu0 %vm310_vm0, %v7374_v60 }
 0x2d6   : > { %16305 = vmatprep.mubr.msk.f32.mxu1 %vm310_vm0, %v7826_v13  ;;  %v5491_v16 = vadd.f32 %v18895_v25, %v5136_v62  ;;  %v5135_v21 = vld [vmem:[#allocation2] sm:$0xff]  ;;  %5076 = vst.msk [vmem:[#allocation2 + $0x28] sm:$0xff] %vm632_vm3, %v5044_v12  ;;  %v7831_v58 = vld [vmem:[#allocation3 + $0x1ae] sm:$0xff] }
 0x2d7   : > { %v5490_v43 = vadd.f32 %v5331_v37, %v5135_v21  ;;  %5075 = vst.msk [vmem:[#allocation2 + $0x20] sm:$0xff] %vm632_vm3, %v5043_v28  ;;  %v15942_v0 = vpop.f32.mrb[166].mxu0  ;;  %v7381_v12 = vld [vmem:[#allocation3 + $0x1b2] sm:$0xff]  ;;  %v7382_v62 = vld [vmem:[#allocation3 + $0x1ca] sm:$0xff] }
 0x2d8   : > { %v18928_v18 = vpop.f32.mrb[166].mxu1  ;;  %5523 = vst.msk [vmem:[#allocation2 + $0x8] sm:$0xff] %vm632_vm3, %v5491_v16  ;;  %v5046_v5 = vadd.f32 %v15942_v0, %v4691_v47  ;;  %v4910_v26 = vpop.f32.mrb[167].mxu0  ;;  %16256 = vmatmul.mubr.msk.f32.gmra.mrb[16].mxu0 %vm310_vm0, %v7375_v42  ;;  %v7833_v61 = vld [vmem:[#allocation3 + $0x1ce] sm:$0xff]  ;;  %v7834_v28 = vld [vmem:[#allocation3 + $0x1e6] sm:$0xff] }
 0x2d9   : > { %v5361_v52 = vpop.f32.mrb[167].mxu1  ;;  %16306 = vmatmul.mubr.msk.f32.gmra.mrb[16].mxu1 %vm310_vm0, %v7827_v3  ;;  %5522 = vst.msk [vmem:[#allocation2] sm:$0xff] %vm632_vm3, %v5490_v43  ;;  %v5138_v50 = vld [vmem:[#allocation2 + $0x18] sm:$0xff]  ;;  %v5045_v55 = vadd.f32 %v4910_v26, %v4690_v23  ;;  %16258 = vmatprep.mubr.msk.f32.mxu0 %vm310_vm0, %v7376_v1  ;;  %v7835_v23 = vld [vmem:[#allocation3 + $0x1ee] sm:$0xff] }
 0x2da   : > { %16308 = vmatprep.mubr.msk.f32.mxu1 %vm310_vm0, %v7828_v15  ;;  %v5493_v48 = vadd.f32 %v18906_v29, %v5138_v50  ;;  %v5137_v9 = vld [vmem:[#allocation2 + $0x10] sm:$0xff]  ;;  %5078 = vst.msk [vmem:[#allocation2 + $0x38] sm:$0xff] %vm632_vm3, %v5046_v5  ;;  %v4695_v29 = vld [vmem:[#allocation2 + $0x58] sm:$0xff] }
 0x2db   : > { %v5492_v33 = vadd.f32 %v5341_v6, %v5137_v9  ;;  %5077 = vst.msk [vmem:[#allocation2 + $0x30] sm:$0xff] %vm632_vm3, %v5045_v55  ;;  %v15945_v19 = vpop.f32.mrb[168].mxu0  ;;  %v4694_v6 = vld [vmem:[#allocation2 + $0x50] sm:$0xff]  ;;  %v7836_v55 = vld [vmem:[#allocation3 + $0x206] sm:$0xff] }
 0x2dc   : > { %v18939_v25 = vpop.f32.mrb[168].mxu1  ;;  %5525 = vst.msk [vmem:[#allocation2 + $0x18] sm:$0xff] %vm632_vm3, %v5493_v48  ;;  %v5048_v38 = vadd.f32 %v15945_v19, %v4693_v10  ;;  %v4920_v20 = vpop.f32.mrb[169].mxu0  ;;  %16259 = vmatmul.mubr.msk.f32.gmra.mrb[18].mxu0 %vm310_vm0, %v7377_v34  ;;  %v7383_v5 = vld [vmem:[#allocation3 + $0x1d2] sm:$0xff]  ;;  %v7384_v50 = vld [vmem:[#allocation3 + $0x1ea] sm:$0xff] }
 0x2dd   : > { %v5371_v37 = vpop.f32.mrb[169].mxu1  ;;  %16309 = vmatmul.mubr.msk.f32.gmra.mrb[18].mxu1 %vm310_vm0, %v7829_v22  ;;  %5524 = vst.msk [vmem:[#allocation2 + $0x10] sm:$0xff] %vm632_vm3, %v5492_v33  ;;  %v5140_v53 = vld [vmem:[#allocation2 + $0x28] sm:$0xff]  ;;  %v5047_v51 = vadd.f32 %v4920_v20, %v4692_v35  ;;  %16261 = vmatprep.mubr.msk.f32.mxu0 %vm310_vm0, %v7378_v40 }
 0x2de   : > { %16311 = vmatprep.mubr.msk.f32.mxu1 %vm310_vm0, %v7830_v45  ;;  %v5495_v17 = vadd.f32 %v18917_v32, %v5140_v53  ;;  %v5139_v36 = vld [vmem:[#allocation2 + $0x20] sm:$0xff]  ;;  %5080 = vst.msk [vmem:[#allocation2 + $0x48] sm:$0xff] %vm632_vm3, %v5048_v38  ;;  %v4697_v32 = vld [vmem:[#allocation2 + $0x68] sm:$0xff]  ;;  %v7385_v38 = vld [vmem:[#allocation3 + $0x1f2] sm:$0xff] }
 0x2df   : > { %v5494_v27 = vadd.f32 %v5351_v11, %v5139_v36  ;;  %5079 = vst.msk [vmem:[#allocation2 + $0x40] sm:$0xff] %vm632_vm3, %v5047_v51  ;;  %v15948_v39 = vpop.f32.mrb[170].mxu0  ;;  %v4696_v11 = vld [vmem:[#allocation2 + $0x60] sm:$0xff]  ;;  %v7837_v35 = vld [vmem:[#allocation3 + $0x20e] sm:$0xff] }
 0x2e0   : > { %v18950_v57 = vpop.f32.mrb[170].mxu1  ;;  %5527 = vst.msk [vmem:[#allocation2 + $0x28] sm:$0xff] %vm632_vm3, %v5495_v17  ;;  %v5050_v41 = vadd.f32 %v15948_v39, %v4695_v29  ;;  %v4930_v54 = vpop.f32.mrb[171].mxu0  ;;  %16262 = vmatmul.mubr.msk.f32.gmra.mrb[20].mxu0 %vm310_vm0, %v7379_v59  ;;  %v7386_v53 = vld [vmem:[#allocation3 + $0x20a] sm:$0xff]  ;;  %v4703_v59 = vld [vmem:[#allocation2 + $0x98] sm:$0xff] }
 0x2e1   : > { %v5381_v56 = vpop.f32.mrb[171].mxu1  ;;  %16312 = vmatmul.mubr.msk.f32.gmra.mrb[20].mxu1 %vm310_vm0, %v7831_v58  ;;  %5526 = vst.msk [vmem:[#allocation2 + $0x20] sm:$0xff] %vm632_vm3, %v5494_v27  ;;  %v5142_v4 = vld [vmem:[#allocation2 + $0x38] sm:$0xff]  ;;  %v5049_v14 = vadd.f32 %v4930_v54, %v4694_v6  ;;  %16264 = vmatprep.mubr.msk.f32.mxu0 %vm310_vm0, %v7380_v2  ;;  %v7838_v51 = vld [vmem:[#allocation3 + $0x226] sm:$0xff]  ;;  %v7839_v54 = vld [vmem:[#allocation3 + $0x22e] sm:$0xff] }
 0x2e2   : > { %16314 = vmatprep.mubr.msk.f32.mxu1 %vm310_vm0, %v7832_v7  ;;  %v5497_v30 = vadd.f32 %v18928_v18, %v5142_v4  ;;  %v5141_v8 = vld [vmem:[#allocation2 + $0x30] sm:$0xff]  ;;  %5082 = vst.msk [vmem:[#allocation2 + $0x58] sm:$0xff] %vm632_vm3, %v5050_v41  ;;  %v4699_v18 = vld [vmem:[#allocation2 + $0x78] sm:$0xff]  ;;  %v7840_v39 = vld [vmem:[#allocation3 + $0x246] sm:$0xff] }
 0x2e3   : > { %v5496_v31 = vadd.f32 %v5361_v52, %v5141_v8  ;;  %5081 = vst.msk [vmem:[#allocation2 + $0x50] sm:$0xff] %vm632_vm3, %v5049_v14  ;;  %v15951_v49 = vpop.f32.mrb[172].mxu0  ;;  %v4698_v52 = vld [vmem:[#allocation2 + $0x70] sm:$0xff] }
 0x2e4   : > { %v18961_v44 = vpop.f32.mrb[172].mxu1  ;;  %5529 = vst.msk [vmem:[#allocation2 + $0x38] sm:$0xff] %vm632_vm3, %v5497_v30  ;;  %v5052_v63 = vadd.f32 %v15951_v49, %v4697_v32  ;;  %v4940_v60 = vpop.f32.mrb[173].mxu0  ;;  %16265 = vmatmul.mubr.msk.f32.gmra.mrb[22].mxu0 %vm310_vm0, %v7381_v12  ;;  %v7387_v6 = vld [vmem:[#allocation3 + $0x212] sm:$0xff]  ;;  %v7388_v14 = vld [vmem:[#allocation3 + $0x22a] sm:$0xff] }
 0x2e5   : > { %v5391_v13 = vpop.f32.mrb[173].mxu1  ;;  %16315 = vmatmul.mubr.msk.f32.gmra.mrb[22].mxu1 %vm310_vm0, %v7833_v61  ;;  %5528 = vst.msk [vmem:[#allocation2 + $0x30] sm:$0xff] %vm632_vm3, %v5496_v31  ;;  %v5144_v16 = vld [vmem:[#allocation2 + $0x48] sm:$0xff]  ;;  %v5051_v21 = vadd.f32 %v4940_v60, %v4696_v11  ;;  %16267 = vmatprep.mubr.msk.f32.mxu0 %vm310_vm0, %v7382_v62  ;;  %v4702_v2 = vld [vmem:[#allocation2 + $0x90] sm:$0xff] }
 0x2e6   : > { %16317 = vmatprep.mubr.msk.f32.mxu1 %vm310_vm0, %v7834_v28  ;;  %v5499_v43 = vadd.f32 %v18939_v25, %v5144_v16  ;;  %v5143_v47 = vld [vmem:[#allocation2 + $0x40] sm:$0xff]  ;;  %5084 = vst.msk [vmem:[#allocation2 + $0x68] sm:$0xff] %vm632_vm3, %v5052_v63  ;;  %v4701_v25 = vld [vmem:[#allocation2 + $0x88] sm:$0xff]  ;;  %v7389_v11 = vld [vmem:[#allocation3 + $0x232] sm:$0xff] }
 0x2e7   : > { %v5498_v0 = vadd.f32 %v5371_v37, %v5143_v47  ;;  %5083 = vst.msk [vmem:[#allocation2 + $0x60] sm:$0xff] %vm632_vm3, %v5051_v21  ;;  %v15954_v42 = vpop.f32.mrb[174].mxu0  ;;  %v4700_v37 = vld [vmem:[#allocation2 + $0x80] sm:$0xff]  ;;  %v7841_v31 = vld [vmem:[#allocation3 + $0x24e] sm:$0xff] }
 0x2e8   : > { %v18972_v3 = vpop.f32.mrb[174].mxu1  ;;  %5531 = vst.msk [vmem:[#allocation2 + $0x48] sm:$0xff] %vm632_vm3, %v5499_v43  ;;  %v5054_v26 = vadd.f32 %v15954_v42, %v4699_v18  ;;  %v4950_v1 = vpop.f32.mrb[175].mxu0  ;;  %16268 = vmatmul.mubr.msk.f32.gmra.mrb[24].mxu0 %vm310_vm0, %v7383_v5  ;;  %v4705_v12 = vld [vmem:[#allocation2 + $0xa8] sm:$0xff]  ;;  %v4707_v5 = vld [vmem:[#allocation2 + $0xb8] sm:$0xff] }
 0x2e9   : > { %v5401_v15 = vpop.f32.mrb[175].mxu1  ;;  %16318 = vmatmul.mubr.msk.f32.gmra.mrb[24].mxu1 %vm310_vm0, %v7835_v23  ;;  %5530 = vst.msk [vmem:[#allocation2 + $0x40] sm:$0xff] %vm632_vm3, %v5498_v0  ;;  %v5146_v48 = vld [vmem:[#allocation2 + $0x58] sm:$0xff]  ;;  %v5053_v9 = vadd.f32 %v4950_v1, %v4698_v52  ;;  %16270 = vmatprep.mubr.msk.f32.mxu0 %vm310_vm0, %v7384_v50  ;;  %v8261_v16 = vld [vmem:[#allocation3 + $0x67] sm:$0xff]  ;;  %v8262_v42 = vld [vmem:[#allocation3 + $0x6f] sm:$0xff] }
 0x2ea   : > { %16320 = vmatprep.mubr.msk.f32.mxu1 %vm310_vm0, %v7836_v55  ;;  %v5501_v33 = vadd.f32 %v18950_v57, %v5146_v48  ;;  %v5145_v10 = vld [vmem:[#allocation2 + $0x50] sm:$0xff]  ;;  %5086 = vst.msk [vmem:[#allocation2 + $0x78] sm:$0xff] %vm632_vm3, %v5054_v26  ;;  %v8712_v21 = vld [vmem:[#allocation3 + $0x68] sm:$0xff] }
 0x2eb   : > { %v5500_v19 = vadd.f32 %v5381_v56, %v5145_v10  ;;  %5085 = vst.msk [vmem:[#allocation2 + $0x70] sm:$0xff] %vm632_vm3, %v5053_v9  ;;  %v15957_v34 = vpop.f32.mrb[176].mxu0  ;;  %v8713_v52 = vld [vmem:[#allocation3 + $0x70] sm:$0xff]  ;;  %v8263_v1 = vld [vmem:[#allocation3 + $0x87] sm:$0xff] }
 0x2ec   : > { %v18983_v22 = vpop.f32.mrb[176].mxu1  ;;  %5533 = vst.msk [vmem:[#allocation2 + $0x58] sm:$0xff] %vm632_vm3, %v5501_v33  ;;  %v5056_v20 = vadd.f32 %v15957_v34, %v4701_v25  ;;  %v4960_v40 = vpop.f32.mrb[177].mxu0  ;;  %16271 = vmatmul.mubr.msk.f32.gmra.mrb[26].mxu0 %vm310_vm0, %v7385_v38  ;;  %v4706_v50 = vld [vmem:[#allocation2 + $0xb0] sm:$0xff]  ;;  %v19030_v9 = vld [vmem:[%s21250_s4 + $0xa0] sm:$0xff]  ;;  %v19035_v33 = vld [vmem:[%s21250_s4 + $0xa8] sm:$0xff] }
 0x2ed   : > { %v5411_v45 = vpop.f32.mrb[177].mxu1  ;;  %16321 = vmatmul.mubr.msk.f32.gmra.mrb[26].mxu1 %vm310_vm0, %v7837_v35  ;;  %5532 = vst.msk [vmem:[#allocation2 + $0x50] sm:$0xff] %vm632_vm3, %v5500_v19  ;;  %v5148_v17 = vld [vmem:[#allocation2 + $0x68] sm:$0xff]  ;;  %v5055_v36 = vadd.f32 %v4960_v40, %v4700_v37  ;;  %16273 = vmatprep.mubr.msk.f32.mxu0 %vm310_vm0, %v7386_v53  ;;  %v8715_v40 = vld [vmem:[#allocation3 + $0x90] sm:$0xff]  ;;  %v4708_v53 = vld [vmem:[#allocation2 + $0xc0] sm:$0xff] }
 0x2ee   : > { %16323 = vmatprep.mubr.msk.f32.mxu1 %vm310_vm0, %v7838_v51  ;;  %v5503_v27 = vadd.f32 %v18961_v44, %v5148_v17  ;;  %v5147_v29 = vld [vmem:[#allocation2 + $0x60] sm:$0xff]  ;;  %5088 = vst.msk [vmem:[#allocation2 + $0x88] sm:$0xff] %vm632_vm3, %v5056_v20  ;;  %v8714_v25 = vld [vmem:[#allocation3 + $0x88] sm:$0xff] }
 0x2ef   : > { %v5502_v57 = vadd.f32 %v5391_v13, %v5147_v29  ;;  %5087 = vst.msk [vmem:[#allocation2 + $0x80] sm:$0xff] %vm632_vm3, %v5055_v36  ;;  %v15960_v58 = vpop.f32.mrb[178].mxu0  ;;  %v4704_v13 = vld [vmem:[#allocation2 + $0xa0] sm:$0xff]  ;;  %v4709_v35 = vld [vmem:[#allocation2 + $0xc8] sm:$0xff] }
 0x2f0   : > { %v18994_v41 = vpop.f32.mrb[178].mxu1  ;;  %5535 = vst.msk [vmem:[#allocation2 + $0x68] sm:$0xff] %vm632_vm3, %v5503_v27  ;;  %v5058_v56 = vadd.f32 %v15960_v58, %v4703_v59  ;;  %v4970_v7 = vpop.f32.mrb[179].mxu0  ;;  %16274 = vmatmul.mubr.msk.f32.gmra.mrb[28].mxu0 %vm310_vm0, %v7387_v6  ;;  %v8265_v17 = vld [vmem:[#allocation3 + $0xa7] sm:$0xff]  ;;  %v4711_v58 = vld [vmem:[#allocation2 + $0xd8] sm:$0xff] }
 0x2f1   : > { %v18997_v4 = vpop.f32.mrb[179].mxu1  ;;  %16324 = vmatmul.mubr.msk.f32.gmra.mrb[28].mxu1 %vm310_vm0, %v7839_v54  ;;  %5534 = vst.msk [vmem:[#allocation2 + $0x60] sm:$0xff] %vm632_vm3, %v5502_v57  ;;  %v5150_v30 = vld [vmem:[#allocation2 + $0x78] sm:$0xff]  ;;  %v5057_v8 = vadd.f32 %v4970_v7, %v4702_v2  ;;  %16276 = vmatprep.mubr.msk.f32.mxu0 %vm310_vm0, %v7388_v14  ;;  %v8716_v36 = vld [vmem:[#allocation3 + $0xa8] sm:$0xff]  ;;  %v4710_v7 = vld [vmem:[#allocation2 + $0xd0] sm:$0xff] }
 0x2f2   : > { %16326 = vmatprep.mubr.msk.f32.mxu1 %vm310_vm0, %v7840_v39  ;;  %v5505_v32 = vadd.f32 %v18972_v3, %v5150_v30  ;;  %v5149_v49 = vld [vmem:[#allocation2 + $0x70] sm:$0xff]  ;;  %5090 = vst.msk [vmem:[#allocation2 + $0x98] sm:$0xff] %vm632_vm3, %v5058_v56  ;;  %v8267_v30 = vld [vmem:[#allocation3 + $0xc7] sm:$0xff] }
 0x2f3   : > { %v5504_v44 = vadd.f32 %v5401_v15, %v5149_v49  ;;  %5089 = vst.msk [vmem:[#allocation2 + $0x90] sm:$0xff] %vm632_vm3, %v5057_v8  ;;  %v15963_v61 = vpop.f32.mrb[180].mxu0  ;;  %v8266_v54 = vld [vmem:[#allocation3 + $0xaf] sm:$0xff] }
 0x2f4   : > { %v19007_v63 = vpop.f32.mrb[180].mxu1  ;;  %5537 = vst.msk [vmem:[#allocation2 + $0x78] sm:$0xff] %vm632_vm3, %v5505_v32  ;;  %v5060_v60 = vadd.f32 %v15963_v61, %v4705_v12  ;;  %v4980_v62 = vpop.f32.mrb[181].mxu0  ;;  %16277 = vmatmul.mubr.msk.f32.gmra.mrb[30].mxu0 %vm310_vm0, %v7389_v11  ;;  %v8717_v56 = vld [vmem:[#allocation3 + $0xb0] sm:$0xff]  ;;  %v8718_v8 = vld [vmem:[#allocation3 + $0xc8] sm:$0xff] }
 0x2f5   : > { %v19010_v28 = vpop.f32.mrb[181].mxu1  ;;  %16327 = vmatmul.mubr.msk.f32.gmra.mrb[30].mxu1 %vm310_vm0, %v7841_v31  ;;  %5536 = vst.msk [vmem:[#allocation2 + $0x70] sm:$0xff] %vm632_vm3, %v5504_v44  ;;  %v5152_v43 = vld [vmem:[#allocation2 + $0x88] sm:$0xff]  ;;  %v5059_v47 = vadd.f32 %v4980_v62, %v4704_v13  ;;  %16331 = vmatprep.mubr.msk.f32.mxu0 %vm310_vm0, %v8261_v16  ;;  %v8719_v13 = vld [vmem:[#allocation3 + $0xd0] sm:$0xff] }
 0x2f6   : > { %16381 = vmatprep.mubr.msk.f32.mxu1 %vm310_vm0, %v8712_v21  ;;  %v5507_v0 = vadd.f32 %v18983_v22, %v5152_v43  ;;  %v5151_v18 = vld [vmem:[#allocation2 + $0x80] sm:$0xff]  ;;  %5092 = vst.msk [vmem:[#allocation2 + $0xa8] sm:$0xff] %vm632_vm3, %v5060_v60  ;;  %v4713_v61 = vld [vmem:[#allocation2 + $0xe8] sm:$0xff] }
 0x2f7   : > { %v5506_v3 = vadd.f32 %v5411_v45, %v5151_v18  ;;  %5091 = vst.msk [vmem:[#allocation2 + $0xa0] sm:$0xff] %vm632_vm3, %v5059_v47  ;;  %v15966_v23 = vpop.f32.mrb[182].mxu0  ;;  %v8268_v60 = vld [vmem:[#allocation3 + $0xcf] sm:$0xff]  ;;  %v8269_v43 = vld [vmem:[#allocation3 + $0xe7] sm:$0xff] }
 0x2f8   : > { %v19020_v26 = vpop.f32.mrb[182].mxu1  ;;  %5539 = vst.msk [vmem:[#allocation2 + $0x88] sm:$0xff] %vm632_vm3, %v5507_v0  ;;  %v5062_v15 = vadd.f32 %v15966_v23, %v4707_v5  ;;  %v4990_v55 = vpop.f32.mrb[183].mxu0  ;;  %16332 = vmatmul.mubr.msk.f32.vlgmr.msra.gmra.mrb[32].mxu0 %vm310_vm0, %v8262_v42  ;;  %v8720_v47 = vld [vmem:[#allocation3 + $0xe8] sm:$0xff]  ;;  %v4715_v23 = vld [vmem:[#allocation2 + $0xf8] sm:$0xff] }
 0x2f9   : > { %v19023_v48 = vpop.f32.mrb[183].mxu1  ;;  %16382 = vmatmul.mubr.msk.f32.vlgmr.msra.gmra.mrb[32].mxu1 %vm310_vm0, %v8713_v52  ;;  %5538 = vst.msk [vmem:[#allocation2 + $0x80] sm:$0xff] %vm632_vm3, %v5506_v3  ;;  %v5154_v10 = vld [vmem:[#allocation2 + $0x98] sm:$0xff]  ;;  %v5061_v19 = vadd.f32 %v4990_v55, %v4706_v50  ;;  %16430 = vmatpush3.msra.mxu0 %v18831_v24  ;;  %v8264_v24 = vld [vmem:[#allocation3 + $0x8f] sm:$0xff] }
 0x2fa   : > { %16334 = vmatprep.mubr.msk.f32.mxu0 %vm310_vm0, %v8263_v1  ;;  %v5509_v34 = vadd.f32 %v18994_v41, %v5154_v10  ;;  %v5153_v22 = vld [vmem:[#allocation2 + $0x90] sm:$0xff]  ;;  %5094 = vst.msk [vmem:[#allocation2 + $0xb8] sm:$0xff] %vm632_vm3, %v5062_v15  ;;  %16384 = vmatprep.mubr.msk.f32.mxu1 %vm310_vm0, %v8714_v25  ;;  %v8722_v25 = vld [vmem:[#allocation3 + $0x108] sm:$0xff] }
 0x2fb   : > { %16480 = vmatpush3.msra.mxu1 %v18836_v46  ;;  %v5508_v38 = vadd.f32 %v18997_v4, %v5153_v22  ;;  %5093 = vst.msk [vmem:[#allocation2 + $0xb0] sm:$0xff] %vm632_vm3, %v5061_v19  ;;  %v15969_v20 = vpop.f32.mrb[184].mxu0  ;;  %16529 = vmatprep.subr.mxu0 %v19030_v9  ;;  %v8270_v1 = vld [vmem:[#allocation3 + $0xef] sm:$0xff]  ;;  %v8271_v19 = vld [vmem:[#allocation3 + $0x107] sm:$0xff] }
 0x2fc   : > { %v19046_v37 = vpop.f32.mrb[184].mxu1  ;;  %16579 = vmatprep.subr.mxu1 %v19035_v33  ;;  %5541 = vst.msk [vmem:[#allocation2 + $0x98] sm:$0xff] %vm632_vm3, %v5509_v34  ;;  %v5064_v45 = vadd.f32 %v15969_v20, %v4709_v35  ;;  %v5000_v51 = vpop.f32.mrb[185].mxu0  ;;  %16335 = vmatmul.mubr.msk.f32.gmra.mrb[34].mxu0 %vm310_vm0, %v8264_v24  ;;  %v8721_v15 = vld [vmem:[#allocation3 + $0xf0] sm:$0xff] }
 0x2fd   : > { %v5451_v46 = vpop.f32.mrb[185].mxu1  ;;  %16385 = vmatmul.mubr.msk.f32.gmra.mrb[34].mxu1 %vm310_vm0, %v8715_v40  ;;  %5540 = vst.msk [vmem:[#allocation2 + $0x90] sm:$0xff] %vm632_vm3, %v5508_v38  ;;  %v5156_v27 = vld [vmem:[#allocation2 + $0xa8] sm:$0xff]  ;;  %v5063_v29 = vadd.f32 %v5000_v51, %v4708_v53  ;;  %16337 = vmatprep.mubr.msk.f32.mxu0 %vm310_vm0, %v8265_v17  ;;  %v4714_v55 = vld [vmem:[#allocation2 + $0xf0] sm:$0xff] }
 0x2fe   : > { %16387 = vmatprep.mubr.msk.f32.mxu1 %vm310_vm0, %v8716_v36  ;;  %v5511_v39 = vadd.f32 %v19007_v63, %v5156_v27  ;;  %v5155_v57 = vld [vmem:[#allocation2 + $0xa0] sm:$0xff]  ;;  %5096 = vst.msk [vmem:[#allocation2 + $0xc8] sm:$0xff] %vm632_vm3, %v5064_v45  ;;  %v8272_v45 = vld [vmem:[#allocation3 + $0x10f] sm:$0xff] }
 0x2ff   : > { %v5510_v59 = vadd.f32 %v19010_v28, %v5155_v57  ;;  %5095 = vst.msk [vmem:[#allocation2 + $0xc0] sm:$0xff] %vm632_vm3, %v5063_v29  ;;  %v15972_v41 = vpop.f32.mrb[186].mxu0  ;;  %v4712_v28 = vld [vmem:[#allocation2 + $0xe0] sm:$0xff]  ;;  %v8723_v53 = vld [vmem:[#allocation3 + $0x110] sm:$0xff]  ;;  %v8724_v29 = vld [vmem:[#allocation3 + $0x128] sm:$0xff] }
 0x300   : > { %v19060_v6 = vpop.f32.mrb[186].mxu1  ;;  %5543 = vst.msk [vmem:[#allocation2 + $0xa8] sm:$0xff] %vm632_vm3, %v5511_v39  ;;  %v5066_v2 = vadd.f32 %v15972_v41, %v4711_v58  ;;  %v5010_v4 = vpop.f32.mrb[187].mxu0  ;;  %16338 = vmatmul.mubr.msk.f32.gmra.mrb[36].mxu0 %vm310_vm0, %v8266_v54  ;;  %v8273_v27 = vld [vmem:[#allocation3 + $0x127] sm:$0xff] }
 0x301   : > { %v5461_v14 = vpop.f32.mrb[187].mxu1  ;;  %16388 = vmatmul.mubr.msk.f32.gmra.mrb[36].mxu1 %vm310_vm0, %v8717_v56  ;;  %5542 = vst.msk [vmem:[#allocation2 + $0xa0] sm:$0xff] %vm632_vm3, %v5510_v59  ;;  %v5158_v31 = vld [vmem:[#allocation2 + $0xb8] sm:$0xff]  ;;  %v5065_v32 = vadd.f32 %v5010_v4, %v4710_v7  ;;  %16340 = vmatprep.mubr.msk.f32.mxu0 %vm310_vm0, %v8267_v30  ;;  %v8725_v7 = vld [vmem:[#allocation3 + $0x130] sm:$0xff] }
 0x302   : > { %16390 = vmatprep.mubr.msk.f32.mxu1 %vm310_vm0, %v8718_v8  ;;  %v5513_v49 = vadd.f32 %v19020_v26, %v5158_v31  ;;  %v5157_v44 = vld [vmem:[#allocation2 + $0xb0] sm:$0xff]  ;;  %5098 = vst.msk [vmem:[#allocation2 + $0xd8] sm:$0xff] %vm632_vm3, %v5066_v2  ;;  %v8275_v31 = vld [vmem:[#allocation3 + $0x147] sm:$0xff] }
 0x303   : > { %v5512_v12 = vadd.f32 %v19023_v48, %v5157_v44  ;;  %5097 = vst.msk [vmem:[#allocation2 + $0xd0] sm:$0xff] %vm632_vm3, %v5065_v32  ;;  %v15975_v63 = vpop.f32.mrb[188].mxu0  ;;  %v8274_v2 = vld [vmem:[#allocation3 + $0x12f] sm:$0xff] }
 0x304   : > { %v19072_v11 = vpop.f32.mrb[188].mxu1  ;;  %5545 = vst.msk [vmem:[#allocation2 + $0xb8] sm:$0xff] %vm632_vm3, %v5513_v49  ;;  %v5068_v62 = vadd.f32 %v15975_v63, %v4713_v61  ;;  %v5020_v16 = vpop.f32.mrb[189].mxu0  ;;  %16341 = vmatmul.mubr.msk.f32.gmra.mrb[38].mxu0 %vm310_vm0, %v8268_v60  ;;  %v8726_v32 = vld [vmem:[#allocation3 + $0x148] sm:$0xff] }
 0x305   : > { %v5471_v21 = vpop.f32.mrb[189].mxu1  ;;  %16391 = vmatmul.mubr.msk.f32.gmra.mrb[38].mxu1 %vm310_vm0, %v8719_v13  ;;  %5544 = vst.msk [vmem:[#allocation2 + $0xb0] sm:$0xff] %vm632_vm3, %v5512_v12  ;;  %v5160_v0 = vld [vmem:[#allocation2 + $0xc8] sm:$0xff]  ;;  %v5067_v18 = vadd.f32 %v5020_v16, %v4712_v28  ;;  %16343 = vmatprep.mubr.msk.f32.mxu0 %vm310_vm0, %v8269_v43  ;;  %v8727_v28 = vld [vmem:[#allocation3 + $0x150] sm:$0xff] }
 0x306   : > { %16393 = vmatprep.mubr.msk.f32.mxu1 %vm310_vm0, %v8720_v47  ;;  %v5515_v42 = vadd.f32 %v19046_v37, %v5160_v0  ;;  %v5159_v3 = vld [vmem:[#allocation2 + $0xc0] sm:$0xff]  ;;  %5100 = vst.msk [vmem:[#allocation2 + $0xe8] sm:$0xff] %vm632_vm3, %v5068_v62  ;;  %v5587_v37 = vld [vmem:[#allocation2 + $0x8] sm:$0xff] }
 0x307   : > { %v5514_v5 = vadd.f32 %v5451_v46, %v5159_v3  ;;  %5099 = vst.msk [vmem:[#allocation2 + $0xe0] sm:$0xff] %vm632_vm3, %v5067_v18  ;;  %v15978_v26 = vpop.f32.mrb[190].mxu0  ;;  %v5586_v46 = vld [vmem:[#allocation2] sm:$0xff]  ;;  %v8276_v62 = vld [vmem:[#allocation3 + $0x14f] sm:$0xff] }
 0x308   : > { %v19083_v52 = vpop.f32.mrb[190].mxu1  ;;  %5547 = vst.msk [vmem:[#allocation2 + $0xc8] sm:$0xff] %vm632_vm3, %v5515_v42  ;;  %v5070_v50 = vadd.f32 %v15978_v26, %v4715_v23  ;;  %v5030_v48 = vpop.f32.mrb[191].mxu0  ;;  %16344 = vmatmul.mubr.msk.f32.gmra.mrb[40].mxu0 %vm310_vm0, %v8270_v1  ;;  %v8277_v0 = vld [vmem:[#allocation3 + $0x167] sm:$0xff] }
 0x309   : > { %v5481_v10 = vpop.f32.mrb[191].mxu1  ;;  %16394 = vmatmul.mubr.msk.f32.gmra.mrb[40].mxu1 %vm310_vm0, %v8721_v15  ;;  %5546 = vst.msk [vmem:[#allocation2 + $0xc0] sm:$0xff] %vm632_vm3, %v5514_v5  ;;  %v5162_v34 = vld [vmem:[#allocation2 + $0xd8] sm:$0xff]  ;;  %v5069_v22 = vadd.f32 %v5030_v48, %v4714_v55  ;;  %16346 = vmatprep.mubr.msk.f32.mxu0 %vm310_vm0, %v8271_v19  ;;  %v8728_v18 = vld [vmem:[#allocation3 + $0x168] sm:$0xff]  ;;  %v8729_v55 = vld [vmem:[#allocation3 + $0x170] sm:$0xff] }
 0x30a   : > { %16396 = vmatprep.mubr.msk.f32.mxu1 %vm310_vm0, %v8722_v25  ;;  %v5517_v38 = vadd.f32 %v19060_v6, %v5162_v34  ;;  %v5161_v35 = vld [vmem:[#allocation2 + $0xd0] sm:$0xff]  ;;  %5102 = vst.msk [vmem:[#allocation2 + $0xf8] sm:$0xff] %vm632_vm3, %v5070_v50  ;;  %v5589_v6 = vld [vmem:[#allocation2 + $0x18] sm:$0xff]  ;;  %v8279_v34 = vld [vmem:[#allocation3 + $0x187] sm:$0xff] }
 0x30b   : > { %v5516_v20 = vadd.f32 %v5461_v14, %v5161_v35  ;;  %5101 = vst.msk [vmem:[#allocation2 + $0xf0] sm:$0xff] %vm632_vm3, %v5069_v22  ;;  %v16033_v24 = vpop.f32.mrb[192].mxu0  ;;  %v5588_v14 = vld [vmem:[#allocation2 + $0x10] sm:$0xff]  ;;  %v8730_v22 = vld [vmem:[#allocation3 + $0x188] sm:$0xff] }
 0x30c   : > { %v19094_v40 = vpop.f32.mrb[192].mxu1  ;;  %5549 = vst.msk [vmem:[#allocation2 + $0xd8] sm:$0xff] %vm632_vm3, %v5517_v38  ;;  %v5942_v51 = vadd.f32 %v16033_v24, %v5587_v37  ;;  %v5782_v17 = vpop.f32.mrb[193].mxu0  ;;  %16347 = vmatmul.mubr.msk.f32.gmra.mrb[42].mxu0 %vm310_vm0, %v8272_v45  ;;  %v8278_v50 = vld [vmem:[#allocation3 + $0x16f] sm:$0xff] }
 0x30d   : > { %v6233_v36 = vpop.f32.mrb[193].mxu1  ;;  %16397 = vmatmul.mubr.msk.f32.gmra.mrb[42].mxu1 %vm310_vm0, %v8723_v53  ;;  %5548 = vst.msk [vmem:[#allocation2 + $0xd0] sm:$0xff] %vm632_vm3, %v5516_v20  ;;  %v5164_v39 = vld [vmem:[#allocation2 + $0xe8] sm:$0xff]  ;;  %v5941_v57 = vadd.f32 %v5782_v17, %v5586_v46  ;;  %16349 = vmatprep.mubr.msk.f32.mxu0 %vm310_vm0, %v8273_v27  ;;  %v8731_v46 = vld [vmem:[#allocation3 + $0x190] sm:$0xff] }
 0x30e   : > { %16399 = vmatprep.mubr.msk.f32.mxu1 %vm310_vm0, %v8724_v29  ;;  %v5519_v59 = vadd.f32 %v19072_v11, %v5164_v39  ;;  %v5163_v58 = vld [vmem:[#allocation2 + $0xe0] sm:$0xff]  ;;  %5974 = vst.msk [vmem:[#allocation2 + $0x8] sm:$0xff] %vm632_vm3, %v5942_v51  ;;  %v5591_v11 = vld [vmem:[#allocation2 + $0x28] sm:$0xff] }
 0x30f   : > { %v5518_v41 = vadd.f32 %v5471_v21, %v5163_v58  ;;  %5973 = vst.msk [vmem:[#allocation2] sm:$0xff] %vm632_vm3, %v5941_v57  ;;  %v16036_v54 = vpop.f32.mrb[194].mxu0  ;;  %v5590_v21 = vld [vmem:[#allocation2 + $0x20] sm:$0xff]  ;;  %v8280_v51 = vld [vmem:[#allocation3 + $0x18f] sm:$0xff] }
 0x310   : > { %v19105_v56 = vpop.f32.mrb[194].mxu1  ;;  %5551 = vst.msk [vmem:[#allocation2 + $0xe8] sm:$0xff] %vm632_vm3, %v5519_v59  ;;  %v5944_v4 = vadd.f32 %v16036_v54, %v5589_v6  ;;  %v5792_v30 = vpop.f32.mrb[195].mxu0  ;;  %16350 = vmatmul.mubr.msk.f32.gmra.mrb[44].mxu0 %vm310_vm0, %v8274_v2  ;;  %v8281_v39 = vld [vmem:[#allocation3 + $0x1a7] sm:$0xff] }
 0x311   : > { %v6243_v8 = vpop.f32.mrb[195].mxu1  ;;  %16400 = vmatmul.mubr.msk.f32.gmra.mrb[44].mxu1 %vm310_vm0, %v8725_v7  ;;  %5550 = vst.msk [vmem:[#allocation2 + $0xe0] sm:$0xff] %vm632_vm3, %v5518_v41  ;;  %v5166_v49 = vld [vmem:[#allocation2 + $0xf8] sm:$0xff]  ;;  %v5943_v44 = vadd.f32 %v5792_v30, %v5588_v14  ;;  %16352 = vmatprep.mubr.msk.f32.mxu0 %vm310_vm0, %v8275_v31  ;;  %v8732_v57 = vld [vmem:[#allocation3 + $0x1a8] sm:$0xff]  ;;  %v8733_v14 = vld [vmem:[#allocation3 + $0x1b0] sm:$0xff] }
 0x312   : > { %16402 = vmatprep.mubr.msk.f32.mxu1 %vm310_vm0, %v8726_v32  ;;  %v5521_v12 = vadd.f32 %v19083_v52, %v5166_v49  ;;  %v5165_v61 = vld [vmem:[#allocation2 + $0xf0] sm:$0xff]  ;;  %5976 = vst.msk [vmem:[#allocation2 + $0x18] sm:$0xff] %vm632_vm3, %v5944_v4  ;;  %v5593_v52 = vld [vmem:[#allocation2 + $0x38] sm:$0xff]  ;;  %v8283_v49 = vld [vmem:[#allocation3 + $0x1c7] sm:$0xff] }
 0x313   : > { %v5520_v63 = vadd.f32 %v5481_v10, %v5165_v61  ;;  %5975 = vst.msk [vmem:[#allocation2 + $0x10] sm:$0xff] %vm632_vm3, %v5943_v44  ;;  %v16039_v60 = vpop.f32.mrb[196].mxu0  ;;  %v5592_v10 = vld [vmem:[#allocation2 + $0x30] sm:$0xff]  ;;  %v8734_v44 = vld [vmem:[#allocation3 + $0x1c8] sm:$0xff] }
 0x314   : > { %v19116_v13 = vpop.f32.mrb[196].mxu1  ;;  %5553 = vst.msk [vmem:[#allocation2 + $0xf8] sm:$0xff] %vm632_vm3, %v5521_v12  ;;  %v5946_v16 = vadd.f32 %v16039_v60, %v5591_v11  ;;  %v5802_v43 = vpop.f32.mrb[197].mxu0  ;;  %16353 = vmatmul.mubr.msk.f32.gmra.mrb[46].mxu0 %vm310_vm0, %v8276_v62  ;;  %v8282_v4 = vld [vmem:[#allocation3 + $0x1af] sm:$0xff] }
 0x315   : > { %v6253_v47 = vpop.f32.mrb[197].mxu1  ;;  %16403 = vmatmul.mubr.msk.f32.gmra.mrb[46].mxu1 %vm310_vm0, %v8727_v28  ;;  %5552 = vst.msk [vmem:[#allocation2 + $0xf0] sm:$0xff] %vm632_vm3, %v5520_v63  ;;  %v6038_v42 = vld [vmem:[#allocation2 + $0x8] sm:$0xff]  ;;  %v5945_v3 = vadd.f32 %v5802_v43, %v5590_v21  ;;  %16355 = vmatprep.mubr.msk.f32.mxu0 %vm310_vm0, %v8277_v0  ;;  %v8735_v21 = vld [vmem:[#allocation3 + $0x1d0] sm:$0xff] }
 0x316   : > { %16405 = vmatprep.mubr.msk.f32.mxu1 %vm310_vm0, %v8728_v18  ;;  %v6393_v5 = vadd.f32 %v19094_v40, %v6038_v42  ;;  %v6037_v23 = vld [vmem:[#allocation2] sm:$0xff]  ;;  %5978 = vst.msk [vmem:[#allocation2 + $0x28] sm:$0xff] %vm632_vm3, %v5946_v16  ;;  %v5595_v40 = vld [vmem:[#allocation2 + $0x48] sm:$0xff] }
 0x317   : > { %v6392_v26 = vadd.f32 %v6233_v36, %v6037_v23  ;;  %5977 = vst.msk [vmem:[#allocation2 + $0x20] sm:$0xff] %vm632_vm3, %v5945_v3  ;;  %v16042_v1 = vpop.f32.mrb[198].mxu0  ;;  %v5594_v36 = vld [vmem:[#allocation2 + $0x40] sm:$0xff]  ;;  %v8284_v16 = vld [vmem:[#allocation3 + $0x1cf] sm:$0xff] }
 0x318   : > { %v19127_v15 = vpop.f32.mrb[198].mxu1  ;;  %6425 = vst.msk [vmem:[#allocation2 + $0x8] sm:$0xff] %vm632_vm3, %v6393_v5  ;;  %v5948_v48 = vadd.f32 %v16042_v1, %v5593_v52  ;;  %v5812_v19 = vpop.f32.mrb[199].mxu0  ;;  %16356 = vmatmul.mubr.msk.f32.gmra.mrb[48].mxu0 %vm310_vm0, %v8278_v50  ;;  %v8285_v42 = vld [vmem:[#allocation3 + $0x1e7] sm:$0xff] }
 0x319   : > { %v6263_v25 = vpop.f32.mrb[199].mxu1  ;;  %16406 = vmatmul.mubr.msk.f32.gmra.mrb[48].mxu1 %vm310_vm0, %v8729_v55  ;;  %6424 = vst.msk [vmem:[#allocation2] sm:$0xff] %vm632_vm3, %v6392_v26  ;;  %v6040_v38 = vld [vmem:[#allocation2 + $0x18] sm:$0xff]  ;;  %v5947_v35 = vadd.f32 %v5812_v19, %v5592_v10  ;;  %16358 = vmatprep.mubr.msk.f32.mxu0 %vm310_vm0, %v8279_v34  ;;  %v8736_v3 = vld [vmem:[#allocation3 + $0x1e8] sm:$0xff]  ;;  %v8737_v10 = vld [vmem:[#allocation3 + $0x1f0] sm:$0xff] }
 0x31a   : > { %16408 = vmatprep.mubr.msk.f32.mxu1 %vm310_vm0, %v8730_v22  ;;  %v6395_v20 = vadd.f32 %v19105_v56, %v6040_v38  ;;  %v6039_v37 = vld [vmem:[#allocation2 + $0x10] sm:$0xff]  ;;  %5980 = vst.msk [vmem:[#allocation2 + $0x38] sm:$0xff] %vm632_vm3, %v5948_v48  ;;  %v5597_v56 = vld [vmem:[#allocation2 + $0x58] sm:$0xff]  ;;  %v8287_v38 = vld [vmem:[#allocation3 + $0x207] sm:$0xff] }
 0x31b   : > { %v6394_v24 = vadd.f32 %v6243_v8, %v6039_v37  ;;  %5979 = vst.msk [vmem:[#allocation2 + $0x30] sm:$0xff] %vm632_vm3, %v5947_v35  ;;  %v16045_v45 = vpop.f32.mrb[200].mxu0  ;;  %v5596_v8 = vld [vmem:[#allocation2 + $0x50] sm:$0xff]  ;;  %v8738_v35 = vld [vmem:[#allocation3 + $0x208] sm:$0xff] }
 0x31c   : > { %v19138_v53 = vpop.f32.mrb[200].mxu1  ;;  %6427 = vst.msk [vmem:[#allocation2 + $0x18] sm:$0xff] %vm632_vm3, %v6395_v20  ;;  %v5950_v17 = vadd.f32 %v16045_v45, %v5595_v40  ;;  %v5822_v27 = vpop.f32.mrb[201].mxu0  ;;  %16359 = vmatmul.mubr.msk.f32.gmra.mrb[50].mxu0 %vm310_vm0, %v8280_v51  ;;  %v8286_v48 = vld [vmem:[#allocation3 + $0x1ef] sm:$0xff] }
 0x31d   : > { %v6273_v29 = vpop.f32.mrb[201].mxu1  ;;  %16409 = vmatmul.mubr.msk.f32.gmra.mrb[50].mxu1 %vm310_vm0, %v8731_v46  ;;  %6426 = vst.msk [vmem:[#allocation2 + $0x10] sm:$0xff] %vm632_vm3, %v6394_v24  ;;  %v6042_v59 = vld [vmem:[#allocation2 + $0x28] sm:$0xff]  ;;  %v5949_v58 = vadd.f32 %v5822_v27, %v5594_v36  ;;  %16361 = vmatprep.mubr.msk.f32.mxu0 %vm310_vm0, %v8281_v39  ;;  %v8739_v36 = vld [vmem:[#allocation3 + $0x210] sm:$0xff] }
 0x31e   : > { %16411 = vmatprep.mubr.msk.f32.mxu1 %vm310_vm0, %v8732_v57  ;;  %v6397_v41 = vadd.f32 %v19116_v13, %v6042_v59  ;;  %v6041_v6 = vld [vmem:[#allocation2 + $0x20] sm:$0xff]  ;;  %5982 = vst.msk [vmem:[#allocation2 + $0x48] sm:$0xff] %vm632_vm3, %v5950_v17  ;;  %v5599_v13 = vld [vmem:[#allocation2 + $0x68] sm:$0xff] }
 0x31f   : > { %v6396_v54 = vadd.f32 %v6253_v47, %v6041_v6  ;;  %5981 = vst.msk [vmem:[#allocation2 + $0x40] sm:$0xff] %vm632_vm3, %v5949_v58  ;;  %v16048_v2 = vpop.f32.mrb[202].mxu0  ;;  %v5598_v47 = vld [vmem:[#allocation2 + $0x60] sm:$0xff]  ;;  %v8288_v17 = vld [vmem:[#allocation3 + $0x20f] sm:$0xff] }
 0x320   : > { %v19149_v7 = vpop.f32.mrb[202].mxu1  ;;  %6429 = vst.msk [vmem:[#allocation2 + $0x28] sm:$0xff] %vm632_vm3, %v6397_v41  ;;  %v5952_v30 = vadd.f32 %v16048_v2, %v5597_v56  ;;  %v5832_v31 = vpop.f32.mrb[203].mxu0  ;;  %16362 = vmatmul.mubr.msk.f32.gmra.mrb[52].mxu0 %vm310_vm0, %v8282_v4  ;;  %v8289_v59 = vld [vmem:[#allocation3 + $0x227] sm:$0xff] }
 0x321   : > { %v6283_v32 = vpop.f32.mrb[203].mxu1  ;;  %16412 = vmatmul.mubr.msk.f32.gmra.mrb[52].mxu1 %vm310_vm0, %v8733_v14  ;;  %6428 = vst.msk [vmem:[#allocation2 + $0x20] sm:$0xff] %vm632_vm3, %v6396_v54  ;;  %v6044_v12 = vld [vmem:[#allocation2 + $0x38] sm:$0xff]  ;;  %v5951_v61 = vadd.f32 %v5832_v31, %v5596_v8  ;;  %16364 = vmatprep.mubr.msk.f32.mxu0 %vm310_vm0, %v8283_v49  ;;  %v8740_v58 = vld [vmem:[#allocation3 + $0x228] sm:$0xff] }
 0x322   : > { %16414 = vmatprep.mubr.msk.f32.mxu1 %vm310_vm0, %v8734_v44  ;;  %v6399_v63 = vadd.f32 %v19127_v15, %v6044_v12  ;;  %v6043_v11 = vld [vmem:[#allocation2 + $0x30] sm:$0xff]  ;;  %5984 = vst.msk [vmem:[#allocation2 + $0x58] sm:$0xff] %vm632_vm3, %v5952_v30  ;;  %v5601_v15 = vld [vmem:[#allocation2 + $0x78] sm:$0xff]  ;;  %v8291_v2 = vld [vmem:[#allocation3 + $0x247] sm:$0xff] }
 0x323   : > { %v6398_v60 = vadd.f32 %v6263_v25, %v6043_v11  ;;  %5983 = vst.msk [vmem:[#allocation2 + $0x50] sm:$0xff] %vm632_vm3, %v5951_v61  ;;  %v16051_v62 = vpop.f32.mrb[204].mxu0  ;;  %v5600_v25 = vld [vmem:[#allocation2 + $0x70] sm:$0xff]  ;;  %v5605_v14 = vld [vmem:[#allocation2 + $0x98] sm:$0xff] }
 0x324   : > { %v19160_v28 = vpop.f32.mrb[204].mxu1  ;;  %6431 = vst.msk [vmem:[#allocation2 + $0x38] sm:$0xff] %vm632_vm3, %v6399_v63  ;;  %v5954_v43 = vadd.f32 %v16051_v62, %v5599_v13  ;;  %v5842_v0 = vpop.f32.mrb[205].mxu0  ;;  %16365 = vmatmul.mubr.msk.f32.gmra.mrb[54].mxu0 %vm310_vm0, %v8284_v16  ;;  %v8290_v31 = vld [vmem:[#allocation3 + $0x22f] sm:$0xff] }
 0x325   : > { %v19163_v18 = vpop.f32.mrb[205].mxu1  ;;  %16415 = vmatmul.mubr.msk.f32.gmra.mrb[54].mxu1 %vm310_vm0, %v8735_v21  ;;  %6430 = vst.msk [vmem:[#allocation2 + $0x30] sm:$0xff] %vm632_vm3, %v6398_v60  ;;  %v6046_v5 = vld [vmem:[#allocation2 + $0x48] sm:$0xff]  ;;  %v5953_v23 = vadd.f32 %v5842_v0, %v5598_v47  ;;  %16367 = vmatprep.mubr.msk.f32.mxu0 %vm310_vm0, %v8285_v42  ;;  %v5604_v44 = vld [vmem:[#allocation2 + $0x90] sm:$0xff] }
 0x326   : > { %16417 = vmatprep.mubr.msk.f32.mxu1 %vm310_vm0, %v8736_v3  ;;  %v6401_v26 = vadd.f32 %v19138_v53, %v6046_v5  ;;  %v6045_v52 = vld [vmem:[#allocation2 + $0x40] sm:$0xff]  ;;  %5986 = vst.msk [vmem:[#allocation2 + $0x68] sm:$0xff] %vm632_vm3, %v5954_v43  ;;  %v5603_v53 = vld [vmem:[#allocation2 + $0x88] sm:$0xff]  ;;  %v8743_v13 = vld [vmem:[#allocation3 + $0x250] sm:$0xff] }
 0x327   : > { %v6400_v1 = vadd.f32 %v6273_v29, %v6045_v52  ;;  %5985 = vst.msk [vmem:[#allocation2 + $0x60] sm:$0xff] %vm632_vm3, %v5953_v23  ;;  %v16054_v50 = vpop.f32.mrb[206].mxu0  ;;  %v5602_v29 = vld [vmem:[#allocation2 + $0x80] sm:$0xff]  ;;  %v8292_v60 = vld [vmem:[#allocation3 + $0x24f] sm:$0xff] }
 0x328   : > { %v19173_v55 = vpop.f32.mrb[206].mxu1  ;;  %6433 = vst.msk [vmem:[#allocation2 + $0x48] sm:$0xff] %vm632_vm3, %v6401_v26  ;;  %v5956_v19 = vadd.f32 %v16054_v50, %v5601_v15  ;;  %v5852_v34 = vpop.f32.mrb[207].mxu0  ;;  %16368 = vmatmul.mubr.msk.f32.gmra.mrb[56].mxu0 %vm310_vm0, %v8286_v48  ;;  %v5607_v21 = vld [vmem:[#allocation2 + $0xa8] sm:$0xff]  ;;  %v9164_v50 = vld [vmem:[#allocation3 + $0x71] sm:$0xff] }
 0x329   : > { %v19176_v22 = vpop.f32.mrb[207].mxu1  ;;  %16418 = vmatmul.mubr.msk.f32.gmra.mrb[56].mxu1 %vm310_vm0, %v8737_v10  ;;  %6432 = vst.msk [vmem:[#allocation2 + $0x40] sm:$0xff] %vm632_vm3, %v6400_v1  ;;  %v6048_v20 = vld [vmem:[#allocation2 + $0x58] sm:$0xff]  ;;  %v5955_v37 = vadd.f32 %v5852_v34, %v5600_v25  ;;  %16370 = vmatprep.mubr.msk.f32.mxu0 %vm310_vm0, %v8287_v38  ;;  %v9163_v5 = vld [vmem:[#allocation3 + $0x69] sm:$0xff] }
 0x32a   : > { %16420 = vmatprep.mubr.msk.f32.mxu1 %vm310_vm0, %v8738_v35  ;;  %v6403_v24 = vadd.f32 %v19149_v7, %v6048_v20  ;;  %v6047_v40 = vld [vmem:[#allocation2 + $0x50] sm:$0xff]  ;;  %5988 = vst.msk [vmem:[#allocation2 + $0x78] sm:$0xff] %vm632_vm3, %v5956_v19  ;;  %v8742_v7 = vld [vmem:[#allocation3 + $0x248] sm:$0xff]  ;;  %v5609_v48 = vld [vmem:[#allocation2 + $0xb8] sm:$0xff] }
 0x32b   : > { %v6402_v45 = vadd.f32 %v6283_v32, %v6047_v40  ;;  %5987 = vst.msk [vmem:[#allocation2 + $0x70] sm:$0xff] %vm632_vm3, %v5955_v37  ;;  %v16057_v51 = vpop.f32.mrb[208].mxu0  ;;  %v8741_v32 = vld [vmem:[#allocation3 + $0x230] sm:$0xff] }
 0x32c   : > { %v19186_v46 = vpop.f32.mrb[208].mxu1  ;;  %6435 = vst.msk [vmem:[#allocation2 + $0x58] sm:$0xff] %vm632_vm3, %v6403_v24  ;;  %v5958_v27 = vadd.f32 %v16057_v51, %v5603_v53  ;;  %v5862_v39 = vpop.f32.mrb[209].mxu0  ;;  %16371 = vmatmul.mubr.msk.f32.gmra.mrb[58].mxu0 %vm310_vm0, %v8288_v17  ;;  %v9614_v23 = vld [vmem:[#allocation3 + $0x6a] sm:$0xff]  ;;  %v9615_v25 = vld [vmem:[#allocation3 + $0x72] sm:$0xff] }
 0x32d   : > { %v6313_v57 = vpop.f32.mrb[209].mxu1  ;;  %16421 = vmatmul.mubr.msk.f32.gmra.mrb[58].mxu1 %vm310_vm0, %v8739_v36  ;;  %6434 = vst.msk [vmem:[#allocation2 + $0x50] sm:$0xff] %vm632_vm3, %v6402_v45  ;;  %v6050_v41 = vld [vmem:[#allocation2 + $0x68] sm:$0xff]  ;;  %v5957_v6 = vadd.f32 %v5862_v39, %v5602_v29  ;;  %16373 = vmatprep.mubr.msk.f32.mxu0 %vm310_vm0, %v8289_v59  ;;  %v5608_v38 = vld [vmem:[#allocation2 + $0xb0] sm:$0xff]  ;;  %v19240_v24 = vld [vmem:[%s21250_s4 + $0xb8] sm:$0xff] }
 0x32e   : > { %16423 = vmatprep.mubr.msk.f32.mxu1 %vm310_vm0, %v8740_v58  ;;  %v6405_v54 = vadd.f32 %v19160_v28, %v6050_v41  ;;  %v6049_v56 = vld [vmem:[#allocation2 + $0x60] sm:$0xff]  ;;  %5990 = vst.msk [vmem:[#allocation2 + $0x88] sm:$0xff] %vm632_vm3, %v5958_v27  ;;  %v9165_v34 = vld [vmem:[#allocation3 + $0x89] sm:$0xff]  ;;  %v9617_v39 = vld [vmem:[#allocation3 + $0x92] sm:$0xff] }
 0x32f   : > { %v6404_v4 = vadd.f32 %v19163_v18, %v6049_v56  ;;  %5989 = vst.msk [vmem:[#allocation2 + $0x80] sm:$0xff] %vm632_vm3, %v5957_v6  ;;  %v16060_v30 = vpop.f32.mrb[210].mxu0  ;;  %v5606_v18 = vld [vmem:[#allocation2 + $0xa0] sm:$0xff]  ;;  %v19235_v37 = vld [vmem:[%s21250_s4 + $0xb0] sm:$0xff]  ;;  %v5611_v36 = vld [vmem:[#allocation2 + $0xc8] sm:$0xff] }
 0x330   : > { %v19198_v8 = vpop.f32.mrb[210].mxu1  ;;  %6437 = vst.msk [vmem:[#allocation2 + $0x68] sm:$0xff] %vm632_vm3, %v6405_v54  ;;  %v5960_v49 = vadd.f32 %v16060_v30, %v5605_v14  ;;  %v5872_v12 = vpop.f32.mrb[211].mxu0  ;;  %16374 = vmatmul.mubr.msk.f32.gmra.mrb[60].mxu0 %vm310_vm0, %v8290_v31  ;;  %v9616_v53 = vld [vmem:[#allocation3 + $0x8a] sm:$0xff]  ;;  %v5610_v59 = vld [vmem:[#allocation2 + $0xc0] sm:$0xff]  ;;  %v5613_v14 = vld [vmem:[#allocation2 + $0xd8] sm:$0xff] }
 0x331   : > { %v19201_v61 = vpop.f32.mrb[211].mxu1  ;;  %16424 = vmatmul.mubr.msk.f32.gmra.mrb[60].mxu1 %vm310_vm0, %v8741_v32  ;;  %6436 = vst.msk [vmem:[#allocation2 + $0x60] sm:$0xff] %vm632_vm3, %v6404_v4  ;;  %v6052_v63 = vld [vmem:[#allocation2 + $0x78] sm:$0xff]  ;;  %v5959_v11 = vadd.f32 %v5872_v12, %v5604_v44  ;;  %16376 = vmatprep.mubr.msk.f32.mxu0 %vm310_vm0, %v8291_v2  ;;  %v9167_v41 = vld [vmem:[#allocation3 + $0xa9] sm:$0xff] }
 0x332   : > { %16426 = vmatprep.mubr.msk.f32.mxu1 %vm310_vm0, %v8742_v7  ;;  %v6407_v62 = vadd.f32 %v19173_v55, %v6052_v63  ;;  %v6051_v28 = vld [vmem:[#allocation2 + $0x70] sm:$0xff]  ;;  %5992 = vst.msk [vmem:[#allocation2 + $0x98] sm:$0xff] %vm632_vm3, %v5960_v49 }
 0x333   : > { %v6406_v16 = vadd.f32 %v19176_v22, %v6051_v28  ;;  %5991 = vst.msk [vmem:[#allocation2 + $0x90] sm:$0xff] %vm632_vm3, %v5959_v11  ;;  %v16063_v43 = vpop.f32.mrb[212].mxu0  ;;  %v9618_v6 = vld [vmem:[#allocation3 + $0xaa] sm:$0xff]  ;;  %v9619_v32 = vld [vmem:[#allocation3 + $0xb2] sm:$0xff] }
 0x334   : > { %v19212_v47 = vpop.f32.mrb[212].mxu1  ;;  %6439 = vst.msk [vmem:[#allocation2 + $0x78] sm:$0xff] %vm632_vm3, %v6407_v62  ;;  %v5962_v0 = vadd.f32 %v16063_v43, %v5607_v21  ;;  %v5882_v42 = vpop.f32.mrb[213].mxu0  ;;  %16377 = vmatmul.mubr.msk.f32.gmra.mrb[62].mxu0 %vm310_vm0, %v8292_v60  ;;  %v9168_v31 = vld [vmem:[#allocation3 + $0xb1] sm:$0xff]  ;;  %v9169_v63 = vld [vmem:[#allocation3 + $0xc9] sm:$0xff] }
 0x335   : > { %v19215_v3 = vpop.f32.mrb[213].mxu1  ;;  %16427 = vmatmul.mubr.msk.f32.gmra.mrb[62].mxu1 %vm310_vm0, %v8743_v13  ;;  %6438 = vst.msk [vmem:[#allocation2 + $0x70] sm:$0xff] %vm632_vm3, %v6406_v16  ;;  %v6054_v26 = vld [vmem:[#allocation2 + $0x88] sm:$0xff]  ;;  %v5961_v52 = vadd.f32 %v5882_v42, %v5606_v18  ;;  %16431 = vmatprep.mubr.msk.f32.mxu0 %vm310_vm0, %v9163_v5  ;;  %v5612_v44 = vld [vmem:[#allocation2 + $0xd0] sm:$0xff] }
 0x336   : > { %16481 = vmatprep.mubr.msk.f32.mxu1 %vm310_vm0, %v9614_v23  ;;  %v6409_v1 = vadd.f32 %v19186_v46, %v6054_v26  ;;  %v6053_v15 = vld [vmem:[#allocation2 + $0x80] sm:$0xff]  ;;  %5994 = vst.msk [vmem:[#allocation2 + $0xa8] sm:$0xff] %vm632_vm3, %v5962_v0  ;;  %v9620_v11 = vld [vmem:[#allocation3 + $0xca] sm:$0xff]  ;;  %v9621_v18 = vld [vmem:[#allocation3 + $0xd2] sm:$0xff] }
 0x337   : > { %v6408_v55 = vadd.f32 %v6313_v57, %v6053_v15  ;;  %5993 = vst.msk [vmem:[#allocation2 + $0xa0] sm:$0xff] %vm632_vm3, %v5961_v52  ;;  %v16066_v10 = vpop.f32.mrb[214].mxu0  ;;  %v5615_v21 = vld [vmem:[#allocation2 + $0xe8] sm:$0xff]  ;;  %v9170_v0 = vld [vmem:[#allocation3 + $0xd1] sm:$0xff] }
 0x338   : > { %v19225_v19 = vpop.f32.mrb[214].mxu1  ;;  %6441 = vst.msk [vmem:[#allocation2 + $0x88] sm:$0xff] %vm632_vm3, %v6409_v1  ;;  %v5964_v22 = vadd.f32 %v16066_v10, %v5609_v48  ;;  %v5892_v35 = vpop.f32.mrb[215].mxu0  ;;  %16432 = vmatmul.mubr.msk.f32.vlgmr.msra.gmra.mrb[64].mxu0 %vm310_vm0, %v9164_v50  ;;  %v9171_v26 = vld [vmem:[#allocation3 + $0xe9] sm:$0xff]  ;;  %v5617_v10 = vld [vmem:[#allocation2 + $0xf8] sm:$0xff] }
 0x339   : > { %v19228_v20 = vpop.f32.mrb[215].mxu1  ;;  %16482 = vmatmul.mubr.msk.f32.vlgmr.msra.gmra.mrb[64].mxu1 %vm310_vm0, %v9615_v25  ;;  %6440 = vst.msk [vmem:[#allocation2 + $0x80] sm:$0xff] %vm632_vm3, %v6408_v55  ;;  %v6056_v40 = vld [vmem:[#allocation2 + $0x98] sm:$0xff]  ;;  %v5963_v45 = vadd.f32 %v5892_v35, %v5608_v38  ;;  %16530 = vmatpush3.msra.mxu0 %v19030_v9  ;;  %v9622_v52 = vld [vmem:[#allocation3 + $0xea] sm:$0xff] }
 0x33a   : > { %16434 = vmatprep.mubr.msk.f32.mxu0 %vm310_vm0, %v9165_v34  ;;  %v6411_v51 = vadd.f32 %v19198_v8, %v6056_v40  ;;  %v6055_v46 = vld [vmem:[#allocation2 + $0x90] sm:$0xff]  ;;  %5996 = vst.msk [vmem:[#allocation2 + $0xb8] sm:$0xff] %vm632_vm3, %v5964_v22  ;;  %16484 = vmatprep.mubr.msk.f32.mxu1 %vm310_vm0, %v9616_v53 }
 0x33b   : > { %16580 = vmatpush3.msra.mxu1 %v19035_v33  ;;  %v6410_v17 = vadd.f32 %v19201_v61, %v6055_v46  ;;  %5995 = vst.msk [vmem:[#allocation2 + $0xb0] sm:$0xff] %vm632_vm3, %v5963_v45  ;;  %v16069_v27 = vpop.f32.mrb[216].mxu0  ;;  %v9166_v9 = vld [vmem:[#allocation3 + $0x91] sm:$0xff]  ;;  %16629 = vmatprep.subr.mxu0 %v19235_v37  ;;  %v9173_v45 = vld [vmem:[#allocation3 + $0x109] sm:$0xff] }
 0x33c   : > { %v19251_v29 = vpop.f32.mrb[216].mxu1  ;;  %16679 = vmatprep.subr.mxu1 %v19240_v24  ;;  %6443 = vst.msk [vmem:[#allocation2 + $0x98] sm:$0xff] %vm632_vm3, %v6411_v51  ;;  %v5966_v57 = vadd.f32 %v16069_v27, %v5611_v36  ;;  %v5902_v58 = vpop.f32.mrb[217].mxu0  ;;  %16435 = vmatmul.mubr.msk.f32.gmra.mrb[66].mxu0 %vm310_vm0, %v9166_v9  ;;  %v9172_v34 = vld [vmem:[#allocation3 + $0xf1] sm:$0xff] }
 0x33d   : > { %v6353_v33 = vpop.f32.mrb[217].mxu1  ;;  %16485 = vmatmul.mubr.msk.f32.gmra.mrb[66].mxu1 %vm310_vm0, %v9617_v39  ;;  %6442 = vst.msk [vmem:[#allocation2 + $0x90] sm:$0xff] %vm632_vm3, %v6410_v17  ;;  %v6058_v54 = vld [vmem:[#allocation2 + $0xa8] sm:$0xff]  ;;  %v5965_v56 = vadd.f32 %v5902_v58, %v5610_v59  ;;  %16437 = vmatprep.mubr.msk.f32.mxu0 %vm310_vm0, %v9167_v41  ;;  %v9623_v22 = vld [vmem:[#allocation3 + $0xf2] sm:$0xff] }
 0x33e   : > { %16487 = vmatprep.mubr.msk.f32.mxu1 %vm310_vm0, %v9618_v6  ;;  %v6413_v2 = vadd.f32 %v19212_v47, %v6058_v54  ;;  %v6057_v7 = vld [vmem:[#allocation2 + $0xa0] sm:$0xff]  ;;  %5998 = vst.msk [vmem:[#allocation2 + $0xc8] sm:$0xff] %vm632_vm3, %v5966_v57  ;;  %v5616_v35 = vld [vmem:[#allocation2 + $0xf0] sm:$0xff] }
 0x33f   : > { %v6412_v4 = vadd.f32 %v19215_v3, %v6057_v7  ;;  %5997 = vst.msk [vmem:[#allocation2 + $0xc0] sm:$0xff] %vm632_vm3, %v5965_v56  ;;  %v16072_v30 = vpop.f32.mrb[218].mxu0  ;;  %v5614_v3 = vld [vmem:[#allocation2 + $0xe0] sm:$0xff]  ;;  %v9624_v53 = vld [vmem:[#allocation3 + $0x10a] sm:$0xff]  ;;  %v9625_v59 = vld [vmem:[#allocation3 + $0x112] sm:$0xff] }
 0x340   : > { %v19265_v8 = vpop.f32.mrb[218].mxu1  ;;  %6445 = vst.msk [vmem:[#allocation2 + $0xa8] sm:$0xff] %vm632_vm3, %v6413_v2  ;;  %v5968_v49 = vadd.f32 %v16072_v30, %v5613_v14  ;;  %v5912_v12 = vpop.f32.mrb[219].mxu0  ;;  %16438 = vmatmul.mubr.msk.f32.gmra.mrb[68].mxu0 %vm310_vm0, %v9168_v31  ;;  %v9174_v57 = vld [vmem:[#allocation3 + $0x111] sm:$0xff]  ;;  %v9175_v54 = vld [vmem:[#allocation3 + $0x129] sm:$0xff] }
 0x341   : > { %v6363_v61 = vpop.f32.mrb[219].mxu1  ;;  %16488 = vmatmul.mubr.msk.f32.gmra.mrb[68].mxu1 %vm310_vm0, %v9619_v32  ;;  %6444 = vst.msk [vmem:[#allocation2 + $0xa0] sm:$0xff] %vm632_vm3, %v6412_v4  ;;  %v6060_v60 = vld [vmem:[#allocation2 + $0xb8] sm:$0xff]  ;;  %v5967_v13 = vadd.f32 %v5912_v12, %v5612_v44  ;;  %16440 = vmatprep.mubr.msk.f32.mxu0 %vm310_vm0, %v9169_v63  ;;  %v9626_v56 = vld [vmem:[#allocation3 + $0x12a] sm:$0xff] }
 0x342   : > { %16490 = vmatprep.mubr.msk.f32.mxu1 %vm310_vm0, %v9620_v11  ;;  %v6415_v62 = vadd.f32 %v19225_v19, %v6060_v60  ;;  %v6059_v28 = vld [vmem:[#allocation2 + $0xb0] sm:$0xff]  ;;  %6000 = vst.msk [vmem:[#allocation2 + $0xd8] sm:$0xff] %vm632_vm3, %v5968_v49 }
 0x343   : > { %v6414_v16 = vadd.f32 %v19228_v20, %v6059_v28  ;;  %5999 = vst.msk [vmem:[#allocation2 + $0xd0] sm:$0xff] %vm632_vm3, %v5967_v13  ;;  %v16075_v43 = vpop.f32.mrb[220].mxu0  ;;  %v9176_v49 = vld [vmem:[#allocation3 + $0x131] sm:$0xff]  ;;  %v9177_v60 = vld [vmem:[#allocation3 + $0x149] sm:$0xff] }
 0x344   : > { %v19277_v47 = vpop.f32.mrb[220].mxu1  ;;  %6447 = vst.msk [vmem:[#allocation2 + $0xb8] sm:$0xff] %vm632_vm3, %v6415_v62  ;;  %v5970_v42 = vadd.f32 %v16075_v43, %v5615_v21  ;;  %v5922_v5 = vpop.f32.mrb[221].mxu0  ;;  %16441 = vmatmul.mubr.msk.f32.gmra.mrb[70].mxu0 %vm310_vm0, %v9170_v0  ;;  %v9627_v44 = vld [vmem:[#allocation3 + $0x132] sm:$0xff]  ;;  %v9628_v13 = vld [vmem:[#allocation3 + $0x14a] sm:$0xff] }
 0x345   : > { %v6373_v23 = vpop.f32.mrb[221].mxu1  ;;  %16491 = vmatmul.mubr.msk.f32.gmra.mrb[70].mxu1 %vm310_vm0, %v9621_v18  ;;  %6446 = vst.msk [vmem:[#allocation2 + $0xb0] sm:$0xff] %vm632_vm3, %v6414_v16  ;;  %v6062_v1 = vld [vmem:[#allocation2 + $0xc8] sm:$0xff]  ;;  %v5969_v15 = vadd.f32 %v5922_v5, %v5614_v3  ;;  %16443 = vmatprep.mubr.msk.f32.mxu0 %vm310_vm0, %v9171_v26  ;;  %v9629_v3 = vld [vmem:[#allocation3 + $0x152] sm:$0xff] }
 0x346   : > { %16493 = vmatprep.mubr.msk.f32.mxu1 %vm310_vm0, %v9622_v52  ;;  %v6417_v50 = vadd.f32 %v19251_v29, %v6062_v1  ;;  %v6061_v55 = vld [vmem:[#allocation2 + $0xc0] sm:$0xff]  ;;  %6002 = vst.msk [vmem:[#allocation2 + $0xe8] sm:$0xff] %vm632_vm3, %v5970_v42  ;;  %v6489_v29 = vld [vmem:[#allocation2 + $0x8] sm:$0xff]  ;;  %v9178_v42 = vld [vmem:[#allocation3 + $0x151] sm:$0xff] }
 0x347   : > { %v6416_v48 = vadd.f32 %v6353_v33, %v6061_v55  ;;  %6001 = vst.msk [vmem:[#allocation2 + $0xe0] sm:$0xff] %vm632_vm3, %v5969_v15  ;;  %v16078_v19 = vpop.f32.mrb[222].mxu0  ;;  %v6488_v33 = vld [vmem:[#allocation2] sm:$0xff]  ;;  %v9179_v1 = vld [vmem:[#allocation3 + $0x169] sm:$0xff] }
 0x348   : > { %v19288_v25 = vpop.f32.mrb[222].mxu1  ;;  %6449 = vst.msk [vmem:[#allocation2 + $0xc8] sm:$0xff] %vm632_vm3, %v6417_v50  ;;  %v5972_v38 = vadd.f32 %v16078_v19, %v5617_v10  ;;  %v5932_v20 = vpop.f32.mrb[223].mxu0  ;;  %16444 = vmatmul.mubr.msk.f32.gmra.mrb[72].mxu0 %vm310_vm0, %v9172_v34  ;;  %v9630_v15 = vld [vmem:[#allocation3 + $0x16a] sm:$0xff] }
 0x349   : > { %v6383_v40 = vpop.f32.mrb[223].mxu1  ;;  %16494 = vmatmul.mubr.msk.f32.gmra.mrb[72].mxu1 %vm310_vm0, %v9623_v22  ;;  %6448 = vst.msk [vmem:[#allocation2 + $0xc0] sm:$0xff] %vm632_vm3, %v6416_v48  ;;  %v6064_v51 = vld [vmem:[#allocation2 + $0xd8] sm:$0xff]  ;;  %v5971_v46 = vadd.f32 %v5932_v20, %v5616_v35  ;;  %16446 = vmatprep.mubr.msk.f32.mxu0 %vm310_vm0, %v9173_v45 }
 0x34a   : > { %16496 = vmatprep.mubr.msk.f32.mxu1 %vm310_vm0, %v9624_v53  ;;  %v6419_v17 = vadd.f32 %v19265_v8, %v6064_v51  ;;  %v6063_v36 = vld [vmem:[#allocation2 + $0xd0] sm:$0xff]  ;;  %6004 = vst.msk [vmem:[#allocation2 + $0xf8] sm:$0xff] %vm632_vm3, %v5972_v38  ;;  %v6491_v8 = vld [vmem:[#allocation2 + $0x18] sm:$0xff] }
 0x34b   : > { %v6418_v27 = vadd.f32 %v6363_v61, %v6063_v36  ;;  %6003 = vst.msk [vmem:[#allocation2 + $0xf0] sm:$0xff] %vm632_vm3, %v5971_v46  ;;  %v16133_v9 = vpop.f32.mrb[224].mxu0  ;;  %v6490_v61 = vld [vmem:[#allocation2 + $0x10] sm:$0xff] }
 0x34c   : > { %v19299_v39 = vpop.f32.mrb[224].mxu1  ;;  %6451 = vst.msk [vmem:[#allocation2 + $0xd8] sm:$0xff] %vm632_vm3, %v6419_v17  ;;  %v6844_v58 = vadd.f32 %v16133_v9, %v6489_v29  ;;  %v6684_v41 = vpop.f32.mrb[225].mxu0  ;;  %16447 = vmatmul.mubr.msk.f32.gmra.mrb[74].mxu0 %vm310_vm0, %v9174_v57  ;;  %v9180_v38 = vld [vmem:[#allocation3 + $0x171] sm:$0xff]  ;;  %v9181_v51 = vld [vmem:[#allocation3 + $0x189] sm:$0xff] }
 0x34d   : > { %v7135_v6 = vpop.f32.mrb[225].mxu1  ;;  %16497 = vmatmul.mubr.msk.f32.gmra.mrb[74].mxu1 %vm310_vm0, %v9625_v59  ;;  %6450 = vst.msk [vmem:[#allocation2 + $0xd0] sm:$0xff] %vm632_vm3, %v6418_v27  ;;  %v6066_v2 = vld [vmem:[#allocation2 + $0xe8] sm:$0xff]  ;;  %v6843_v7 = vadd.f32 %v6684_v41, %v6488_v33  ;;  %16449 = vmatprep.mubr.msk.f32.mxu0 %vm310_vm0, %v9175_v54  ;;  %v9631_v35 = vld [vmem:[#allocation3 + $0x172] sm:$0xff] }
 0x34e   : > { %16499 = vmatprep.mubr.msk.f32.mxu1 %vm310_vm0, %v9626_v56  ;;  %v6421_v4 = vadd.f32 %v19277_v47, %v6066_v2  ;;  %v6065_v14 = vld [vmem:[#allocation2 + $0xe0] sm:$0xff]  ;;  %6876 = vst.msk [vmem:[#allocation2 + $0x8] sm:$0xff] %vm632_vm3, %v6844_v58  ;;  %v6493_v47 = vld [vmem:[#allocation2 + $0x28] sm:$0xff]  ;;  %v9182_v58 = vld [vmem:[#allocation3 + $0x191] sm:$0xff] }
 0x34f   : > { %v6420_v30 = vadd.f32 %v6373_v23, %v6065_v14  ;;  %6875 = vst.msk [vmem:[#allocation2] sm:$0xff] %vm632_vm3, %v6843_v7  ;;  %v16136_v31 = vpop.f32.mrb[226].mxu0  ;;  %v6492_v23 = vld [vmem:[#allocation2 + $0x20] sm:$0xff]  ;;  %v9632_v46 = vld [vmem:[#allocation3 + $0x18a] sm:$0xff]  ;;  %v9633_v33 = vld [vmem:[#allocation3 + $0x192] sm:$0xff] }
 0x350   : > { %v19310_v32 = vpop.f32.mrb[226].mxu1  ;;  %6453 = vst.msk [vmem:[#allocation2 + $0xe8] sm:$0xff] %vm632_vm3, %v6421_v4  ;;  %v6846_v12 = vadd.f32 %v16136_v31, %v6491_v8  ;;  %v6694_v63 = vpop.f32.mrb[227].mxu0  ;;  %16450 = vmatmul.mubr.msk.f32.gmra.mrb[76].mxu0 %vm310_vm0, %v9176_v49  ;;  %v9183_v2 = vld [vmem:[#allocation3 + $0x1a9] sm:$0xff] }
 0x351   : > { %v7145_v11 = vpop.f32.mrb[227].mxu1  ;;  %16500 = vmatmul.mubr.msk.f32.gmra.mrb[76].mxu1 %vm310_vm0, %v9627_v44  ;;  %6452 = vst.msk [vmem:[#allocation2 + $0xe0] sm:$0xff] %vm632_vm3, %v6420_v30  ;;  %v6068_v62 = vld [vmem:[#allocation2 + $0xf8] sm:$0xff]  ;;  %v6845_v28 = vadd.f32 %v6694_v63, %v6490_v61  ;;  %16452 = vmatprep.mubr.msk.f32.mxu0 %vm310_vm0, %v9177_v60  ;;  %v9634_v7 = vld [vmem:[#allocation3 + $0x1aa] sm:$0xff] }
 0x352   : > { %16502 = vmatprep.mubr.msk.f32.mxu1 %vm310_vm0, %v9628_v13  ;;  %v6423_v16 = vadd.f32 %v19288_v25, %v6068_v62  ;;  %v6067_v21 = vld [vmem:[#allocation2 + $0xf0] sm:$0xff]  ;;  %6878 = vst.msk [vmem:[#allocation2 + $0x18] sm:$0xff] %vm632_vm3, %v6846_v12  ;;  %v6495_v25 = vld [vmem:[#allocation2 + $0x38] sm:$0xff] }
 0x353   : > { %v6422_v43 = vadd.f32 %v6383_v40, %v6067_v21  ;;  %6877 = vst.msk [vmem:[#allocation2 + $0x10] sm:$0xff] %vm632_vm3, %v6845_v28  ;;  %v16139_v0 = vpop.f32.mrb[228].mxu0  ;;  %v6494_v40 = vld [vmem:[#allocation2 + $0x30] sm:$0xff] }
 0x354   : > { %v19321_v18 = vpop.f32.mrb[228].mxu1  ;;  %6455 = vst.msk [vmem:[#allocation2 + $0xf8] sm:$0xff] %vm632_vm3, %v6423_v16  ;;  %v6848_v5 = vadd.f32 %v16139_v0, %v6493_v47  ;;  %v6704_v26 = vpop.f32.mrb[229].mxu0  ;;  %16453 = vmatmul.mubr.msk.f32.gmra.mrb[78].mxu0 %vm310_vm0, %v9178_v42  ;;  %v9184_v12 = vld [vmem:[#allocation3 + $0x1b1] sm:$0xff]  ;;  %v9185_v62 = vld [vmem:[#allocation3 + $0x1c9] sm:$0xff] }
 0x355   : > { %v7155_v52 = vpop.f32.mrb[229].mxu1  ;;  %16503 = vmatmul.mubr.msk.f32.gmra.mrb[78].mxu1 %vm310_vm0, %v9629_v3  ;;  %6454 = vst.msk [vmem:[#allocation2 + $0xf0] sm:$0xff] %vm632_vm3, %v6422_v43  ;;  %v6940_v50 = vld [vmem:[#allocation2 + $0x8] sm:$0xff]  ;;  %v6847_v55 = vadd.f32 %v6704_v26, %v6492_v23  ;;  %16455 = vmatprep.mubr.msk.f32.mxu0 %vm310_vm0, %v9179_v1  ;;  %v9635_v61 = vld [vmem:[#allocation3 + $0x1b2] sm:$0xff] }
 0x356   : > { %16505 = vmatprep.mubr.msk.f32.mxu1 %vm310_vm0, %v9630_v15  ;;  %v7295_v48 = vadd.f32 %v19299_v39, %v6940_v50  ;;  %v6939_v10 = vld [vmem:[#allocation2] sm:$0xff]  ;;  %6880 = vst.msk [vmem:[#allocation2 + $0x28] sm:$0xff] %vm632_vm3, %v6848_v5  ;;  %v6497_v39 = vld [vmem:[#allocation2 + $0x48] sm:$0xff]  ;;  %v9186_v5 = vld [vmem:[#allocation3 + $0x1d1] sm:$0xff] }
 0x357   : > { %v7294_v19 = vadd.f32 %v7135_v6, %v6939_v10  ;;  %6879 = vst.msk [vmem:[#allocation2 + $0x20] sm:$0xff] %vm632_vm3, %v6847_v55  ;;  %v16142_v34 = vpop.f32.mrb[230].mxu0  ;;  %v6496_v6 = vld [vmem:[#allocation2 + $0x40] sm:$0xff]  ;;  %v9636_v28 = vld [vmem:[#allocation3 + $0x1ca] sm:$0xff]  ;;  %v9637_v23 = vld [vmem:[#allocation3 + $0x1d2] sm:$0xff] }
 0x358   : > { %v19332_v22 = vpop.f32.mrb[230].mxu1  ;;  %7327 = vst.msk [vmem:[#allocation2 + $0x8] sm:$0xff] %vm632_vm3, %v7295_v48  ;;  %v6850_v20 = vadd.f32 %v16142_v34, %v6495_v25  ;;  %v6714_v45 = vpop.f32.mrb[231].mxu0  ;;  %16456 = vmatmul.mubr.msk.f32.gmra.mrb[80].mxu0 %vm310_vm0, %v9180_v38  ;;  %v9187_v50 = vld [vmem:[#allocation3 + $0x1e9] sm:$0xff] }
 0x359   : > { %v7165_v53 = vpop.f32.mrb[231].mxu1  ;;  %16506 = vmatmul.mubr.msk.f32.gmra.mrb[80].mxu1 %vm310_vm0, %v9631_v35  ;;  %7326 = vst.msk [vmem:[#allocation2] sm:$0xff] %vm632_vm3, %v7294_v19  ;;  %v6942_v17 = vld [vmem:[#allocation2 + $0x18] sm:$0xff]  ;;  %v6849_v36 = vadd.f32 %v6714_v45, %v6494_v40  ;;  %16458 = vmatprep.mubr.msk.f32.mxu0 %vm310_vm0, %v9181_v51  ;;  %v9638_v55 = vld [vmem:[#allocation3 + $0x1ea] sm:$0xff] }
 0x35a   : > { %16508 = vmatprep.mubr.msk.f32.mxu1 %vm310_vm0, %v9632_v46  ;;  %v7297_v27 = vadd.f32 %v19310_v32, %v6942_v17  ;;  %v6941_v29 = vld [vmem:[#allocation2 + $0x10] sm:$0xff]  ;;  %6882 = vst.msk [vmem:[#allocation2 + $0x38] sm:$0xff] %vm632_vm3, %v6850_v20  ;;  %v6499_v32 = vld [vmem:[#allocation2 + $0x58] sm:$0xff] }
 0x35b   : > { %v7296_v9 = vadd.f32 %v7145_v11, %v6941_v29  ;;  %6881 = vst.msk [vmem:[#allocation2 + $0x30] sm:$0xff] %vm632_vm3, %v6849_v36  ;;  %v16145_v57 = vpop.f32.mrb[232].mxu0  ;;  %v6498_v11 = vld [vmem:[#allocation2 + $0x50] sm:$0xff] }
 0x35c   : > { %v19343_v59 = vpop.f32.mrb[232].mxu1  ;;  %7329 = vst.msk [vmem:[#allocation2 + $0x18] sm:$0xff] %vm632_vm3, %v7297_v27  ;;  %v6852_v41 = vadd.f32 %v16145_v57, %v6497_v39  ;;  %v6724_v54 = vpop.f32.mrb[233].mxu0  ;;  %16459 = vmatmul.mubr.msk.f32.gmra.mrb[82].mxu0 %vm310_vm0, %v9182_v58  ;;  %v9188_v20 = vld [vmem:[#allocation3 + $0x1f1] sm:$0xff]  ;;  %v9189_v17 = vld [vmem:[#allocation3 + $0x209] sm:$0xff] }
 0x35d   : > { %v7175_v56 = vpop.f32.mrb[233].mxu1  ;;  %16509 = vmatmul.mubr.msk.f32.gmra.mrb[82].mxu1 %vm310_vm0, %v9633_v33  ;;  %7328 = vst.msk [vmem:[#allocation2 + $0x10] sm:$0xff] %vm632_vm3, %v7296_v9  ;;  %v6944_v4 = vld [vmem:[#allocation2 + $0x28] sm:$0xff]  ;;  %v6851_v14 = vadd.f32 %v6724_v54, %v6496_v6  ;;  %16461 = vmatprep.mubr.msk.f32.mxu0 %vm310_vm0, %v9183_v2  ;;  %v9639_v40 = vld [vmem:[#allocation3 + $0x1f2] sm:$0xff] }
 0x35e   : > { %16511 = vmatprep.mubr.msk.f32.mxu1 %vm310_vm0, %v9634_v7  ;;  %v7299_v30 = vadd.f32 %v19321_v18, %v6944_v4  ;;  %v6943_v8 = vld [vmem:[#allocation2 + $0x20] sm:$0xff]  ;;  %6884 = vst.msk [vmem:[#allocation2 + $0x48] sm:$0xff] %vm632_vm3, %v6852_v41  ;;  %v6501_v18 = vld [vmem:[#allocation2 + $0x68] sm:$0xff]  ;;  %v9190_v41 = vld [vmem:[#allocation3 + $0x211] sm:$0xff] }
 0x35f   : > { %v7298_v31 = vadd.f32 %v7155_v52, %v6943_v8  ;;  %6883 = vst.msk [vmem:[#allocation2 + $0x40] sm:$0xff] %vm632_vm3, %v6851_v14  ;;  %v16148_v49 = vpop.f32.mrb[234].mxu0  ;;  %v6500_v52 = vld [vmem:[#allocation2 + $0x60] sm:$0xff]  ;;  %v9640_v36 = vld [vmem:[#allocation3 + $0x20a] sm:$0xff]  ;;  %v9641_v6 = vld [vmem:[#allocation3 + $0x212] sm:$0xff] }
 0x360   : > { %v19354_v44 = vpop.f32.mrb[234].mxu1  ;;  %7331 = vst.msk [vmem:[#allocation2 + $0x28] sm:$0xff] %vm632_vm3, %v7299_v30  ;;  %v6854_v63 = vadd.f32 %v16148_v49, %v6499_v32  ;;  %v6734_v60 = vpop.f32.mrb[235].mxu0  ;;  %16462 = vmatmul.mubr.msk.f32.gmra.mrb[84].mxu0 %vm310_vm0, %v9184_v12  ;;  %v9191_v4 = vld [vmem:[#allocation3 + $0x229] sm:$0xff] }
 0x361   : > { %v7185_v13 = vpop.f32.mrb[235].mxu1  ;;  %16512 = vmatmul.mubr.msk.f32.gmra.mrb[84].mxu1 %vm310_vm0, %v9635_v61  ;;  %7330 = vst.msk [vmem:[#allocation2 + $0x20] sm:$0xff] %vm632_vm3, %v7298_v31  ;;  %v6946_v16 = vld [vmem:[#allocation2 + $0x38] sm:$0xff]  ;;  %v6853_v21 = vadd.f32 %v6734_v60, %v6498_v11  ;;  %16464 = vmatprep.mubr.msk.f32.mxu0 %vm310_vm0, %v9185_v62  ;;  %v9642_v14 = vld [vmem:[#allocation3 + $0x22a] sm:$0xff] }
 0x362   : > { %16514 = vmatprep.mubr.msk.f32.mxu1 %vm310_vm0, %v9636_v28  ;;  %v7301_v43 = vadd.f32 %v19332_v22, %v6946_v16  ;;  %v6945_v47 = vld [vmem:[#allocation2 + $0x30] sm:$0xff]  ;;  %6886 = vst.msk [vmem:[#allocation2 + $0x58] sm:$0xff] %vm632_vm3, %v6854_v63  ;;  %v6503_v22 = vld [vmem:[#allocation2 + $0x78] sm:$0xff] }
 0x363   : > { %v7300_v0 = vadd.f32 %v7165_v53, %v6945_v47  ;;  %6885 = vst.msk [vmem:[#allocation2 + $0x50] sm:$0xff] %vm632_vm3, %v6853_v21  ;;  %v16151_v42 = vpop.f32.mrb[236].mxu0  ;;  %v6502_v53 = vld [vmem:[#allocation2 + $0x70] sm:$0xff]  ;;  %v6507_v61 = vld [vmem:[#allocation2 + $0x98] sm:$0xff] }
 0x364   : > { %v19365_v3 = vpop.f32.mrb[236].mxu1  ;;  %7333 = vst.msk [vmem:[#allocation2 + $0x38] sm:$0xff] %vm632_vm3, %v7301_v43  ;;  %v6856_v26 = vadd.f32 %v16151_v42, %v6501_v18  ;;  %v6744_v1 = vpop.f32.mrb[237].mxu0  ;;  %16465 = vmatmul.mubr.msk.f32.gmra.mrb[86].mxu0 %vm310_vm0, %v9186_v5  ;;  %v9193_v49 = vld [vmem:[#allocation3 + $0x249] sm:$0xff]  ;;  %v9192_v60 = vld [vmem:[#allocation3 + $0x231] sm:$0xff] }
 0x365   : > { %v19368_v15 = vpop.f32.mrb[237].mxu1  ;;  %16515 = vmatmul.mubr.msk.f32.gmra.mrb[86].mxu1 %vm310_vm0, %v9637_v23  ;;  %7332 = vst.msk [vmem:[#allocation2 + $0x30] sm:$0xff] %vm632_vm3, %v7300_v0  ;;  %v6948_v48 = vld [vmem:[#allocation2 + $0x48] sm:$0xff]  ;;  %v6855_v10 = vadd.f32 %v6744_v1, %v6500_v52  ;;  %16467 = vmatprep.mubr.msk.f32.mxu0 %vm310_vm0, %v9187_v50  ;;  %v6506_v28 = vld [vmem:[#allocation2 + $0x90] sm:$0xff] }
 0x366   : > { %16517 = vmatprep.mubr.msk.f32.mxu1 %vm310_vm0, %v9638_v55  ;;  %v7303_v19 = vadd.f32 %v19343_v59, %v6948_v48  ;;  %v6947_v25 = vld [vmem:[#allocation2 + $0x40] sm:$0xff]  ;;  %6888 = vst.msk [vmem:[#allocation2 + $0x68] sm:$0xff] %vm632_vm3, %v6856_v26  ;;  %v6505_v59 = vld [vmem:[#allocation2 + $0x88] sm:$0xff]  ;;  %v9194_v0 = vld [vmem:[#allocation3 + $0x251] sm:$0xff] }
 0x367   : > { %v7302_v34 = vadd.f32 %v7175_v56, %v6947_v25  ;;  %6887 = vst.msk [vmem:[#allocation2 + $0x60] sm:$0xff] %vm632_vm3, %v6855_v10  ;;  %v16154_v38 = vpop.f32.mrb[238].mxu0  ;;  %v6504_v56 = vld [vmem:[#allocation2 + $0x80] sm:$0xff]  ;;  %v9645_v18 = vld [vmem:[#allocation3 + $0x252] sm:$0xff]  ;;  %v6509_v23 = vld [vmem:[#allocation2 + $0xa8] sm:$0xff] }
 0x368   : > { %v19378_v35 = vpop.f32.mrb[238].mxu1  ;;  %7335 = vst.msk [vmem:[#allocation2 + $0x48] sm:$0xff] %vm632_vm3, %v7303_v19  ;;  %v6858_v45 = vadd.f32 %v16154_v38, %v6503_v22  ;;  %v6754_v51 = vpop.f32.mrb[239].mxu0  ;;  %16468 = vmatmul.mubr.msk.f32.gmra.mrb[88].mxu0 %vm310_vm0, %v9188_v20  ;;  %v10066_v48 = vld [vmem:[#allocation3 + $0x86] sm:$0xff]  ;;  %v10067_v38 = vld [vmem:[#allocation3 + $0x8e] sm:$0xff]  ;;  %v6511_v20 = vld [vmem:[#allocation2 + $0xb8] sm:$0xff] }
 0x369   : > { %v19381_v46 = vpop.f32.mrb[239].mxu1  ;;  %16518 = vmatmul.mubr.msk.f32.gmra.mrb[88].mxu1 %vm310_vm0, %v9639_v40  ;;  %7334 = vst.msk [vmem:[#allocation2 + $0x40] sm:$0xff] %vm632_vm3, %v7302_v34  ;;  %v6950_v27 = vld [vmem:[#allocation2 + $0x58] sm:$0xff]  ;;  %v6857_v29 = vadd.f32 %v6754_v51, %v6502_v53  ;;  %16470 = vmatprep.mubr.msk.f32.mxu0 %vm310_vm0, %v9189_v17  ;;  %v10517_v10 = vld [vmem:[#allocation3 + $0x87] sm:$0xff]  ;;  %v10518_v53 = vld [vmem:[#allocation3 + $0x8f] sm:$0xff] }
 0x36a   : > { %16520 = vmatprep.mubr.msk.f32.mxu1 %vm310_vm0, %v9640_v36  ;;  %v7305_v9 = vadd.f32 %v19354_v44, %v6950_v27  ;;  %v6949_v39 = vld [vmem:[#allocation2 + $0x50] sm:$0xff]  ;;  %6890 = vst.msk [vmem:[#allocation2 + $0x78] sm:$0xff] %vm632_vm3, %v6858_v45  ;;  %v10068_v51 = vld [vmem:[#allocation3 + $0xa6] sm:$0xff] }
 0x36b   : > { %v7304_v57 = vadd.f32 %v7185_v13, %v6949_v39  ;;  %6889 = vst.msk [vmem:[#allocation2 + $0x70] sm:$0xff] %vm632_vm3, %v6857_v29  ;;  %v16157_v58 = vpop.f32.mrb[240].mxu0  ;;  %v9644_v44 = vld [vmem:[#allocation3 + $0x24a] sm:$0xff]  ;;  %v9643_v13 = vld [vmem:[#allocation3 + $0x232] sm:$0xff]  ;;  %v19440_v29 = vld [vmem:[%s21250_s4 + $0xc0] sm:$0xff] }
 0x36c   : > { %v19391_v33 = vpop.f32.mrb[240].mxu1  ;;  %7337 = vst.msk [vmem:[#allocation2 + $0x58] sm:$0xff] %vm632_vm3, %v7305_v9  ;;  %v6860_v54 = vadd.f32 %v16157_v58, %v6505_v59  ;;  %v6764_v2 = vpop.f32.mrb[241].mxu0  ;;  %16471 = vmatmul.mubr.msk.f32.gmra.mrb[90].mxu0 %vm310_vm0, %v9190_v41  ;;  %v6510_v17 = vld [vmem:[#allocation2 + $0xb0] sm:$0xff]  ;;  %v19445_v9 = vld [vmem:[%s21251_s5] sm:$0xff] }
 0x36d   : > { %v7215_v7 = vpop.f32.mrb[241].mxu1  ;;  %16521 = vmatmul.mubr.msk.f32.gmra.mrb[90].mxu1 %vm310_vm0, %v9641_v6  ;;  %7336 = vst.msk [vmem:[#allocation2 + $0x50] sm:$0xff] %vm632_vm3, %v7304_v57  ;;  %v6952_v30 = vld [vmem:[#allocation2 + $0x68] sm:$0xff]  ;;  %v6859_v8 = vadd.f32 %v6764_v2, %v6504_v56  ;;  %16473 = vmatprep.mubr.msk.f32.mxu0 %vm310_vm0, %v9191_v4  ;;  %v6512_v4 = vld [vmem:[#allocation2 + $0xc0] sm:$0xff] }
 0x36e   : > { %16523 = vmatprep.mubr.msk.f32.mxu1 %vm310_vm0, %v9642_v14  ;;  %v7307_v31 = vadd.f32 %v19365_v3, %v6952_v30  ;;  %v6951_v32 = vld [vmem:[#allocation2 + $0x60] sm:$0xff]  ;;  %6892 = vst.msk [vmem:[#allocation2 + $0x88] sm:$0xff] %vm632_vm3, %v6860_v54  ;;  %v6513_v6 = vld [vmem:[#allocation2 + $0xc8] sm:$0xff] }
 0x36f   : > { %v7306_v12 = vadd.f32 %v19368_v15, %v6951_v32  ;;  %6891 = vst.msk [vmem:[#allocation2 + $0x80] sm:$0xff] %vm632_vm3, %v6859_v8  ;;  %v16160_v63 = vpop.f32.mrb[242].mxu0  ;;  %v6508_v15 = vld [vmem:[#allocation2 + $0xa0] sm:$0xff]  ;;  %v10520_v2 = vld [vmem:[#allocation3 + $0xaf] sm:$0xff] }
 0x370   : > { %v19403_v11 = vpop.f32.mrb[242].mxu1  ;;  %7339 = vst.msk [vmem:[#allocation2 + $0x68] sm:$0xff] %vm632_vm3, %v7307_v31  ;;  %v6862_v62 = vadd.f32 %v16160_v63, %v6507_v61  ;;  %v6774_v16 = vpop.f32.mrb[243].mxu0  ;;  %16474 = vmatmul.mubr.msk.f32.gmra.mrb[92].mxu0 %vm310_vm0, %v9192_v60  ;;  %v10519_v59 = vld [vmem:[#allocation3 + $0xa7] sm:$0xff]  ;;  %v6515_v61 = vld [vmem:[#allocation2 + $0xd8] sm:$0xff] }
 0x371   : > { %v19406_v21 = vpop.f32.mrb[243].mxu1  ;;  %16524 = vmatmul.mubr.msk.f32.gmra.mrb[92].mxu1 %vm310_vm0, %v9643_v13  ;;  %7338 = vst.msk [vmem:[#allocation2 + $0x60] sm:$0xff] %vm632_vm3, %v7306_v12  ;;  %v6954_v43 = vld [vmem:[#allocation2 + $0x78] sm:$0xff]  ;;  %v6861_v47 = vadd.f32 %v6774_v16, %v6506_v28  ;;  %16476 = vmatprep.mubr.msk.f32.mxu0 %vm310_vm0, %v9193_v49  ;;  %v10070_v30 = vld [vmem:[#allocation3 + $0xc6] sm:$0xff]  ;;  %v10071_v60 = vld [vmem:[#allocation3 + $0xce] sm:$0xff] }
 0x372   : > { %16526 = vmatprep.mubr.msk.f32.mxu1 %vm310_vm0, %v9644_v44  ;;  %v7309_v42 = vadd.f32 %v19378_v35, %v6954_v43  ;;  %v6953_v3 = vld [vmem:[#allocation2 + $0x70] sm:$0xff]  ;;  %6894 = vst.msk [vmem:[#allocation2 + $0x98] sm:$0xff] %vm632_vm3, %v6862_v62  ;;  %v10521_v8 = vld [vmem:[#allocation3 + $0xc7] sm:$0xff] }
 0x373   : > { %v7308_v5 = vadd.f32 %v19381_v46, %v6953_v3  ;;  %6893 = vst.msk [vmem:[#allocation2 + $0x90] sm:$0xff] %vm632_vm3, %v6861_v47  ;;  %v16163_v26 = vpop.f32.mrb[244].mxu0  ;;  %v10522_v13 = vld [vmem:[#allocation3 + $0xcf] sm:$0xff]  ;;  %v10072_v43 = vld [vmem:[#allocation3 + $0xe6] sm:$0xff] }
 0x374   : > { %v19417_v52 = vpop.f32.mrb[244].mxu1  ;;  %7341 = vst.msk [vmem:[#allocation2 + $0x78] sm:$0xff] %vm632_vm3, %v7309_v42  ;;  %v6864_v1 = vadd.f32 %v16163_v26, %v6509_v23  ;;  %v6784_v50 = vpop.f32.mrb[245].mxu0  ;;  %16477 = vmatmul.mubr.msk.f32.gmra.mrb[94].mxu0 %vm310_vm0, %v9194_v0  ;;  %v6514_v28 = vld [vmem:[#allocation2 + $0xd0] sm:$0xff]  ;;  %v10523_v47 = vld [vmem:[#allocation3 + $0xe7] sm:$0xff] }
 0x375   : > { %v19420_v55 = vpop.f32.mrb[245].mxu1  ;;  %16527 = vmatmul.mubr.msk.f32.gmra.mrb[94].mxu1 %vm310_vm0, %v9645_v18  ;;  %7340 = vst.msk [vmem:[#allocation2 + $0x70] sm:$0xff] %vm632_vm3, %v7308_v5  ;;  %v6956_v19 = vld [vmem:[#allocation2 + $0x88] sm:$0xff]  ;;  %v6863_v25 = vadd.f32 %v6784_v50, %v6508_v15  ;;  %16531 = vmatprep.mubr.msk.f32.mxu0 %vm310_vm0, %v10066_v48 }
 0x376   : > { %16581 = vmatprep.mubr.msk.f32.mxu1 %vm310_vm0, %v10517_v10  ;;  %v7311_v34 = vadd.f32 %v19391_v33, %v6956_v19  ;;  %v6955_v22 = vld [vmem:[#allocation2 + $0x80] sm:$0xff]  ;;  %6896 = vst.msk [vmem:[#allocation2 + $0xa8] sm:$0xff] %vm632_vm3, %v6864_v1  ;;  %v6517_v23 = vld [vmem:[#allocation2 + $0xe8] sm:$0xff] }
 0x377   : > { %v7310_v35 = vadd.f32 %v7215_v7, %v6955_v22  ;;  %6895 = vst.msk [vmem:[#allocation2 + $0xa0] sm:$0xff] %vm632_vm3, %v6863_v25  ;;  %v16166_v40 = vpop.f32.mrb[246].mxu0  ;;  %v10073_v1 = vld [vmem:[#allocation3 + $0xee] sm:$0xff]  ;;  %v10074_v19 = vld [vmem:[#allocation3 + $0x106] sm:$0xff] }
 0x378   : > { %v19430_v45 = vpop.f32.mrb[246].mxu1  ;;  %7343 = vst.msk [vmem:[#allocation2 + $0x88] sm:$0xff] %vm632_vm3, %v7311_v34  ;;  %v6866_v46 = vadd.f32 %v16166_v40, %v6511_v20  ;;  %v6794_v36 = vpop.f32.mrb[247].mxu0  ;;  %16532 = vmatmul.mubr.msk.f32.vlgmr.msra.gmra.mrb[96].mxu0 %vm310_vm0, %v10067_v38  ;;  %v10524_v15 = vld [vmem:[#allocation3 + $0xef] sm:$0xff]  ;;  %v10525_v25 = vld [vmem:[#allocation3 + $0x107] sm:$0xff]  ;;  %v6519_v40 = vld [vmem:[#allocation2 + $0xf8] sm:$0xff] }
 0x379   : > { %v19433_v27 = vpop.f32.mrb[247].mxu1  ;;  %16582 = vmatmul.mubr.msk.f32.vlgmr.msra.gmra.mrb[96].mxu1 %vm310_vm0, %v10518_v53  ;;  %7342 = vst.msk [vmem:[#allocation2 + $0x80] sm:$0xff] %vm632_vm3, %v7310_v35  ;;  %v6958_v39 = vld [vmem:[#allocation2 + $0x98] sm:$0xff]  ;;  %v6865_v57 = vadd.f32 %v6794_v36, %v6510_v17  ;;  %16630 = vmatpush3.msra.mxu0 %v19235_v37  ;;  %v10069_v37 = vld [vmem:[#allocation3 + $0xae] sm:$0xff] }
 0x37a   : > { %16534 = vmatprep.mubr.msk.f32.mxu0 %vm310_vm0, %v10068_v51  ;;  %v7313_v58 = vadd.f32 %v19403_v11, %v6958_v39  ;;  %v6957_v33 = vld [vmem:[#allocation2 + $0x90] sm:$0xff]  ;;  %6898 = vst.msk [vmem:[#allocation2 + $0xb8] sm:$0xff] %vm632_vm3, %v6866_v46  ;;  %16584 = vmatprep.mubr.msk.f32.mxu1 %vm310_vm0, %v10519_v59  ;;  %v10527_v59 = vld [vmem:[#allocation3 + $0x127] sm:$0xff] }
 0x37b   : > { %16680 = vmatpush3.msra.mxu1 %v19240_v24  ;;  %v7312_v41 = vadd.f32 %v19406_v21, %v6957_v33  ;;  %6897 = vst.msk [vmem:[#allocation2 + $0xb0] sm:$0xff] %vm632_vm3, %v6865_v57  ;;  %v16169_v54 = vpop.f32.mrb[248].mxu0  ;;  %16729 = vmatprep.subr.mxu0 %v19440_v29  ;;  %v10075_v51 = vld [vmem:[#allocation3 + $0x10e] sm:$0xff]  ;;  %v10076_v57 = vld [vmem:[#allocation3 + $0x126] sm:$0xff] }
 0x37c   : > { %v19456_v56 = vpop.f32.mrb[248].mxu1  ;;  %16779 = vmatprep.subr.mxu1 %v19445_v9  ;;  %7345 = vst.msk [vmem:[#allocation2 + $0x98] sm:$0xff] %vm632_vm3, %v7313_v58  ;;  %v6868_v7 = vadd.f32 %v16169_v54, %v6513_v6  ;;  %v6804_v14 = vpop.f32.mrb[249].mxu0  ;;  %16535 = vmatmul.mubr.msk.f32.gmra.mrb[98].mxu0 %vm310_vm0, %v10069_v37  ;;  %v10526_v46 = vld [vmem:[#allocation3 + $0x10f] sm:$0xff] }
 0x37d   : > { %v7255_v24 = vpop.f32.mrb[249].mxu1  ;;  %16585 = vmatmul.mubr.msk.f32.gmra.mrb[98].mxu1 %vm310_vm0, %v10520_v2  ;;  %7344 = vst.msk [vmem:[#allocation2 + $0x90] sm:$0xff] %vm632_vm3, %v7312_v41  ;;  %v6960_v31 = vld [vmem:[#allocation2 + $0xa8] sm:$0xff]  ;;  %v6867_v32 = vadd.f32 %v6804_v14, %v6512_v4  ;;  %16537 = vmatprep.mubr.msk.f32.mxu0 %vm310_vm0, %v10070_v30  ;;  %v6518_v36 = vld [vmem:[#allocation2 + $0xf0] sm:$0xff] }
 0x37e   : > { %16587 = vmatprep.mubr.msk.f32.mxu1 %vm310_vm0, %v10521_v8  ;;  %v7315_v49 = vadd.f32 %v19417_v52, %v6960_v31  ;;  %v6959_v44 = vld [vmem:[#allocation2 + $0xa0] sm:$0xff]  ;;  %6900 = vst.msk [vmem:[#allocation2 + $0xc8] sm:$0xff] %vm632_vm3, %v6868_v7  ;;  %v10077_v7 = vld [vmem:[#allocation3 + $0x12e] sm:$0xff] }
 0x37f   : > { %v7314_v12 = vadd.f32 %v19420_v55, %v6959_v44  ;;  %6899 = vst.msk [vmem:[#allocation2 + $0xc0] sm:$0xff] %vm632_vm3, %v6867_v32  ;;  %v16172_v63 = vpop.f32.mrb[250].mxu0  ;;  %v6516_v55 = vld [vmem:[#allocation2 + $0xe0] sm:$0xff]  ;;  %v10528_v4 = vld [vmem:[#allocation3 + $0x12f] sm:$0xff] }
 0x380   : > { %v19470_v11 = vpop.f32.mrb[250].mxu1  ;;  %7347 = vst.msk [vmem:[#allocation2 + $0xa8] sm:$0xff] %vm632_vm3, %v7315_v49  ;;  %v6870_v62 = vadd.f32 %v16172_v63, %v6515_v61  ;;  %v6814_v16 = vpop.f32.mrb[251].mxu0  ;;  %16538 = vmatmul.mubr.msk.f32.gmra.mrb[100].mxu0 %vm310_vm0, %v10071_v60  ;;  %v10078_v31 = vld [vmem:[#allocation3 + $0x146] sm:$0xff] }
 0x381   : > { %v7265_v21 = vpop.f32.mrb[251].mxu1  ;;  %16588 = vmatmul.mubr.msk.f32.gmra.mrb[100].mxu1 %vm310_vm0, %v10522_v13  ;;  %7346 = vst.msk [vmem:[#allocation2 + $0xa0] sm:$0xff] %vm632_vm3, %v7314_v12  ;;  %v6962_v0 = vld [vmem:[#allocation2 + $0xb8] sm:$0xff]  ;;  %v6869_v18 = vadd.f32 %v6814_v16, %v6514_v28  ;;  %16540 = vmatprep.mubr.msk.f32.mxu0 %vm310_vm0, %v10072_v43  ;;  %v10529_v32 = vld [vmem:[#allocation3 + $0x147] sm:$0xff]  ;;  %v10530_v28 = vld [vmem:[#allocation3 + $0x14f] sm:$0xff] }
 0x382   : > { %16590 = vmatprep.mubr.msk.f32.mxu1 %vm310_vm0, %v10523_v47  ;;  %v7317_v42 = vadd.f32 %v19430_v45, %v6962_v0  ;;  %v6961_v3 = vld [vmem:[#allocation2 + $0xb0] sm:$0xff]  ;;  %6902 = vst.msk [vmem:[#allocation2 + $0xd8] sm:$0xff] %vm632_vm3, %v6870_v62  ;;  %v10080_v0 = vld [vmem:[#allocation3 + $0x166] sm:$0xff] }
 0x383   : > { %v7316_v5 = vadd.f32 %v19433_v27, %v6961_v3  ;;  %6901 = vst.msk [vmem:[#allocation2 + $0xd0] sm:$0xff] %vm632_vm3, %v6869_v18  ;;  %v16175_v26 = vpop.f32.mrb[252].mxu0  ;;  %v10079_v62 = vld [vmem:[#allocation3 + $0x14e] sm:$0xff] }
 0x384   : > { %v19482_v52 = vpop.f32.mrb[252].mxu1  ;;  %7349 = vst.msk [vmem:[#allocation2 + $0xb8] sm:$0xff] %vm632_vm3, %v7317_v42  ;;  %v6872_v50 = vadd.f32 %v16175_v26, %v6517_v23  ;;  %v6824_v48 = vpop.f32.mrb[253].mxu0  ;;  %16541 = vmatmul.mubr.msk.f32.gmra.mrb[102].mxu0 %vm310_vm0, %v10073_v1  ;;  %v10531_v18 = vld [vmem:[#allocation3 + $0x167] sm:$0xff] }
 0x385   : > { %v7275_v10 = vpop.f32.mrb[253].mxu1  ;;  %16591 = vmatmul.mubr.msk.f32.gmra.mrb[102].mxu1 %vm310_vm0, %v10524_v15  ;;  %7348 = vst.msk [vmem:[#allocation2 + $0xb0] sm:$0xff] %vm632_vm3, %v7316_v5  ;;  %v6964_v34 = vld [vmem:[#allocation2 + $0xc8] sm:$0xff]  ;;  %v6871_v22 = vadd.f32 %v6824_v48, %v6516_v55  ;;  %16543 = vmatprep.mubr.msk.f32.mxu0 %vm310_vm0, %v10074_v19 }
 0x386   : > { %16593 = vmatprep.mubr.msk.f32.mxu1 %vm310_vm0, %v10525_v25  ;;  %v7319_v38 = vadd.f32 %v19456_v56, %v6964_v34  ;;  %v6963_v35 = vld [vmem:[#allocation2 + $0xc0] sm:$0xff]  ;;  %6904 = vst.msk [vmem:[#allocation2 + $0xe8] sm:$0xff] %vm632_vm3, %v6872_v50  ;;  %v7391_v56 = vld [vmem:[#allocation2 + $0x8] sm:$0xff] }
 0x387   : > { %v7318_v20 = vadd.f32 %v7255_v24, %v6963_v35  ;;  %6903 = vst.msk [vmem:[#allocation2 + $0xe0] sm:$0xff] %vm632_vm3, %v6871_v22  ;;  %v16178_v45 = vpop.f32.mrb[254].mxu0  ;;  %v7390_v24 = vld [vmem:[#allocation2] sm:$0xff]  ;;  %v10081_v50 = vld [vmem:[#allocation3 + $0x16e] sm:$0xff] }
 0x388   : > { %v19493_v53 = vpop.f32.mrb[254].mxu1  ;;  %7351 = vst.msk [vmem:[#allocation2 + $0xc8] sm:$0xff] %vm632_vm3, %v7319_v38  ;;  %v6874_v17 = vadd.f32 %v16178_v45, %v6519_v40  ;;  %v6834_v27 = vpop.f32.mrb[255].mxu0  ;;  %16544 = vmatmul.mubr.msk.f32.gmra.mrb[104].mxu0 %vm310_vm0, %v10075_v51  ;;  %v10532_v55 = vld [vmem:[#allocation3 + $0x16f] sm:$0xff]  ;;  %v10082_v34 = vld [vmem:[#allocation3 + $0x186] sm:$0xff] }
 0x389   : > { %v7285_v39 = vpop.f32.mrb[255].mxu1  ;;  %16594 = vmatmul.mubr.msk.f32.gmra.mrb[104].mxu1 %vm310_vm0, %v10526_v46  ;;  %7350 = vst.msk [vmem:[#allocation2 + $0xc0] sm:$0xff] %vm632_vm3, %v7318_v20  ;;  %v6966_v58 = vld [vmem:[#allocation2 + $0xd8] sm:$0xff]  ;;  %v6873_v33 = vadd.f32 %v6834_v27, %v6518_v36  ;;  %16546 = vmatprep.mubr.msk.f32.mxu0 %vm310_vm0, %v10076_v57  ;;  %v10533_v22 = vld [vmem:[#allocation3 + $0x187] sm:$0xff]  ;;  %v10534_v36 = vld [vmem:[#allocation3 + $0x18f] sm:$0xff] }
 0x38a   : > { %16596 = vmatprep.mubr.msk.f32.mxu1 %vm310_vm0, %v10527_v59  ;;  %v7321_v41 = vadd.f32 %v19470_v11, %v6966_v58  ;;  %v6965_v6 = vld [vmem:[#allocation2 + $0xd0] sm:$0xff]  ;;  %6906 = vst.msk [vmem:[#allocation2 + $0xf8] sm:$0xff] %vm632_vm3, %v6874_v17  ;;  %v7393_v11 = vld [vmem:[#allocation2 + $0x18] sm:$0xff]  ;;  %v10084_v58 = vld [vmem:[#allocation3 + $0x1a6] sm:$0xff] }
 0x38b   : > { %v7320_v54 = vadd.f32 %v7265_v21, %v6965_v6  ;;  %6905 = vst.msk [vmem:[#allocation2 + $0xf0] sm:$0xff] %vm632_vm3, %v6873_v33  ;;  %v16233_v37 = vpop.f32.mrb[0].mxu0  ;;  %v7392_v21 = vld [vmem:[#allocation2 + $0x10] sm:$0xff]  ;;  %v10535_v33 = vld [vmem:[#allocation3 + $0x1a7] sm:$0xff] }
 0x38c   : > { %v19504_v2 = vpop.f32.mrb[0].mxu1  ;;  %7353 = vst.msk [vmem:[#allocation2 + $0xd8] sm:$0xff] %vm632_vm3, %v7321_v41  ;;  %v7746_v14 = vadd.f32 %v16233_v37, %v7391_v56  ;;  %v7586_v30 = vpop.f32.mrb[1].mxu0  ;;  %16547 = vmatmul.mubr.msk.f32.gmra.mrb[106].mxu0 %vm310_vm0, %v10077_v7  ;;  %v10083_v17 = vld [vmem:[#allocation3 + $0x18e] sm:$0xff] }
 0x38d   : > { %v8038_v8 = vpop.f32.mrb[1].mxu1  ;;  %16597 = vmatmul.mubr.msk.f32.gmra.mrb[106].mxu1 %vm310_vm0, %v10528_v4  ;;  %7352 = vst.msk [vmem:[#allocation2 + $0xd0] sm:$0xff] %vm632_vm3, %v7320_v54  ;;  %v6968_v49 = vld [vmem:[#allocation2 + $0xe8] sm:$0xff]  ;;  %v7745_v44 = vadd.f32 %v7586_v30, %v7390_v24  ;;  %16549 = vmatprep.mubr.msk.f32.mxu0 %vm310_vm0, %v10078_v31 }
 0x38e   : > { %16599 = vmatprep.mubr.msk.f32.mxu1 %vm310_vm0, %v10529_v32  ;;  %v7323_v12 = vadd.f32 %v19482_v52, %v6968_v49  ;;  %v6967_v61 = vld [vmem:[#allocation2 + $0xe0] sm:$0xff]  ;;  %7778 = vst.msk [vmem:[#allocation2 + $0x8] sm:$0xff] %vm632_vm3, %v7746_v14  ;;  %v7395_v52 = vld [vmem:[#allocation2 + $0x28] sm:$0xff] }
 0x38f   : > { %v7322_v63 = vadd.f32 %v7275_v10, %v6967_v61  ;;  %7777 = vst.msk [vmem:[#allocation2] sm:$0xff] %vm632_vm3, %v7745_v44  ;;  %v16236_v60 = vpop.f32.mrb[2].mxu0  ;;  %v7394_v10 = vld [vmem:[#allocation2 + $0x20] sm:$0xff]  ;;  %v10085_v14 = vld [vmem:[#allocation3 + $0x1ae] sm:$0xff] }
 0x390   : > { %v19515_v13 = vpop.f32.mrb[2].mxu1  ;;  %7355 = vst.msk [vmem:[#allocation2 + $0xe8] sm:$0xff] %vm632_vm3, %v7323_v12  ;;  %v7748_v16 = vadd.f32 %v16236_v60, %v7393_v11  ;;  %v7596_v43 = vpop.f32.mrb[3].mxu0  ;;  %16550 = vmatmul.mubr.msk.f32.gmra.mrb[108].mxu0 %vm310_vm0, %v10079_v62  ;;  %v10536_v24 = vld [vmem:[#allocation3 + $0x1af] sm:$0xff]  ;;  %v10086_v49 = vld [vmem:[#allocation3 + $0x1c6] sm:$0xff] }
 0x391   : > { %v8048_v47 = vpop.f32.mrb[3].mxu1  ;;  %16600 = vmatmul.mubr.msk.f32.gmra.mrb[108].mxu1 %vm310_vm0, %v10530_v28  ;;  %7354 = vst.msk [vmem:[#allocation2 + $0xe0] sm:$0xff] %vm632_vm3, %v7322_v63  ;;  %v6970_v42 = vld [vmem:[#allocation2 + $0xf8] sm:$0xff]  ;;  %v7747_v3 = vadd.f32 %v7596_v43, %v7392_v21  ;;  %16552 = vmatprep.mubr.msk.f32.mxu0 %vm310_vm0, %v10080_v0  ;;  %v10537_v44 = vld [vmem:[#allocation3 + $0x1c7] sm:$0xff]  ;;  %v10538_v21 = vld [vmem:[#allocation3 + $0x1cf] sm:$0xff] }
 0x392   : > { %16602 = vmatprep.mubr.msk.f32.mxu1 %vm310_vm0, %v10531_v18  ;;  %v7325_v5 = vadd.f32 %v19493_v53, %v6970_v42  ;;  %v6969_v23 = vld [vmem:[#allocation2 + $0xf0] sm:$0xff]  ;;  %7780 = vst.msk [vmem:[#allocation2 + $0x18] sm:$0xff] %vm632_vm3, %v7748_v16  ;;  %v7397_v53 = vld [vmem:[#allocation2 + $0x38] sm:$0xff]  ;;  %v10088_v42 = vld [vmem:[#allocation3 + $0x1e6] sm:$0xff] }
 0x393   : > { %v7324_v26 = vadd.f32 %v7285_v39, %v6969_v23  ;;  %7779 = vst.msk [vmem:[#allocation2 + $0x10] sm:$0xff] %vm632_vm3, %v7747_v3  ;;  %v16239_v1 = vpop.f32.mrb[4].mxu0  ;;  %v7396_v39 = vld [vmem:[#allocation2 + $0x30] sm:$0xff]  ;;  %v10539_v3 = vld [vmem:[#allocation3 + $0x1e7] sm:$0xff] }
 0x394   : > { %v19526_v15 = vpop.f32.mrb[4].mxu1  ;;  %7357 = vst.msk [vmem:[#allocation2 + $0xf8] sm:$0xff] %vm632_vm3, %v7325_v5  ;;  %v7750_v48 = vadd.f32 %v16239_v1, %v7395_v52  ;;  %v7606_v19 = vpop.f32.mrb[5].mxu0  ;;  %16553 = vmatmul.mubr.msk.f32.gmra.mrb[110].mxu0 %vm310_vm0, %v10081_v50  ;;  %v10087_v16 = vld [vmem:[#allocation3 + $0x1ce] sm:$0xff] }
 0x395   : > { %v8058_v25 = vpop.f32.mrb[5].mxu1  ;;  %16603 = vmatmul.mubr.msk.f32.gmra.mrb[110].mxu1 %vm310_vm0, %v10532_v55  ;;  %7356 = vst.msk [vmem:[#allocation2 + $0xf0] sm:$0xff] %vm632_vm3, %v7324_v26  ;;  %v7843_v38 = vld [vmem:[#allocation2 + $0x8] sm:$0xff]  ;;  %v7749_v35 = vadd.f32 %v7606_v19, %v7394_v10  ;;  %16555 = vmatprep.mubr.msk.f32.mxu0 %vm310_vm0, %v10082_v34 }
 0x396   : > { %16605 = vmatprep.mubr.msk.f32.mxu1 %vm310_vm0, %v10533_v22  ;;  %v8198_v20 = vadd.f32 %v19504_v2, %v7843_v38  ;;  %v7842_v40 = vld [vmem:[#allocation2] sm:$0xff]  ;;  %7782 = vst.msk [vmem:[#allocation2 + $0x28] sm:$0xff] %vm632_vm3, %v7750_v48  ;;  %v7399_v2 = vld [vmem:[#allocation2 + $0x48] sm:$0xff] }
 0x397   : > { %v8197_v45 = vadd.f32 %v8038_v8, %v7842_v40  ;;  %7781 = vst.msk [vmem:[#allocation2 + $0x20] sm:$0xff] %vm632_vm3, %v7749_v35  ;;  %v16242_v51 = vpop.f32.mrb[6].mxu0  ;;  %v7398_v8 = vld [vmem:[#allocation2 + $0x40] sm:$0xff]  ;;  %v10089_v48 = vld [vmem:[#allocation3 + $0x1ee] sm:$0xff] }
 0x398   : > { %v19537_v46 = vpop.f32.mrb[6].mxu1  ;;  %8230 = vst.msk [vmem:[#allocation2 + $0x8] sm:$0xff] %vm632_vm3, %v8198_v20  ;;  %v7752_v27 = vadd.f32 %v16242_v51, %v7397_v53  ;;  %v7616_v57 = vpop.f32.mrb[7].mxu0  ;;  %16556 = vmatmul.mubr.msk.f32.gmra.mrb[112].mxu0 %vm310_vm0, %v10083_v17  ;;  %v10540_v10 = vld [vmem:[#allocation3 + $0x1ef] sm:$0xff]  ;;  %v10090_v38 = vld [vmem:[#allocation3 + $0x206] sm:$0xff] }
 0x399   : > { %v8068_v59 = vpop.f32.mrb[7].mxu1  ;;  %16606 = vmatmul.mubr.msk.f32.gmra.mrb[112].mxu1 %vm310_vm0, %v10534_v36  ;;  %8229 = vst.msk [vmem:[#allocation2] sm:$0xff] %vm632_vm3, %v8197_v45  ;;  %v7845_v41 = vld [vmem:[#allocation2 + $0x18] sm:$0xff]  ;;  %v7751_v6 = vadd.f32 %v7616_v57, %v7396_v39  ;;  %16558 = vmatprep.mubr.msk.f32.mxu0 %vm310_vm0, %v10084_v58  ;;  %v10541_v35 = vld [vmem:[#allocation3 + $0x207] sm:$0xff]  ;;  %v10542_v39 = vld [vmem:[#allocation3 + $0x20f] sm:$0xff] }
 0x39a   : > { %16608 = vmatprep.mubr.msk.f32.mxu1 %vm310_vm0, %v10535_v33  ;;  %v8200_v54 = vadd.f32 %v19515_v13, %v7845_v41  ;;  %v7844_v56 = vld [vmem:[#allocation2 + $0x10] sm:$0xff]  ;;  %7784 = vst.msk [vmem:[#allocation2 + $0x38] sm:$0xff] %vm632_vm3, %v7752_v27  ;;  %v7401_v13 = vld [vmem:[#allocation2 + $0x58] sm:$0xff]  ;;  %v10092_v41 = vld [vmem:[#allocation3 + $0x226] sm:$0xff] }
 0x39b   : > { %v8199_v37 = vadd.f32 %v8048_v47, %v7844_v56  ;;  %7783 = vst.msk [vmem:[#allocation2 + $0x30] sm:$0xff] %vm632_vm3, %v7751_v6  ;;  %v16245_v7 = vpop.f32.mrb[8].mxu0  ;;  %v7400_v47 = vld [vmem:[#allocation2 + $0x50] sm:$0xff]  ;;  %v10543_v6 = vld [vmem:[#allocation3 + $0x227] sm:$0xff] }
 0x39c   : > { %v19548_v4 = vpop.f32.mrb[8].mxu1  ;;  %8232 = vst.msk [vmem:[#allocation2 + $0x18] sm:$0xff] %vm632_vm3, %v8200_v54  ;;  %v7754_v30 = vadd.f32 %v16245_v7, %v7399_v2  ;;  %v7626_v31 = vpop.f32.mrb[9].mxu0  ;;  %16559 = vmatmul.mubr.msk.f32.gmra.mrb[114].mxu0 %vm310_vm0, %v10085_v14  ;;  %v10091_v27 = vld [vmem:[#allocation3 + $0x20e] sm:$0xff]  ;;  %v10094_v7 = vld [vmem:[#allocation3 + $0x246] sm:$0xff] }
 0x39d   : > { %v8078_v32 = vpop.f32.mrb[9].mxu1  ;;  %16609 = vmatmul.mubr.msk.f32.gmra.mrb[114].mxu1 %vm310_vm0, %v10536_v24  ;;  %8231 = vst.msk [vmem:[#allocation2 + $0x10] sm:$0xff] %vm632_vm3, %v8199_v37  ;;  %v7847_v12 = vld [vmem:[#allocation2 + $0x28] sm:$0xff]  ;;  %v7753_v61 = vadd.f32 %v7626_v31, %v7398_v8  ;;  %16561 = vmatprep.mubr.msk.f32.mxu0 %vm310_vm0, %v10086_v49 }
 0x39e   : > { %16611 = vmatprep.mubr.msk.f32.mxu1 %vm310_vm0, %v10537_v44  ;;  %v8202_v63 = vadd.f32 %v19526_v15, %v7847_v12  ;;  %v7846_v11 = vld [vmem:[#allocation2 + $0x20] sm:$0xff]  ;;  %7786 = vst.msk [vmem:[#allocation2 + $0x48] sm:$0xff] %vm632_vm3, %v7754_v30  ;;  %v7403_v15 = vld [vmem:[#allocation2 + $0x68] sm:$0xff]  ;;  %v12460_v44 = vld [vmem:[#allocation4 + $0x10] sm:$0xff] }
 0x39f   : > { %v8201_v60 = vadd.f32 %v8058_v25, %v7846_v11  ;;  %7785 = vst.msk [vmem:[#allocation2 + $0x40] sm:$0xff] %vm632_vm3, %v7753_v61  ;;  %v16248_v62 = vpop.f32.mrb[10].mxu0  ;;  %v7402_v25 = vld [vmem:[#allocation2 + $0x60] sm:$0xff]  ;;  %v7407_v24 = vld [vmem:[#allocation2 + $0x88] sm:$0xff] }
 0x3a0   : > { %v19559_v28 = vpop.f32.mrb[10].mxu1  ;;  %8234 = vst.msk [vmem:[#allocation2 + $0x28] sm:$0xff] %vm632_vm3, %v8202_v63  ;;  %v7756_v43 = vadd.f32 %v16248_v62, %v7401_v13  ;;  %v7636_v0 = vpop.f32.mrb[11].mxu0  ;;  %16562 = vmatmul.mubr.msk.f32.gmra.mrb[116].mxu0 %vm310_vm0, %v10087_v16  ;;  %v10093_v31 = vld [vmem:[#allocation3 + $0x22e] sm:$0xff]  ;;  %v7406_v61 = vld [vmem:[#allocation2 + $0x80] sm:$0xff] }
 0x3a1   : > { %v19562_v18 = vpop.f32.mrb[11].mxu1  ;;  %16612 = vmatmul.mubr.msk.f32.gmra.mrb[116].mxu1 %vm310_vm0, %v10538_v21  ;;  %8233 = vst.msk [vmem:[#allocation2 + $0x20] sm:$0xff] %vm632_vm3, %v8201_v60  ;;  %v7849_v5 = vld [vmem:[#allocation2 + $0x38] sm:$0xff]  ;;  %v7755_v23 = vadd.f32 %v7636_v0, %v7400_v47  ;;  %16564 = vmatprep.mubr.msk.f32.mxu0 %vm310_vm0, %v10088_v42  ;;  %v12428_v49 = vld [vmem:[#allocation4 + $0xf] sm:$0xff]  ;;  %v10547_v47 = vld [vmem:[#allocation3 + $0x267] sm:$0xff] }
 0x3a2   : > { %16614 = vmatprep.mubr.msk.f32.mxu1 %vm310_vm0, %v10539_v3  ;;  %v8204_v26 = vadd.f32 %v19537_v46, %v7849_v5  ;;  %v7848_v52 = vld [vmem:[#allocation2 + $0x30] sm:$0xff]  ;;  %7788 = vst.msk [vmem:[#allocation2 + $0x58] sm:$0xff] %vm632_vm3, %v7756_v43  ;;  %v7405_v46 = vld [vmem:[#allocation2 + $0x78] sm:$0xff]  ;;  %v10096_v43 = vld [vmem:[#allocation3 + $0x266] sm:$0xff] }
 0x3a3   : > { %v8203_v1 = vadd.f32 %v8068_v59, %v7848_v52  ;;  %7787 = vst.msk [vmem:[#allocation2 + $0x50] sm:$0xff] %vm632_vm3, %v7755_v23  ;;  %v16251_v50 = vpop.f32.mrb[12].mxu0  ;;  %v7404_v59 = vld [vmem:[#allocation2 + $0x70] sm:$0xff] }
 0x3a4   : > { %v19572_v55 = vpop.f32.mrb[12].mxu1  ;;  %8236 = vst.msk [vmem:[#allocation2 + $0x38] sm:$0xff] %vm632_vm3, %v8204_v26  ;;  %v7758_v19 = vadd.f32 %v16251_v50, %v7403_v15  ;;  %v7646_v34 = vpop.f32.mrb[13].mxu0  ;;  %16565 = vmatmul.mubr.msk.f32.gmra.mrb[118].mxu0 %vm310_vm0, %v10089_v48  ;;  %v10095_v62 = vld [vmem:[#allocation3 + $0x24e] sm:$0xff] }
 0x3a5   : > { %v19575_v22 = vpop.f32.mrb[13].mxu1  ;;  %16615 = vmatmul.mubr.msk.f32.gmra.mrb[118].mxu1 %vm310_vm0, %v10540_v10  ;;  %8235 = vst.msk [vmem:[#allocation2 + $0x30] sm:$0xff] %vm632_vm3, %v8203_v1  ;;  %v7851_v20 = vld [vmem:[#allocation2 + $0x48] sm:$0xff]  ;;  %v7757_v40 = vadd.f32 %v7646_v34, %v7402_v25  ;;  %16567 = vmatprep.mubr.msk.f32.mxu0 %vm310_vm0, %v10090_v38  ;;  %v7408_v23 = vld [vmem:[#allocation2 + $0x90] sm:$0xff]  ;;  %v12492_v1 = vmax.f32 %v12428_v49, %v12460_v44 }
 0x3a6   : > { %16617 = vmatprep.mubr.msk.f32.mxu1 %vm310_vm0, %v10541_v35  ;;  %v8206_v45 = vadd.f32 %v19548_v4, %v7851_v20  ;;  %v7850_v53 = vld [vmem:[#allocation2 + $0x40] sm:$0xff]  ;;  %7790 = vst.msk [vmem:[#allocation2 + $0x68] sm:$0xff] %vm632_vm3, %v7758_v19  ;;  %v10548_v48 = vld [vmem:[#allocation3 + $0x26f] sm:$0xff] }
 0x3a7   : > { %v8205_v51 = vadd.f32 %v8078_v32, %v7850_v53  ;;  %7789 = vst.msk [vmem:[#allocation2 + $0x60] sm:$0xff] %vm632_vm3, %v7757_v40  ;;  %v16254_v17 = vpop.f32.mrb[14].mxu0  ;;  %v10545_v4 = vld [vmem:[#allocation3 + $0x247] sm:$0xff]  ;;  %v10544_v32 = vld [vmem:[#allocation3 + $0x22f] sm:$0xff] }
 0x3a8   : > { %v19585_v36 = vpop.f32.mrb[14].mxu1  ;;  %8238 = vst.msk [vmem:[#allocation2 + $0x48] sm:$0xff] %vm632_vm3, %v8206_v45  ;;  %v7760_v57 = vadd.f32 %v16254_v17, %v7405_v46  ;;  %v7656_v58 = vpop.f32.mrb[15].mxu0  ;;  %16568 = vmatmul.mubr.msk.f32.gmra.mrb[120].mxu0 %vm310_vm0, %v10091_v27  ;;  %v12524_v10 = vld [vmem:[#allocation4 + $0x11] sm:$0xff]  ;;  %v7410_v40 = vld [vmem:[#allocation2 + $0xa0] sm:$0xff]  ;;  %v11419_v46 = vld [vmem:[#allocation3 + $0x89] sm:$0xff] }
 0x3a9   : > { %v19588_v33 = vpop.f32.mrb[15].mxu1  ;;  %16618 = vmatmul.mubr.msk.f32.gmra.mrb[120].mxu1 %vm310_vm0, %v10542_v39  ;;  %8237 = vst.msk [vmem:[#allocation2 + $0x40] sm:$0xff] %vm632_vm3, %v8205_v51  ;;  %v7853_v54 = vld [vmem:[#allocation2 + $0x58] sm:$0xff]  ;;  %v7759_v56 = vadd.f32 %v7656_v58, %v7404_v59  ;;  %16570 = vmatprep.mubr.msk.f32.mxu0 %vm310_vm0, %v10092_v41  ;;  %v10968_v51 = vld [vmem:[#allocation3 + $0x88] sm:$0xff]  ;;  %v19634_v17 = vmax.f32 %v12492_v1, %v12524_v10 }
 0x3aa   : > { %16620 = vmatprep.mubr.msk.f32.mxu1 %vm310_vm0, %v10543_v6  ;;  %v8208_v37 = vadd.f32 %v19559_v28, %v7853_v54  ;;  %v7852_v2 = vld [vmem:[#allocation2 + $0x50] sm:$0xff]  ;;  %7792 = vst.msk [vmem:[#allocation2 + $0x78] sm:$0xff] %vm632_vm3, %v7760_v57  ;;  %v12427_v39 = vld [vmem:[#allocation4 + $0x7] sm:$0xff]  ;;  %v7413_v6 = vld [vmem:[#allocation2 + $0xb8] sm:$0xff] }
 0x3ab   : > { %v8207_v14 = vadd.f32 %v19562_v18, %v7852_v2  ;;  %7791 = vst.msk [vmem:[#allocation2 + $0x70] sm:$0xff] %vm632_vm3, %v7759_v56  ;;  %v16257_v30 = vpop.f32.mrb[16].mxu0  ;;  %v10546_v28 = vld [vmem:[#allocation3 + $0x24f] sm:$0xff]  ;;  %v7409_v18 = vld [vmem:[#allocation2 + $0x98] sm:$0xff] }
 0x3ac   : > { %v19599_v8 = vpop.f32.mrb[16].mxu1  ;;  %8240 = vst.msk [vmem:[#allocation2 + $0x58] sm:$0xff] %vm632_vm3, %v8208_v37  ;;  %v7762_v12 = vadd.f32 %v16257_v30, %v7407_v24  ;;  %v7666_v63 = vpop.f32.mrb[17].mxu0  ;;  %16571 = vmatmul.mubr.msk.f32.gmra.mrb[122].mxu0 %vm310_vm0, %v10093_v31  ;;  %v12459_v57 = vld [vmem:[#allocation4 + $0x8] sm:$0xff]  ;;  %v10969_v37 = vld [vmem:[#allocation3 + $0x90] sm:$0xff] }
 0x3ad   : > { %v19602_v11 = vpop.f32.mrb[17].mxu1  ;;  %16621 = vmatmul.mubr.msk.f32.gmra.mrb[122].mxu1 %vm310_vm0, %v10544_v32  ;;  %8239 = vst.msk [vmem:[#allocation2 + $0x50] sm:$0xff] %vm632_vm3, %v8207_v14  ;;  %v7855_v60 = vld [vmem:[#allocation2 + $0x68] sm:$0xff]  ;;  %v7761_v13 = vadd.f32 %v7666_v63, %v7406_v61  ;;  %16573 = vmatprep.mubr.msk.f32.mxu0 %vm310_vm0, %v10094_v7  ;;  %v11420_v2 = vld [vmem:[#allocation3 + $0x91] sm:$0xff]  ;;  %v12491_v32 = vmax.f32 %v12427_v39, %v12459_v57 }
 0x3ae   : > { %16623 = vmatprep.mubr.msk.f32.mxu1 %vm310_vm0, %v10545_v4  ;;  %v8210_v16 = vadd.f32 %v19572_v55, %v7855_v60  ;;  %v7854_v21 = vld [vmem:[#allocation2 + $0x60] sm:$0xff]  ;;  %7794 = vst.msk [vmem:[#allocation2 + $0x88] sm:$0xff] %vm632_vm3, %v7762_v12  ;;  %v10097_v55 = vld [vmem:[#allocation3 + $0x26e] sm:$0xff] }
 0x3af   : > { %v8209_v0 = vadd.f32 %v19575_v22, %v7854_v21  ;;  %7793 = vst.msk [vmem:[#allocation2 + $0x80] sm:$0xff] %vm632_vm3, %v7761_v13  ;;  %v16260_v42 = vpop.f32.mrb[18].mxu0  ;;  %v7411_v22 = vld [vmem:[#allocation2 + $0xa8] sm:$0xff]  ;;  %v12652_v7 = vld [vmem:[#allocation4 + $0x30] sm:$0xff] }
 0x3b0   : > { %v19613_v3 = vpop.f32.mrb[18].mxu1  ;;  %8242 = vst.msk [vmem:[#allocation2 + $0x68] sm:$0xff] %vm632_vm3, %v8210_v16  ;;  %v7764_v5 = vadd.f32 %v16260_v42, %v7409_v18  ;;  %v7676_v26 = vpop.f32.mrb[19].mxu0  ;;  %16574 = vmatmul.mubr.msk.f32.gmra.mrb[124].mxu0 %vm310_vm0, %v10095_v62  ;;  %v12588_v59 = vld [vmem:[#allocation4 + $0x2f] sm:$0xff]  ;;  %v7414_v42 = vld [vmem:[#allocation2 + $0xc0] sm:$0xff] }
 0x3b1   : > { %v19616_v52 = vpop.f32.mrb[19].mxu1  ;;  %16624 = vmatmul.mubr.msk.f32.gmra.mrb[124].mxu1 %vm310_vm0, %v10546_v28  ;;  %8241 = vst.msk [vmem:[#allocation2 + $0x60] sm:$0xff] %vm632_vm3, %v8209_v0  ;;  %v7857_v15 = vld [vmem:[#allocation2 + $0x78] sm:$0xff]  ;;  %v7763_v50 = vadd.f32 %v7676_v26, %v7408_v23  ;;  %16576 = vmatprep.mubr.msk.f32.mxu0 %vm310_vm0, %v10096_v43  ;;  %v7412_v14 = vld [vmem:[#allocation2 + $0xb0] sm:$0xff]  ;;  %v12620_v49 = vmax.f32 %v19634_v17, %v12588_v59  ;;  %v7415_v62 = vld [vmem:[#allocation2 + $0xc8] sm:$0xff] }
 0x3b2   : > { %16626 = vmatprep.mubr.msk.f32.mxu1 %vm310_vm0, %v10547_v47  ;;  %v8212_v19 = vadd.f32 %v19585_v36, %v7857_v15  ;;  %v7856_v25 = vld [vmem:[#allocation2 + $0x70] sm:$0xff]  ;;  %7796 = vst.msk [vmem:[#allocation2 + $0x98] sm:$0xff] %vm632_vm3, %v7764_v5  ;;  %v19658_v28 = vld [vmem:[#allocation4 + $0x27] sm:$0xff] }
 0x3b3   : > { %v8211_v34 = vadd.f32 %v19588_v33, %v7856_v25  ;;  %7795 = vst.msk [vmem:[#allocation2 + $0x90] sm:$0xff] %vm632_vm3, %v7763_v50  ;;  %v16263_v38 = vpop.f32.mrb[20].mxu0  ;;  %v11421_v31 = vld [vmem:[#allocation3 + $0xa9] sm:$0xff]  ;;  %v11422_v63 = vld [vmem:[#allocation3 + $0xb1] sm:$0xff]  ;;  %v19679_v1 = vmax.f32 %v12620_v49, %v12652_v7 }
 0x3b4   : > { %v19627_v35 = vpop.f32.mrb[20].mxu1  ;;  %8244 = vst.msk [vmem:[#allocation2 + $0x78] sm:$0xff] %vm632_vm3, %v8212_v19  ;;  %v7766_v20 = vadd.f32 %v16263_v38, %v7411_v22  ;;  %v7686_v45 = vpop.f32.mrb[21].mxu0  ;;  %16577 = vmatmul.mubr.msk.f32.gmra.mrb[126].mxu0 %vm310_vm0, %v10097_v55  ;;  %v10971_v61 = vld [vmem:[#allocation3 + $0xb0] sm:$0xff]  ;;  %v19664_v43 = vld [vmem:[#allocation4 + $0x28] sm:$0xff] }
 0x3b5   : > { %v19630_v53 = vpop.f32.mrb[21].mxu1  ;;  %16627 = vmatmul.mubr.msk.f32.gmra.mrb[126].mxu1 %vm310_vm0, %v10548_v48  ;;  %8243 = vst.msk [vmem:[#allocation2 + $0x70] sm:$0xff] %vm632_vm3, %v8211_v34  ;;  %v7859_v36 = vld [vmem:[#allocation2 + $0x88] sm:$0xff]  ;;  %v7765_v27 = vadd.f32 %v7686_v45, %v7410_v40  ;;  %16631 = vmatprep.mubr.msk.f32.mxu0 %vm310_vm0, %v10968_v51  ;;  %v19670_v18 = vld [vmem:[#allocation4 + $0x31] sm:$0xff]  ;;  %v12493_v22 = vmax.f32 %v19658_v28, %v19664_v43 }
 0x3b6   : > { %16681 = vmatprep.mubr.msk.f32.mxu1 %vm310_vm0, %v11419_v46  ;;  %v8214_v58 = vadd.f32 %v19599_v8, %v7859_v36  ;;  %v7858_v33 = vld [vmem:[#allocation2 + $0x80] sm:$0xff]  ;;  %7798 = vst.msk [vmem:[#allocation2 + $0xa8] sm:$0xff] %vm632_vm3, %v7766_v20  ;;  %v10970_v8 = vld [vmem:[#allocation3 + $0xa8] sm:$0xff]  ;;  %v10973_v55 = vld [vmem:[#allocation3 + $0xd0] sm:$0xff] }
 0x3b7   : > { %v8213_v41 = vadd.f32 %v19602_v11, %v7858_v33  ;;  %7797 = vst.msk [vmem:[#allocation2 + $0xa0] sm:$0xff] %vm632_vm3, %v7765_v27  ;;  %v16266_v54 = vpop.f32.mrb[22].mxu0  ;;  %v12523_v11 = vld [vmem:[#allocation4 + $0x9] sm:$0xff]  ;;  %v11424_v48 = vld [vmem:[#allocation3 + $0xd1] sm:$0xff] }
 0x3b8   : > { %v19643_v56 = vpop.f32.mrb[22].mxu1  ;;  %8246 = vst.msk [vmem:[#allocation2 + $0x88] sm:$0xff] %vm632_vm3, %v8214_v58  ;;  %v7768_v4 = vadd.f32 %v16266_v54, %v7413_v6  ;;  %v7696_v24 = vpop.f32.mrb[23].mxu0  ;;  %16632 = vmatmul.mubr.msk.f32.vlgmr.msra.gmra.mrb[128].mxu0 %vm310_vm0, %v10969_v37  ;;  %v19666_v47 = vld [vmem:[#allocation4 + $0x47] sm:$0xff]  ;;  %v7417_v40 = vld [vmem:[#allocation2 + $0xd8] sm:$0xff]  ;;  %v7416_v36 = vld [vmem:[#allocation2 + $0xd0] sm:$0xff]  ;;  %v12748_v54 = vmax.f32 %v19679_v1, %v19670_v18 }
 0x3b9   : > { %v19646_v30 = vpop.f32.mrb[23].mxu1  ;;  %16682 = vmatmul.mubr.msk.f32.vlgmr.msra.gmra.mrb[128].mxu1 %vm310_vm0, %v11420_v2  ;;  %8245 = vst.msk [vmem:[#allocation2 + $0x80] sm:$0xff] %vm632_vm3, %v8213_v41  ;;  %v7861_v44 = vld [vmem:[#allocation2 + $0x98] sm:$0xff]  ;;  %v7767_v12 = vadd.f32 %v7696_v24, %v7412_v14  ;;  %16730 = vmatpush3.msra.mxu0 %v19440_v29  ;;  %v19668_v0 = vld [vmem:[#allocation4 + $0x48] sm:$0xff]  ;;  %v12462_v59 = vld [vmem:[#allocation4 + $0x30] sm:$0xff] }
 0x3ba   : > { %16634 = vmatprep.mubr.msk.f32.mxu0 %vm310_vm0, %v10970_v8  ;;  %v8216_v60 = vadd.f32 %v19613_v3, %v7861_v44  ;;  %v7860_v13 = vld [vmem:[#allocation2 + $0x90] sm:$0xff]  ;;  %7800 = vst.msk [vmem:[#allocation2 + $0xb8] sm:$0xff] %vm632_vm3, %v7768_v4  ;;  %16684 = vmatprep.mubr.msk.f32.mxu1 %vm310_vm0, %v11421_v31  ;;  %v10972_v23 = vld [vmem:[#allocation3 + $0xc8] sm:$0xff]  ;;  %v12495_v38 = vmax.f32 %v19666_v47, %v19668_v0 }
 0x3bb   : > { %16780 = vmatpush3.msra.mxu1 %v19445_v9  ;;  %v8215_v16 = vadd.f32 %v19616_v52, %v7860_v13  ;;  %7799 = vst.msk [vmem:[#allocation2 + $0xb0] sm:$0xff] %vm632_vm3, %v7767_v12  ;;  %v16269_v29 = vpop.f32.mrb[24].mxu0  ;;  %v11423_v26 = vld [vmem:[#allocation3 + $0xc9] sm:$0xff]  ;;  %v19677_v52 = vmax.f32 %v12491_v32, %v12523_v11  ;;  %v11426_v6 = vld [vmem:[#allocation3 + $0xf1] sm:$0xff]  ;;  %v7418_v11 = vld [vmem:[#allocation2 + $0xe0] sm:$0xff] }
 0x3bc   : > { %v19662_v21 = vpop.f32.mrb[24].mxu1  ;;  %8248 = vst.msk [vmem:[#allocation2 + $0x98] sm:$0xff] %vm632_vm3, %v8216_v60  ;;  %v7770_v9 = vadd.f32 %v16269_v29, %v7415_v62  ;;  %v7706_v3 = vpop.f32.mrb[25].mxu0  ;;  %16635 = vmatmul.mubr.msk.f32.gmra.mrb[130].mxu0 %vm310_vm0, %v10971_v61  ;;  %v10974_v25 = vld [vmem:[#allocation3 + $0xe8] sm:$0xff]  ;;  %v10975_v41 = vld [vmem:[#allocation3 + $0xf0] sm:$0xff] }
 0x3bd   : > { %v19673_v5 = vpop.f32.mrb[25].mxu1  ;;  %16685 = vmatmul.mubr.msk.f32.gmra.mrb[130].mxu1 %vm310_vm0, %v11422_v63  ;;  %8247 = vst.msk [vmem:[#allocation2 + $0x90] sm:$0xff] %vm632_vm3, %v8215_v16  ;;  %v7863_v15 = vld [vmem:[#allocation2 + $0xa8] sm:$0xff]  ;;  %v7769_v50 = vadd.f32 %v7706_v3, %v7414_v42  ;;  %16637 = vmatprep.mubr.msk.f32.mxu0 %vm310_vm0, %v10972_v23  ;;  %v19724_v44 = vld [vmem:[#allocation4 + $0x50] sm:$0xff] }
 0x3be   : > { %16687 = vmatprep.mubr.msk.f32.mxu1 %vm310_vm0, %v11423_v26  ;;  %v8218_v10 = vadd.f32 %v19627_v35, %v7863_v15  ;;  %v7862_v19 = vld [vmem:[#allocation2 + $0xa0] sm:$0xff]  ;;  %7802 = vst.msk [vmem:[#allocation2 + $0xc8] sm:$0xff] %vm632_vm3, %v7770_v9  ;;  %v11425_v34 = vld [vmem:[#allocation3 + $0xe9] sm:$0xff]  ;;  %v11428_v9 = vld [vmem:[#allocation3 + $0x111] sm:$0xff] }
 0x3bf   : > { %v8217_v20 = vadd.f32 %v19630_v53, %v7862_v19  ;;  %7801 = vst.msk [vmem:[#allocation2 + $0xc0] sm:$0xff] %vm632_vm3, %v7769_v50  ;;  %v16272_v45 = vpop.f32.mrb[26].mxu0  ;;  %v19694_v35 = vld [vmem:[#allocation4 + $0x29] sm:$0xff]  ;;  %v12619_v53 = vmax.f32 %v19677_v52, %v19658_v28  ;;  %v12526_v28 = vld [vmem:[#allocation4 + $0x31] sm:$0xff] }
 0x3c0   : > { %v19692_v51 = vpop.f32.mrb[26].mxu1  ;;  %v19696_v46 = vld [vmem:[#allocation4 + $0x49] sm:$0xff]  ;;  %8250 = vst.msk [vmem:[#allocation2 + $0xa8] sm:$0xff] %vm632_vm3, %v8218_v10  ;;  %v7772_v17 = vadd.f32 %v16272_v45, %v7417_v40  ;;  %v7716_v27 = vpop.f32.mrb[27].mxu0  ;;  %16638 = vmatmul.mubr.msk.f32.gmra.mrb[132].mxu0 %vm310_vm0, %v10973_v55  ;;  %v19715_v24 = vmax.f32 %v12493_v22, %v19694_v35  ;;  %v7421_v55 = vld [vmem:[#allocation2 + $0xf8] sm:$0xff] }
 0x3c1   : > { %v19699_v39 = vpop.f32.mrb[27].mxu1  ;;  %16688 = vmatmul.mubr.msk.f32.gmra.mrb[132].mxu1 %vm310_vm0, %v11424_v48  ;;  %v12430_v57 = vld [vmem:[#allocation4 + $0x2f] sm:$0xff]  ;;  %8249 = vst.msk [vmem:[#allocation2 + $0xa0] sm:$0xff] %vm632_vm3, %v8217_v20  ;;  %v7865_v58 = vld [vmem:[#allocation2 + $0xb8] sm:$0xff]  ;;  %v7771_v33 = vadd.f32 %v7716_v27, %v7416_v36  ;;  %16640 = vmatprep.mubr.msk.f32.mxu0 %vm310_vm0, %v10974_v25  ;;  %v19718_v8 = vmax.f32 %v12495_v38, %v19696_v46  ;;  %v19726_v12 = vld [vmem:[#allocation4 + $0x67] sm:$0xff] }
 0x3c2   : > { %16690 = vmatprep.mubr.msk.f32.mxu1 %vm310_vm0, %v11425_v34  ;;  %v8220_v37 = vadd.f32 %v19643_v56, %v7865_v58  ;;  %v7864_v2 = vld [vmem:[#allocation2 + $0xb0] sm:$0xff]  ;;  %7804 = vst.msk [vmem:[#allocation2 + $0xd8] sm:$0xff] %vm632_vm3, %v7772_v17  ;;  %v10976_v7 = vld [vmem:[#allocation3 + $0x108] sm:$0xff]  ;;  %v12494_v61 = vmax.f32 %v12430_v57, %v12462_v59  ;;  %v12621_v52 = vmax.f32 %v19715_v24, %v19666_v47 }
 0x3c3   : > { %v11427_v4 = vld [vmem:[#allocation3 + $0x109] sm:$0xff]  ;;  %v8219_v31 = vadd.f32 %v19646_v30, %v7864_v2  ;;  %7803 = vst.msk [vmem:[#allocation2 + $0xd0] sm:$0xff] %vm632_vm3, %v7771_v33  ;;  %v16275_v49 = vpop.f32.mrb[28].mxu0  ;;  %v19734_v30 = vmax.f32 %v12619_v53, %v19664_v43  ;;  %v12623_v1 = vmax.f32 %v19718_v8, %v19726_v12  ;;  %v19756_v10 = vld [vmem:[#allocation4 + $0x51] sm:$0xff] }
 0x3c4   : > { %v19712_v14 = vld [vmem:[#allocation4 + $0x4f] sm:$0xff]  ;;  %v19722_v56 = vpop.f32.mrb[28].mxu1  ;;  %8252 = vst.msk [vmem:[#allocation2 + $0xb8] sm:$0xff] %vm632_vm3, %v8220_v37  ;;  %v7726_v60 = vpop.f32.mrb[29].mxu0  ;;  %16641 = vmatmul.mubr.msk.f32.gmra.mrb[134].mxu0 %vm310_vm0, %v10975_v41  ;;  %v19760_v25 = vmax.f32 %v12494_v61, %v12526_v28  ;;  %v19783_v33 = vmax.f32 %v12621_v52, %v19668_v0  ;;  %v8293_v61 = vld [vmem:[#allocation2] sm:$0xff] }
 0x3c5   : > { %v7419_v32 = vld [vmem:[#allocation2 + $0xe8] sm:$0xff]  ;;  %v19729_v13 = vpop.f32.mrb[29].mxu1  ;;  %16691 = vmatmul.mubr.msk.f32.gmra.mrb[134].mxu1 %vm310_vm0, %v11426_v6  ;;  %8251 = vst.msk [vmem:[#allocation2 + $0xb0] sm:$0xff] %vm632_vm3, %v8219_v31  ;;  %v7773_v29 = vadd.f32 %v7726_v60, %v7418_v11  ;;  %16643 = vmatprep.mubr.msk.f32.mxu0 %vm310_vm0, %v10976_v7  ;;  %v10977_v18 = vld [vmem:[#allocation3 + $0x110] sm:$0xff]  ;;  %v19742_v42 = vmax.f32 %v12748_v54, %v19712_v14 }
 0x3c6   : > { %v7774_v63 = vadd.f32 %v16275_v49, %v7419_v32  ;;  %v19736_v62 = vld [vmem:[#allocation4 + $0x68] sm:$0xff]  ;;  %16693 = vmatprep.mubr.msk.f32.mxu1 %vm310_vm0, %v11427_v4  ;;  %v7866_v43 = vld [vmem:[#allocation2 + $0xc0] sm:$0xff]  ;;  %v12496_v15 = vmax.f32 %v19712_v14, %v19724_v44  ;;  %v7420_v38 = vld [vmem:[#allocation2 + $0xf0] sm:$0xff]  ;;  %v12747_v40 = vmax.f32 %v19734_v30, %v19694_v35  ;;  %v12622_v31 = vmax.f32 %v19760_v25, %v19712_v14 }
 0x3c7   : > { %v7867_v16 = vld [vmem:[#allocation2 + $0xc8] sm:$0xff]  ;;  %v8221_v50 = vadd.f32 %v19673_v5, %v7866_v43  ;;  %7805 = vst.msk [vmem:[#allocation2 + $0xe0] sm:$0xff] %vm632_vm3, %v7773_v29  ;;  %v12497_v34 = vmax.f32 %v19726_v12, %v19736_v62  ;;  %v19773_v17 = vld [vmem:[#allocation4 + $0x70] sm:$0xff]  ;;  %v12877_v59 = vmax.f32 %v19742_v42, %v19724_v44  ;;  %v19786_v41 = vmax.f32 %v12623_v1, %v19736_v62 }
 0x3c8   : > { %v8222_v3 = vadd.f32 %v19662_v21, %v7867_v16  ;;  %7806 = vst.msk [vmem:[#allocation2 + $0xe8] sm:$0xff] %vm632_vm3, %v7774_v63  ;;  %v10978_v23 = vld [vmem:[#allocation3 + $0x128] sm:$0xff]  ;;  %v16278_v21 = vpop.f32.mrb[30].mxu0  ;;  %v19754_v48 = vpop.f32.mrb[30].mxu1  ;;  %16644 = vmatmul.mubr.msk.f32.gmra.mrb[136].mxu0 %vm310_vm0, %v10977_v18  ;;  %v10979_v53 = vld [vmem:[#allocation3 + $0x130] sm:$0xff]  ;;  %v19793_v37 = vmax.f32 %v12496_v15, %v19756_v10  ;;  %v19812_v60 = vmax.f32 %v12747_v40, %v19666_v47 }
 0x3c9   : > { %v11429_v26 = vld [vmem:[#allocation3 + $0x129] sm:$0xff]  ;;  %v7776_v22 = vadd.f32 %v16278_v21, %v7421_v55  ;;  %v7736_v5 = vpop.f32.mrb[31].mxu0  ;;  %16694 = vmatmul.mubr.msk.f32.gmra.mrb[136].mxu1 %vm310_vm0, %v11428_v9  ;;  %v19767_v20 = vpop.f32.mrb[31].mxu1  ;;  %8253 = vst.msk [vmem:[#allocation2 + $0xc0] sm:$0xff] %vm632_vm3, %v8221_v50  ;;  %v7869_v36 = vld [vmem:[#allocation2 + $0xd8] sm:$0xff]  ;;  %16646 = vmatprep.mubr.msk.f32.mxu0 %vm310_vm0, %v10978_v23  ;;  %v19822_v29 = vmax.f32 %v12877_v59, %v19756_v10 }
 0x3ca   : > { %v19758_v19 = vld [vmem:[#allocation4 + $0x69] sm:$0xff]  ;;  %8254 = vst.msk [vmem:[#allocation2 + $0xc8] sm:$0xff] %vm632_vm3, %v8222_v3  ;;  %v7775_v27 = vadd.f32 %v7736_v5, %v7420_v38  ;;  %16696 = vmatprep.mubr.msk.f32.mxu1 %vm310_vm0, %v11429_v26  ;;  %v11430_v57 = vld [vmem:[#allocation3 + $0x131] sm:$0xff]  ;;  %v8224_v58 = vadd.f32 %v19692_v51, %v7869_v36  ;;  %v12749_v43 = vmax.f32 %v19783_v33, %v19696_v46 }
 0x3cb   : > { %v19771_v45 = vld [vmem:[#allocation4 + $0x6f] sm:$0xff]  ;;  %7808 = vst.msk [vmem:[#allocation2 + $0xf8] sm:$0xff] %vm632_vm3, %v7776_v22  ;;  %v19788_v6 = vld [vmem:[#allocation4 + $0x87] sm:$0xff]  ;;  %v16333_v7 = vpop.f32.mrb[32].mxu0  ;;  %v19802_v32 = vmax.f32 %v12497_v34, %v19758_v19  ;;  %v12751_v23 = vmax.f32 %v19786_v41, %v19758_v19  ;;  %v19847_v34 = vmax.f32 %v12622_v31, %v19724_v44 }
 0x3cc   : > { %v7868_v35 = vld [vmem:[#allocation2 + $0xd0] sm:$0xff]  ;;  %v19790_v54 = vld [vmem:[#allocation4 + $0x88] sm:$0xff]  ;;  %7807 = vst.msk [vmem:[#allocation2 + $0xf0] sm:$0xff] %vm632_vm3, %v7775_v27  ;;  %v19797_v4 = vpop.f32.mrb[32].mxu1  ;;  %v12498_v49 = vmax.f32 %v19771_v45, %v19773_v17  ;;  %8256 = vst.msk [vmem:[#allocation2 + $0xd8] sm:$0xff] %vm632_vm3, %v8224_v58  ;;  %v8489_v63 = vpop.f32.mrb[33].mxu0  ;;  %16647 = vmatmul.mubr.msk.f32.gmra.mrb[138].mxu0 %vm310_vm0, %v10979_v53  ;;  %v12624_v26 = vmax.f32 %v19793_v37, %v19771_v45  ;;  %v12876_v53 = vmax.f32 %v19812_v60, %v19668_v0 }
 0x3cd   : > { %v8223_v2 = vadd.f32 %v19699_v39, %v7868_v35  ;;  %v8294_v51 = vld [vmem:[#allocation2 + $0x8] sm:$0xff]  ;;  %v19807_v11 = vpop.f32.mrb[33].mxu1  ;;  %16697 = vmatmul.mubr.msk.f32.gmra.mrb[138].mxu1 %vm310_vm0, %v11430_v57  ;;  %v19814_v14 = vld [vmem:[#allocation4 + $0x71] sm:$0xff]  ;;  %v8648_v16 = vadd.f32 %v8489_v63, %v8293_v61  ;;  %v12499_v47 = vmax.f32 %v19788_v6, %v19790_v54  ;;  %v12625_v22 = vmax.f32 %v19802_v32, %v19788_v6 }
 0x3ce   : > { %v10980_v24 = vld [vmem:[#allocation3 + $0x148] sm:$0xff]  ;;  %v8649_v39 = vadd.f32 %v16333_v7, %v8294_v51  ;;  %v19826_v9 = vld [vmem:[#allocation4 + $0x90] sm:$0xff]  ;;  %v7870_v3 = vld [vmem:[#allocation2 + $0xe0] sm:$0xff]  ;;  %v19852_v38 = vmax.f32 %v12498_v49, %v19814_v14  ;;  %v19876_v7 = vmax.f32 %v12749_v43, %v19726_v12  ;;  %v12750_v12 = vmax.f32 %v19847_v34, %v19756_v10 }
 0x3cf   : > { %v11431_v8 = vld [vmem:[#allocation3 + $0x149] sm:$0xff]  ;;  %8255 = vst.msk [vmem:[#allocation2 + $0xd0] sm:$0xff] %vm632_vm3, %v8223_v2  ;;  %16649 = vmatprep.mubr.msk.f32.mxu0 %vm310_vm0, %v10980_v24  ;;  %v8225_v15 = vadd.f32 %v19729_v13, %v7870_v3  ;;  %8680 = vst.msk [vmem:[#allocation2] sm:$0xff] %vm632_vm3, %v8648_v16  ;;  %v16336_v50 = vpop.f32.mrb[34].mxu0  ;;  %v11432_v25 = vld [vmem:[#allocation3 + $0x151] sm:$0xff]  ;;  %v19879_v24 = vmax.f32 %v12751_v23, %v19788_v6  ;;  %v19893_v61 = vmax.f32 %v12625_v22, %v19790_v54 }
 0x3d0   : > { %v19816_v30 = vld [vmem:[#allocation4 + $0x89] sm:$0xff]  ;;  %16699 = vmatprep.mubr.msk.f32.mxu1 %vm310_vm0, %v11431_v8  ;;  %8681 = vst.msk [vmem:[#allocation2 + $0x8] sm:$0xff] %vm632_vm3, %v8649_v39  ;;  %v19844_v55 = vpop.f32.mrb[34].mxu1  ;;  %v8499_v40 = vpop.f32.mrb[35].mxu0  ;;  %v19866_v33 = vld [vmem:[#allocation4 + $0x91] sm:$0xff]  ;;  %v19882_v8 = vmax.f32 %v12624_v26, %v19773_v17  ;;  %v19907_v3 = vmax.f32 %v12876_v53, %v19696_v46 }
 0x3d1   : > { %v7871_v28 = vld [vmem:[#allocation2 + $0xe8] sm:$0xff]  ;;  %v10981_v21 = vld [vmem:[#allocation3 + $0x150] sm:$0xff]  ;;  %v19855_v36 = vpop.f32.mrb[35].mxu1  ;;  %16700 = vmatmul.mubr.msk.f32.gmra.mrb[140].mxu1 %vm310_vm0, %v11432_v25  ;;  %8257 = vst.msk [vmem:[#allocation2 + $0xe0] sm:$0xff] %vm632_vm3, %v8225_v15  ;;  %v19869_v41 = vmax.f32 %v12499_v47, %v19816_v30  ;;  %v12878_v25 = vmax.f32 %v19876_v7, %v19736_v62  ;;  %v12753_v62 = vmax.f32 %v19893_v61, %v19816_v30 }
 0x3d2   : > { %v19824_v18 = vld [vmem:[#allocation4 + $0x8f] sm:$0xff]  ;;  %v8226_v42 = vadd.f32 %v19722_v56, %v7871_v28  ;;  %v19838_v52 = vld [vmem:[#allocation4 + $0xa7] sm:$0xff]  ;;  %v8296_v56 = vld [vmem:[#allocation2 + $0x18] sm:$0xff]  ;;  %16650 = vmatmul.mubr.msk.f32.gmra.mrb[140].mxu0 %vm310_vm0, %v10981_v21  ;;  %v12752_v34 = vmax.f32 %v19882_v8, %v19814_v14 }
 0x3d3   : > { %v19840_v1 = vld [vmem:[#allocation4 + $0xa8] sm:$0xff]  ;;  %v8651_v13 = vadd.f32 %v16336_v50, %v8296_v56  ;;  %v8295_v5 = vld [vmem:[#allocation2 + $0x10] sm:$0xff]  ;;  %v12500_v57 = vmax.f32 %v19824_v18, %v19826_v9  ;;  %v7873_v59 = vld [vmem:[#allocation2 + $0xf8] sm:$0xff]  ;;  %v16339_v49 = vpop.f32.mrb[36].mxu0  ;;  %v12626_v6 = vmax.f32 %v19852_v38, %v19824_v18  ;;  %v12627_v15 = vmax.f32 %v19869_v41, %v19838_v52 }
 0x3d4   : > { %8258 = vst.msk [vmem:[#allocation2 + $0xe8] sm:$0xff] %vm632_vm3, %v8226_v42  ;;  %v10982_v27 = vld [vmem:[#allocation3 + $0x168] sm:$0xff]  ;;  %v8650_v58 = vadd.f32 %v8499_v40, %v8295_v5  ;;  %v10983_v35 = vld [vmem:[#allocation3 + $0x170] sm:$0xff]  ;;  %v12501_v0 = vmax.f32 %v19838_v52, %v19840_v1  ;;  %v8228_v37 = vadd.f32 %v19754_v48, %v7873_v59  ;;  %v19888_v39 = vpop.f32.mrb[36].mxu1  ;;  %v8297_v28 = vld [vmem:[#allocation2 + $0x20] sm:$0xff]  ;;  %v8509_v16 = vpop.f32.mrb[37].mxu0 }
 0x3d5   : > { %v11433_v44 = vld [vmem:[#allocation3 + $0x169] sm:$0xff]  ;;  %16652 = vmatprep.mubr.msk.f32.mxu0 %vm310_vm0, %v10982_v27  ;;  %8683 = vst.msk [vmem:[#allocation2 + $0x18] sm:$0xff] %vm632_vm3, %v8651_v13  ;;  %v11434_v51 = vld [vmem:[#allocation3 + $0x171] sm:$0xff]  ;;  %v19902_v47 = vpop.f32.mrb[37].mxu1  ;;  %v19910_v43 = vmax.f32 %v12500_v57, %v19866_v33  ;;  %v8652_v26 = vadd.f32 %v8509_v16, %v8297_v28  ;;  %v19940_v53 = vmax.f32 %v12626_v6, %v19826_v9 }
 0x3d6   : > { %16702 = vmatprep.mubr.msk.f32.mxu1 %vm310_vm0, %v11433_v44  ;;  %v7872_v2 = vld [vmem:[#allocation2 + $0xf0] sm:$0xff]  ;;  %8682 = vst.msk [vmem:[#allocation2 + $0x10] sm:$0xff] %vm632_vm3, %v8650_v58  ;;  %v8298_v48 = vld [vmem:[#allocation2 + $0x28] sm:$0xff]  ;;  %8260 = vst.msk [vmem:[#allocation2 + $0xf8] sm:$0xff] %vm632_vm3, %v8228_v37  ;;  %16653 = vmatmul.mubr.msk.f32.gmra.mrb[142].mxu0 %vm310_vm0, %v10983_v35  ;;  %v19935_v44 = vmax.f32 %v12750_v12, %v19771_v45  ;;  %v19957_v7 = vmax.f32 %v12627_v15, %v19840_v1 }
 0x3d7   : > { %v19884_v31 = vld [vmem:[#allocation4 + $0xa9] sm:$0xff]  ;;  %v8227_v32 = vadd.f32 %v19767_v20, %v7872_v2  ;;  %v8653_v20 = vadd.f32 %v16339_v49, %v8298_v48  ;;  %16703 = vmatmul.mubr.msk.f32.gmra.mrb[142].mxu1 %vm310_vm0, %v11434_v51  ;;  %v8744_v50 = vld [vmem:[#allocation2] sm:$0xff]  ;;  %8684 = vst.msk [vmem:[#allocation2 + $0x20] sm:$0xff] %vm632_vm3, %v8652_v26  ;;  %v16342_v5 = vpop.f32.mrb[38].mxu0  ;;  %v11436_v27 = vld [vmem:[#allocation3 + $0x191] sm:$0xff]  ;;  %v19966_v49 = vmax.f32 %v12878_v25, %v19758_v19 }
 0x3d8   : > { %v19897_v63 = vld [vmem:[#allocation4 + $0xaf] sm:$0xff]  ;;  %v19918_v56 = vmax.f32 %v12501_v0, %v19884_v31  ;;  %v19926_v22 = vld [vmem:[#allocation4 + $0xc7] sm:$0xff]  ;;  %v9099_v13 = vadd.f32 %v19807_v11, %v8744_v50  ;;  %v19932_v40 = vpop.f32.mrb[38].mxu1  ;;  %v8519_v58 = vpop.f32.mrb[39].mxu0  ;;  %v12880_v0 = vmax.f32 %v19879_v24, %v19790_v54  ;;  %v19969_v12 = vmax.f32 %v12752_v34, %v19824_v18 }
 0x3d9   : > { %v19899_v60 = vld [vmem:[#allocation4 + $0xb0] sm:$0xff]  ;;  %v10984_v10 = vld [vmem:[#allocation3 + $0x188] sm:$0xff]  ;;  %8259 = vst.msk [vmem:[#allocation2 + $0xf0] sm:$0xff] %vm632_vm3, %v8227_v32  ;;  %8685 = vst.msk [vmem:[#allocation2 + $0x28] sm:$0xff] %vm632_vm3, %v8653_v20  ;;  %v19945_v35 = vpop.f32.mrb[39].mxu1  ;;  %v12628_v37 = vmax.f32 %v19910_v43, %v19897_v63  ;;  %v19981_v19 = vmax.f32 %v12753_v62, %v19838_v52  ;;  %v12754_v18 = vmax.f32 %v19940_v53, %v19866_v33 }
 0x3da   : > { %v11435_v42 = vld [vmem:[#allocation3 + $0x189] sm:$0xff]  ;;  %16655 = vmatprep.mubr.msk.f32.mxu0 %vm310_vm0, %v10984_v10  ;;  %v12502_v38 = vmax.f32 %v19897_v63, %v19899_v60  ;;  %v19942_v57 = vld [vmem:[#allocation4 + $0xb1] sm:$0xff]  ;;  %9131 = vst.msk [vmem:[#allocation2] sm:$0xff] %vm632_vm3, %v9099_v13  ;;  %v12629_v32 = vmax.f32 %v19918_v56, %v19926_v22  ;;  %v12879_v10 = vmax.f32 %v19935_v44, %v19773_v17  ;;  %v8301_v43 = vld [vmem:[#allocation2 + $0x40] sm:$0xff] }
 0x3db   : > { %v8745_v23 = vld [vmem:[#allocation2 + $0x8] sm:$0xff]  ;;  %16705 = vmatprep.mubr.msk.f32.mxu1 %vm310_vm0, %v11435_v42  ;;  %v10985_v21 = vld [vmem:[#allocation3 + $0x190] sm:$0xff]  ;;  %v16345_v28 = vpop.f32.mrb[40].mxu0  ;;  %v19993_v52 = vmax.f32 %v12628_v37, %v19899_v60  ;;  %v12755_v25 = vmax.f32 %v19957_v7, %v19884_v31  ;;  %v20010_v44 = vmax.f32 %v12880_v0, %v19816_v30  ;;  %v12881_v62 = vmax.f32 %v19969_v12, %v19826_v9 }
 0x3dc   : > { %v9100_v46 = vadd.f32 %v19797_v4, %v8745_v23  ;;  %v8300_v4 = vld [vmem:[#allocation2 + $0x38] sm:$0xff]  ;;  %v8299_v59 = vld [vmem:[#allocation2 + $0x30] sm:$0xff]  ;;  %16656 = vmatmul.mubr.msk.f32.gmra.mrb[144].mxu0 %vm310_vm0, %v10985_v21  ;;  %16706 = vmatmul.mubr.msk.f32.gmra.mrb[144].mxu1 %vm310_vm0, %v11436_v27  ;;  %v10986_v45 = vld [vmem:[#allocation3 + $0x1a8] sm:$0xff]  ;;  %v19972_v61 = vmax.f32 %v12502_v38, %v19942_v57  ;;  %v8529_v23 = vpop.f32.mrb[41].mxu0  ;;  %v12882_v30 = vmax.f32 %v19981_v19, %v19840_v1 }
 0x3dd   : > { %v8655_v11 = vadd.f32 %v16342_v5, %v8300_v4  ;;  %v11437_v41 = vld [vmem:[#allocation3 + $0x1a9] sm:$0xff]  ;;  %v8747_v2 = vld [vmem:[#allocation2 + $0x18] sm:$0xff]  ;;  %v8654_v51 = vadd.f32 %v8519_v58, %v8299_v59  ;;  %16658 = vmatprep.mubr.msk.f32.mxu0 %vm310_vm0, %v10986_v45  ;;  %v8656_v50 = vadd.f32 %v8529_v23, %v8301_v43  ;;  %v20026_v9 = vmax.f32 %v12754_v18, %v19897_v63 }
 0x3de   : > { %9132 = vst.msk [vmem:[#allocation2 + $0x8] sm:$0xff] %vm632_vm3, %v9100_v46  ;;  %16708 = vmatprep.mubr.msk.f32.mxu1 %vm310_vm0, %v11437_v41  ;;  %v19959_v8 = vld [vmem:[#allocation4 + $0xc8] sm:$0xff]  ;;  %v9102_v54 = vadd.f32 %v19844_v55, %v8747_v2  ;;  %v8746_v24 = vld [vmem:[#allocation2 + $0x10] sm:$0xff]  ;;  %v19976_v55 = vpop.f32.mrb[40].mxu1  ;;  %v8748_v4 = vld [vmem:[#allocation2 + $0x20] sm:$0xff]  ;;  %v20021_v41 = vmax.f32 %v12879_v10, %v19814_v14  ;;  %v12756_v14 = vmax.f32 %v19993_v52, %v19942_v57 }
 0x3df   : > { %8687 = vst.msk [vmem:[#allocation2 + $0x38] sm:$0xff] %vm632_vm3, %v8655_v11  ;;  %v10987_v48 = vld [vmem:[#allocation3 + $0x1b0] sm:$0xff]  ;;  %v9101_v6 = vadd.f32 %v19855_v36, %v8746_v24  ;;  %8686 = vst.msk [vmem:[#allocation2 + $0x30] sm:$0xff] %vm632_vm3, %v8654_v51  ;;  %v8302_v20 = vld [vmem:[#allocation2 + $0x48] sm:$0xff]  ;;  %v19988_v26 = vpop.f32.mrb[41].mxu1  ;;  %v12503_v56 = vmax.f32 %v19926_v22, %v19959_v8  ;;  %v20005_v38 = vmax.f32 %v12629_v32, %v19959_v8 }
 0x3e0   : > { %v11438_v16 = vld [vmem:[#allocation3 + $0x1b1] sm:$0xff]  ;;  %9134 = vst.msk [vmem:[#allocation2 + $0x18] sm:$0xff] %vm632_vm3, %v9102_v54  ;;  %v8657_v36 = vadd.f32 %v16345_v28, %v8302_v20  ;;  %16659 = vmatmul.mubr.msk.f32.gmra.mrb[146].mxu0 %vm310_vm0, %v10987_v48  ;;  %v10988_v17 = vld [vmem:[#allocation3 + $0x1c8] sm:$0xff]  ;;  %v9103_v11 = vadd.f32 %v19902_v47, %v8748_v4  ;;  %8688 = vst.msk [vmem:[#allocation2 + $0x40] sm:$0xff] %vm632_vm3, %v8656_v50  ;;  %v20018_v58 = vpop.f32.mrb[42].mxu1  ;;  %v20048_v12 = vmax.f32 %v12755_v25, %v19926_v22 }
 0x3e1   : > { %v19985_v42 = vld [vmem:[#allocation4 + $0xcf] sm:$0xff]  ;;  %16709 = vmatmul.mubr.msk.f32.gmra.mrb[146].mxu1 %vm310_vm0, %v11438_v16  ;;  %9133 = vst.msk [vmem:[#allocation2 + $0x10] sm:$0xff] %vm632_vm3, %v9101_v6  ;;  %16661 = vmatprep.mubr.msk.f32.mxu0 %vm310_vm0, %v10988_v17  ;;  %v8304_v59 = vld [vmem:[#allocation2 + $0x58] sm:$0xff]  ;;  %v20031_v51 = vpop.f32.mrb[43].mxu1  ;;  %v20037_v1 = vld [vmem:[#allocation4 + $0xe7] sm:$0xff]  ;;  %v20055_v10 = vmax.f32 %v12881_v62, %v19866_v33  ;;  %v20071_v33 = vmax.f32 %v12882_v30, %v19884_v31 }
 0x3e2   : > { %v11439_v15 = vld [vmem:[#allocation3 + $0x1c9] sm:$0xff]  ;;  %8689 = vst.msk [vmem:[#allocation2 + $0x48] sm:$0xff] %vm632_vm3, %v8657_v36  ;;  %v11440_v5 = vld [vmem:[#allocation3 + $0x1d1] sm:$0xff]  ;;  %v12630_v53 = vmax.f32 %v19972_v61, %v19985_v42  ;;  %9135 = vst.msk [vmem:[#allocation2 + $0x20] sm:$0xff] %vm632_vm3, %v9103_v11  ;;  %v20087_v31 = vmax.f32 %v12756_v14, %v19985_v42 }
 0x3e3   : > { %v8749_v46 = vld [vmem:[#allocation2 + $0x28] sm:$0xff]  ;;  %16711 = vmatprep.mubr.msk.f32.mxu1 %vm310_vm0, %v11439_v15  ;;  %v10989_v21 = vld [vmem:[#allocation3 + $0x1d0] sm:$0xff]  ;;  %v12883_v15 = vmax.f32 %v20026_v9, %v19899_v60  ;;  %v8305_v50 = vld [vmem:[#allocation2 + $0x60] sm:$0xff] }
 0x3e4   : > { %v20002_v34 = vld [vmem:[#allocation4 + $0xc9] sm:$0xff]  ;;  %v9104_v13 = vadd.f32 %v19888_v39, %v8749_v46  ;;  %v16348_v39 = vpop.f32.mrb[42].mxu0  ;;  %16662 = vmatmul.mubr.msk.f32.gmra.mrb[148].mxu0 %vm310_vm0, %v10989_v21  ;;  %v11442_v48 = vld [vmem:[#allocation3 + $0x1f1] sm:$0xff]  ;;  %v20068_v17 = vpop.f32.mrb[44].mxu1 }
 0x3e5   : > { %v10990_v27 = vld [vmem:[#allocation3 + $0x1e8] sm:$0xff]  ;;  %v20028_v0 = vld [vmem:[#allocation4 + $0xd0] sm:$0xff]  ;;  %v8659_v47 = vadd.f32 %v16348_v39, %v8304_v59  ;;  %v8539_v2 = vpop.f32.mrb[43].mxu0  ;;  %16712 = vmatmul.mubr.msk.f32.gmra.mrb[148].mxu1 %vm310_vm0, %v11440_v5  ;;  %v20042_v7 = vmax.f32 %v12503_v56, %v20002_v34  ;;  %v12757_v61 = vmax.f32 %v20005_v38, %v20002_v34  ;;  %v20082_v25 = vpop.f32.mrb[45].mxu1  ;;  %v20117_v14 = vmax.f32 %v12883_v15, %v19942_v57 }
 0x3e6   : > { %v11441_v45 = vld [vmem:[#allocation3 + $0x1e9] sm:$0xff]  ;;  %9136 = vst.msk [vmem:[#allocation2 + $0x28] sm:$0xff] %vm632_vm3, %v9104_v13  ;;  %v8751_v32 = vld [vmem:[#allocation2 + $0x38] sm:$0xff]  ;;  %16664 = vmatprep.mubr.msk.f32.mxu0 %vm310_vm0, %v10990_v27  ;;  %v20062_v22 = vmax.f32 %v12630_v53, %v20028_v0  ;;  %v12504_v36 = vmax.f32 %v19985_v42, %v20028_v0  ;;  %v16351_v23 = vpop.f32.mrb[44].mxu0  ;;  %v12884_v42 = vmax.f32 %v20048_v12, %v19959_v8 }
 0x3e7   : > { %v8303_v37 = vld [vmem:[#allocation2 + $0x50] sm:$0xff]  ;;  %v20039_v63 = vld [vmem:[#allocation4 + $0xe8] sm:$0xff]  ;;  %16714 = vmatprep.mubr.msk.f32.mxu1 %vm310_vm0, %v11441_v45  ;;  %v9106_v6 = vadd.f32 %v19932_v40, %v8751_v32  ;;  %8691 = vst.msk [vmem:[#allocation2 + $0x58] sm:$0xff] %vm632_vm3, %v8659_v47  ;;  %v8549_v21 = vpop.f32.mrb[45].mxu0  ;;  %v12631_v60 = vmax.f32 %v20042_v7, %v20037_v1  ;;  %v20101_v53 = vmax.f32 %v12757_v61, %v20037_v1  ;;  %v8752_v59 = vld [vmem:[#allocation2 + $0x40] sm:$0xff] }
 0x3e8   : > { %v8658_v54 = vadd.f32 %v8539_v2, %v8303_v37  ;;  %v10991_v24 = vld [vmem:[#allocation3 + $0x1f0] sm:$0xff]  ;;  %v10992_v28 = vld [vmem:[#allocation3 + $0x208] sm:$0xff]  ;;  %v12505_v46 = vmax.f32 %v20037_v1, %v20039_v63  ;;  %v8660_v5 = vadd.f32 %v8549_v21, %v8305_v50  ;;  %v9107_v8 = vadd.f32 %v19988_v26, %v8752_v59  ;;  %v8308_v37 = vld [vmem:[#allocation2 + $0x78] sm:$0xff]  ;;  %v20114_v2 = vpop.f32.mrb[46].mxu1 }
 0x3e9   : > { %v8750_v20 = vld [vmem:[#allocation2 + $0x30] sm:$0xff]  ;;  %v8306_v43 = vld [vmem:[#allocation2 + $0x68] sm:$0xff]  ;;  %9138 = vst.msk [vmem:[#allocation2 + $0x38] sm:$0xff] %vm632_vm3, %v9106_v6  ;;  %16665 = vmatmul.mubr.msk.f32.gmra.mrb[150].mxu0 %vm310_vm0, %v10991_v24  ;;  %16715 = vmatmul.mubr.msk.f32.gmra.mrb[150].mxu1 %vm310_vm0, %v11442_v48  ;;  %v20129_v12 = vpop.f32.mrb[47].mxu1  ;;  %v12885_v57 = vmax.f32 %v20087_v31, %v20028_v0  ;;  %v20136_v61 = vmax.f32 %v12631_v60, %v20039_v63 }
 0x3ea   : > { %v11443_v16 = vld [vmem:[#allocation3 + $0x209] sm:$0xff]  ;;  %v20057_v19 = vld [vmem:[#allocation4 + $0xd1] sm:$0xff]  ;;  %v9105_v40 = vadd.f32 %v19945_v35, %v8750_v20  ;;  %8690 = vst.msk [vmem:[#allocation2 + $0x50] sm:$0xff] %vm632_vm3, %v8658_v54  ;;  %v8661_v35 = vadd.f32 %v16351_v23, %v8306_v43  ;;  %16667 = vmatprep.mubr.msk.f32.mxu0 %vm310_vm0, %v10992_v28  ;;  %8692 = vst.msk [vmem:[#allocation2 + $0x60] sm:$0xff] %vm632_vm3, %v8660_v5  ;;  %v20146_v0 = vmax.f32 %v12884_v42, %v20002_v34 }
 0x3eb   : > { %v20059_v18 = vld [vmem:[#allocation4 + $0xe9] sm:$0xff]  ;;  %16717 = vmatprep.mubr.msk.f32.mxu1 %vm310_vm0, %v11443_v16  ;;  %v11444_v62 = vld [vmem:[#allocation3 + $0x211] sm:$0xff]  ;;  %v12758_v30 = vmax.f32 %v20062_v22, %v20057_v19  ;;  %v20108_v9 = vmax.f32 %v12504_v36, %v20057_v19  ;;  %9139 = vst.msk [vmem:[#allocation2 + $0x40] sm:$0xff] %vm632_vm3, %v9107_v8  ;;  %v12886_v23 = vmax.f32 %v20101_v53, %v20039_v63  ;;  %v8309_v53 = vld [vmem:[#allocation2 + $0x80] sm:$0xff] }
 0x3ec   : > { %v20075_v52 = vld [vmem:[#allocation4 + $0xef] sm:$0xff]  ;;  %v20091_v38 = vld [vmem:[#allocation4 + $0x107] sm:$0xff]  ;;  %9137 = vst.msk [vmem:[#allocation2 + $0x30] sm:$0xff] %vm632_vm3, %v9105_v40  ;;  %8693 = vst.msk [vmem:[#allocation2 + $0x68] sm:$0xff] %vm632_vm3, %v8661_v35  ;;  %v20124_v32 = vmax.f32 %v12505_v46, %v20059_v18 }
 0x3ed   : > { %v20077_v56 = vld [vmem:[#allocation4 + $0xf0] sm:$0xff]  ;;  %v20093_v13 = vld [vmem:[#allocation4 + $0x108] sm:$0xff]  ;;  %16718 = vmatmul.mubr.msk.f32.gmra.mrb[152].mxu1 %vm310_vm0, %v11444_v62  ;;  %v20153_v35 = vmax.f32 %v12758_v30, %v20075_v52  ;;  %v12632_v50 = vmax.f32 %v20108_v9, %v20075_v52  ;;  %v20181_v30 = vmax.f32 %v12885_v57, %v20057_v19  ;;  %v12759_v9 = vmax.f32 %v20136_v61, %v20059_v18 }
 0x3ee   : > { %v8753_v4 = vld [vmem:[#allocation2 + $0x48] sm:$0xff]  ;;  %v10993_v27 = vld [vmem:[#allocation3 + $0x210] sm:$0xff]  ;;  %v12506_v47 = vmax.f32 %v20075_v52, %v20077_v56  ;;  %v12507_v54 = vmax.f32 %v20091_v38, %v20093_v13  ;;  %v8755_v28 = vld [vmem:[#allocation2 + $0x58] sm:$0xff]  ;;  %v12633_v52 = vmax.f32 %v20124_v32, %v20091_v38  ;;  %v20193_v32 = vmax.f32 %v12886_v23, %v20059_v18 }
 0x3ef   : > { %v9108_v11 = vadd.f32 %v19976_v55, %v8753_v4  ;;  %v10994_v39 = vld [vmem:[#allocation3 + $0x228] sm:$0xff]  ;;  %v16354_v55 = vpop.f32.mrb[46].mxu0  ;;  %v20119_v1 = vld [vmem:[#allocation4 + $0xf1] sm:$0xff]  ;;  %16668 = vmatmul.mubr.msk.f32.gmra.mrb[152].mxu0 %vm310_vm0, %v10993_v27  ;;  %v9110_v15 = vadd.f32 %v20018_v58, %v8755_v28  ;;  %v20166_v4 = vpop.f32.mrb[48].mxu1  ;;  %v12887_v57 = vmax.f32 %v20153_v35, %v20077_v56  ;;  %v20206_v61 = vmax.f32 %v12632_v50, %v20077_v56 }
 0x3f0   : > { %v11445_v45 = vld [vmem:[#allocation3 + $0x229] sm:$0xff]  ;;  %v8663_v26 = vadd.f32 %v16354_v55, %v8308_v37  ;;  %v8559_v48 = vpop.f32.mrb[47].mxu0  ;;  %16670 = vmatprep.mubr.msk.f32.mxu0 %vm310_vm0, %v10994_v39  ;;  %v11446_v36 = vld [vmem:[#allocation3 + $0x231] sm:$0xff]  ;;  %v20162_v34 = vmax.f32 %v12506_v47, %v20119_v1  ;;  %v20176_v59 = vpop.f32.mrb[49].mxu1  ;;  %v20219_v23 = vmax.f32 %v12633_v52, %v20093_v13 }
 0x3f1   : > { %v20121_v7 = vld [vmem:[#allocation4 + $0x109] sm:$0xff]  ;;  %9140 = vst.msk [vmem:[#allocation2 + $0x48] sm:$0xff] %vm632_vm3, %v9108_v11  ;;  %16720 = vmatprep.mubr.msk.f32.mxu1 %vm310_vm0, %v11445_v45  ;;  %v16357_v60 = vpop.f32.mrb[48].mxu0  ;;  %v11448_v27 = vld [vmem:[#allocation3 + $0x251] sm:$0xff]  ;;  %9142 = vst.msk [vmem:[#allocation2 + $0x58] sm:$0xff] %vm632_vm3, %v9110_v15 }
 0x3f2   : > { %v8307_v24 = vld [vmem:[#allocation2 + $0x70] sm:$0xff]  ;;  %v10996_v40 = vld [vmem:[#allocation3 + $0x248] sm:$0xff]  ;;  %8695 = vst.msk [vmem:[#allocation2 + $0x78] sm:$0xff] %vm632_vm3, %v8663_v26  ;;  %v20171_v62 = vmax.f32 %v12507_v54, %v20121_v7  ;;  %v8569_v11 = vpop.f32.mrb[49].mxu0  ;;  %16721 = vmatmul.mubr.msk.f32.gmra.mrb[154].mxu1 %vm310_vm0, %v11446_v36 }
 0x3f3   : > { %v20138_v6 = vld [vmem:[#allocation4 + $0x10f] sm:$0xff]  ;;  %v8662_v16 = vadd.f32 %v8559_v48, %v8307_v24  ;;  %v20157_v21 = vld [vmem:[#allocation4 + $0x127] sm:$0xff]  ;;  %v8664_v55 = vadd.f32 %v8569_v11, %v8309_v53  ;;  %v16360_v36 = vpop.f32.mrb[50].mxu0  ;;  %v20253_v11 = vmax.f32 %v12887_v57, %v20119_v1 }
 0x3f4   : > { %v20140_v20 = vld [vmem:[#allocation4 + $0x110] sm:$0xff]  ;;  %v20159_v31 = vld [vmem:[#allocation4 + $0x128] sm:$0xff]  ;;  %v8756_v48 = vld [vmem:[#allocation2 + $0x60] sm:$0xff]  ;;  %v12634_v18 = vmax.f32 %v20162_v34, %v20138_v6  ;;  %v12635_v56 = vmax.f32 %v20171_v62, %v20157_v21  ;;  %v8579_v35 = vpop.f32.mrb[51].mxu0 }
 0x3f5   : > { %v10995_v22 = vld [vmem:[#allocation3 + $0x230] sm:$0xff]  ;;  %8694 = vst.msk [vmem:[#allocation2 + $0x70] sm:$0xff] %vm632_vm3, %v8662_v16  ;;  %v8310_v58 = vld [vmem:[#allocation2 + $0x88] sm:$0xff]  ;;  %v12508_v42 = vmax.f32 %v20138_v6, %v20140_v20  ;;  %v12509_v26 = vmax.f32 %v20157_v21, %v20159_v31  ;;  %8696 = vst.msk [vmem:[#allocation2 + $0x80] sm:$0xff] %vm632_vm3, %v8664_v55 }
 0x3f6   : > { %v11447_v43 = vld [vmem:[#allocation3 + $0x249] sm:$0xff]  ;;  %16671 = vmatmul.mubr.msk.f32.gmra.mrb[154].mxu0 %vm310_vm0, %v10995_v22  ;;  %v20185_v47 = vld [vmem:[#allocation4 + $0x111] sm:$0xff]  ;;  %v9111_v22 = vadd.f32 %v20082_v25, %v8756_v48  ;;  %v20269_v48 = vmax.f32 %v12635_v56, %v20159_v31 }
 0x3f7   : > { %v8754_v46 = vld [vmem:[#allocation2 + $0x50] sm:$0xff]  ;;  %v10998_v39 = vld [vmem:[#allocation3 + $0x268] sm:$0xff]  ;;  %16673 = vmatprep.mubr.msk.f32.mxu0 %vm310_vm0, %v10996_v40  ;;  %16723 = vmatprep.mubr.msk.f32.mxu1 %vm310_vm0, %v11447_v43  ;;  %v20216_v40 = vpop.f32.mrb[50].mxu1  ;;  %v20224_v15 = vmax.f32 %v12508_v42, %v20185_v47 }
 0x3f8   : > { %v9109_v63 = vadd.f32 %v20031_v51, %v8754_v46  ;;  %v10997_v5 = vld [vmem:[#allocation3 + $0x250] sm:$0xff]  ;;  %v8665_v51 = vadd.f32 %v16357_v60, %v8310_v58  ;;  %v8757_v37 = vld [vmem:[#allocation2 + $0x68] sm:$0xff]  ;;  %v20227_v50 = vpop.f32.mrb[51].mxu1  ;;  %16724 = vmatmul.mubr.msk.f32.gmra.mrb[156].mxu1 %vm310_vm0, %v11448_v27  ;;  %9143 = vst.msk [vmem:[#allocation2 + $0x60] sm:$0xff] %vm632_vm3, %v9111_v22 }
 0x3f9   : > { %v11449_v45 = vld [vmem:[#allocation3 + $0x269] sm:$0xff]  ;;  %v9112_v24 = vadd.f32 %v20068_v17, %v8757_v37  ;;  %v8312_v17 = vld [vmem:[#allocation2 + $0x98] sm:$0xff] }
 0x3fa   : > { %v20187_v8 = vld [vmem:[#allocation4 + $0x129] sm:$0xff]  ;;  %9141 = vst.msk [vmem:[#allocation2 + $0x50] sm:$0xff] %vm632_vm3, %v9109_v63  ;;  %8697 = vst.msk [vmem:[#allocation2 + $0x88] sm:$0xff] %vm632_vm3, %v8665_v51  ;;  %v8667_v46 = vadd.f32 %v16360_v36, %v8312_v17  ;;  %16674 = vmatmul.mubr.msk.f32.gmra.mrb[156].mxu0 %vm310_vm0, %v10997_v5  ;;  %v11450_v34 = vld [vmem:[#allocation3 + $0x271] sm:$0xff]  ;;  %v20232_v63 = vmax.f32 %v12759_v9, %v20091_v38  ;;  %16726 = vmatprep.mubr.msk.f32.mxu1 %vm310_vm0, %v11449_v45 }
 0x3fb   : > { %v20195_v19 = vld [vmem:[#allocation4 + $0x12f] sm:$0xff]  ;;  %v20210_v28 = vld [vmem:[#allocation4 + $0x147] sm:$0xff]  ;;  %9144 = vst.msk [vmem:[#allocation2 + $0x68] sm:$0xff] %vm632_vm3, %v9112_v24  ;;  %v8759_v52 = vld [vmem:[#allocation2 + $0x78] sm:$0xff]  ;;  %16676 = vmatprep.mubr.msk.f32.mxu0 %vm310_vm0, %v10998_v39  ;;  %v20246_v38 = vmax.f32 %v12509_v26, %v20187_v8  ;;  %v12760_v39 = vmax.f32 %v20206_v61, %v20119_v1  ;;  %v20258_v45 = vmax.f32 %v12634_v18, %v20140_v20  ;;  %v20264_v26 = vpop.f32.mrb[52].mxu1 }
 0x3fc   : > { %v20197_v54 = vld [vmem:[#allocation4 + $0x130] sm:$0xff]  ;;  %v20212_v16 = vld [vmem:[#allocation4 + $0x148] sm:$0xff]  ;;  %v9114_v51 = vadd.f32 %v20114_v2, %v8759_v52  ;;  %8699 = vst.msk [vmem:[#allocation2 + $0x98] sm:$0xff] %vm632_vm3, %v8667_v46  ;;  %v16363_v2 = vpop.f32.mrb[52].mxu0  ;;  %v12761_v24 = vmax.f32 %v20219_v23, %v20121_v7  ;;  %v12636_v1 = vmax.f32 %v20224_v15, %v20195_v19  ;;  %v8313_v61 = vld [vmem:[#allocation2 + $0xa0] sm:$0xff]  ;;  %v20274_v18 = vpop.f32.mrb[53].mxu1  ;;  %16727 = vmatmul.mubr.msk.f32.gmra.mrb[158].mxu1 %vm310_vm0, %v11450_v34 }
 0x3fd   : > { %v10999_v43 = vld [vmem:[#allocation3 + $0x270] sm:$0xff]  ;;  %v12510_v60 = vmax.f32 %v20195_v19, %v20197_v54  ;;  %v12511_v42 = vmax.f32 %v20210_v28, %v20212_v16  ;;  %v8314_v55 = vld [vmem:[#allocation2 + $0xa8] sm:$0xff]  ;;  %16781 = vmatprep.mubr.msk.f32.mxu1 %vm310_vm0, %v19907_v3  ;;  %v12888_v34 = vmax.f32 %v20232_v63, %v20093_v13  ;;  %v12762_v3 = vmax.f32 %v20258_v45, %v20185_v47 }
 0x3fe   : > { %v8311_v25 = vld [vmem:[#allocation2 + $0x90] sm:$0xff]  ;;  %9146 = vst.msk [vmem:[#allocation2 + $0x78] sm:$0xff] %vm632_vm3, %v9114_v51  ;;  %v8669_v57 = vadd.f32 %v16363_v2, %v8314_v55  ;;  %16677 = vmatmul.mubr.msk.f32.gmra.mrb[158].mxu0 %vm310_vm0, %v10999_v43  ;;  %v12637_v43 = vmax.f32 %v20246_v38, %v20210_v28  ;;  %v20303_v52 = vld [vmem:[#allocation4 + $0x167] sm:$0xff]  ;;  %v8316_v38 = vld [vmem:[#allocation2 + $0xb8] sm:$0xff]  ;;  %v12763_v13 = vmax.f32 %v20269_v48, %v20187_v8 }
 0x3ff   : > { %v20234_v58 = vld [vmem:[#allocation4 + $0x131] sm:$0xff]  ;;  %v8666_v62 = vadd.f32 %v8579_v35, %v8311_v25  ;;  %v20260_v9 = vld [vmem:[#allocation4 + $0x149] sm:$0xff]  ;;  %v8760_v35 = vld [vmem:[#allocation2 + $0x80] sm:$0xff] }
 0x400   : > { %v20241_v5 = vld [vmem:[#allocation4 + $0x14f] sm:$0xff]  ;;  %v20279_v17 = vmax.f32 %v12510_v60, %v20234_v58  ;;  %v20292_v46 = vmax.f32 %v12511_v42, %v20260_v9  ;;  %8701 = vst.msk [vmem:[#allocation2 + $0xa8] sm:$0xff] %vm632_vm3, %v8669_v57  ;;  %v20299_v60 = vmax.f32 %v12760_v39, %v20138_v6  ;;  %v20307_v42 = vpop.f32.mrb[54].mxu1  ;;  %v20315_v6 = vmax.f32 %v12636_v1, %v20197_v54 }
 0x401   : > { %v20243_v27 = vld [vmem:[#allocation4 + $0x150] sm:$0xff]  ;;  %8698 = vst.msk [vmem:[#allocation2 + $0x90] sm:$0xff] %vm632_vm3, %v8666_v62  ;;  %v8761_v23 = vld [vmem:[#allocation2 + $0x88] sm:$0xff]  ;;  %v9115_v62 = vadd.f32 %v20176_v59, %v8760_v35  ;;  %v20318_v45 = vpop.f32.mrb[55].mxu1  ;;  %16782 = vmatmul.mubr.msk.f32.vlgmr.msra.gmra.mrb[160].mxu1 %vm310_vm0, %v19822_v29  ;;  %v20333_v48 = vmax.f32 %v12637_v43, %v20212_v16 }
 0x402   : > { %v8758_v53 = vld [vmem:[#allocation2 + $0x70] sm:$0xff]  ;;  %v12512_v36 = vmax.f32 %v20241_v5, %v20243_v27  ;;  %v9116_v25 = vadd.f32 %v20166_v4, %v8761_v23  ;;  %16784 = vmatprep.mubr.msk.f32.mxu1 %vm310_vm0, %v19966_v49  ;;  %v12639_v29 = vmax.f32 %v20292_v46, %v20303_v52  ;;  %v20347_v49 = vmax.f32 %v12762_v3, %v20195_v19  ;;  %v20360_v19 = vld [vmem:[#allocation4 + $0x168] sm:$0xff]  ;;  %v8317_v46 = vld [vmem:[#allocation2 + $0xc0] sm:$0xff] }
 0x403   : > { %v9113_v37 = vadd.f32 %v20129_v12, %v8758_v53  ;;  %v8589_v12 = vpop.f32.mrb[53].mxu0  ;;  %v11870_v22 = vld [vmem:[#allocation3 + $0x8a] sm:$0xff]  ;;  %v11871_v51 = vld [vmem:[#allocation3 + $0x92] sm:$0xff]  ;;  %v20310_v53 = vmax.f32 %v12761_v24, %v20157_v21  ;;  %v12638_v21 = vmax.f32 %v20279_v17, %v20241_v5  ;;  %9147 = vst.msk [vmem:[#allocation2 + $0x80] sm:$0xff] %vm632_vm3, %v9115_v62  ;;  %v12765_v62 = vmax.f32 %v20333_v48, %v20260_v9 }
 0x404   : > { %v8668_v56 = vadd.f32 %v8589_v12, %v8313_v61  ;;  %16731 = vmatprep.mubr.msk.f32.mxu0 %vm310_vm0, %v11870_v22  ;;  %v20287_v15 = vld [vmem:[#allocation4 + $0x151] sm:$0xff]  ;;  %v16366_v4 = vpop.f32.mrb[54].mxu0  ;;  %9148 = vst.msk [vmem:[#allocation2 + $0x88] sm:$0xff] %vm632_vm3, %v9116_v25  ;;  %v20342_v12 = vmax.f32 %v12888_v34, %v20121_v7  ;;  %v12889_v22 = vmax.f32 %v20299_v60, %v20140_v20 }
 0x405   : > { %9145 = vst.msk [vmem:[#allocation2 + $0x70] sm:$0xff] %vm632_vm3, %v9113_v37  ;;  %v8671_v63 = vadd.f32 %v16366_v4, %v8316_v38  ;;  %v8315_v59 = vld [vmem:[#allocation2 + $0xb0] sm:$0xff]  ;;  %v8599_v39 = vpop.f32.mrb[55].mxu0  ;;  %16732 = vmatmul.mubr.msk.f32.vlgmr.msra.gmra.mrb[160].mxu0 %vm310_vm0, %v11871_v51  ;;  %v20326_v55 = vmax.f32 %v12512_v36, %v20287_v15  ;;  %v8763_v2 = vld [vmem:[#allocation2 + $0x98] sm:$0xff]  ;;  %v8318_v36 = vld [vmem:[#allocation2 + $0xc8] sm:$0xff]  ;;  %v12890_v43 = vmax.f32 %v20310_v53, %v20159_v31 }
 0x406   : > { %8700 = vst.msk [vmem:[#allocation2 + $0xa0] sm:$0xff] %vm632_vm3, %v8668_v56  ;;  %v11872_v37 = vld [vmem:[#allocation3 + $0xaa] sm:$0xff]  ;;  %v8670_v24 = vadd.f32 %v8599_v39, %v8315_v59  ;;  %v9118_v57 = vadd.f32 %v20216_v40, %v8763_v2  ;;  %v16369_v23 = vpop.f32.mrb[56].mxu0  ;;  %v20351_v56 = vpop.f32.mrb[56].mxu1  ;;  %v11873_v40 = vld [vmem:[#allocation3 + $0xb2] sm:$0xff]  ;;  %v20356_v7 = vmax.f32 %v12763_v13, %v20210_v28  ;;  %v12764_v20 = vmax.f32 %v20315_v6, %v20234_v58 }
 0x407   : > { %16734 = vmatprep.mubr.msk.f32.mxu0 %vm310_vm0, %v11872_v37  ;;  %v20335_v1 = vld [vmem:[#allocation4 + $0x16f] sm:$0xff]  ;;  %8703 = vst.msk [vmem:[#allocation2 + $0xb8] sm:$0xff] %vm632_vm3, %v8671_v63  ;;  %v8609_v25 = vpop.f32.mrb[57].mxu0  ;;  %v20363_v35 = vpop.f32.mrb[57].mxu1  ;;  %16785 = vmatmul.mubr.msk.f32.gmra.mrb[162].mxu1 %vm310_vm0, %v20021_v41  ;;  %v20369_v31 = vmax.f32 %v12638_v21, %v20243_v27  ;;  %v20380_v41 = vmax.f32 %v12639_v29, %v20360_v19  ;;  %v8320_v59 = vld [vmem:[#allocation2 + $0xd8] sm:$0xff] }
 0x408   : > { %v8762_v61 = vld [vmem:[#allocation2 + $0x90] sm:$0xff]  ;;  %8702 = vst.msk [vmem:[#allocation2 + $0xb0] sm:$0xff] %vm632_vm3, %v8670_v24  ;;  %9150 = vst.msk [vmem:[#allocation2 + $0x98] sm:$0xff] %vm632_vm3, %v9118_v57  ;;  %v12640_v28 = vmax.f32 %v20326_v55, %v20335_v1  ;;  %v8765_v60 = vld [vmem:[#allocation2 + $0xa8] sm:$0xff]  ;;  %v8672_v3 = vadd.f32 %v8609_v25, %v8317_v46  ;;  %16787 = vmatprep.mubr.msk.f32.mxu1 %vm310_vm0, %v20010_v44  ;;  %v20385_v13 = vmax.f32 %v12889_v22, %v20185_v47  ;;  %v20393_v39 = vpop.f32.mrb[58].mxu1 }
 0x409   : > { %v9117_v17 = vadd.f32 %v20227_v50, %v8762_v61  ;;  %v8673_v50 = vadd.f32 %v16369_v23, %v8318_v36  ;;  %16735 = vmatmul.mubr.msk.f32.gmra.mrb[162].mxu0 %vm310_vm0, %v11873_v40  ;;  %v11874_v34 = vld [vmem:[#allocation3 + $0xca] sm:$0xff]  ;;  %v9120_v38 = vadd.f32 %v20264_v26, %v8765_v60  ;;  %v11875_v51 = vld [vmem:[#allocation3 + $0xd2] sm:$0xff]  ;;  %v12891_v6 = vmax.f32 %v20347_v49, %v20197_v54  ;;  %v16372_v26 = vpop.f32.mrb[58].mxu0  ;;  %v20408_v48 = vpop.f32.mrb[59].mxu1  ;;  %v8321_v60 = vld [vmem:[#allocation2 + $0xe0] sm:$0xff] }
 0x40a   : > { %16737 = vmatprep.mubr.msk.f32.mxu0 %vm310_vm0, %v11874_v34  ;;  %v11876_v53 = vld [vmem:[#allocation3 + $0xea] sm:$0xff]  ;;  %v12513_v44 = vmax.f32 %v20303_v52, %v20360_v19  ;;  %8704 = vst.msk [vmem:[#allocation2 + $0xc0] sm:$0xff] %vm632_vm3, %v8672_v3  ;;  %v20396_v37 = vmax.f32 %v12890_v43, %v20187_v8  ;;  %v12892_v47 = vmax.f32 %v20356_v7, %v20212_v16  ;;  %v8619_v24 = vpop.f32.mrb[59].mxu0  ;;  %v11877_v22 = vld [vmem:[#allocation3 + $0xf2] sm:$0xff]  ;;  %v20447_v46 = vpop.f32.mrb[60].mxu1 }
 0x40b   : > { %9149 = vst.msk [vmem:[#allocation2 + $0x90] sm:$0xff] %vm632_vm3, %v9117_v17  ;;  %8705 = vst.msk [vmem:[#allocation2 + $0xc8] sm:$0xff] %vm632_vm3, %v8673_v50  ;;  %v20401_v21 = vmax.f32 %v12764_v20, %v20241_v5  ;;  %v20403_v54 = vld [vmem:[#allocation4 + $0x169] sm:$0xff]  ;;  %16788 = vmatmul.mubr.msk.f32.gmra.mrb[164].mxu1 %vm310_vm0, %v20055_v10  ;;  %v12766_v8 = vmax.f32 %v20369_v31, %v20287_v15  ;;  %v20427_v10 = vmax.f32 %v12765_v62, %v20303_v52  ;;  %v20436_v43 = vld [vmem:[#allocation4 + $0x171] sm:$0xff]  ;;  %v16375_v50 = vpop.f32.mrb[60].mxu0  ;;  %v20461_v62 = vpop.f32.mrb[61].mxu1 }
 0x40c   : > { %v20405_v55 = vld [vmem:[#allocation4 + $0x170] sm:$0xff]  ;;  %9152 = vst.msk [vmem:[#allocation2 + $0xa8] sm:$0xff] %vm632_vm3, %v9120_v38  ;;  %v20415_v16 = vld [vmem:[#allocation4 + $0x187] sm:$0xff]  ;;  %16790 = vmatprep.mubr.msk.f32.mxu1 %vm310_vm0, %v20071_v33  ;;  %v12767_v49 = vmax.f32 %v20380_v41, %v20403_v54  ;;  %v20434_v40 = vmax.f32 %v12891_v6, %v20234_v58  ;;  %v20441_v33 = vmax.f32 %v12513_v44, %v20403_v54  ;;  %v8629_v3 = vpop.f32.mrb[61].mxu0 }
 0x40d   : > { %v8764_v4 = vld [vmem:[#allocation2 + $0xa0] sm:$0xff]  ;;  %v8319_v2 = vld [vmem:[#allocation2 + $0xd0] sm:$0xff]  ;;  %16738 = vmatmul.mubr.msk.f32.gmra.mrb[164].mxu0 %vm310_vm0, %v11875_v51  ;;  %v20417_v5 = vld [vmem:[#allocation4 + $0x188] sm:$0xff]  ;;  %v20420_v29 = vmax.f32 %v12640_v28, %v20405_v55  ;;  %v12514_v52 = vmax.f32 %v20335_v1, %v20405_v55  ;;  %v20450_v58 = vmax.f32 %v12892_v47, %v20260_v9  ;;  %v12893_v25 = vmax.f32 %v20401_v21, %v20243_v27  ;;  %v20495_v21 = vpop.f32.mrb[62].mxu1 }
 0x40e   : > { %v9119_v63 = vadd.f32 %v20274_v18, %v8764_v4  ;;  %v8675_v18 = vadd.f32 %v16372_v26, %v8320_v59  ;;  %v8767_v57 = vld [vmem:[#allocation2 + $0xb8] sm:$0xff]  ;;  %v8674_v61 = vadd.f32 %v8619_v24, %v8319_v2  ;;  %16740 = vmatprep.mubr.msk.f32.mxu0 %vm310_vm0, %v11876_v53  ;;  %v11878_v23 = vld [vmem:[#allocation3 + $0x10a] sm:$0xff]  ;;  %v12515_v28 = vmax.f32 %v20415_v16, %v20417_v5 }
 0x40f   : > { %v9122_v17 = vadd.f32 %v20307_v42, %v8767_v57  ;;  %v8766_v36 = vld [vmem:[#allocation2 + $0xb0] sm:$0xff]  ;;  %v8322_v42 = vld [vmem:[#allocation2 + $0xe8] sm:$0xff]  ;;  %16791 = vmatmul.mubr.msk.f32.gmra.mrb[166].mxu1 %vm310_vm0, %v20117_v14  ;;  %v20467_v27 = vmax.f32 %v12766_v8, %v20335_v1  ;;  %v12768_v9 = vmax.f32 %v20420_v29, %v20436_v43  ;;  %v8676_v51 = vadd.f32 %v8629_v3, %v8321_v60  ;;  %v8324_v47 = vld [vmem:[#allocation2 + $0xf8] sm:$0xff] }
 0x410   : > { %9151 = vst.msk [vmem:[#allocation2 + $0xa0] sm:$0xff] %vm632_vm3, %v9119_v63  ;;  %8707 = vst.msk [vmem:[#allocation2 + $0xd8] sm:$0xff] %vm632_vm3, %v8675_v18  ;;  %v20438_v7 = vld [vmem:[#allocation4 + $0x189] sm:$0xff]  ;;  %v9121_v20 = vadd.f32 %v20318_v45, %v8766_v36  ;;  %v8677_v45 = vadd.f32 %v16375_v50, %v8322_v42  ;;  %16793 = vmatprep.mubr.msk.f32.mxu1 %vm310_vm0, %v20146_v0  ;;  %v12894_v14 = vmax.f32 %v20427_v10, %v20360_v19  ;;  %v11879_v44 = vld [vmem:[#allocation3 + $0x112] sm:$0xff] }
 0x411   : > { %8706 = vst.msk [vmem:[#allocation2 + $0xd0] sm:$0xff] %vm632_vm3, %v8674_v61  ;;  %v20454_v34 = vld [vmem:[#allocation4 + $0x18f] sm:$0xff]  ;;  %9154 = vst.msk [vmem:[#allocation2 + $0xb8] sm:$0xff] %vm632_vm3, %v9122_v17  ;;  %16741 = vmatmul.mubr.msk.f32.gmra.mrb[166].mxu0 %vm310_vm0, %v11877_v22  ;;  %v20471_v41 = vld [vmem:[#allocation4 + $0x1a7] sm:$0xff]  ;;  %v20482_v1 = vmax.f32 %v12767_v49, %v20415_v16  ;;  %v12641_v59 = vmax.f32 %v20441_v33, %v20415_v16  ;;  %v20489_v26 = vmax.f32 %v12514_v52, %v20436_v43  ;;  %v20511_v61 = vpop.f32.mrb[63].mxu1 }
 0x412   : > { %v20456_v31 = vld [vmem:[#allocation4 + $0x190] sm:$0xff]  ;;  %v20473_v38 = vld [vmem:[#allocation4 + $0x1a8] sm:$0xff]  ;;  %9153 = vst.msk [vmem:[#allocation2 + $0xb0] sm:$0xff] %vm632_vm3, %v9121_v20  ;;  %16743 = vmatprep.mubr.msk.f32.mxu0 %vm310_vm0, %v11878_v23  ;;  %v8768_v6 = vld [vmem:[#allocation2 + $0xc0] sm:$0xff]  ;;  %v20498_v18 = vmax.f32 %v12893_v25, %v20287_v15  ;;  %v20505_v8 = vmax.f32 %v12515_v28, %v20438_v7  ;;  %v12895_v15 = vmax.f32 %v20467_v27, %v20405_v55  ;;  %v20549_v28 = vpop.f32.mrb[64].mxu1 }
 0x413   : > { %v8769_v4 = vld [vmem:[#allocation2 + $0xc8] sm:$0xff]  ;;  %8709 = vst.msk [vmem:[#allocation2 + $0xe8] sm:$0xff] %vm632_vm3, %v8677_v45  ;;  %v12516_v0 = vmax.f32 %v20454_v34, %v20456_v31  ;;  %v9123_v19 = vadd.f32 %v20363_v35, %v8768_v6  ;;  %8708 = vst.msk [vmem:[#allocation2 + $0xe0] sm:$0xff] %vm632_vm3, %v8676_v51  ;;  %v20500_v2 = vld [vmem:[#allocation4 + $0x191] sm:$0xff]  ;;  %v12517_v16 = vmax.f32 %v20471_v41, %v20473_v38  ;;  %16794 = vmatmul.mubr.msk.f32.gmra.mrb[168].mxu1 %vm310_vm0, %v20181_v30 }
 0x414   : > { %v9124_v53 = vadd.f32 %v20351_v56, %v8769_v4  ;;  %v11880_v63 = vld [vmem:[#allocation3 + $0x12a] sm:$0xff]  ;;  %v16378_v56 = vpop.f32.mrb[62].mxu0  ;;  %v20518_v22 = vmax.f32 %v12768_v9, %v20454_v34  ;;  %16796 = vmatprep.mubr.msk.f32.mxu1 %vm310_vm0, %v20193_v32  ;;  %v20529_v30 = vmax.f32 %v12894_v14, %v20403_v54  ;;  %v12896_v55 = vmax.f32 %v20482_v1, %v20417_v5  ;;  %v9195_v27 = vld [vmem:[#allocation2] sm:$0xff]  ;;  %v20559_v4 = vpop.f32.mrb[65].mxu1 }
 0x415   : > { %v20502_v24 = vld [vmem:[#allocation4 + $0x1a9] sm:$0xff]  ;;  %v8679_v35 = vadd.f32 %v16378_v56, %v8324_v47  ;;  %v8639_v57 = vpop.f32.mrb[63].mxu0  ;;  %16744 = vmatmul.mubr.msk.f32.gmra.mrb[168].mxu0 %vm310_vm0, %v11879_v44  ;;  %9155 = vst.msk [vmem:[#allocation2 + $0xc0] sm:$0xff] %vm632_vm3, %v9123_v19  ;;  %v20536_v52 = vmax.f32 %v12641_v59, %v20417_v5  ;;  %v12642_v20 = vmax.f32 %v20489_v26, %v20454_v34  ;;  %v11881_v5 = vld [vmem:[#allocation3 + $0x132] sm:$0xff] }
 0x416   : > { %9156 = vst.msk [vmem:[#allocation2 + $0xc8] sm:$0xff] %vm632_vm3, %v9124_v53  ;;  %v8323_v29 = vld [vmem:[#allocation2 + $0xf0] sm:$0xff]  ;;  %16746 = vmatprep.mubr.msk.f32.mxu0 %vm310_vm0, %v11880_v63  ;;  %v20540_v42 = vld [vmem:[#allocation4 + $0x1c7] sm:$0xff]  ;;  %v20545_v54 = vmax.f32 %v12516_v0, %v20500_v2  ;;  %v16433_v25 = vpop.f32.mrb[64].mxu0  ;;  %v12643_v34 = vmax.f32 %v20505_v8, %v20471_v41  ;;  %v20554_v60 = vmax.f32 %v12517_v16, %v20502_v24 }
 0x417   : > { %v20520_v10 = vld [vmem:[#allocation4 + $0x1af] sm:$0xff]  ;;  %v8771_v17 = vld [vmem:[#allocation2 + $0xd8] sm:$0xff]  ;;  %v8678_v36 = vadd.f32 %v8639_v57, %v8323_v29  ;;  %8711 = vst.msk [vmem:[#allocation2 + $0xf8] sm:$0xff] %vm632_vm3, %v8679_v35  ;;  %v9391_v9 = vpop.f32.mrb[65].mxu0  ;;  %16797 = vmatmul.mubr.msk.f32.gmra.mrb[170].mxu1 %vm310_vm0, %v20253_v11  ;;  %v20565_v51 = vmax.f32 %v12895_v15, %v20436_v43  ;;  %v12897_v14 = vmax.f32 %v20518_v22, %v20456_v31  ;;  %v20595_v56 = vld [vmem:[#allocation4 + $0x1e7] sm:$0xff]  ;;  %v20601_v29 = vpop.f32.mrb[66].mxu1 }
 0x418   : > { %v20522_v49 = vld [vmem:[#allocation4 + $0x1b0] sm:$0xff]  ;;  %v9126_v23 = vadd.f32 %v20393_v39, %v8771_v17  ;;  %v20542_v32 = vld [vmem:[#allocation4 + $0x1c8] sm:$0xff]  ;;  %v9550_v44 = vadd.f32 %v9391_v9, %v9195_v27  ;;  %16799 = vmatprep.mubr.msk.f32.mxu1 %vm310_vm0, %v20342_v12  ;;  %v20578_v11 = vmax.f32 %v12896_v55, %v20438_v7  ;;  %v12769_v19 = vmax.f32 %v20536_v52, %v20438_v7  ;;  %v16436_v35 = vpop.f32.mrb[66].mxu0 }
 0x419   : > { %v8770_v33 = vld [vmem:[#allocation2 + $0xd0] sm:$0xff]  ;;  %8710 = vst.msk [vmem:[#allocation2 + $0xf0] sm:$0xff] %vm632_vm3, %v8678_v36  ;;  %v9196_v39 = vld [vmem:[#allocation2 + $0x8] sm:$0xff]  ;;  %v12518_v3 = vmax.f32 %v20520_v10, %v20522_v49  ;;  %16747 = vmatmul.mubr.msk.f32.gmra.mrb[170].mxu0 %vm310_vm0, %v11881_v5  ;;  %v12519_v59 = vmax.f32 %v20540_v42, %v20542_v32  ;;  %v20591_v12 = vmax.f32 %v12642_v20, %v20456_v31  ;;  %v9401_v17 = vpop.f32.mrb[67].mxu0  ;;  %v20612_v36 = vpop.f32.mrb[67].mxu1 }
 0x41a   : > { %v9125_v50 = vadd.f32 %v20408_v48, %v8770_v33  ;;  %v11882_v45 = vld [vmem:[#allocation3 + $0x14a] sm:$0xff]  ;;  %9158 = vst.msk [vmem:[#allocation2 + $0xd8] sm:$0xff] %vm632_vm3, %v9126_v23  ;;  %v9551_v48 = vadd.f32 %v16433_v25, %v9196_v39  ;;  %v8772_v0 = vld [vmem:[#allocation2 + $0xe0] sm:$0xff]  ;;  %v12644_v47 = vmax.f32 %v20545_v54, %v20520_v10  ;;  %9582 = vst.msk [vmem:[#allocation2] sm:$0xff] %vm632_vm3, %v9550_v44  ;;  %v20651_v9 = vpop.f32.mrb[68].mxu1 }
 0x41b   : > { %v20569_v1 = vld [vmem:[#allocation4 + $0x1b1] sm:$0xff]  ;;  %v20571_v53 = vld [vmem:[#allocation4 + $0x1c9] sm:$0xff]  ;;  %16749 = vmatprep.mubr.msk.f32.mxu0 %vm310_vm0, %v11882_v45  ;;  %v9127_v16 = vadd.f32 %v20461_v62, %v8772_v0  ;;  %v20604_v7 = vmax.f32 %v12643_v34, %v20473_v38  ;;  %v12645_v31 = vmax.f32 %v20554_v60, %v20540_v42  ;;  %16800 = vmatmul.mubr.msk.f32.gmra.mrb[172].mxu1 %vm310_vm0, %v20385_v13 }
 0x41c   : > { %9157 = vst.msk [vmem:[#allocation2 + $0xd0] sm:$0xff] %vm632_vm3, %v9125_v50  ;;  %v8773_v6 = vld [vmem:[#allocation2 + $0xe8] sm:$0xff]  ;;  %v20582_v63 = vld [vmem:[#allocation4 + $0x1d0] sm:$0xff]  ;;  %9583 = vst.msk [vmem:[#allocation2 + $0x8] sm:$0xff] %vm632_vm3, %v9551_v48  ;;  %v20609_v15 = vmax.f32 %v12518_v3, %v20569_v1  ;;  %v20618_v23 = vmax.f32 %v12897_v14, %v20500_v2  ;;  %16802 = vmatprep.mubr.msk.f32.mxu1 %vm310_vm0, %v20396_v37  ;;  %v20633_v39 = vmax.f32 %v12519_v59, %v20571_v53 }
 0x41d   : > { %v20580_v43 = vld [vmem:[#allocation4 + $0x1cf] sm:$0xff]  ;;  %v9128_v26 = vadd.f32 %v20447_v46, %v8773_v6  ;;  %v9198_v46 = vld [vmem:[#allocation2 + $0x18] sm:$0xff]  ;;  %9159 = vst.msk [vmem:[#allocation2 + $0xe0] sm:$0xff] %vm632_vm3, %v9127_v16  ;;  %v20640_v34 = vmax.f32 %v12769_v19, %v20471_v41  ;;  %v12770_v37 = vmax.f32 %v20591_v12, %v20500_v2  ;;  %v20645_v60 = vmax.f32 %v12644_v47, %v20522_v49 }
 0x41e   : > { %v20597_v8 = vld [vmem:[#allocation4 + $0x1e8] sm:$0xff]  ;;  %v11883_v57 = vld [vmem:[#allocation3 + $0x152] sm:$0xff]  ;;  %v9553_v22 = vadd.f32 %v16436_v35, %v9198_v46  ;;  %v12520_v52 = vmax.f32 %v20580_v43, %v20582_v63  ;;  %v12771_v41 = vmax.f32 %v20604_v7, %v20502_v24  ;;  %v20656_v6 = vmax.f32 %v12645_v31, %v20542_v32 }
 0x41f   : > { %9160 = vst.msk [vmem:[#allocation2 + $0xe8] sm:$0xff] %vm632_vm3, %v9128_v26  ;;  %v9197_v62 = vld [vmem:[#allocation2 + $0x10] sm:$0xff]  ;;  %16750 = vmatmul.mubr.msk.f32.gmra.mrb[172].mxu0 %vm310_vm0, %v11883_v57  ;;  %v8775_v20 = vld [vmem:[#allocation2 + $0xf8] sm:$0xff]  ;;  %v12521_v25 = vmax.f32 %v20595_v56, %v20597_v8  ;;  %v9200_v27 = vld [vmem:[#allocation2 + $0x28] sm:$0xff]  ;;  %v12646_v2 = vmax.f32 %v20609_v15, %v20580_v43  ;;  %v20661_v26 = vpop.f32.mrb[69].mxu1  ;;  %16803 = vmatmul.mubr.msk.f32.gmra.mrb[174].mxu1 %vm310_vm0, %v20434_v40 }
 0x420   : > { %v11884_v55 = vld [vmem:[#allocation3 + $0x16a] sm:$0xff]  ;;  %v9552_v54 = vadd.f32 %v9401_v17, %v9197_v62  ;;  %v9130_v5 = vadd.f32 %v20495_v21, %v8775_v20  ;;  %9585 = vst.msk [vmem:[#allocation2 + $0x18] sm:$0xff] %vm632_vm3, %v9553_v22  ;;  %v16439_v21 = vpop.f32.mrb[68].mxu0  ;;  %v11885_v14 = vld [vmem:[#allocation3 + $0x172] sm:$0xff]  ;;  %16805 = vmatprep.mubr.msk.f32.mxu1 %vm310_vm0, %v20450_v58  ;;  %v12647_v40 = vmax.f32 %v20633_v39, %v20595_v56 }
 0x421   : > { %v20620_v33 = vld [vmem:[#allocation4 + $0x1d1] sm:$0xff]  ;;  %16752 = vmatprep.mubr.msk.f32.mxu0 %vm310_vm0, %v11884_v55  ;;  %v20647_v3 = vld [vmem:[#allocation4 + $0x1e9] sm:$0xff]  ;;  %v9555_v44 = vadd.f32 %v16439_v21, %v9200_v27  ;;  %v9411_v59 = vpop.f32.mrb[69].mxu0  ;;  %v9646_v7 = vld [vmem:[#allocation2] sm:$0xff]  ;;  %v12898_v31 = vmax.f32 %v20640_v34, %v20473_v38  ;;  %v20687_v15 = vmax.f32 %v12770_v37, %v20520_v10  ;;  %v12772_v58 = vmax.f32 %v20645_v60, %v20569_v1  ;;  %v20695_v55 = vpop.f32.mrb[70].mxu1 }
 0x422   : > { %v20628_v50 = vld [vmem:[#allocation4 + $0x1ef] sm:$0xff]  ;;  %9584 = vst.msk [vmem:[#allocation2 + $0x10] sm:$0xff] %vm632_vm3, %v9552_v54  ;;  %9162 = vst.msk [vmem:[#allocation2 + $0xf8] sm:$0xff] %vm632_vm3, %v9130_v5  ;;  %v20667_v19 = vmax.f32 %v12520_v52, %v20620_v33  ;;  %v20680_v35 = vmax.f32 %v12521_v25, %v20647_v3  ;;  %v20691_v22 = vld [vmem:[#allocation4 + $0x207] sm:$0xff]  ;;  %v10001_v62 = vadd.f32 %v20559_v4, %v9646_v7  ;;  %v20706_v25 = vpop.f32.mrb[71].mxu1 }
 0x423   : > { %v20630_v13 = vld [vmem:[#allocation4 + $0x1f0] sm:$0xff]  ;;  %16753 = vmatmul.mubr.msk.f32.gmra.mrb[174].mxu0 %vm310_vm0, %v11885_v14  ;;  %v9647_v47 = vld [vmem:[#allocation2 + $0x8] sm:$0xff]  ;;  %9587 = vst.msk [vmem:[#allocation2 + $0x28] sm:$0xff] %vm632_vm3, %v9555_v44  ;;  %v9202_v17 = vld [vmem:[#allocation2 + $0x38] sm:$0xff]  ;;  %v20698_v20 = vmax.f32 %v12771_v41, %v20540_v42  ;;  %v12773_v38 = vmax.f32 %v20656_v6, %v20571_v53  ;;  %v20703_v10 = vmax.f32 %v12646_v2, %v20582_v63 }
 0x424   : > { %v8774_v45 = vld [vmem:[#allocation2 + $0xf0] sm:$0xff]  ;;  %v12522_v12 = vmax.f32 %v20628_v50, %v20630_v13  ;;  %v10002_v57 = vadd.f32 %v20549_v28, %v9647_v47  ;;  %v16442_v28 = vpop.f32.mrb[70].mxu0  ;;  %16806 = vmatmul.mubr.msk.f32.gmra.mrb[176].mxu1 %vm310_vm0, %v20498_v18  ;;  %v12648_v42 = vmax.f32 %v20667_v19, %v20628_v50  ;;  %10033 = vst.msk [vmem:[#allocation2] sm:$0xff] %vm632_vm3, %v10001_v62  ;;  %v20735_v6 = vld [vmem:[#allocation4 + $0x208] sm:$0xff] }
 0x425   : > { %v9129_v48 = vadd.f32 %v20511_v61, %v8774_v45  ;;  %v9199_v61 = vld [vmem:[#allocation2 + $0x20] sm:$0xff]  ;;  %v11886_v0 = vld [vmem:[#allocation3 + $0x18a] sm:$0xff]  ;;  %v11887_v52 = vld [vmem:[#allocation3 + $0x192] sm:$0xff]  ;;  %v9557_v54 = vadd.f32 %v16442_v28, %v9202_v17  ;;  %v9421_v39 = vpop.f32.mrb[71].mxu0  ;;  %16808 = vmatprep.mubr.msk.f32.mxu1 %vm310_vm0, %v20529_v30  ;;  %v20721_v60 = vmax.f32 %v12647_v40, %v20597_v8  ;;  %v12649_v18 = vmax.f32 %v20680_v35, %v20691_v22 }
 0x426   : > { %v9554_v16 = vadd.f32 %v9411_v59, %v9199_v61  ;;  %16755 = vmatprep.mubr.msk.f32.mxu0 %vm310_vm0, %v11886_v0  ;;  %v20675_v46 = vld [vmem:[#allocation4 + $0x1f1] sm:$0xff]  ;;  %10034 = vst.msk [vmem:[#allocation2 + $0x8] sm:$0xff] %vm632_vm3, %v10002_v57  ;;  %v12962_v14 = vmax.f32 %v12898_v31, %v20502_v24  ;;  %v12899_v41 = vmax.f32 %v20687_v15, %v20522_v49  ;;  %v9204_v44 = vld [vmem:[#allocation2 + $0x48] sm:$0xff]  ;;  %v16445_v61 = vpop.f32.mrb[72].mxu0 }
 0x427   : > { %9161 = vst.msk [vmem:[#allocation2 + $0xf0] sm:$0xff] %vm632_vm3, %v9129_v48  ;;  %v9201_v4 = vld [vmem:[#allocation2 + $0x30] sm:$0xff]  ;;  %16756 = vmatmul.mubr.msk.f32.gmra.mrb[176].mxu0 %vm310_vm0, %v11887_v52  ;;  %v20714_v45 = vmax.f32 %v12522_v12, %v20675_v46  ;;  %v9649_v34 = vld [vmem:[#allocation2 + $0x18] sm:$0xff]  ;;  %9589 = vst.msk [vmem:[#allocation2 + $0x38] sm:$0xff] %vm632_vm3, %v9557_v54  ;;  %v20733_v30 = vmax.f32 %v12772_v58, %v20580_v43  ;;  %v12900_v24 = vmax.f32 %v20698_v20, %v20542_v32  ;;  %v9431_v19 = vpop.f32.mrb[73].mxu0 }
 0x428   : > { %9586 = vst.msk [vmem:[#allocation2 + $0x20] sm:$0xff] %vm632_vm3, %v9554_v16  ;;  %v11888_v5 = vld [vmem:[#allocation3 + $0x1aa] sm:$0xff]  ;;  %v9556_v37 = vadd.f32 %v9421_v39, %v9201_v4  ;;  %v10004_v27 = vadd.f32 %v20601_v29, %v9649_v34  ;;  %v20739_v29 = vpop.f32.mrb[72].mxu1  ;;  %v11889_v59 = vld [vmem:[#allocation3 + $0x1b2] sm:$0xff]  ;;  %v20744_v0 = vmax.f32 %v12773_v38, %v20595_v56  ;;  %v12774_v49 = vmax.f32 %v20703_v10, %v20620_v33  ;;  %v16448_v28 = vpop.f32.mrb[74].mxu0 }
 0x429   : > { %16758 = vmatprep.mubr.msk.f32.mxu0 %vm310_vm0, %v11888_v5  ;;  %v20723_v48 = vld [vmem:[#allocation4 + $0x20f] sm:$0xff]  ;;  %v9559_v43 = vadd.f32 %v16445_v61, %v9204_v44  ;;  %v20749_v12 = vpop.f32.mrb[73].mxu1  ;;  %16809 = vmatmul.mubr.msk.f32.gmra.mrb[178].mxu1 %vm310_vm0, %v20565_v51  ;;  %v20755_v32 = vmax.f32 %v12648_v42, %v20630_v13  ;;  %v12775_v35 = vmax.f32 %v20721_v60, %v20647_v3  ;;  %v9206_v17 = vld [vmem:[#allocation2 + $0x58] sm:$0xff]  ;;  %v9441_v54 = vpop.f32.mrb[75].mxu0 }
 0x42a   : > { %v9648_v21 = vld [vmem:[#allocation2 + $0x10] sm:$0xff]  ;;  %9588 = vst.msk [vmem:[#allocation2 + $0x30] sm:$0xff] %vm632_vm3, %v9556_v37  ;;  %10036 = vst.msk [vmem:[#allocation2 + $0x18] sm:$0xff] %vm632_vm3, %v10004_v27  ;;  %v12650_v56 = vmax.f32 %v20714_v45, %v20723_v48  ;;  %v9651_v16 = vld [vmem:[#allocation2 + $0x28] sm:$0xff]  ;;  %16811 = vmatprep.mubr.msk.f32.mxu1 %vm310_vm0, %v20578_v11  ;;  %v20768_v51 = vmax.f32 %v12649_v18, %v20735_v6  ;;  %v12963_v15 = vmax.f32 %v12899_v41, %v20569_v1  ;;  %v20779_v52 = vpop.f32.mrb[74].mxu1  ;;  %v16451_v27 = vpop.f32.mrb[76].mxu0 }
 0x42b   : > { %v10003_v2 = vadd.f32 %v20612_v36, %v9648_v21  ;;  %v9203_v36 = vld [vmem:[#allocation2 + $0x40] sm:$0xff]  ;;  %16759 = vmatmul.mubr.msk.f32.gmra.mrb[178].mxu0 %vm310_vm0, %v11889_v59  ;;  %v11890_v47 = vld [vmem:[#allocation3 + $0x1ca] sm:$0xff]  ;;  %v10006_v7 = vadd.f32 %v20651_v9, %v9651_v16  ;;  %9591 = vst.msk [vmem:[#allocation2 + $0x48] sm:$0xff] %vm632_vm3, %v9559_v43  ;;  %v12901_v58 = vmax.f32 %v20733_v30, %v20582_v63  ;;  %v11891_v20 = vld [vmem:[#allocation3 + $0x1d2] sm:$0xff]  ;;  %v9451_v44 = vpop.f32.mrb[77].mxu0 }
 0x42c   : > { %v9558_v40 = vadd.f32 %v9431_v19, %v9203_v36  ;;  %16761 = vmatprep.mubr.msk.f32.mxu0 %vm310_vm0, %v11890_v47  ;;  %v20765_v57 = vld [vmem:[#allocation4 + $0x210] sm:$0xff]  ;;  %v12964_v9 = vmax.f32 %v12900_v24, %v20571_v53  ;;  %v12902_v38 = vmax.f32 %v20744_v0, %v20597_v8  ;;  %v12839_v1 = vmax.f32 %v12774_v49, %v20628_v50  ;;  %v12810_v37 = vld [vmem:[#allocation4 + $0x227] sm:$0xff]  ;;  %v9210_v47 = vld [vmem:[#allocation2 + $0x78] sm:$0xff] }
 0x42d   : > { %10035 = vst.msk [vmem:[#allocation2 + $0x10] sm:$0xff] %vm632_vm3, %v10003_v2  ;;  %v20775_v62 = vld [vmem:[#allocation4 + $0x209] sm:$0xff]  ;;  %10038 = vst.msk [vmem:[#allocation2 + $0x28] sm:$0xff] %vm632_vm3, %v10006_v7  ;;  %v9561_v63 = vadd.f32 %v16448_v28, %v9206_v17  ;;  %16812 = vmatmul.mubr.msk.f32.gmra.mrb[180].mxu1 %vm310_vm0, %v20618_v23  ;;  %v12776_v53 = vmax.f32 %v20755_v32, %v20675_v46  ;;  %v12714_v8 = vmax.f32 %v12650_v56, %v20765_v57  ;;  %v20798_v42 = vld [vmem:[#allocation4 + $0x211] sm:$0xff]  ;;  %v16454_v32 = vpop.f32.mrb[78].mxu0 }
 0x42e   : > { %9590 = vst.msk [vmem:[#allocation2 + $0x40] sm:$0xff] %vm632_vm3, %v9558_v40  ;;  %v9205_v10 = vld [vmem:[#allocation2 + $0x50] sm:$0xff]  ;;  %v9653_v50 = vld [vmem:[#allocation2 + $0x38] sm:$0xff]  ;;  %16814 = vmatprep.mubr.msk.f32.mxu1 %vm310_vm0, %v12962_v14  ;;  %v12840_v5 = vmax.f32 %v12775_v35, %v20691_v22  ;;  %v12777_v23 = vmax.f32 %v20768_v51, %v20775_v62  ;;  %v9208_v18 = vld [vmem:[#allocation2 + $0x68] sm:$0xff]  ;;  %v12965_v14 = vmax.f32 %v12901_v58, %v20620_v33 }
 0x42f   : > { %v9650_v31 = vld [vmem:[#allocation2 + $0x20] sm:$0xff]  ;;  %16762 = vmatmul.mubr.msk.f32.gmra.mrb[180].mxu0 %vm310_vm0, %v11891_v20  ;;  %v11892_v4 = vld [vmem:[#allocation3 + $0x1ea] sm:$0xff]  ;;  %v9560_v39 = vadd.f32 %v9441_v54, %v9205_v10  ;;  %v10008_v45 = vadd.f32 %v20695_v55, %v9653_v50  ;;  %9593 = vst.msk [vmem:[#allocation2 + $0x58] sm:$0xff] %vm632_vm3, %v9561_v63  ;;  %v11893_v22 = vld [vmem:[#allocation3 + $0x1f2] sm:$0xff]  ;;  %v12966_v41 = vmax.f32 %v12902_v38, %v20647_v3 }
 0x430   : > { %v10005_v11 = vadd.f32 %v20661_v26, %v9650_v31  ;;  %v20786_v26 = vpop.f32.mrb[75].mxu1  ;;  %16764 = vmatprep.mubr.msk.f32.mxu0 %vm310_vm0, %v11892_v4  ;;  %v12903_v30 = vmax.f32 %v12839_v1, %v20630_v13  ;;  %v9563_v55 = vadd.f32 %v16451_v27, %v9208_v18  ;;  %v9207_v2 = vld [vmem:[#allocation2 + $0x60] sm:$0xff]  ;;  %v12841_v59 = vmax.f32 %v12776_v53, %v20723_v48  ;;  %v12811_v49 = vld [vmem:[#allocation4 + $0x22f] sm:$0xff]  ;;  %v9214_v18 = vld [vmem:[#allocation2 + $0x98] sm:$0xff] }
 0x431   : > { %v9652_v34 = vld [vmem:[#allocation2 + $0x30] sm:$0xff]  ;;  %9592 = vst.msk [vmem:[#allocation2 + $0x50] sm:$0xff] %vm632_vm3, %v9560_v39  ;;  %v20806_v21 = vpop.f32.mrb[76].mxu1  ;;  %10040 = vst.msk [vmem:[#allocation2 + $0x38] sm:$0xff] %vm632_vm3, %v10008_v45  ;;  %16815 = vmatmul.mubr.msk.f32.gmra.mrb[182].mxu1 %vm310_vm0, %v12963_v15  ;;  %v12778_v33 = vmax.f32 %v12714_v8, %v20798_v42  ;;  %v9562_v13 = vadd.f32 %v9451_v44, %v9207_v2  ;;  %v12904_v24 = vmax.f32 %v12840_v5, %v20735_v6  ;;  %v12874_v48 = vld [vmem:[#allocation4 + $0x228] sm:$0xff] }
 0x432   : > { %10037 = vst.msk [vmem:[#allocation2 + $0x20] sm:$0xff] %vm632_vm3, %v10005_v11  ;;  %v10007_v60 = vadd.f32 %v20706_v25, %v9652_v34  ;;  %v20812_v61 = vpop.f32.mrb[77].mxu1  ;;  %v11894_v25 = vld [vmem:[#allocation3 + $0x20a] sm:$0xff]  ;;  %16817 = vmatprep.mubr.msk.f32.mxu1 %vm310_vm0, %v12964_v9  ;;  %v12842_v0 = vmax.f32 %v12777_v23, %v12810_v37  ;;  %9595 = vst.msk [vmem:[#allocation2 + $0x68] sm:$0xff] %vm632_vm3, %v9563_v55  ;;  %v11895_v16 = vld [vmem:[#allocation3 + $0x212] sm:$0xff]  ;;  %v12967_v40 = vmax.f32 %v12903_v30, %v20675_v46 }
 0x433   : > { %16765 = vmatmul.mubr.msk.f32.gmra.mrb[182].mxu0 %vm310_vm0, %v11893_v22  ;;  %v9655_v3 = vld [vmem:[#allocation2 + $0x48] sm:$0xff]  ;;  %9594 = vst.msk [vmem:[#allocation2 + $0x60] sm:$0xff] %vm632_vm3, %v9562_v13  ;;  %v20826_v56 = vpop.f32.mrb[78].mxu1  ;;  %v9565_v6 = vadd.f32 %v16454_v32, %v9210_v47  ;;  %v9209_v35 = vld [vmem:[#allocation2 + $0x70] sm:$0xff]  ;;  %v12843_v31 = vmax.f32 %v12778_v33, %v12811_v49  ;;  %v12968_v46 = vmax.f32 %v12904_v24, %v20775_v62  ;;  %v9211_v4 = vld [vmem:[#allocation2 + $0x80] sm:$0xff] }
 0x434   : > { %10039 = vst.msk [vmem:[#allocation2 + $0x30] sm:$0xff] %vm632_vm3, %v10007_v60  ;;  %16767 = vmatprep.mubr.msk.f32.mxu0 %vm310_vm0, %v11894_v25  ;;  %v10010_v43 = vadd.f32 %v20739_v29, %v9655_v3  ;;  %v9461_v29 = vpop.f32.mrb[79].mxu0  ;;  %v20830_v51 = vpop.f32.mrb[79].mxu1  ;;  %v11896_v7 = vld [vmem:[#allocation3 + $0x22a] sm:$0xff]  ;;  %v12906_v11 = vmax.f32 %v12842_v0, %v12874_v48  ;;  %v11897_v54 = vld [vmem:[#allocation3 + $0x232] sm:$0xff]  ;;  %v9215_v49 = vld [vmem:[#allocation2 + $0xa0] sm:$0xff] }
 0x435   : > { %v9654_v36 = vld [vmem:[#allocation2 + $0x40] sm:$0xff]  ;;  %16818 = vmatmul.mubr.msk.f32.gmra.mrb[184].mxu1 %vm310_vm0, %v12965_v14  ;;  %v9564_v58 = vadd.f32 %v9461_v29, %v9209_v35  ;;  %v12875_v17 = vld [vmem:[#allocation4 + $0x230] sm:$0xff]  ;;  %9597 = vst.msk [vmem:[#allocation2 + $0x78] sm:$0xff] %vm632_vm3, %v9565_v6  ;;  %v9212_v1 = vld [vmem:[#allocation2 + $0x88] sm:$0xff]  ;;  %v16457_v63 = vpop.f32.mrb[80].mxu0  ;;  %v16507_v10 = vpop.f32.mrb[80].mxu1 }
 0x436   : > { %v10009_v19 = vadd.f32 %v20749_v12, %v9654_v36  ;;  %10042 = vst.msk [vmem:[#allocation2 + $0x48] sm:$0xff] %vm632_vm3, %v10010_v43  ;;  %v12905_v12 = vmax.f32 %v12841_v59, %v20765_v57  ;;  %v9657_v15 = vld [vmem:[#allocation2 + $0x58] sm:$0xff]  ;;  %16820 = vmatprep.mubr.msk.f32.mxu1 %vm310_vm0, %v12966_v41  ;;  %v11898_v9 = vld [vmem:[#allocation3 + $0x24a] sm:$0xff]  ;;  %v9567_v62 = vadd.f32 %v16457_v63, %v9212_v1  ;;  %v9471_v53 = vpop.f32.mrb[81].mxu0  ;;  %v9922_v8 = vpop.f32.mrb[81].mxu1 }
 0x437   : > { %16768 = vmatmul.mubr.msk.f32.gmra.mrb[184].mxu0 %vm310_vm0, %v11895_v16  ;;  %v10012_v28 = vadd.f32 %v20779_v52, %v9657_v15  ;;  %v12938_v57 = vld [vmem:[#allocation4 + $0x229] sm:$0xff]  ;;  %9596 = vst.msk [vmem:[#allocation2 + $0x70] sm:$0xff] %vm632_vm3, %v9564_v58  ;;  %v12907_v50 = vmax.f32 %v12843_v31, %v12875_v17  ;;  %v9566_v39 = vadd.f32 %v9471_v53, %v9211_v4  ;;  %v11899_v5 = vld [vmem:[#allocation3 + $0x252] sm:$0xff]  ;;  %v16460_v27 = vpop.f32.mrb[82].mxu0  ;;  %v16510_v22 = vpop.f32.mrb[82].mxu1 }
 0x438   : > { %10041 = vst.msk [vmem:[#allocation2 + $0x40] sm:$0xff] %vm632_vm3, %v10009_v19  ;;  %16770 = vmatprep.mubr.msk.f32.mxu0 %vm310_vm0, %v11896_v7  ;;  %v9656_v20 = vld [vmem:[#allocation2 + $0x50] sm:$0xff]  ;;  %v12969_v52 = vmax.f32 %v12905_v12, %v20798_v42  ;;  %v12970_v23 = vmax.f32 %v12906_v11, %v12938_v57  ;;  %9599 = vst.msk [vmem:[#allocation2 + $0x88] sm:$0xff] %vm632_vm3, %v9567_v62  ;;  %v9569_v14 = vadd.f32 %v16460_v27, %v9214_v18  ;;  %v9481_v30 = vpop.f32.mrb[83].mxu0  ;;  %v9932_v55 = vpop.f32.mrb[83].mxu1  ;;  %v9216_v3 = vld [vmem:[#allocation2 + $0xa8] sm:$0xff] }
 0x439   : > { %v10011_v38 = vadd.f32 %v20786_v26, %v9656_v20  ;;  %10044 = vst.msk [vmem:[#allocation2 + $0x58] sm:$0xff] %vm632_vm3, %v10012_v28  ;;  %16821 = vmatmul.mubr.msk.f32.gmra.mrb[186].mxu1 %vm310_vm0, %v12967_v40  ;;  %v9659_v26 = vld [vmem:[#allocation2 + $0x68] sm:$0xff]  ;;  %v12939_v45 = vld [vmem:[#allocation4 + $0x231] sm:$0xff]  ;;  %9598 = vst.msk [vmem:[#allocation2 + $0x80] sm:$0xff] %vm632_vm3, %v9566_v39  ;;  %v16463_v13 = vpop.f32.mrb[84].mxu0  ;;  %v16513_v24 = vpop.f32.mrb[84].mxu1 }
 0x43a   : > { %16823 = vmatprep.mubr.msk.f32.mxu1 %vm310_vm0, %v12968_v46  ;;  %v10014_v34 = vadd.f32 %v20806_v21, %v9659_v26  ;;  %v9658_v37 = vld [vmem:[#allocation2 + $0x60] sm:$0xff]  ;;  %v11900_v60 = vld [vmem:[#allocation3 + $0x26a] sm:$0xff]  ;;  %v12971_v21 = vmax.f32 %v12907_v50, %v12939_v45  ;;  %9601 = vst.msk [vmem:[#allocation2 + $0x98] sm:$0xff] %vm632_vm3, %v9569_v14  ;;  %v9571_v0 = vadd.f32 %v16463_v13, %v9216_v3  ;;  %v9491_v43 = vpop.f32.mrb[85].mxu0  ;;  %v9942_v36 = vpop.f32.mrb[85].mxu1  ;;  %v9218_v16 = vld [vmem:[#allocation2 + $0xb8] sm:$0xff] }
 0x43b   : > { %16771 = vmatmul.mubr.msk.f32.gmra.mrb[186].mxu0 %vm310_vm0, %v11897_v54  ;;  %10043 = vst.msk [vmem:[#allocation2 + $0x50] sm:$0xff] %vm632_vm3, %v10011_v38  ;;  %v10013_v42 = vadd.f32 %v20812_v61, %v9658_v37  ;;  %v9213_v41 = vld [vmem:[#allocation2 + $0x90] sm:$0xff]  ;;  %v9570_v19 = vadd.f32 %v9491_v43, %v9215_v49  ;;  %v16466_v40 = vpop.f32.mrb[86].mxu0  ;;  %v16516_v6 = vpop.f32.mrb[86].mxu1  ;;  %v9220_v11 = vld [vmem:[#allocation2 + $0xc8] sm:$0xff]  ;;  %v9222_v4 = vld [vmem:[#allocation2 + $0xd8] sm:$0xff] }
 0x43c   : > { %16773 = vmatprep.mubr.msk.f32.mxu0 %vm310_vm0, %v11898_v9  ;;  %10046 = vst.msk [vmem:[#allocation2 + $0x68] sm:$0xff] %vm632_vm3, %v10014_v34  ;;  %v9661_v2 = vld [vmem:[#allocation2 + $0x78] sm:$0xff]  ;;  %v9568_v44 = vadd.f32 %v9481_v30, %v9213_v41  ;;  %9603 = vst.msk [vmem:[#allocation2 + $0xa8] sm:$0xff] %vm632_vm3, %v9571_v0  ;;  %v9573_v35 = vadd.f32 %v16466_v40, %v9218_v16  ;;  %v9217_v29 = vld [vmem:[#allocation2 + $0xb0] sm:$0xff]  ;;  %v9952_v7 = vpop.f32.mrb[87].mxu1 }
 0x43d   : > { %16824 = vmatmul.mubr.msk.f32.gmra.mrb[188].mxu1 %vm310_vm0, %v12969_v52  ;;  %10045 = vst.msk [vmem:[#allocation2 + $0x60] sm:$0xff] %vm632_vm3, %v10013_v42  ;;  %v11901_v61 = vld [vmem:[#allocation3 + $0x272] sm:$0xff]  ;;  %v10016_v25 = vadd.f32 %v20826_v56, %v9661_v2  ;;  %9602 = vst.msk [vmem:[#allocation2 + $0xa0] sm:$0xff] %vm632_vm3, %v9570_v19  ;;  %v16519_v28 = vpop.f32.mrb[88].mxu1  ;;  %v9219_v9 = vld [vmem:[#allocation2 + $0xc0] sm:$0xff] }
 0x43e   : > { %16826 = vmatprep.mubr.msk.f32.mxu1 %vm310_vm0, %v12970_v23  ;;  %v9660_v59 = vld [vmem:[#allocation2 + $0x70] sm:$0xff]  ;;  %9600 = vst.msk [vmem:[#allocation2 + $0x90] sm:$0xff] %vm632_vm3, %v9568_v44  ;;  %9605 = vst.msk [vmem:[#allocation2 + $0xb8] sm:$0xff] %vm632_vm3, %v9573_v35  ;;  %v9962_v38 = vpop.f32.mrb[89].mxu1  ;;  %v10099_v19 = vld [vmem:[#allocation2 + $0x8] sm:$0xff] }
 0x43f   : > { %16774 = vmatmul.mubr.msk.f32.gmra.mrb[188].mxu0 %vm310_vm0, %v11899_v5  ;;  %v10015_v33 = vadd.f32 %v20830_v51, %v9660_v59  ;;  %10048 = vst.msk [vmem:[#allocation2 + $0x78] sm:$0xff] %vm632_vm3, %v10016_v25  ;;  %v9663_v48 = vld [vmem:[#allocation2 + $0x88] sm:$0xff]  ;;  %v9501_v51 = vpop.f32.mrb[87].mxu0  ;;  %v9221_v50 = vld [vmem:[#allocation2 + $0xd0] sm:$0xff]  ;;  %v10098_v16 = vld [vmem:[#allocation2] sm:$0xff] }
 0x440   : > { %16776 = vmatprep.mubr.msk.f32.mxu0 %vm310_vm0, %v11900_v60  ;;  %v10018_v47 = vadd.f32 %v16507_v10, %v9663_v48  ;;  %v9662_v32 = vld [vmem:[#allocation2 + $0x80] sm:$0xff]  ;;  %v9572_v31 = vadd.f32 %v9501_v51, %v9217_v29  ;;  %v16469_v17 = vpop.f32.mrb[88].mxu0  ;;  %v9224_v60 = vld [vmem:[#allocation2 + $0xe8] sm:$0xff]  ;;  %v9225_v3 = vld [vmem:[#allocation2 + $0xf0] sm:$0xff] }
 0x441   : > { %16827 = vmatmul.mubr.msk.f32.gmra.mrb[190].mxu1 %vm310_vm0, %v12971_v21  ;;  %10047 = vst.msk [vmem:[#allocation2 + $0x70] sm:$0xff] %vm632_vm3, %v10015_v33  ;;  %v10017_v56 = vadd.f32 %v9922_v8, %v9662_v32  ;;  %v9665_v12 = vld [vmem:[#allocation2 + $0x98] sm:$0xff]  ;;  %v9575_v20 = vadd.f32 %v16469_v17, %v9220_v11  ;;  %v9511_v57 = vpop.f32.mrb[89].mxu0  ;;  %v16522_v8 = vpop.f32.mrb[90].mxu1  ;;  %v10100_v11 = vld [vmem:[#allocation2 + $0x10] sm:$0xff] }
 0x442   : > { %10050 = vst.msk [vmem:[#allocation2 + $0x88] sm:$0xff] %vm632_vm3, %v10018_v47  ;;  %v10020_v15 = vadd.f32 %v16510_v22, %v9665_v12  ;;  %9604 = vst.msk [vmem:[#allocation2 + $0xb0] sm:$0xff] %vm632_vm3, %v9572_v31  ;;  %v9574_v63 = vadd.f32 %v9511_v57, %v9219_v9  ;;  %v16472_v53 = vpop.f32.mrb[90].mxu0  ;;  %v9972_v39 = vpop.f32.mrb[91].mxu1  ;;  %v9223_v22 = vld [vmem:[#allocation2 + $0xe0] sm:$0xff]  ;;  %v10101_v31 = vld [vmem:[#allocation2 + $0x18] sm:$0xff] }
 0x443   : > { %16777 = vmatmul.mubr.msk.f32.gmra.mrb[190].mxu0 %vm310_vm0, %v11901_v61  ;;  %10049 = vst.msk [vmem:[#allocation2 + $0x80] sm:$0xff] %vm632_vm3, %v10017_v56  ;;  %v9667_v1 = vld [vmem:[#allocation2 + $0xa8] sm:$0xff]  ;;  %9607 = vst.msk [vmem:[#allocation2 + $0xc8] sm:$0xff] %vm632_vm3, %v9575_v20  ;;  %v9577_v52 = vadd.f32 %v16472_v53, %v9222_v4  ;;  %v9521_v26 = vpop.f32.mrb[91].mxu0  ;;  %v9226_v61 = vld [vmem:[#allocation2 + $0xf8] sm:$0xff] }
 0x444   : > { %10052 = vst.msk [vmem:[#allocation2 + $0x98] sm:$0xff] %vm632_vm3, %v10020_v15  ;;  %v10022_v10 = vadd.f32 %v16513_v24, %v9667_v1  ;;  %v9666_v54 = vld [vmem:[#allocation2 + $0xa0] sm:$0xff]  ;;  %9606 = vst.msk [vmem:[#allocation2 + $0xc0] sm:$0xff] %vm632_vm3, %v9574_v63  ;;  %v9576_v23 = vadd.f32 %v9521_v26, %v9221_v50  ;;  %v16475_v42 = vpop.f32.mrb[92].mxu0  ;;  %v16525_v18 = vpop.f32.mrb[92].mxu1  ;;  %v10103_v63 = vld [vmem:[#allocation2 + $0x28] sm:$0xff] }
 0x445   : > { %v9664_v58 = vld [vmem:[#allocation2 + $0x90] sm:$0xff]  ;;  %v10021_v62 = vadd.f32 %v9942_v36, %v9666_v54  ;;  %v9669_v5 = vld [vmem:[#allocation2 + $0xb8] sm:$0xff]  ;;  %9609 = vst.msk [vmem:[#allocation2 + $0xd8] sm:$0xff] %vm632_vm3, %v9577_v52  ;;  %v9579_v27 = vadd.f32 %v16475_v42, %v9224_v60  ;;  %v9531_v14 = vpop.f32.mrb[93].mxu0  ;;  %v9982_v41 = vpop.f32.mrb[93].mxu1  ;;  %v10102_v4 = vld [vmem:[#allocation2 + $0x20] sm:$0xff] }
 0x446   : > { %v10019_v46 = vadd.f32 %v9932_v55, %v9664_v58  ;;  %10054 = vst.msk [vmem:[#allocation2 + $0xa8] sm:$0xff] %vm632_vm3, %v10022_v10  ;;  %v10024_v45 = vadd.f32 %v16516_v6, %v9669_v5  ;;  %9608 = vst.msk [vmem:[#allocation2 + $0xd0] sm:$0xff] %vm632_vm3, %v9576_v23  ;;  %v9578_v55 = vadd.f32 %v9531_v14, %v9223_v22  ;;  %v10105_v23 = vld [vmem:[#allocation2 + $0x38] sm:$0xff]  ;;  %v10104_v60 = vld [vmem:[#allocation2 + $0x30] sm:$0xff] }
 0x447   : > { %10053 = vst.msk [vmem:[#allocation2 + $0xa0] sm:$0xff] %vm632_vm3, %v10021_v62  ;;  %9611 = vst.msk [vmem:[#allocation2 + $0xe8] sm:$0xff] %vm632_vm3, %v9579_v27  ;;  %v16478_v25 = vpop.f32.mrb[94].mxu0 }
 0x448   : > { %10051 = vst.msk [vmem:[#allocation2 + $0x90] sm:$0xff] %vm632_vm3, %v10019_v46  ;;  %10056 = vst.msk [vmem:[#allocation2 + $0xb8] sm:$0xff] %vm632_vm3, %v10024_v45  ;;  %v16528_v59 = vpop.f32.mrb[94].mxu1  ;;  %v9581_v33 = vadd.f32 %v16478_v25, %v9226_v61  ;;  %v9541_v13 = vpop.f32.mrb[95].mxu0  ;;  %v10106_v61 = vld [vmem:[#allocation2 + $0x40] sm:$0xff] }
 0x449   : > { %v9668_v34 = vld [vmem:[#allocation2 + $0xb0] sm:$0xff]  ;;  %9610 = vst.msk [vmem:[#allocation2 + $0xe0] sm:$0xff] %vm632_vm3, %v9578_v55  ;;  %v9992_v24 = vpop.f32.mrb[95].mxu1  ;;  %v9580_v49 = vadd.f32 %v9541_v13, %v9225_v3  ;;  %v10107_v55 = vld [vmem:[#allocation2 + $0x48] sm:$0xff] }
 0x44a   : > { %v10023_v37 = vadd.f32 %v9952_v7, %v9668_v34  ;;  %v9671_v30 = vld [vmem:[#allocation2 + $0xc8] sm:$0xff]  ;;  %9613 = vst.msk [vmem:[#allocation2 + $0xf8] sm:$0xff] %vm632_vm3, %v9581_v33 }
 0x44b   : > { %v10026_v21 = vadd.f32 %v16519_v28, %v9671_v30  ;;  %v9670_v2 = vld [vmem:[#allocation2 + $0xc0] sm:$0xff]  ;;  %9612 = vst.msk [vmem:[#allocation2 + $0xf0] sm:$0xff] %vm632_vm3, %v9580_v49  ;;  %v16533_v47 = vpop.f32.mrb[96].mxu0  ;;  %v10109_v49 = vld [vmem:[#allocation2 + $0x58] sm:$0xff] }
 0x44c   : > { %10055 = vst.msk [vmem:[#allocation2 + $0xb0] sm:$0xff] %vm632_vm3, %v10023_v37  ;;  %v10025_v44 = vadd.f32 %v9962_v38, %v9670_v2  ;;  %v9673_v0 = vld [vmem:[#allocation2 + $0xd8] sm:$0xff]  ;;  %v16583_v32 = vpop.f32.mrb[96].mxu1  ;;  %v10454_v56 = vadd.f32 %v16533_v47, %v10099_v19  ;;  %v10294_v40 = vpop.f32.mrb[97].mxu0  ;;  %v10108_v19 = vld [vmem:[#allocation2 + $0x50] sm:$0xff] }
 0x44d   : > { %10058 = vst.msk [vmem:[#allocation2 + $0xc8] sm:$0xff] %vm632_vm3, %v10026_v21  ;;  %v10028_v43 = vadd.f32 %v16522_v8, %v9673_v0  ;;  %v9672_v36 = vld [vmem:[#allocation2 + $0xd0] sm:$0xff]  ;;  %v10745_v6 = vpop.f32.mrb[97].mxu1  ;;  %v10453_v29 = vadd.f32 %v10294_v40, %v10098_v16 }
 0x44e   : > { %10057 = vst.msk [vmem:[#allocation2 + $0xc0] sm:$0xff] %vm632_vm3, %v10025_v44  ;;  %v10027_v48 = vadd.f32 %v9972_v39, %v9672_v36  ;;  %v9675_v35 = vld [vmem:[#allocation2 + $0xe8] sm:$0xff]  ;;  %10486 = vst.msk [vmem:[#allocation2 + $0x8] sm:$0xff] %vm632_vm3, %v10454_v56 }
 0x44f   : > { %10060 = vst.msk [vmem:[#allocation2 + $0xd8] sm:$0xff] %vm632_vm3, %v10028_v43  ;;  %v10030_v51 = vadd.f32 %v16525_v18, %v9675_v35  ;;  %10485 = vst.msk [vmem:[#allocation2] sm:$0xff] %vm632_vm3, %v10453_v29  ;;  %v16536_v15 = vpop.f32.mrb[98].mxu0  ;;  %v10111_v29 = vld [vmem:[#allocation2 + $0x68] sm:$0xff] }
 0x450   : > { %10059 = vst.msk [vmem:[#allocation2 + $0xd0] sm:$0xff] %vm632_vm3, %v10027_v48  ;;  %v9674_v7 = vld [vmem:[#allocation2 + $0xe0] sm:$0xff]  ;;  %v16586_v58 = vpop.f32.mrb[98].mxu1  ;;  %v10456_v46 = vadd.f32 %v16536_v15, %v10101_v31  ;;  %v10304_v17 = vpop.f32.mrb[99].mxu0 }
 0x451   : > { %v10029_v12 = vadd.f32 %v9982_v41, %v9674_v7  ;;  %10062 = vst.msk [vmem:[#allocation2 + $0xe8] sm:$0xff] %vm632_vm3, %v10030_v51  ;;  %v10755_v28 = vpop.f32.mrb[99].mxu1  ;;  %v9677_v20 = vld [vmem:[#allocation2 + $0xf8] sm:$0xff]  ;;  %v10455_v9 = vadd.f32 %v10304_v17, %v10100_v11  ;;  %v10110_v31 = vld [vmem:[#allocation2 + $0x60] sm:$0xff] }
 0x452   : > { %v10032_v57 = vadd.f32 %v16528_v59, %v9677_v20  ;;  %v9676_v38 = vld [vmem:[#allocation2 + $0xf0] sm:$0xff]  ;;  %10488 = vst.msk [vmem:[#allocation2 + $0x18] sm:$0xff] %vm632_vm3, %v10456_v46 }
 0x453   : > { %10061 = vst.msk [vmem:[#allocation2 + $0xe0] sm:$0xff] %vm632_vm3, %v10029_v12  ;;  %v10031_v1 = vadd.f32 %v9992_v24, %v9676_v38  ;;  %10487 = vst.msk [vmem:[#allocation2 + $0x10] sm:$0xff] %vm632_vm3, %v10455_v9  ;;  %v16539_v10 = vpop.f32.mrb[100].mxu0  ;;  %v10113_v9 = vld [vmem:[#allocation2 + $0x78] sm:$0xff] }
 0x454   : > { %v16589_v54 = vpop.f32.mrb[100].mxu1  ;;  %10064 = vst.msk [vmem:[#allocation2 + $0xf8] sm:$0xff] %vm632_vm3, %v10032_v57  ;;  %v10458_v62 = vadd.f32 %v16539_v10, %v10103_v63  ;;  %v10314_v53 = vpop.f32.mrb[101].mxu0  ;;  %v10112_v63 = vld [vmem:[#allocation2 + $0x70] sm:$0xff] }
 0x455   : > { %v10765_v8 = vpop.f32.mrb[101].mxu1  ;;  %10063 = vst.msk [vmem:[#allocation2 + $0xf0] sm:$0xff] %vm632_vm3, %v10031_v1  ;;  %v10550_v52 = vld [vmem:[#allocation2 + $0x8] sm:$0xff]  ;;  %v10457_v50 = vadd.f32 %v10314_v53, %v10102_v4 }
 0x456   : > { %v10905_v26 = vadd.f32 %v16583_v32, %v10550_v52  ;;  %v10549_v39 = vld [vmem:[#allocation2] sm:$0xff]  ;;  %10490 = vst.msk [vmem:[#allocation2 + $0x28] sm:$0xff] %vm632_vm3, %v10458_v62 }
 0x457   : > { %v10904_v5 = vadd.f32 %v10745_v6, %v10549_v39  ;;  %10489 = vst.msk [vmem:[#allocation2 + $0x20] sm:$0xff] %vm632_vm3, %v10457_v50  ;;  %v16542_v45 = vpop.f32.mrb[102].mxu0  ;;  %v10115_v50 = vld [vmem:[#allocation2 + $0x88] sm:$0xff] }
 0x458   : > { %v16592_v34 = vpop.f32.mrb[102].mxu1  ;;  %10937 = vst.msk [vmem:[#allocation2 + $0x8] sm:$0xff] %vm632_vm3, %v10905_v26  ;;  %v10460_v37 = vadd.f32 %v16542_v45, %v10105_v23  ;;  %v10324_v42 = vpop.f32.mrb[103].mxu0  ;;  %v10114_v23 = vld [vmem:[#allocation2 + $0x80] sm:$0xff] }
 0x459   : > { %v10775_v18 = vpop.f32.mrb[103].mxu1  ;;  %10936 = vst.msk [vmem:[#allocation2] sm:$0xff] %vm632_vm3, %v10904_v5  ;;  %v10552_v27 = vld [vmem:[#allocation2 + $0x18] sm:$0xff]  ;;  %v10459_v22 = vadd.f32 %v10324_v42, %v10104_v60 }
 0x45a   : > { %v10907_v14 = vadd.f32 %v16586_v58, %v10552_v27  ;;  %v10551_v41 = vld [vmem:[#allocation2 + $0x10] sm:$0xff]  ;;  %10492 = vst.msk [vmem:[#allocation2 + $0x38] sm:$0xff] %vm632_vm3, %v10460_v37 }
 0x45b   : > { %v10906_v30 = vadd.f32 %v10755_v28, %v10551_v41  ;;  %10491 = vst.msk [vmem:[#allocation2 + $0x30] sm:$0xff] %vm632_vm3, %v10459_v22  ;;  %v16545_v21 = vpop.f32.mrb[104].mxu0  ;;  %v10117_v22 = vld [vmem:[#allocation2 + $0x98] sm:$0xff] }
 0x45c   : > { %v16595_v2 = vpop.f32.mrb[104].mxu1  ;;  %10939 = vst.msk [vmem:[#allocation2 + $0x18] sm:$0xff] %vm632_vm3, %v10907_v14  ;;  %v10462_v44 = vadd.f32 %v16545_v21, %v10107_v55  ;;  %v10334_v25 = vpop.f32.mrb[105].mxu0  ;;  %v10116_v55 = vld [vmem:[#allocation2 + $0x90] sm:$0xff] }
 0x45d   : > { %v10785_v59 = vpop.f32.mrb[105].mxu1  ;;  %10938 = vst.msk [vmem:[#allocation2 + $0x10] sm:$0xff] %vm632_vm3, %v10906_v30  ;;  %v10554_v33 = vld [vmem:[#allocation2 + $0x28] sm:$0xff]  ;;  %v10461_v3 = vadd.f32 %v10334_v25, %v10106_v61 }
 0x45e   : > { %v10909_v13 = vadd.f32 %v16589_v54, %v10554_v33  ;;  %v10553_v24 = vld [vmem:[#allocation2 + $0x20] sm:$0xff]  ;;  %10494 = vst.msk [vmem:[#allocation2 + $0x48] sm:$0xff] %vm632_vm3, %v10462_v44 }
 0x45f   : > { %v10908_v0 = vadd.f32 %v10765_v8, %v10553_v24  ;;  %10493 = vst.msk [vmem:[#allocation2 + $0x40] sm:$0xff] %vm632_vm3, %v10461_v3  ;;  %v16548_v43 = vpop.f32.mrb[106].mxu0  ;;  %v10119_v3 = vld [vmem:[#allocation2 + $0xa8] sm:$0xff] }
 0x460   : > { %v16598_v36 = vpop.f32.mrb[106].mxu1  ;;  %10941 = vst.msk [vmem:[#allocation2 + $0x28] sm:$0xff] %vm632_vm3, %v10909_v13  ;;  %v10464_v48 = vadd.f32 %v16548_v43, %v10109_v49  ;;  %v10344_v47 = vpop.f32.mrb[107].mxu0  ;;  %v10118_v49 = vld [vmem:[#allocation2 + $0xa0] sm:$0xff] }
 0x461   : > { %v10795_v32 = vpop.f32.mrb[107].mxu1  ;;  %10940 = vst.msk [vmem:[#allocation2 + $0x20] sm:$0xff] %vm632_vm3, %v10908_v0  ;;  %v10556_v56 = vld [vmem:[#allocation2 + $0x38] sm:$0xff]  ;;  %v10463_v16 = vadd.f32 %v10344_v47, %v10108_v19 }
 0x462   : > { %v10911_v40 = vadd.f32 %v16592_v34, %v10556_v56  ;;  %v10555_v6 = vld [vmem:[#allocation2 + $0x30] sm:$0xff]  ;;  %10496 = vst.msk [vmem:[#allocation2 + $0x58] sm:$0xff] %vm632_vm3, %v10464_v48 }
 0x463   : > { %v10910_v35 = vadd.f32 %v10775_v18, %v10555_v6  ;;  %10495 = vst.msk [vmem:[#allocation2 + $0x50] sm:$0xff] %vm632_vm3, %v10463_v16  ;;  %v16551_v51 = vpop.f32.mrb[108].mxu0  ;;  %v10121_v16 = vld [vmem:[#allocation2 + $0xb8] sm:$0xff] }
 0x464   : > { %v16601_v7 = vpop.f32.mrb[108].mxu1  ;;  %10943 = vst.msk [vmem:[#allocation2 + $0x38] sm:$0xff] %vm632_vm3, %v10911_v40  ;;  %v10466_v12 = vadd.f32 %v16551_v51, %v10111_v29  ;;  %v10354_v15 = vpop.f32.mrb[109].mxu0  ;;  %v10120_v29 = vld [vmem:[#allocation2 + $0xb0] sm:$0xff] }
 0x465   : > { %v10805_v58 = vpop.f32.mrb[109].mxu1  ;;  %10942 = vst.msk [vmem:[#allocation2 + $0x30] sm:$0xff] %vm632_vm3, %v10910_v35  ;;  %v10558_v46 = vld [vmem:[#allocation2 + $0x48] sm:$0xff]  ;;  %v10465_v11 = vadd.f32 %v10354_v15, %v10110_v31 }
 0x466   : > { %v10913_v17 = vadd.f32 %v16595_v2, %v10558_v46  ;;  %v10557_v28 = vld [vmem:[#allocation2 + $0x40] sm:$0xff]  ;;  %10498 = vst.msk [vmem:[#allocation2 + $0x68] sm:$0xff] %vm632_vm3, %v10466_v12 }
 0x467   : > { %v10912_v20 = vadd.f32 %v10785_v59, %v10557_v28  ;;  %10497 = vst.msk [vmem:[#allocation2 + $0x60] sm:$0xff] %vm632_vm3, %v10465_v11  ;;  %v16554_v57 = vpop.f32.mrb[110].mxu0  ;;  %v10123_v11 = vld [vmem:[#allocation2 + $0xc8] sm:$0xff] }
 0x468   : > { %v16604_v38 = vpop.f32.mrb[110].mxu1  ;;  %10945 = vst.msk [vmem:[#allocation2 + $0x48] sm:$0xff] %vm632_vm3, %v10913_v17  ;;  %v10468_v1 = vadd.f32 %v16554_v57, %v10113_v9  ;;  %v10364_v10 = vpop.f32.mrb[111].mxu0  ;;  %v10122_v9 = vld [vmem:[#allocation2 + $0xc0] sm:$0xff] }
 0x469   : > { %v10815_v54 = vpop.f32.mrb[111].mxu1  ;;  %10944 = vst.msk [vmem:[#allocation2 + $0x40] sm:$0xff] %vm632_vm3, %v10912_v20  ;;  %v10560_v62 = vld [vmem:[#allocation2 + $0x58] sm:$0xff]  ;;  %v10467_v4 = vadd.f32 %v10364_v10, %v10112_v63 }
 0x46a   : > { %v10915_v53 = vadd.f32 %v16598_v36, %v10560_v62  ;;  %v10559_v8 = vld [vmem:[#allocation2 + $0x50] sm:$0xff]  ;;  %10500 = vst.msk [vmem:[#allocation2 + $0x78] sm:$0xff] %vm632_vm3, %v10468_v1 }
 0x46b   : > { %v10914_v52 = vadd.f32 %v10795_v32, %v10559_v8  ;;  %10499 = vst.msk [vmem:[#allocation2 + $0x70] sm:$0xff] %vm632_vm3, %v10467_v4  ;;  %v16557_v26 = vpop.f32.mrb[112].mxu0  ;;  %v10125_v4 = vld [vmem:[#allocation2 + $0xd8] sm:$0xff] }
 0x46c   : > { %v16607_v39 = vpop.f32.mrb[112].mxu1  ;;  %10947 = vst.msk [vmem:[#allocation2 + $0x58] sm:$0xff] %vm632_vm3, %v10915_v53  ;;  %v10470_v5 = vadd.f32 %v16557_v26, %v10115_v50  ;;  %v10374_v45 = vpop.f32.mrb[113].mxu0  ;;  %v10124_v50 = vld [vmem:[#allocation2 + $0xd0] sm:$0xff] }
 0x46d   : > { %v10825_v34 = vpop.f32.mrb[113].mxu1  ;;  %10946 = vst.msk [vmem:[#allocation2 + $0x50] sm:$0xff] %vm632_vm3, %v10914_v52  ;;  %v10562_v37 = vld [vmem:[#allocation2 + $0x68] sm:$0xff]  ;;  %v10469_v60 = vadd.f32 %v10374_v45, %v10114_v23 }
 0x46e   : > { %v10917_v42 = vadd.f32 %v16601_v7, %v10562_v37  ;;  %v10561_v18 = vld [vmem:[#allocation2 + $0x60] sm:$0xff]  ;;  %10502 = vst.msk [vmem:[#allocation2 + $0x88] sm:$0xff] %vm632_vm3, %v10470_v5 }
 0x46f   : > { %v10916_v27 = vadd.f32 %v10805_v58, %v10561_v18  ;;  %10501 = vst.msk [vmem:[#allocation2 + $0x80] sm:$0xff] %vm632_vm3, %v10469_v60  ;;  %v16560_v14 = vpop.f32.mrb[114].mxu0  ;;  %v10127_v60 = vld [vmem:[#allocation2 + $0xe8] sm:$0xff] }
 0x470   : > { %v16610_v41 = vpop.f32.mrb[114].mxu1  ;;  %10949 = vst.msk [vmem:[#allocation2 + $0x68] sm:$0xff] %vm632_vm3, %v10917_v42  ;;  %v10472_v30 = vadd.f32 %v16560_v14, %v10117_v22  ;;  %v10384_v21 = vpop.f32.mrb[115].mxu0  ;;  %v10126_v22 = vld [vmem:[#allocation2 + $0xe0] sm:$0xff] }
 0x471   : > { %v10835_v2 = vpop.f32.mrb[115].mxu1  ;;  %10948 = vst.msk [vmem:[#allocation2 + $0x60] sm:$0xff] %vm632_vm3, %v10916_v27  ;;  %v10564_v44 = vld [vmem:[#allocation2 + $0x78] sm:$0xff]  ;;  %v10471_v61 = vadd.f32 %v10384_v21, %v10116_v55 }
 0x472   : > { %v10919_v25 = vadd.f32 %v16604_v38, %v10564_v44  ;;  %v10563_v59 = vld [vmem:[#allocation2 + $0x70] sm:$0xff]  ;;  %10504 = vst.msk [vmem:[#allocation2 + $0x98] sm:$0xff] %vm632_vm3, %v10472_v30 }
 0x473   : > { %v10918_v33 = vadd.f32 %v10815_v54, %v10563_v59  ;;  %10503 = vst.msk [vmem:[#allocation2 + $0x90] sm:$0xff] %vm632_vm3, %v10471_v61  ;;  %v16563_v13 = vpop.f32.mrb[116].mxu0  ;;  %v10129_v61 = vld [vmem:[#allocation2 + $0xf8] sm:$0xff] }
 0x474   : > { %v16613_v24 = vpop.f32.mrb[116].mxu1  ;;  %10951 = vst.msk [vmem:[#allocation2 + $0x78] sm:$0xff] %vm632_vm3, %v10919_v25  ;;  %v10474_v0 = vadd.f32 %v16563_v13, %v10119_v3  ;;  %v10394_v43 = vpop.f32.mrb[117].mxu0  ;;  %v10128_v3 = vld [vmem:[#allocation2 + $0xf0] sm:$0xff] }
 0x475   : > { %v10845_v36 = vpop.f32.mrb[117].mxu1  ;;  %10950 = vst.msk [vmem:[#allocation2 + $0x70] sm:$0xff] %vm632_vm3, %v10918_v33  ;;  %v10566_v48 = vld [vmem:[#allocation2 + $0x88] sm:$0xff]  ;;  %v10473_v19 = vadd.f32 %v10394_v43, %v10118_v49 }
 0x476   : > { %v10921_v47 = vadd.f32 %v16607_v39, %v10566_v48  ;;  %v10565_v32 = vld [vmem:[#allocation2 + $0x80] sm:$0xff]  ;;  %10506 = vst.msk [vmem:[#allocation2 + $0xa8] sm:$0xff] %vm632_vm3, %v10474_v0 }
 0x477   : > { %v10920_v56 = vadd.f32 %v10825_v34, %v10565_v32  ;;  %10505 = vst.msk [vmem:[#allocation2 + $0xa0] sm:$0xff] %vm632_vm3, %v10473_v19  ;;  %v16566_v40 = vpop.f32.mrb[118].mxu0  ;;  %v11001_v19 = vld [vmem:[#allocation2 + $0x8] sm:$0xff] }
 0x478   : > { %v16616_v6 = vpop.f32.mrb[118].mxu1  ;;  %10953 = vst.msk [vmem:[#allocation2 + $0x88] sm:$0xff] %vm632_vm3, %v10921_v47  ;;  %v10476_v35 = vadd.f32 %v16566_v40, %v10121_v16  ;;  %v10404_v51 = vpop.f32.mrb[119].mxu0  ;;  %v11000_v16 = vld [vmem:[#allocation2] sm:$0xff] }
 0x479   : > { %v10855_v7 = vpop.f32.mrb[119].mxu1  ;;  %10952 = vst.msk [vmem:[#allocation2 + $0x80] sm:$0xff] %vm632_vm3, %v10920_v56  ;;  %v10568_v12 = vld [vmem:[#allocation2 + $0x98] sm:$0xff]  ;;  %v10475_v31 = vadd.f32 %v10404_v51, %v10120_v29 }
 0x47a   : > { %v10923_v15 = vadd.f32 %v16610_v41, %v10568_v12  ;;  %v10567_v58 = vld [vmem:[#allocation2 + $0x90] sm:$0xff]  ;;  %10508 = vst.msk [vmem:[#allocation2 + $0xb8] sm:$0xff] %vm632_vm3, %v10476_v35 }
 0x47b   : > { %v10922_v46 = vadd.f32 %v10835_v2, %v10567_v58  ;;  %10507 = vst.msk [vmem:[#allocation2 + $0xb0] sm:$0xff] %vm632_vm3, %v10475_v31  ;;  %v16569_v17 = vpop.f32.mrb[120].mxu0  ;;  %v11003_v31 = vld [vmem:[#allocation2 + $0x18] sm:$0xff] }
 0x47c   : > { %v16619_v28 = vpop.f32.mrb[120].mxu1  ;;  %10955 = vst.msk [vmem:[#allocation2 + $0x98] sm:$0xff] %vm632_vm3, %v10923_v15  ;;  %v10478_v20 = vadd.f32 %v16569_v17, %v10123_v11  ;;  %v10414_v57 = vpop.f32.mrb[121].mxu0  ;;  %v11002_v11 = vld [vmem:[#allocation2 + $0x10] sm:$0xff] }
 0x47d   : > { %v10865_v38 = vpop.f32.mrb[121].mxu1  ;;  %10954 = vst.msk [vmem:[#allocation2 + $0x90] sm:$0xff] %vm632_vm3, %v10922_v46  ;;  %v10570_v1 = vld [vmem:[#allocation2 + $0xa8] sm:$0xff]  ;;  %v10477_v63 = vadd.f32 %v10414_v57, %v10122_v9 }
 0x47e   : > { %v10925_v10 = vadd.f32 %v16613_v24, %v10570_v1  ;;  %v10569_v54 = vld [vmem:[#allocation2 + $0xa0] sm:$0xff]  ;;  %10510 = vst.msk [vmem:[#allocation2 + $0xc8] sm:$0xff] %vm632_vm3, %v10478_v20 }
 0x47f   : > { %v10924_v62 = vadd.f32 %v10845_v36, %v10569_v54  ;;  %10509 = vst.msk [vmem:[#allocation2 + $0xc0] sm:$0xff] %vm632_vm3, %v10477_v63  ;;  %v16572_v53 = vpop.f32.mrb[122].mxu0  ;;  %v11005_v63 = vld [vmem:[#allocation2 + $0x28] sm:$0xff] }
 0x480   : > { %v16622_v8 = vpop.f32.mrb[122].mxu1  ;;  %10957 = vst.msk [vmem:[#allocation2 + $0xa8] sm:$0xff] %vm632_vm3, %v10925_v10  ;;  %v10480_v52 = vadd.f32 %v16572_v53, %v10125_v4  ;;  %v10424_v26 = vpop.f32.mrb[123].mxu0  ;;  %v11004_v4 = vld [vmem:[#allocation2 + $0x20] sm:$0xff] }
 0x481   : > { %v10875_v39 = vpop.f32.mrb[123].mxu1  ;;  %10956 = vst.msk [vmem:[#allocation2 + $0xa0] sm:$0xff] %vm632_vm3, %v10924_v62  ;;  %v10572_v5 = vld [vmem:[#allocation2 + $0xb8] sm:$0xff]  ;;  %v10479_v23 = vadd.f32 %v10424_v26, %v10124_v50 }
 0x482   : > { %v10927_v45 = vadd.f32 %v16616_v6, %v10572_v5  ;;  %v10571_v34 = vld [vmem:[#allocation2 + $0xb0] sm:$0xff]  ;;  %10512 = vst.msk [vmem:[#allocation2 + $0xd8] sm:$0xff] %vm632_vm3, %v10480_v52 }
 0x483   : > { %v10926_v37 = vadd.f32 %v10855_v7, %v10571_v34  ;;  %10511 = vst.msk [vmem:[#allocation2 + $0xd0] sm:$0xff] %vm632_vm3, %v10479_v23  ;;  %v16575_v42 = vpop.f32.mrb[124].mxu0  ;;  %v11007_v23 = vld [vmem:[#allocation2 + $0x38] sm:$0xff] }
 0x484   : > { %v16625_v18 = vpop.f32.mrb[124].mxu1  ;;  %10959 = vst.msk [vmem:[#allocation2 + $0xb8] sm:$0xff] %vm632_vm3, %v10927_v45  ;;  %v10482_v27 = vadd.f32 %v16575_v42, %v10127_v60  ;;  %v10434_v14 = vpop.f32.mrb[125].mxu0  ;;  %v11006_v60 = vld [vmem:[#allocation2 + $0x30] sm:$0xff] }
 0x485   : > { %v10885_v41 = vpop.f32.mrb[125].mxu1  ;;  %10958 = vst.msk [vmem:[#allocation2 + $0xb0] sm:$0xff] %vm632_vm3, %v10926_v37  ;;  %v10574_v30 = vld [vmem:[#allocation2 + $0xc8] sm:$0xff]  ;;  %v10481_v55 = vadd.f32 %v10434_v14, %v10126_v22 }
 0x486   : > { %v10929_v21 = vadd.f32 %v16619_v28, %v10574_v30  ;;  %v10573_v2 = vld [vmem:[#allocation2 + $0xc0] sm:$0xff]  ;;  %10514 = vst.msk [vmem:[#allocation2 + $0xe8] sm:$0xff] %vm632_vm3, %v10482_v27 }
 0x487   : > { %v10928_v44 = vadd.f32 %v10865_v38, %v10573_v2  ;;  %10513 = vst.msk [vmem:[#allocation2 + $0xe0] sm:$0xff] %vm632_vm3, %v10481_v55  ;;  %v16578_v25 = vpop.f32.mrb[126].mxu0  ;;  %v11009_v55 = vld [vmem:[#allocation2 + $0x48] sm:$0xff] }
 0x488   : > { %v16628_v59 = vpop.f32.mrb[126].mxu1  ;;  %10961 = vst.msk [vmem:[#allocation2 + $0xc8] sm:$0xff] %vm632_vm3, %v10929_v21  ;;  %v10484_v33 = vadd.f32 %v16578_v25, %v10129_v61  ;;  %v10444_v13 = vpop.f32.mrb[127].mxu0  ;;  %v11008_v61 = vld [vmem:[#allocation2 + $0x40] sm:$0xff] }
 0x489   : > { %v10895_v24 = vpop.f32.mrb[127].mxu1  ;;  %10960 = vst.msk [vmem:[#allocation2 + $0xc0] sm:$0xff] %vm632_vm3, %v10928_v44  ;;  %v10576_v0 = vld [vmem:[#allocation2 + $0xd8] sm:$0xff]  ;;  %v10483_v49 = vadd.f32 %v10444_v13, %v10128_v3 }
 0x48a   : > { %v10931_v43 = vadd.f32 %v16622_v8, %v10576_v0  ;;  %v10575_v36 = vld [vmem:[#allocation2 + $0xd0] sm:$0xff]  ;;  %10516 = vst.msk [vmem:[#allocation2 + $0xf8] sm:$0xff] %vm632_vm3, %v10484_v33 }
 0x48b   : > { %v10930_v48 = vadd.f32 %v10875_v39, %v10575_v36  ;;  %10515 = vst.msk [vmem:[#allocation2 + $0xf0] sm:$0xff] %vm632_vm3, %v10483_v49  ;;  %v16633_v47 = vpop.f32.mrb[128].mxu0  ;;  %v11011_v49 = vld [vmem:[#allocation2 + $0x58] sm:$0xff] }
 0x48c   : > { %v16683_v32 = vpop.f32.mrb[128].mxu1  ;;  %10963 = vst.msk [vmem:[#allocation2 + $0xd8] sm:$0xff] %vm632_vm3, %v10931_v43  ;;  %v11356_v56 = vadd.f32 %v16633_v47, %v11001_v19  ;;  %v11196_v40 = vpop.f32.mrb[129].mxu0  ;;  %v11010_v19 = vld [vmem:[#allocation2 + $0x50] sm:$0xff] }
 0x48d   : > { %v11647_v6 = vpop.f32.mrb[129].mxu1  ;;  %10962 = vst.msk [vmem:[#allocation2 + $0xd0] sm:$0xff] %vm632_vm3, %v10930_v48  ;;  %v10578_v35 = vld [vmem:[#allocation2 + $0xe8] sm:$0xff]  ;;  %v11355_v29 = vadd.f32 %v11196_v40, %v11000_v16 }
 0x48e   : > { %v10933_v51 = vadd.f32 %v16625_v18, %v10578_v35  ;;  %v10577_v7 = vld [vmem:[#allocation2 + $0xe0] sm:$0xff]  ;;  %11388 = vst.msk [vmem:[#allocation2 + $0x8] sm:$0xff] %vm632_vm3, %v11356_v56 }
 0x48f   : > { %v10932_v12 = vadd.f32 %v10885_v41, %v10577_v7  ;;  %11387 = vst.msk [vmem:[#allocation2] sm:$0xff] %vm632_vm3, %v11355_v29  ;;  %v16636_v15 = vpop.f32.mrb[130].mxu0  ;;  %v11013_v29 = vld [vmem:[#allocation2 + $0x68] sm:$0xff] }
 0x490   : > { %v16686_v58 = vpop.f32.mrb[130].mxu1  ;;  %10965 = vst.msk [vmem:[#allocation2 + $0xe8] sm:$0xff] %vm632_vm3, %v10933_v51  ;;  %v11358_v46 = vadd.f32 %v16636_v15, %v11003_v31  ;;  %v11206_v17 = vpop.f32.mrb[131].mxu0  ;;  %v11012_v31 = vld [vmem:[#allocation2 + $0x60] sm:$0xff] }
 0x491   : > { %v11657_v28 = vpop.f32.mrb[131].mxu1  ;;  %10964 = vst.msk [vmem:[#allocation2 + $0xe0] sm:$0xff] %vm632_vm3, %v10932_v12  ;;  %v10580_v20 = vld [vmem:[#allocation2 + $0xf8] sm:$0xff]  ;;  %v11357_v9 = vadd.f32 %v11206_v17, %v11002_v11 }
 0x492   : > { %v10935_v57 = vadd.f32 %v16628_v59, %v10580_v20  ;;  %v10579_v38 = vld [vmem:[#allocation2 + $0xf0] sm:$0xff]  ;;  %11390 = vst.msk [vmem:[#allocation2 + $0x18] sm:$0xff] %vm632_vm3, %v11358_v46 }
 0x493   : > { %v10934_v1 = vadd.f32 %v10895_v24, %v10579_v38  ;;  %11389 = vst.msk [vmem:[#allocation2 + $0x10] sm:$0xff] %vm632_vm3, %v11357_v9  ;;  %v16639_v10 = vpop.f32.mrb[132].mxu0  ;;  %v11015_v9 = vld [vmem:[#allocation2 + $0x78] sm:$0xff] }
 0x494   : > { %v16689_v54 = vpop.f32.mrb[132].mxu1  ;;  %10967 = vst.msk [vmem:[#allocation2 + $0xf8] sm:$0xff] %vm632_vm3, %v10935_v57  ;;  %v11360_v62 = vadd.f32 %v16639_v10, %v11005_v63  ;;  %v11216_v53 = vpop.f32.mrb[133].mxu0  ;;  %v11014_v63 = vld [vmem:[#allocation2 + $0x70] sm:$0xff] }
 0x495   : > { %v11667_v8 = vpop.f32.mrb[133].mxu1  ;;  %10966 = vst.msk [vmem:[#allocation2 + $0xf0] sm:$0xff] %vm632_vm3, %v10934_v1  ;;  %v11452_v52 = vld [vmem:[#allocation2 + $0x8] sm:$0xff]  ;;  %v11359_v50 = vadd.f32 %v11216_v53, %v11004_v4 }
 0x496   : > { %v11807_v26 = vadd.f32 %v16683_v32, %v11452_v52  ;;  %v11451_v39 = vld [vmem:[#allocation2] sm:$0xff]  ;;  %11392 = vst.msk [vmem:[#allocation2 + $0x28] sm:$0xff] %vm632_vm3, %v11360_v62 }
 0x497   : > { %v11806_v5 = vadd.f32 %v11647_v6, %v11451_v39  ;;  %11391 = vst.msk [vmem:[#allocation2 + $0x20] sm:$0xff] %vm632_vm3, %v11359_v50  ;;  %v16642_v45 = vpop.f32.mrb[134].mxu0  ;;  %v11017_v50 = vld [vmem:[#allocation2 + $0x88] sm:$0xff] }
 0x498   : > { %v16692_v34 = vpop.f32.mrb[134].mxu1  ;;  %11839 = vst.msk [vmem:[#allocation2 + $0x8] sm:$0xff] %vm632_vm3, %v11807_v26  ;;  %v11362_v37 = vadd.f32 %v16642_v45, %v11007_v23  ;;  %v11226_v42 = vpop.f32.mrb[135].mxu0  ;;  %v11016_v23 = vld [vmem:[#allocation2 + $0x80] sm:$0xff] }
 0x499   : > { %v11677_v18 = vpop.f32.mrb[135].mxu1  ;;  %11838 = vst.msk [vmem:[#allocation2] sm:$0xff] %vm632_vm3, %v11806_v5  ;;  %v11454_v27 = vld [vmem:[#allocation2 + $0x18] sm:$0xff]  ;;  %v11361_v22 = vadd.f32 %v11226_v42, %v11006_v60 }
 0x49a   : > { %v11809_v14 = vadd.f32 %v16686_v58, %v11454_v27  ;;  %v11453_v41 = vld [vmem:[#allocation2 + $0x10] sm:$0xff]  ;;  %11394 = vst.msk [vmem:[#allocation2 + $0x38] sm:$0xff] %vm632_vm3, %v11362_v37 }
 0x49b   : > { %v11808_v30 = vadd.f32 %v11657_v28, %v11453_v41  ;;  %11393 = vst.msk [vmem:[#allocation2 + $0x30] sm:$0xff] %vm632_vm3, %v11361_v22  ;;  %v16645_v21 = vpop.f32.mrb[136].mxu0  ;;  %v11019_v22 = vld [vmem:[#allocation2 + $0x98] sm:$0xff] }
 0x49c   : > { %v16695_v2 = vpop.f32.mrb[136].mxu1  ;;  %11841 = vst.msk [vmem:[#allocation2 + $0x18] sm:$0xff] %vm632_vm3, %v11809_v14  ;;  %v11364_v44 = vadd.f32 %v16645_v21, %v11009_v55  ;;  %v11236_v25 = vpop.f32.mrb[137].mxu0  ;;  %v11018_v55 = vld [vmem:[#allocation2 + $0x90] sm:$0xff] }
 0x49d   : > { %v11687_v59 = vpop.f32.mrb[137].mxu1  ;;  %11840 = vst.msk [vmem:[#allocation2 + $0x10] sm:$0xff] %vm632_vm3, %v11808_v30  ;;  %v11456_v33 = vld [vmem:[#allocation2 + $0x28] sm:$0xff]  ;;  %v11363_v3 = vadd.f32 %v11236_v25, %v11008_v61 }
 0x49e   : > { %v11811_v13 = vadd.f32 %v16689_v54, %v11456_v33  ;;  %v11455_v24 = vld [vmem:[#allocation2 + $0x20] sm:$0xff]  ;;  %11396 = vst.msk [vmem:[#allocation2 + $0x48] sm:$0xff] %vm632_vm3, %v11364_v44 }
 0x49f   : > { %v11810_v0 = vadd.f32 %v11667_v8, %v11455_v24  ;;  %11395 = vst.msk [vmem:[#allocation2 + $0x40] sm:$0xff] %vm632_vm3, %v11363_v3  ;;  %v16648_v43 = vpop.f32.mrb[138].mxu0  ;;  %v11021_v3 = vld [vmem:[#allocation2 + $0xa8] sm:$0xff] }
 0x4a0   : > { %v16698_v36 = vpop.f32.mrb[138].mxu1  ;;  %11843 = vst.msk [vmem:[#allocation2 + $0x28] sm:$0xff] %vm632_vm3, %v11811_v13  ;;  %v11366_v48 = vadd.f32 %v16648_v43, %v11011_v49  ;;  %v11246_v47 = vpop.f32.mrb[139].mxu0  ;;  %v11020_v49 = vld [vmem:[#allocation2 + $0xa0] sm:$0xff] }
 0x4a1   : > { %v11697_v32 = vpop.f32.mrb[139].mxu1  ;;  %11842 = vst.msk [vmem:[#allocation2 + $0x20] sm:$0xff] %vm632_vm3, %v11810_v0  ;;  %v11458_v56 = vld [vmem:[#allocation2 + $0x38] sm:$0xff]  ;;  %v11365_v16 = vadd.f32 %v11246_v47, %v11010_v19 }
 0x4a2   : > { %v11813_v40 = vadd.f32 %v16692_v34, %v11458_v56  ;;  %v11457_v6 = vld [vmem:[#allocation2 + $0x30] sm:$0xff]  ;;  %11398 = vst.msk [vmem:[#allocation2 + $0x58] sm:$0xff] %vm632_vm3, %v11366_v48 }
 0x4a3   : > { %v11812_v35 = vadd.f32 %v11677_v18, %v11457_v6  ;;  %11397 = vst.msk [vmem:[#allocation2 + $0x50] sm:$0xff] %vm632_vm3, %v11365_v16  ;;  %v11023_v16 = vld [vmem:[#allocation2 + $0xb8] sm:$0xff] }
 0x4a4   : > { %v16701_v7 = vpop.f32.mrb[140].mxu1  ;;  %11845 = vst.msk [vmem:[#allocation2 + $0x38] sm:$0xff] %vm632_vm3, %v11813_v40 }
 0x4a5   : > { %v16651_v51 = vpop.f32.mrb[140].mxu0  ;;  %v11707_v58 = vpop.f32.mrb[141].mxu1  ;;  %11844 = vst.msk [vmem:[#allocation2 + $0x30] sm:$0xff] %vm632_vm3, %v11812_v35  ;;  %v11460_v46 = vld [vmem:[#allocation2 + $0x48] sm:$0xff] }
 0x4a6   : > { %v11368_v12 = vadd.f32 %v16651_v51, %v11013_v29  ;;  %v11256_v15 = vpop.f32.mrb[141].mxu0  ;;  %v11815_v17 = vadd.f32 %v16695_v2, %v11460_v46  ;;  %v11459_v28 = vld [vmem:[#allocation2 + $0x40] sm:$0xff]  ;;  %v11022_v29 = vld [vmem:[#allocation2 + $0xb0] sm:$0xff] }
 0x4a7   : > { %v11367_v11 = vadd.f32 %v11256_v15, %v11012_v31  ;;  %v11814_v20 = vadd.f32 %v11687_v59, %v11459_v28 }
 0x4a8   : > { %11400 = vst.msk [vmem:[#allocation2 + $0x68] sm:$0xff] %vm632_vm3, %v11368_v12  ;;  %11847 = vst.msk [vmem:[#allocation2 + $0x48] sm:$0xff] %vm632_vm3, %v11815_v17 }
 0x4a9   : > { %11399 = vst.msk [vmem:[#allocation2 + $0x60] sm:$0xff] %vm632_vm3, %v11367_v11  ;;  %v16654_v57 = vpop.f32.mrb[142].mxu0  ;;  %11846 = vst.msk [vmem:[#allocation2 + $0x40] sm:$0xff] %vm632_vm3, %v11814_v20  ;;  %v11462_v62 = vld [vmem:[#allocation2 + $0x58] sm:$0xff]  ;;  %v11025_v11 = vld [vmem:[#allocation2 + $0xc8] sm:$0xff] }
 0x4aa   : > { %v16704_v38 = vpop.f32.mrb[142].mxu1  ;;  %v11370_v1 = vadd.f32 %v16654_v57, %v11015_v9  ;;  %v11266_v10 = vpop.f32.mrb[143].mxu0  ;;  %v11817_v53 = vadd.f32 %v16698_v36, %v11462_v62  ;;  %v11461_v8 = vld [vmem:[#allocation2 + $0x50] sm:$0xff]  ;;  %v11024_v9 = vld [vmem:[#allocation2 + $0xc0] sm:$0xff] }
 0x4ab   : > { %v11717_v54 = vpop.f32.mrb[143].mxu1  ;;  %v11369_v4 = vadd.f32 %v11266_v10, %v11014_v63  ;;  %v11816_v52 = vadd.f32 %v11697_v32, %v11461_v8 }
 0x4ac   : > { %11402 = vst.msk [vmem:[#allocation2 + $0x78] sm:$0xff] %vm632_vm3, %v11370_v1  ;;  %11849 = vst.msk [vmem:[#allocation2 + $0x58] sm:$0xff] %vm632_vm3, %v11817_v53 }
 0x4ad   : > { %11401 = vst.msk [vmem:[#allocation2 + $0x70] sm:$0xff] %vm632_vm3, %v11369_v4  ;;  %11848 = vst.msk [vmem:[#allocation2 + $0x50] sm:$0xff] %vm632_vm3, %v11816_v52  ;;  %v11027_v4 = vld [vmem:[#allocation2 + $0xd8] sm:$0xff] }
 0x4af   : > { %v16657_v26 = vpop.f32.mrb[144].mxu0  ;;  %v16707_v39 = vpop.f32.mrb[144].mxu1  ;;  %v11464_v37 = vld [vmem:[#allocation2 + $0x68] sm:$0xff] }
 0x4b0   : > { %v11372_v5 = vadd.f32 %v16657_v26, %v11017_v50  ;;  %v11276_v45 = vpop.f32.mrb[145].mxu0  ;;  %v11727_v34 = vpop.f32.mrb[145].mxu1  ;;  %v11819_v42 = vadd.f32 %v16701_v7, %v11464_v37  ;;  %v11463_v18 = vld [vmem:[#allocation2 + $0x60] sm:$0xff]  ;;  %v11026_v50 = vld [vmem:[#allocation2 + $0xd0] sm:$0xff] }
 0x4b1   : > { %v11371_v60 = vadd.f32 %v11276_v45, %v11016_v23  ;;  %v11818_v27 = vadd.f32 %v11707_v58, %v11463_v18 }
 0x4b2   : > { %11404 = vst.msk [vmem:[#allocation2 + $0x88] sm:$0xff] %vm632_vm3, %v11372_v5  ;;  %11851 = vst.msk [vmem:[#allocation2 + $0x68] sm:$0xff] %vm632_vm3, %v11819_v42 }
 0x4b3   : > { %11403 = vst.msk [vmem:[#allocation2 + $0x80] sm:$0xff] %vm632_vm3, %v11371_v60  ;;  %v16660_v14 = vpop.f32.mrb[146].mxu0  ;;  %11850 = vst.msk [vmem:[#allocation2 + $0x60] sm:$0xff] %vm632_vm3, %v11818_v27  ;;  %v11466_v44 = vld [vmem:[#allocation2 + $0x78] sm:$0xff]  ;;  %v11029_v60 = vld [vmem:[#allocation2 + $0xe8] sm:$0xff] }
 0x4b4   : > { %v16710_v41 = vpop.f32.mrb[146].mxu1  ;;  %v11374_v30 = vadd.f32 %v16660_v14, %v11019_v22  ;;  %v11286_v21 = vpop.f32.mrb[147].mxu0  ;;  %v11821_v25 = vadd.f32 %v16704_v38, %v11466_v44  ;;  %v11465_v59 = vld [vmem:[#allocation2 + $0x70] sm:$0xff]  ;;  %v11028_v22 = vld [vmem:[#allocation2 + $0xe0] sm:$0xff] }
 0x4b5   : > { %v11737_v2 = vpop.f32.mrb[147].mxu1  ;;  %v11373_v61 = vadd.f32 %v11286_v21, %v11018_v55  ;;  %v11820_v33 = vadd.f32 %v11717_v54, %v11465_v59 }
 0x4b6   : > { %11406 = vst.msk [vmem:[#allocation2 + $0x98] sm:$0xff] %vm632_vm3, %v11374_v30  ;;  %11853 = vst.msk [vmem:[#allocation2 + $0x78] sm:$0xff] %vm632_vm3, %v11821_v25 }
 0x4b7   : > { %11405 = vst.msk [vmem:[#allocation2 + $0x90] sm:$0xff] %vm632_vm3, %v11373_v61  ;;  %v16663_v13 = vpop.f32.mrb[148].mxu0  ;;  %11852 = vst.msk [vmem:[#allocation2 + $0x70] sm:$0xff] %vm632_vm3, %v11820_v33  ;;  %v11031_v61 = vld [vmem:[#allocation2 + $0xf8] sm:$0xff] }
 0x4b8   : > { %v16713_v24 = vpop.f32.mrb[148].mxu1  ;;  %v11376_v0 = vadd.f32 %v16663_v13, %v11021_v3  ;;  %v11296_v43 = vpop.f32.mrb[149].mxu0  ;;  %v11030_v3 = vld [vmem:[#allocation2 + $0xf0] sm:$0xff] }
 0x4b9   : > { %v11747_v36 = vpop.f32.mrb[149].mxu1  ;;  %v11468_v48 = vld [vmem:[#allocation2 + $0x88] sm:$0xff]  ;;  %v11375_v19 = vadd.f32 %v11296_v43, %v11020_v49 }
 0x4ba   : > { %v11823_v47 = vadd.f32 %v16707_v39, %v11468_v48  ;;  %v11467_v32 = vld [vmem:[#allocation2 + $0x80] sm:$0xff]  ;;  %11408 = vst.msk [vmem:[#allocation2 + $0xa8] sm:$0xff] %vm632_vm3, %v11376_v0 }
 0x4bb   : > { %v11822_v56 = vadd.f32 %v11727_v34, %v11467_v32  ;;  %11407 = vst.msk [vmem:[#allocation2 + $0xa0] sm:$0xff] %vm632_vm3, %v11375_v19  ;;  %v11903_v19 = vld [vmem:[#allocation2 + $0x8] sm:$0xff] }
 0x4bc   : > { %v16666_v40 = vpop.f32.mrb[150].mxu0  ;;  %v16716_v6 = vpop.f32.mrb[150].mxu1  ;;  %11855 = vst.msk [vmem:[#allocation2 + $0x88] sm:$0xff] %vm632_vm3, %v11823_v47 }
 0x4bd   : > { %v11378_v35 = vadd.f32 %v16666_v40, %v11023_v16  ;;  %v11306_v51 = vpop.f32.mrb[151].mxu0  ;;  %v11757_v7 = vpop.f32.mrb[151].mxu1  ;;  %11854 = vst.msk [vmem:[#allocation2 + $0x80] sm:$0xff] %vm632_vm3, %v11822_v56  ;;  %v11470_v12 = vld [vmem:[#allocation2 + $0x98] sm:$0xff]  ;;  %v11902_v16 = vld [vmem:[#allocation2] sm:$0xff] }
 0x4be   : > { %v11377_v31 = vadd.f32 %v11306_v51, %v11022_v29  ;;  %v11825_v15 = vadd.f32 %v16710_v41, %v11470_v12  ;;  %v11469_v58 = vld [vmem:[#allocation2 + $0x90] sm:$0xff] }
 0x4bf   : > { %11410 = vst.msk [vmem:[#allocation2 + $0xb8] sm:$0xff] %vm632_vm3, %v11378_v35  ;;  %v11824_v46 = vadd.f32 %v11737_v2, %v11469_v58 }
 0x4c0   : > { %11409 = vst.msk [vmem:[#allocation2 + $0xb0] sm:$0xff] %vm632_vm3, %v11377_v31  ;;  %v16719_v28 = vpop.f32.mrb[152].mxu1  ;;  %11857 = vst.msk [vmem:[#allocation2 + $0x98] sm:$0xff] %vm632_vm3, %v11825_v15  ;;  %v11905_v31 = vld [vmem:[#allocation2 + $0x18] sm:$0xff] }
 0x4c1   : > { %v11767_v38 = vpop.f32.mrb[153].mxu1  ;;  %11856 = vst.msk [vmem:[#allocation2 + $0x90] sm:$0xff] %vm632_vm3, %v11824_v46  ;;  %v11472_v1 = vld [vmem:[#allocation2 + $0xa8] sm:$0xff] }
 0x4c2   : > { %v16669_v17 = vpop.f32.mrb[152].mxu0  ;;  %v11827_v10 = vadd.f32 %v16713_v24, %v11472_v1  ;;  %v11471_v54 = vld [vmem:[#allocation2 + $0xa0] sm:$0xff] }
 0x4c3   : > { %v11380_v20 = vadd.f32 %v16669_v17, %v11025_v11  ;;  %v11316_v57 = vpop.f32.mrb[153].mxu0  ;;  %v11826_v62 = vadd.f32 %v11747_v36, %v11471_v54  ;;  %v11904_v11 = vld [vmem:[#allocation2 + $0x10] sm:$0xff] }
 0x4c4   : > { %v11379_v63 = vadd.f32 %v11316_v57, %v11024_v9  ;;  %11859 = vst.msk [vmem:[#allocation2 + $0xa8] sm:$0xff] %vm632_vm3, %v11827_v10 }
 0x4c5   : > { %11412 = vst.msk [vmem:[#allocation2 + $0xc8] sm:$0xff] %vm632_vm3, %v11380_v20  ;;  %v16722_v8 = vpop.f32.mrb[154].mxu1  ;;  %11858 = vst.msk [vmem:[#allocation2 + $0xa0] sm:$0xff] %vm632_vm3, %v11826_v62 }
 0x4c6   : > { %11411 = vst.msk [vmem:[#allocation2 + $0xc0] sm:$0xff] %vm632_vm3, %v11379_v63  ;;  %v11777_v39 = vpop.f32.mrb[155].mxu1  ;;  %v11474_v5 = vld [vmem:[#allocation2 + $0xb8] sm:$0xff]  ;;  %v11907_v63 = vld [vmem:[#allocation2 + $0x28] sm:$0xff] }
 0x4c7   : > { %v11829_v45 = vadd.f32 %v16716_v6, %v11474_v5  ;;  %v11473_v34 = vld [vmem:[#allocation2 + $0xb0] sm:$0xff] }
 0x4c8   : > { %v11828_v37 = vadd.f32 %v11757_v7, %v11473_v34 }
 0x4c9   : > { %v16672_v53 = vpop.f32.mrb[154].mxu0  ;;  %11861 = vst.msk [vmem:[#allocation2 + $0xb8] sm:$0xff] %vm632_vm3, %v11829_v45 }
 0x4ca   : > { %v11382_v52 = vadd.f32 %v16672_v53, %v11027_v4  ;;  %v11326_v26 = vpop.f32.mrb[155].mxu0  ;;  %11860 = vst.msk [vmem:[#allocation2 + $0xb0] sm:$0xff] %vm632_vm3, %v11828_v37  ;;  %v11906_v4 = vld [vmem:[#allocation2 + $0x20] sm:$0xff] }
 0x4cb   : > { %v11381_v23 = vadd.f32 %v11326_v26, %v11026_v50  ;;  %v16725_v18 = vpop.f32.mrb[156].mxu1 }
 0x4cc   : > { %11414 = vst.msk [vmem:[#allocation2 + $0xd8] sm:$0xff] %vm632_vm3, %v11382_v52  ;;  %v11787_v41 = vpop.f32.mrb[157].mxu1  ;;  %v11476_v30 = vld [vmem:[#allocation2 + $0xc8] sm:$0xff] }
 0x4cd   : > { %11413 = vst.msk [vmem:[#allocation2 + $0xd0] sm:$0xff] %vm632_vm3, %v11381_v23  ;;  %v16675_v42 = vpop.f32.mrb[156].mxu0  ;;  %v11831_v21 = vadd.f32 %v16719_v28, %v11476_v30  ;;  %v11475_v2 = vld [vmem:[#allocation2 + $0xc0] sm:$0xff]  ;;  %v11909_v23 = vld [vmem:[#allocation2 + $0x38] sm:$0xff] }
 0x4ce   : > { %v11384_v27 = vadd.f32 %v16675_v42, %v11029_v60  ;;  %v11336_v14 = vpop.f32.mrb[157].mxu0  ;;  %v11830_v44 = vadd.f32 %v11767_v38, %v11475_v2  ;;  %v11908_v60 = vld [vmem:[#allocation2 + $0x30] sm:$0xff] }
 0x4cf   : > { %v11383_v55 = vadd.f32 %v11336_v14, %v11028_v22  ;;  %v16728_v59 = vpop.f32.mrb[158].mxu1  ;;  %11863 = vst.msk [vmem:[#allocation2 + $0xc8] sm:$0xff] %vm632_vm3, %v11831_v21 }
 0x4d0   : > { %11416 = vst.msk [vmem:[#allocation2 + $0xe8] sm:$0xff] %vm632_vm3, %v11384_v27  ;;  %v11797_v24 = vpop.f32.mrb[159].mxu1  ;;  %11862 = vst.msk [vmem:[#allocation2 + $0xc0] sm:$0xff] %vm632_vm3, %v11830_v44 }
 0x4d1   : > { %11415 = vst.msk [vmem:[#allocation2 + $0xe0] sm:$0xff] %vm632_vm3, %v11383_v55  ;;  %v16678_v25 = vpop.f32.mrb[158].mxu0  ;;  %v11911_v55 = vld [vmem:[#allocation2 + $0x48] sm:$0xff] }
 0x4d2   : > { %v11386_v33 = vadd.f32 %v16678_v25, %v11031_v61  ;;  %v11346_v13 = vpop.f32.mrb[159].mxu0  ;;  %v11910_v61 = vld [vmem:[#allocation2 + $0x40] sm:$0xff] }
 0x4d3   : > { %v11478_v0 = vld [vmem:[#allocation2 + $0xd8] sm:$0xff]  ;;  %v11385_v49 = vadd.f32 %v11346_v13, %v11030_v3 }
 0x4d4   : > { %v11833_v43 = vadd.f32 %v16722_v8, %v11478_v0  ;;  %v11477_v36 = vld [vmem:[#allocation2 + $0xd0] sm:$0xff]  ;;  %11418 = vst.msk [vmem:[#allocation2 + $0xf8] sm:$0xff] %vm632_vm3, %v11386_v33  ;;  %v16783_v32 = vpop.f32.mrb[160].mxu1  ;;  %v21041_v33 = vld [vmem:[%s21252_s6] ss:$0 sm:$0xff] }
 0x4d5   : > { %v11832_v48 = vadd.f32 %v11777_v39, %v11477_v36  ;;  %11417 = vst.msk [vmem:[#allocation2 + $0xf0] sm:$0xff] %vm632_vm3, %v11385_v49  ;;  %v13167_v6 = vpop.f32.mrb[161].mxu1  ;;  %v11913_v36 = vld [vmem:[#allocation2 + $0x58] sm:$0xff] }
 0x4d6   : > { %11865 = vst.msk [vmem:[#allocation2 + $0xd8] sm:$0xff] %vm632_vm3, %v11833_v43 }
 0x4d7   : > { %11864 = vst.msk [vmem:[#allocation2 + $0xd0] sm:$0xff] %vm632_vm3, %v11832_v48  ;;  %v11480_v35 = vld [vmem:[#allocation2 + $0xe8] sm:$0xff] }
 0x4d8   : > { %v16733_v47 = vpop.f32.mrb[160].mxu0  ;;  %v11835_v51 = vadd.f32 %v16725_v18, %v11480_v35  ;;  %v11479_v7 = vld [vmem:[#allocation2 + $0xe0] sm:$0xff] }
 0x4d9   : > { %v12258_v56 = vadd.f32 %v16733_v47, %v11903_v19  ;;  %v12098_v40 = vpop.f32.mrb[161].mxu0  ;;  %v11834_v12 = vadd.f32 %v11787_v41, %v11479_v7 }
 0x4da   : > { %v12257_v29 = vadd.f32 %v12098_v40, %v11902_v16  ;;  %v16786_v58 = vpop.f32.mrb[162].mxu1  ;;  %11867 = vst.msk [vmem:[#allocation2 + $0xe8] sm:$0xff] %vm632_vm3, %v11835_v51  ;;  %v11912_v16 = vld [vmem:[#allocation2 + $0x50] sm:$0xff] }
 0x4db   : > { %12290 = vst.msk [vmem:[#allocation2 + $0x8] sm:$0xff] %vm632_vm3, %v12258_v56  ;;  %v13177_v28 = vpop.f32.mrb[163].mxu1  ;;  %11866 = vst.msk [vmem:[#allocation2 + $0xe0] sm:$0xff] %vm632_vm3, %v11834_v12  ;;  %v11482_v20 = vld [vmem:[#allocation2 + $0xf8] sm:$0xff] }
 0x4dc   : > { %12289 = vst.msk [vmem:[#allocation2] sm:$0xff] %vm632_vm3, %v12257_v29  ;;  %v16736_v15 = vpop.f32.mrb[162].mxu0  ;;  %v11837_v57 = vadd.f32 %v16728_v59, %v11482_v20  ;;  %v11481_v38 = vld [vmem:[#allocation2 + $0xf0] sm:$0xff] }
 0x4dd   : > { %v12260_v46 = vadd.f32 %v16736_v15, %v11905_v31  ;;  %v12108_v17 = vpop.f32.mrb[163].mxu0  ;;  %v11836_v1 = vadd.f32 %v11797_v24, %v11481_v38 }
 0x4de   : > { %v12259_v9 = vadd.f32 %v12108_v17, %v11904_v11  ;;  %v16789_v54 = vpop.f32.mrb[164].mxu1  ;;  %11869 = vst.msk [vmem:[#allocation2 + $0xf8] sm:$0xff] %vm632_vm3, %v11837_v57 }
 0x4df   : > { %12292 = vst.msk [vmem:[#allocation2 + $0x18] sm:$0xff] %vm632_vm3, %v12260_v46  ;;  %v13187_v8 = vpop.f32.mrb[165].mxu1  ;;  %11868 = vst.msk [vmem:[#allocation2 + $0xf0] sm:$0xff] %vm632_vm3, %v11836_v1 }
 0x4e0   : > { %12291 = vst.msk [vmem:[#allocation2 + $0x10] sm:$0xff] %vm632_vm3, %v12259_v9  ;;  %v16739_v10 = vpop.f32.mrb[164].mxu0  ;;  %v11914_v9 = vld [vmem:[#allocation2 + $0x60] sm:$0xff] }
 0x4e1   : > { %v12262_v62 = vadd.f32 %v16739_v10, %v11907_v63  ;;  %v12118_v53 = vpop.f32.mrb[165].mxu0 }
 0x4e2   : > { %v12261_v52 = vadd.f32 %v12118_v53, %v11906_v4  ;;  %v12973_v50 = vld [vmem:[#allocation2 + $0x8] sm:$0xff]  ;;  %v16792_v34 = vpop.f32.mrb[166].mxu1 }
 0x4e3   : > { %12294 = vst.msk [vmem:[#allocation2 + $0x28] sm:$0xff] %vm632_vm3, %v12262_v62  ;;  %v13327_v26 = vadd.f32 %v16783_v32, %v12973_v50  ;;  %v12972_v39 = vld [vmem:[#allocation2] sm:$0xff]  ;;  %v13197_v18 = vpop.f32.mrb[167].mxu1 }
 0x4e4   : > { %12293 = vst.msk [vmem:[#allocation2 + $0x20] sm:$0xff] %vm632_vm3, %v12261_v52  ;;  %v13326_v5 = vadd.f32 %v13167_v6, %v12972_v39  ;;  %v16742_v45 = vpop.f32.mrb[166].mxu0 }
 0x4e5   : > { %13359 = vst.msk [vmem:[#allocation2 + $0x8] sm:$0xff] %vm632_vm3, %v13327_v26  ;;  %v12264_v37 = vadd.f32 %v16742_v45, %v11909_v23  ;;  %v12128_v42 = vpop.f32.mrb[167].mxu0  ;;  %v11916_v23 = vld [vmem:[#allocation2 + $0x70] sm:$0xff] }
 0x4e6   : > { %13358 = vst.msk [vmem:[#allocation2] sm:$0xff] %vm632_vm3, %v13326_v5  ;;  %v12263_v27 = vadd.f32 %v12128_v42, %v11908_v60  ;;  %v12975_v22 = vld [vmem:[#allocation2 + $0x18] sm:$0xff]  ;;  %v16795_v2 = vpop.f32.mrb[168].mxu1 }
 0x4e7   : > { %12296 = vst.msk [vmem:[#allocation2 + $0x38] sm:$0xff] %vm632_vm3, %v12264_v37  ;;  %v13329_v14 = vadd.f32 %v16786_v58, %v12975_v22  ;;  %v12974_v41 = vld [vmem:[#allocation2 + $0x10] sm:$0xff]  ;;  %v13207_v59 = vpop.f32.mrb[169].mxu1  ;;  %v11915_v58 = vld [vmem:[#allocation2 + $0x68] sm:$0xff] }
 0x4e8   : > { %12295 = vst.msk [vmem:[#allocation2 + $0x30] sm:$0xff] %vm632_vm3, %v12263_v27  ;;  %v13328_v30 = vadd.f32 %v13177_v28, %v12974_v41  ;;  %v16745_v21 = vpop.f32.mrb[168].mxu0  ;;  %v11919_v41 = vld [vmem:[#allocation2 + $0x88] sm:$0xff] }
 0x4e9   : > { %13361 = vst.msk [vmem:[#allocation2 + $0x18] sm:$0xff] %vm632_vm3, %v13329_v14  ;;  %v12266_v44 = vadd.f32 %v16745_v21, %v11911_v55  ;;  %v12138_v25 = vpop.f32.mrb[169].mxu0 }
 0x4ea   : > { %13360 = vst.msk [vmem:[#allocation2 + $0x10] sm:$0xff] %vm632_vm3, %v13328_v30  ;;  %v12265_v3 = vadd.f32 %v12138_v25, %v11910_v61  ;;  %v12977_v13 = vld [vmem:[#allocation2 + $0x28] sm:$0xff]  ;;  %v16798_v19 = vpop.f32.mrb[170].mxu1  ;;  %v11918_v61 = vld [vmem:[#allocation2 + $0x80] sm:$0xff] }
 0x4eb   : > { %12298 = vst.msk [vmem:[#allocation2 + $0x48] sm:$0xff] %vm632_vm3, %v12266_v44  ;;  %v13331_v24 = vadd.f32 %v16789_v54, %v12977_v13  ;;  %v12976_v0 = vld [vmem:[#allocation2 + $0x20] sm:$0xff]  ;;  %v13217_v6 = vpop.f32.mrb[171].mxu1 }
 0x4ec   : > { %v13391_v49 = vld [vmem:[#allocation2 + $0x8] sm:$0xff]  ;;  %12297 = vst.msk [vmem:[#allocation2 + $0x40] sm:$0xff] %vm632_vm3, %v12265_v3  ;;  %v13330_v43 = vadd.f32 %v13187_v8, %v12976_v0  ;;  %v16748_v48 = vpop.f32.mrb[170].mxu0  ;;  %v11917_v8 = vld [vmem:[#allocation2 + $0x78] sm:$0xff] }
 0x4ed   : > { %v13430_v47 = vadd.f32 %v21041_v33, %v13391_v49  ;;  %v13390_v32 = vld [vmem:[#allocation2] sm:$0xff]  ;;  %13363 = vst.msk [vmem:[#allocation2 + $0x28] sm:$0xff] %vm632_vm3, %v13331_v24  ;;  %v12268_v56 = vadd.f32 %v16748_v48, %v11913_v36  ;;  %v12148_v40 = vpop.f32.mrb[171].mxu0  ;;  %v11921_v48 = vld [vmem:[#allocation2 + $0x98] sm:$0xff] }
 0x4ee   : > { %v13429_v35 = vadd.f32 %v21041_v33, %v13390_v32  ;;  %13362 = vst.msk [vmem:[#allocation2 + $0x20] sm:$0xff] %vm632_vm3, %v13330_v43  ;;  %v12267_v29 = vadd.f32 %v12148_v40, %v11912_v16  ;;  %v12979_v51 = vld [vmem:[#allocation2 + $0x38] sm:$0xff]  ;;  %v16801_v11 = vpop.f32.mrb[172].mxu1  ;;  %v11920_v40 = vld [vmem:[#allocation2 + $0x90] sm:$0xff] }
 0x4ef   : > { %13462 = vst.msk [vmem:[%s21050_s29 + $0x8] sm:$0xff] %vm632_vm3, %v13430_v47  ;;  %12300 = vst.msk [vmem:[#allocation2 + $0x58] sm:$0xff] %vm632_vm3, %v12268_v56  ;;  %v13333_v7 = vadd.f32 %v16792_v34, %v12979_v51  ;;  %v12978_v12 = vld [vmem:[#allocation2 + $0x30] sm:$0xff]  ;;  %v13227_v38 = vpop.f32.mrb[173].mxu1 }
 0x4f0   : > { %13461 = vst.msk [vmem:[%s21050_s29] sm:$0xff] %vm632_vm3, %v13429_v35  ;;  %v13393_v31 = vld [vmem:[#allocation2 + $0x18] sm:$0xff]  ;;  %12299 = vst.msk [vmem:[#allocation2 + $0x50] sm:$0xff] %vm632_vm3, %v12267_v29  ;;  %v13332_v15 = vadd.f32 %v13197_v18, %v12978_v12 }
 0x4f1   : > { %v13432_v17 = vadd.f32 %v21041_v33, %v13393_v31  ;;  %v13392_v28 = vld [vmem:[#allocation2 + $0x10] sm:$0xff]  ;;  %13365 = vst.msk [vmem:[#allocation2 + $0x38] sm:$0xff] %vm632_vm3, %v13333_v7 }
 0x4f2   : > { %v16751_v46 = vpop.f32.mrb[172].mxu0  ;;  %v13431_v1 = vadd.f32 %v21041_v33, %v13392_v28  ;;  %13364 = vst.msk [vmem:[#allocation2 + $0x30] sm:$0xff] %vm632_vm3, %v13332_v15  ;;  %v12981_v10 = vld [vmem:[#allocation2 + $0x48] sm:$0xff]  ;;  %v16804_v50 = vpop.f32.mrb[174].mxu1 }
 0x4f3   : > { %v12270_v20 = vadd.f32 %v16751_v46, %v11915_v58  ;;  %v12158_v57 = vpop.f32.mrb[173].mxu0  ;;  %13464 = vst.msk [vmem:[%s21050_s29 + $0x18] sm:$0xff] %vm632_vm3, %v13432_v17  ;;  %v13335_v54 = vadd.f32 %v16795_v2, %v12981_v10  ;;  %v12980_v62 = vld [vmem:[#allocation2 + $0x40] sm:$0xff]  ;;  %v13237_v34 = vpop.f32.mrb[175].mxu1  ;;  %v11923_v46 = vld [vmem:[#allocation2 + $0xa8] sm:$0xff] }
 0x4f4   : > { %v12269_v63 = vadd.f32 %v12158_v57, %v11914_v9  ;;  %13463 = vst.msk [vmem:[%s21050_s29 + $0x10] sm:$0xff] %vm632_vm3, %v13431_v1  ;;  %v13395_v4 = vld [vmem:[#allocation2 + $0x28] sm:$0xff]  ;;  %v13334_v53 = vadd.f32 %v13207_v59, %v12980_v62  ;;  %v11922_v57 = vld [vmem:[#allocation2 + $0xa0] sm:$0xff] }
 0x4f5   : > { %12302 = vst.msk [vmem:[#allocation2 + $0x68] sm:$0xff] %vm632_vm3, %v12270_v20  ;;  %v13434_v26 = vadd.f32 %v21041_v33, %v13395_v4  ;;  %v13394_v39 = vld [vmem:[#allocation2 + $0x20] sm:$0xff]  ;;  %13367 = vst.msk [vmem:[#allocation2 + $0x48] sm:$0xff] %vm632_vm3, %v13335_v54 }
 0x4f6   : > { %12301 = vst.msk [vmem:[#allocation2 + $0x60] sm:$0xff] %vm632_vm3, %v12269_v63  ;;  %v16754_v52 = vpop.f32.mrb[174].mxu0  ;;  %v13433_v37 = vadd.f32 %v21041_v33, %v13394_v39  ;;  %13366 = vst.msk [vmem:[#allocation2 + $0x40] sm:$0xff] %vm632_vm3, %v13334_v53  ;;  %v12983_v42 = vld [vmem:[#allocation2 + $0x58] sm:$0xff] }
 0x4f7   : > { %v12272_v5 = vadd.f32 %v16754_v52, %v11917_v8  ;;  %v12168_v45 = vpop.f32.mrb[175].mxu0  ;;  %13466 = vst.msk [vmem:[%s21050_s29 + $0x28] sm:$0xff] %vm632_vm3, %v13434_v26  ;;  %v13337_v18 = vadd.f32 %v16798_v19, %v12983_v42  ;;  %v12982_v27 = vld [vmem:[#allocation2 + $0x50] sm:$0xff]  ;;  %v16807_v55 = vpop.f32.mrb[176].mxu1  ;;  %v11925_v52 = vld [vmem:[#allocation2 + $0xb8] sm:$0xff] }
 0x4f8   : > { %v12271_v60 = vadd.f32 %v12168_v45, %v11916_v23  ;;  %13465 = vst.msk [vmem:[%s21050_s29 + $0x20] sm:$0xff] %vm632_vm3, %v13433_v37  ;;  %v13397_v22 = vld [vmem:[#allocation2 + $0x38] sm:$0xff]  ;;  %v13336_v14 = vadd.f32 %v13217_v6, %v12982_v27  ;;  %v13247_v59 = vpop.f32.mrb[177].mxu1  ;;  %v11924_v45 = vld [vmem:[#allocation2 + $0xb0] sm:$0xff] }
 0x4f9   : > { %12304 = vst.msk [vmem:[#allocation2 + $0x78] sm:$0xff] %vm632_vm3, %v12272_v5  ;;  %v13436_v21 = vadd.f32 %v21041_v33, %v13397_v22  ;;  %v13396_v2 = vld [vmem:[#allocation2 + $0x30] sm:$0xff]  ;;  %13369 = vst.msk [vmem:[#allocation2 + $0x58] sm:$0xff] %vm632_vm3, %v13337_v18 }
 0x4fa   : > { %12303 = vst.msk [vmem:[#allocation2 + $0x70] sm:$0xff] %vm632_vm3, %v12271_v60  ;;  %v16757_v30 = vpop.f32.mrb[176].mxu0  ;;  %v13435_v3 = vadd.f32 %v21041_v33, %v13396_v2  ;;  %13368 = vst.msk [vmem:[#allocation2 + $0x50] sm:$0xff] %vm632_vm3, %v13336_v14 }
 0x4fb   : > { %v12274_v44 = vadd.f32 %v16757_v30, %v11919_v41  ;;  %v12178_v25 = vpop.f32.mrb[177].mxu0  ;;  %13468 = vst.msk [vmem:[%s21050_s29 + $0x38] sm:$0xff] %vm632_vm3, %v13436_v21  ;;  %v11927_v30 = vld [vmem:[#allocation2 + $0xc8] sm:$0xff] }
 0x4fc   : > { %v12273_v13 = vadd.f32 %v12178_v25, %v11918_v61  ;;  %v12985_v24 = vld [vmem:[#allocation2 + $0x68] sm:$0xff]  ;;  %13467 = vst.msk [vmem:[%s21050_s29 + $0x30] sm:$0xff] %vm632_vm3, %v13435_v3  ;;  %v16810_v47 = vpop.f32.mrb[178].mxu1  ;;  %v11926_v25 = vld [vmem:[#allocation2 + $0xc0] sm:$0xff] }
 0x4fd   : > { %12306 = vst.msk [vmem:[#allocation2 + $0x88] sm:$0xff] %vm632_vm3, %v12274_v44  ;;  %v13339_v0 = vadd.f32 %v16801_v11, %v12985_v24  ;;  %v12984_v49 = vld [vmem:[#allocation2 + $0x60] sm:$0xff]  ;;  %v13399_v43 = vld [vmem:[#allocation2 + $0x48] sm:$0xff]  ;;  %v13257_v35 = vpop.f32.mrb[179].mxu1 }
 0x4fe   : > { %12305 = vst.msk [vmem:[#allocation2 + $0x80] sm:$0xff] %vm632_vm3, %v12273_v13  ;;  %v13338_v36 = vadd.f32 %v13227_v38, %v12984_v49  ;;  %v16760_v19 = vpop.f32.mrb[178].mxu0  ;;  %v13438_v32 = vadd.f32 %v21041_v33, %v13399_v43  ;;  %v13398_v56 = vld [vmem:[#allocation2 + $0x40] sm:$0xff] }
 0x4ff   : > { %13371 = vst.msk [vmem:[#allocation2 + $0x68] sm:$0xff] %vm632_vm3, %v13339_v0  ;;  %v12276_v16 = vadd.f32 %v16760_v19, %v11921_v48  ;;  %v12188_v6 = vpop.f32.mrb[179].mxu0  ;;  %v13437_v29 = vadd.f32 %v21041_v33, %v13398_v56  ;;  %v11929_v19 = vld [vmem:[#allocation2 + $0xd8] sm:$0xff] }
 0x500   : > { %13370 = vst.msk [vmem:[#allocation2 + $0x60] sm:$0xff] %vm632_vm3, %v13338_v36  ;;  %v12275_v51 = vadd.f32 %v12188_v6, %v11920_v40  ;;  %v12987_v7 = vld [vmem:[#allocation2 + $0x78] sm:$0xff]  ;;  %13470 = vst.msk [vmem:[%s21050_s29 + $0x48] sm:$0xff] %vm632_vm3, %v13438_v32  ;;  %v16813_v17 = vpop.f32.mrb[180].mxu1  ;;  %v11928_v6 = vld [vmem:[#allocation2 + $0xd0] sm:$0xff] }
 0x501   : > { %12308 = vst.msk [vmem:[#allocation2 + $0x98] sm:$0xff] %vm632_vm3, %v12276_v16  ;;  %v13341_v12 = vadd.f32 %v16804_v50, %v12987_v7  ;;  %v12986_v31 = vld [vmem:[#allocation2 + $0x70] sm:$0xff]  ;;  %13469 = vst.msk [vmem:[%s21050_s29 + $0x40] sm:$0xff] %vm632_vm3, %v13437_v29  ;;  %v13401_v15 = vld [vmem:[#allocation2 + $0x58] sm:$0xff]  ;;  %v13267_v1 = vpop.f32.mrb[181].mxu1 }
 0x502   : > { %12307 = vst.msk [vmem:[#allocation2 + $0x90] sm:$0xff] %vm632_vm3, %v12275_v51  ;;  %v13340_v58 = vadd.f32 %v13237_v34, %v12986_v31  ;;  %v16763_v11 = vpop.f32.mrb[180].mxu0  ;;  %v13440_v28 = vadd.f32 %v21041_v33, %v13401_v15  ;;  %v13400_v20 = vld [vmem:[#allocation2 + $0x50] sm:$0xff] }
 0x503   : > { %13373 = vst.msk [vmem:[#allocation2 + $0x78] sm:$0xff] %vm632_vm3, %v13341_v12  ;;  %v12278_v9 = vadd.f32 %v16763_v11, %v11923_v46  ;;  %v12198_v38 = vpop.f32.mrb[181].mxu0  ;;  %v13439_v63 = vadd.f32 %v21041_v33, %v13400_v20  ;;  %v11931_v11 = vld [vmem:[#allocation2 + $0xe8] sm:$0xff] }
 0x504   : > { %13372 = vst.msk [vmem:[#allocation2 + $0x70] sm:$0xff] %vm632_vm3, %v13340_v58  ;;  %v12277_v10 = vadd.f32 %v12198_v38, %v11922_v57  ;;  %v12989_v54 = vld [vmem:[#allocation2 + $0x88] sm:$0xff]  ;;  %13472 = vst.msk [vmem:[%s21050_s29 + $0x58] sm:$0xff] %vm632_vm3, %v13440_v28  ;;  %v16816_v26 = vpop.f32.mrb[182].mxu1  ;;  %v11930_v38 = vld [vmem:[#allocation2 + $0xe0] sm:$0xff] }
 0x505   : > { %12310 = vst.msk [vmem:[#allocation2 + $0xa8] sm:$0xff] %vm632_vm3, %v12278_v9  ;;  %v13343_v62 = vadd.f32 %v16807_v55, %v12989_v54  ;;  %v12988_v4 = vld [vmem:[#allocation2 + $0x80] sm:$0xff]  ;;  %13471 = vst.msk [vmem:[%s21050_s29 + $0x50] sm:$0xff] %vm632_vm3, %v13439_v63  ;;  %v13277_v37 = vpop.f32.mrb[183].mxu1 }
 0x506   : > { %v13403_v53 = vld [vmem:[#allocation2 + $0x68] sm:$0xff]  ;;  %12309 = vst.msk [vmem:[#allocation2 + $0xa0] sm:$0xff] %vm632_vm3, %v12277_v10  ;;  %v13342_v8 = vadd.f32 %v13247_v59, %v12988_v4  ;;  %v16766_v50 = vpop.f32.mrb[182].mxu0 }
 0x507   : > { %v13442_v39 = vadd.f32 %v21041_v33, %v13403_v53  ;;  %v13402_v5 = vld [vmem:[#allocation2 + $0x60] sm:$0xff]  ;;  %13375 = vst.msk [vmem:[#allocation2 + $0x88] sm:$0xff] %vm632_vm3, %v13343_v62  ;;  %v12280_v23 = vadd.f32 %v16766_v50, %v11925_v52  ;;  %v12208_v34 = vpop.f32.mrb[183].mxu0  ;;  %v11933_v50 = vld [vmem:[#allocation2 + $0xf8] sm:$0xff] }
 0x508   : > { %v13441_v60 = vadd.f32 %v21041_v33, %v13402_v5  ;;  %13374 = vst.msk [vmem:[#allocation2 + $0x80] sm:$0xff] %vm632_vm3, %v13342_v8  ;;  %v12279_v42 = vadd.f32 %v12208_v34, %v11924_v45  ;;  %v12991_v18 = vld [vmem:[#allocation2 + $0x98] sm:$0xff]  ;;  %v16819_v21 = vpop.f32.mrb[184].mxu1  ;;  %v11932_v34 = vld [vmem:[#allocation2 + $0xf0] sm:$0xff] }
 0x509   : > { %13474 = vst.msk [vmem:[%s21050_s29 + $0x68] sm:$0xff] %vm632_vm3, %v13442_v39  ;;  %12312 = vst.msk [vmem:[#allocation2 + $0xb8] sm:$0xff] %vm632_vm3, %v12280_v23  ;;  %v13345_v27 = vadd.f32 %v16810_v47, %v12991_v18  ;;  %v12990_v22 = vld [vmem:[#allocation2 + $0x90] sm:$0xff]  ;;  %v13287_v3 = vpop.f32.mrb[185].mxu1 }
 0x50a   : > { %13473 = vst.msk [vmem:[%s21050_s29 + $0x60] sm:$0xff] %vm632_vm3, %v13441_v60  ;;  %v13405_v14 = vld [vmem:[#allocation2 + $0x78] sm:$0xff]  ;;  %12311 = vst.msk [vmem:[#allocation2 + $0xb0] sm:$0xff] %vm632_vm3, %v12279_v42  ;;  %v13344_v41 = vadd.f32 %v13257_v35, %v12990_v22  ;;  %v16769_v55 = vpop.f32.mrb[184].mxu0 }
 0x50b   : > { %v13444_v2 = vadd.f32 %v21041_v33, %v13405_v14  ;;  %v13404_v44 = vld [vmem:[#allocation2 + $0x70] sm:$0xff]  ;;  %13377 = vst.msk [vmem:[#allocation2 + $0x98] sm:$0xff] %vm632_vm3, %v13345_v27  ;;  %v12282_v61 = vadd.f32 %v16769_v55, %v11927_v30  ;;  %v12218_v59 = vpop.f32.mrb[185].mxu0 }
 0x50c   : > { %v13443_v13 = vadd.f32 %v21041_v33, %v13404_v44  ;;  %13376 = vst.msk [vmem:[#allocation2 + $0x90] sm:$0xff] %vm632_vm3, %v13344_v41  ;;  %v12281_v24 = vadd.f32 %v12218_v59, %v11926_v25  ;;  %v12993_v0 = vld [vmem:[#allocation2 + $0xa8] sm:$0xff]  ;;  %v16822_v32 = vpop.f32.mrb[186].mxu1 }
 0x50d   : > { %13476 = vst.msk [vmem:[%s21050_s29 + $0x78] sm:$0xff] %vm632_vm3, %v13444_v2  ;;  %12314 = vst.msk [vmem:[#allocation2 + $0xc8] sm:$0xff] %vm632_vm3, %v12282_v61  ;;  %v13347_v49 = vadd.f32 %v16813_v17, %v12993_v0  ;;  %v12992_v43 = vld [vmem:[#allocation2 + $0xa0] sm:$0xff]  ;;  %v13297_v29 = vpop.f32.mrb[187].mxu1 }
 0x50e   : > { %13475 = vst.msk [vmem:[%s21050_s29 + $0x70] sm:$0xff] %vm632_vm3, %v13443_v13  ;;  %v13407_v36 = vld [vmem:[#allocation2 + $0x88] sm:$0xff]  ;;  %12313 = vst.msk [vmem:[#allocation2 + $0xc0] sm:$0xff] %vm632_vm3, %v12281_v24  ;;  %v13346_v48 = vadd.f32 %v13267_v1, %v12992_v43  ;;  %v16772_v47 = vpop.f32.mrb[186].mxu0 }
 0x50f   : > { %v13446_v56 = vadd.f32 %v21041_v33, %v13407_v36  ;;  %v13406_v16 = vld [vmem:[#allocation2 + $0x80] sm:$0xff]  ;;  %13379 = vst.msk [vmem:[#allocation2 + $0xa8] sm:$0xff] %vm632_vm3, %v13347_v49  ;;  %v12284_v40 = vadd.f32 %v16772_v47, %v11929_v19  ;;  %v12228_v35 = vpop.f32.mrb[187].mxu0 }
 0x510   : > { %v13445_v51 = vadd.f32 %v21041_v33, %v13406_v16  ;;  %13378 = vst.msk [vmem:[#allocation2 + $0xa0] sm:$0xff] %vm632_vm3, %v13346_v48  ;;  %v12283_v7 = vadd.f32 %v12228_v35, %v11928_v6  ;;  %v12995_v12 = vld [vmem:[#allocation2 + $0xb8] sm:$0xff]  ;;  %v16825_v28 = vpop.f32.mrb[188].mxu1 }
 0x511   : > { %13478 = vst.msk [vmem:[%s21050_s29 + $0x88] sm:$0xff] %vm632_vm3, %v13446_v56  ;;  %12316 = vst.msk [vmem:[#allocation2 + $0xd8] sm:$0xff] %vm632_vm3, %v12284_v40  ;;  %v13349_v31 = vadd.f32 %v16816_v26, %v12995_v12  ;;  %v12994_v15 = vld [vmem:[#allocation2 + $0xb0] sm:$0xff]  ;;  %v13307_v63 = vpop.f32.mrb[189].mxu1 }
 0x512   : > { %13477 = vst.msk [vmem:[%s21050_s29 + $0x80] sm:$0xff] %vm632_vm3, %v13445_v51  ;;  %v13409_v58 = vld [vmem:[#allocation2 + $0x98] sm:$0xff]  ;;  %12315 = vst.msk [vmem:[#allocation2 + $0xd0] sm:$0xff] %vm632_vm3, %v12283_v7  ;;  %v13348_v46 = vadd.f32 %v13277_v37, %v12994_v15  ;;  %v16775_v17 = vpop.f32.mrb[188].mxu0 }
 0x513   : > { %v13448_v20 = vadd.f32 %v21041_v33, %v13409_v58  ;;  %v13408_v9 = vld [vmem:[#allocation2 + $0x90] sm:$0xff]  ;;  %13381 = vst.msk [vmem:[#allocation2 + $0xb8] sm:$0xff] %vm632_vm3, %v13349_v31  ;;  %v12286_v57 = vadd.f32 %v16775_v17, %v11931_v11  ;;  %v12238_v1 = vpop.f32.mrb[189].mxu0 }
 0x514   : > { %v13447_v10 = vadd.f32 %v21041_v33, %v13408_v9  ;;  %13380 = vst.msk [vmem:[#allocation2 + $0xb0] sm:$0xff] %vm632_vm3, %v13348_v46  ;;  %v12285_v54 = vadd.f32 %v12238_v1, %v11930_v38  ;;  %v12997_v62 = vld [vmem:[#allocation2 + $0xc8] sm:$0xff]  ;;  %v16828_v39 = vpop.f32.mrb[190].mxu1 }
 0x515   : > { %13480 = vst.msk [vmem:[%s21050_s29 + $0x98] sm:$0xff] %vm632_vm3, %v13448_v20  ;;  %12318 = vst.msk [vmem:[#allocation2 + $0xe8] sm:$0xff] %vm632_vm3, %v12286_v57  ;;  %v13351_v4 = vadd.f32 %v16819_v21, %v12997_v62  ;;  %v12996_v53 = vld [vmem:[#allocation2 + $0xc0] sm:$0xff]  ;;  %v13317_v60 = vpop.f32.mrb[191].mxu1 }
 0x516   : > { %13479 = vst.msk [vmem:[%s21050_s29 + $0x90] sm:$0xff] %vm632_vm3, %v13447_v10  ;;  %v13411_v8 = vld [vmem:[#allocation2 + $0xa8] sm:$0xff]  ;;  %12317 = vst.msk [vmem:[#allocation2 + $0xe0] sm:$0xff] %vm632_vm3, %v12285_v54  ;;  %v13350_v52 = vadd.f32 %v13287_v3, %v12996_v53  ;;  %v16778_v26 = vpop.f32.mrb[190].mxu0 }
 0x517   : > { %v13450_v5 = vadd.f32 %v21041_v33, %v13411_v8  ;;  %v13410_v23 = vld [vmem:[#allocation2 + $0xa0] sm:$0xff]  ;;  %13383 = vst.msk [vmem:[#allocation2 + $0xc8] sm:$0xff] %vm632_vm3, %v13351_v4  ;;  %v12288_v45 = vadd.f32 %v16778_v26, %v11933_v50  ;;  %v12248_v37 = vpop.f32.mrb[191].mxu0 }
 0x518   : > { %v13449_v42 = vadd.f32 %v21041_v33, %v13410_v23  ;;  %13382 = vst.msk [vmem:[#allocation2 + $0xc0] sm:$0xff] %vm632_vm3, %v13350_v52  ;;  %v12287_v18 = vadd.f32 %v12248_v37, %v11932_v34  ;;  %v12999_v27 = vld [vmem:[#allocation2 + $0xd8] sm:$0xff] }
 0x519   : > { %13482 = vst.msk [vmem:[%s21050_s29 + $0xa8] sm:$0xff] %vm632_vm3, %v13450_v5  ;;  %12320 = vst.msk [vmem:[#allocation2 + $0xf8] sm:$0xff] %vm632_vm3, %v12288_v45  ;;  %v13353_v22 = vadd.f32 %v16822_v32, %v12999_v27  ;;  %v12998_v14 = vld [vmem:[#allocation2 + $0xd0] sm:$0xff] }
 0x51a   : > { %13481 = vst.msk [vmem:[%s21050_s29 + $0xa0] sm:$0xff] %vm632_vm3, %v13449_v42  ;;  %v13413_v41 = vld [vmem:[#allocation2 + $0xb8] sm:$0xff]  ;;  %12319 = vst.msk [vmem:[#allocation2 + $0xf0] sm:$0xff] %vm632_vm3, %v12287_v18  ;;  %v13352_v30 = vadd.f32 %v13297_v29, %v12998_v14 }
 0x51b   : > { %v13452_v55 = vadd.f32 %v21041_v33, %v13413_v41  ;;  %v13412_v21 = vld [vmem:[#allocation2 + $0xb0] sm:$0xff]  ;;  %13385 = vst.msk [vmem:[#allocation2 + $0xd8] sm:$0xff] %vm632_vm3, %v13353_v22 }
 0x51c   : > { %v13451_v2 = vadd.f32 %v21041_v33, %v13412_v21  ;;  %13384 = vst.msk [vmem:[#allocation2 + $0xd0] sm:$0xff] %vm632_vm3, %v13352_v30  ;;  %v13001_v44 = vld [vmem:[#allocation2 + $0xe8] sm:$0xff] }
 0x51d   : > { %13484 = vst.msk [vmem:[%s21050_s29 + $0xb8] sm:$0xff] %vm632_vm3, %v13452_v55  ;;  %v13355_v61 = vadd.f32 %v16825_v28, %v13001_v44  ;;  %v13000_v25 = vld [vmem:[#allocation2 + $0xe0] sm:$0xff] }
 0x51e   : > { %13483 = vst.msk [vmem:[%s21050_s29 + $0xb0] sm:$0xff] %vm632_vm3, %v13451_v2  ;;  %v13415_v59 = vld [vmem:[#allocation2 + $0xc8] sm:$0xff]  ;;  %v13354_v3 = vadd.f32 %v13307_v63, %v13000_v25 }
 0x51f   : > { %v13454_v13 = vadd.f32 %v21041_v33, %v13415_v59  ;;  %v13414_v24 = vld [vmem:[#allocation2 + $0xc0] sm:$0xff]  ;;  %13387 = vst.msk [vmem:[#allocation2 + $0xe8] sm:$0xff] %vm632_vm3, %v13355_v61 }
 0x520   : > { %v13453_v0 = vadd.f32 %v21041_v33, %v13414_v24  ;;  %13386 = vst.msk [vmem:[#allocation2 + $0xe0] sm:$0xff] %vm632_vm3, %v13354_v3  ;;  %v13003_v49 = vld [vmem:[#allocation2 + $0xf8] sm:$0xff] }
 0x521   : > { %13486 = vst.msk [vmem:[%s21050_s29 + $0xc8] sm:$0xff] %vm632_vm3, %v13454_v13  ;;  %v13357_v43 = vadd.f32 %v16828_v39, %v13003_v49  ;;  %v13002_v36 = vld [vmem:[#allocation2 + $0xf0] sm:$0xff] }
 0x522   : > { %13485 = vst.msk [vmem:[%s21050_s29 + $0xc0] sm:$0xff] %vm632_vm3, %v13453_v0  ;;  %v13417_v48 = vld [vmem:[#allocation2 + $0xd8] sm:$0xff]  ;;  %v13356_v19 = vadd.f32 %v13317_v60, %v13002_v36 }
 0x523   : > { %v13456_v47 = vadd.f32 %v21041_v33, %v13417_v48  ;;  %v13416_v32 = vld [vmem:[#allocation2 + $0xd0] sm:$0xff]  ;;  %13389 = vst.msk [vmem:[#allocation2 + $0xf8] sm:$0xff] %vm632_vm3, %v13357_v43 }
 0x524   : > { %v13455_v56 = vadd.f32 %v21041_v33, %v13416_v32  ;;  %13388 = vst.msk [vmem:[#allocation2 + $0xf0] sm:$0xff] %vm632_vm3, %v13356_v19 }
 0x525   : > { %13488 = vst.msk [vmem:[%s21050_s29 + $0xd8] sm:$0xff] %vm632_vm3, %v13456_v47 }
 0x526   : > { %13487 = vst.msk [vmem:[%s21050_s29 + $0xd0] sm:$0xff] %vm632_vm3, %v13455_v56  ;;  %v13419_v16 = vld [vmem:[#allocation2 + $0xe8] sm:$0xff] }
 0x527   : > { %v13458_v40 = vadd.f32 %v21041_v33, %v13419_v16  ;;  %v13418_v6 = vld [vmem:[#allocation2 + $0xe0] sm:$0xff] }
 0x528   : > { %v13457_v35 = vadd.f32 %v21041_v33, %v13418_v6 }
 0x529   : > { %13490 = vst.msk [vmem:[%s21050_s29 + $0xe8] sm:$0xff] %vm632_vm3, %v13458_v40 }
 0x52a   : > { %13489 = vst.msk [vmem:[%s21050_s29 + $0xe0] sm:$0xff] %vm632_vm3, %v13457_v35  ;;  %v13421_v29 = vld [vmem:[#allocation2 + $0xf8] sm:$0xff] }
 0x52b   : > { %v13460_v51 = vadd.f32 %v21041_v33, %v13421_v29  ;;  %v13420_v7 = vld [vmem:[#allocation2 + $0xf0] sm:$0xff] }
 0x52c   : > { %v13459_v12 = vadd.f32 %v21041_v33, %v13420_v7 }
 0x52d   : > { %13492 = vst.msk [vmem:[%s21050_s29 + $0xf8] sm:$0xff] %vm632_vm3, %v13460_v51 }
 0x52e   : > { %13491 = vst.msk [vmem:[%s21050_s29 + $0xf0] sm:$0xff] %vm632_vm3, %v13459_v12 }
 0x52f   : > { %16887 = shalt.err (!%p16884_p3)
}
 0x530   : > { %s16888_s20 = scalar_lea.hbm %s21194_s15, 4096  ;;  %s16892_s23 = scalar_lea.hbm %s21253_s7, 8192 }
 0x531   : > { %p16889_p4 = scmp.ne.s32.totalorder %s21194_s15, %s16888_s20  ;;  %p16893_p9 = scmp.lt.u32.totalorder %s21194_s15, %s21253_s7 }
 0x532   : > { %p16894_p10 = scmp.lt.u32.totalorder %s16892_s23, %s16888_s20  ;;  %p16896_p12 = scmp.lt.u32.totalorder %s16888_s20, %s21194_s15 }
 0x533   : > { %p16890_p7 = pnand %p16889_p4, %p17021_p5 }
 0x534   : > { %p16895_p11 = por %p16894_p10, %p16893_p9 }
 0x535   : > { %p16891_p8 = pneg %p16890_p7 }
 0x536   : > { %p16897_p13 = por %p16896_p12, %p16895_p11 }
 0x538   : > { %p16898_p0 = pnand %p16897_p13, %p16891_p8 }
 0x53a   : > { %16901 = shalt.err (!%p16898_p0)
}
 0x53b   : > { %s16941_s13 = smov 128   ;;  %s16942_s14 = smov 8  }
 0x53c   : > { %16829 = dma.vmem_to_hbm [thread:$0]  (%p17021_p5), %s21196_s9, 4096, %s21194_s15, %s21205_s28, %s16941_s13, %s16941_s13, %s16942_s14  }
 0x53d PF: > { %p16835_p1 = scmp.ge.s32.totalorder %s16936_s27, 2  ;;  %s13522_s16 = sand.u32 1, %s16924_s24  }
 0x53e   : > { %s13523_s17 = scalar_lea.sflag [#allocation6], %s13522_s16 }
 0x53f   : > { %p16832_p2 = pnand %p16835_p1, %p17025_p6 }
 0x541   : > { %16919 = dma.done.wait (!%p16832_p2), %s13523_s17, 4096  }
 0x542   : > { %16921 = vsyncadd (!%p16832_p2), %s13523_s17, 4294963200  ;;  %p17_p3 = scmp.ge.s32.totalorder %s17008_s30, 4   ;;  %s21265_s24 = smov %s16928_s25 }
 0x543   : > { %s21266_s25 = smov %s16932_s26  ;;  %s21267_s26 = smov %s17019_s10 }
 0x544   : > { %s21268_s27 = smov %s17008_s30  ;;  %19 = sbr.rel (!%p17_p3) target bundleno = 3 (0x3), region = 113 }
 0x54b   :  { %13528 = vsyncpa [#allocation6], 1 }
 0x54c   :  { %13530 = vsyncpa [#allocation6 + $0x1], 1 }

</bundles_post_ra>
